<compile_context>
chip_gen: v5e
topology: v5e:2x2
jax: 0.10.0
libtpu: 0.0.40
codegen_flags: <defaults>
</compile_context>

<pallas_src>
import jax
import jax.numpy as jnp
from jax import lax
from jax.experimental import pallas as pl
from jax.experimental.pallas import tpu as pltpu

BN_EPS = 1e-5
LANES = 128


def _round_up(x, m):
    return (x + m - 1) // m * m


def _conv_matmul_weights(w_hwio, cp):
    """3x3 HWIO conv weights -> compact im2col RHS of shape (9*cp, cp).

    Row index k*cp + ci (k = dy*3 + dx) holds w[dy, dx, ci, :], zero-padded to
    cp input/output channels, so  im2col(x_pad) @ W  ==  conv3x3(x) (SAME).
    """
    kh, kw, cin, cout = w_hwio.shape
    wm = jnp.zeros((kh * kw, cp, cp), w_hwio.dtype)
    wm = wm.at[:, :cin, :cout].set(w_hwio.reshape(kh * kw, cin, cout))
    return wm.reshape(kh * kw * cp, cp)


def _basic_block_kernel(x_ref, w1_ref, g1_ref, b1_ref, w2_ref, g2_ref, b2_ref,
                        out_ref, pad_ref, col_ref):
    # x_ref  : (N*H*W, Cp)       f32  channel-padded NHWC input (+ residual)
    # w1/w2  : (9*Cp, Cp)        MXU dtype (f32 or bf16) im2col conv weights
    # g*/b*  : (1, Cp)           f32  BN gamma / beta (0 in padded channels)
    # out_ref: (N*H*W, Cp)       f32  output (HBM-aliased with x)
    # pad_ref: (N, H+2, W+2, Cp) f32  scratch: zero-halo padded activations
    # col_ref: (N*H*W, 9*Cp)     MXU-dtype scratch: im2col slab
    n, hp2, wp2, cp = pad_ref.shape
    h, w = hp2 - 2, wp2 - 2
    m = n * h * w
    inv_m = 1.0 / float(m)
    mxu_dtype = col_ref.dtype

    # Zero only the 1-pixel halo ring, once (interior is always overwritten;
    # the ring is shared by both convs).
    pad_ref[:, 0:1, :, :] = jnp.zeros((n, 1, wp2, cp), jnp.float32)
    pad_ref[:, hp2 - 1:hp2, :, :] = jnp.zeros((n, 1, wp2, cp), jnp.float32)
    pad_ref[:, :, 0:1, :] = jnp.zeros((n, hp2, 1, cp), jnp.float32)
    pad_ref[:, :, wp2 - 1:wp2, :] = jnp.zeros((n, hp2, 1, cp), jnp.float32)

    def conv3x3(src, w_ref):
        # Refresh the interior of the shared zero-halo slab.
        pad_ref[:, 1:h + 1, 1:w + 1, :] = src.reshape(n, h, w, cp)
        # im2col: 9 shifted windows stacked along lanes.  Every col store is a
        # 128-lane-aligned, full-width store; cast to the MXU operand dtype.
        for k in range(9):
            dy, dx = k // 3, k % 3
            win = pad_ref[:, dy:dy + h, dx:dx + w, :].reshape(m, cp)
            col_ref[:, k * cp:(k + 1) * cp] = win.astype(mxu_dtype)
        # One deep-K (9*Cp) MXU matmul per conv, f32 accumulation.
        return jnp.dot(col_ref[...], w_ref[...],
                       preferred_element_type=jnp.float32)

    def batch_norm(acc, g_ref, b_ref):
        # Two-pass batch statistics in f32 (mean, then centered variance).
        mean = jnp.sum(acc, axis=0, keepdims=True) * inv_m        # (1, Cp)
        cen = acc - mean
        var = jnp.sum(cen * cen, axis=0, keepdims=True) * inv_m   # biased var
        scale = g_ref[...] * lax.rsqrt(var + BN_EPS)
        return cen * scale + b_ref[...]

    x = x_ref[...]
    # conv1 -> bn1 -> relu
    h1 = jnp.maximum(batch_norm(conv3x3(x, w1_ref), g1_ref, b1_ref), 0.0)
    # conv2 -> bn2 -> + residual -> relu; full-width unmasked store.
    h2 = batch_norm(conv3x3(h1, w2_ref), g2_ref, b2_ref)
    out_ref[...] = jnp.maximum(h2 + x, 0.0)


def basic_block_pallas(x_nhwc, w1_hwio, g1, b1, w2_hwio, g2, b2,
                       *, mxu_dtype=jnp.bfloat16):
    """BasicBlock forward.  x_nhwc: (N,H,W,C) f32 -> (N,H,W,C) f32.

    mxu_dtype: dtype of the conv-matmul operands (weights + im2col slab).
      bf16 (default) uses the v6e/v7x-native MXU path with f32 accumulation
      (~1e-2-level max abs deviation at these magnitudes); float32 matches the
      f32 reference to ~1e-6.
    """
    n, hh, ww, c = x_nhwc.shape
    cp = _round_up(c, LANES)
    m = n * hh * ww

    # Channel-pad to a full lane width (exact: padded channels stay zero).
    x_p = jnp.pad(x_nhwc, ((0, 0), (0, 0), (0, 0), (0, cp - c))).reshape(m, cp)
    wm1 = _conv_matmul_weights(w1_hwio, cp).astype(mxu_dtype)
    wm2 = _conv_matmul_weights(w2_hwio, cp).astype(mxu_dtype)

    def pad_c(v):
        return jnp.pad(v, (0, cp - c)).reshape(1, cp).astype(jnp.float32)

    vmem = pl.BlockSpec(memory_space=pltpu.MemorySpace.VMEM)
    out_p = pl.pallas_call(
        _basic_block_kernel,
        out_shape=jax.ShapeDtypeStruct((m, cp), jnp.float32),
        in_specs=[vmem] * 7,
        out_specs=vmem,
        scratch_shapes=[
            pltpu.VMEM((n, hh + 2, ww + 2, cp), jnp.float32),  # padded slab
            pltpu.VMEM((m, 9 * cp), mxu_dtype),                # im2col slab
        ],
        input_output_aliases={0: 0},   # residual input and output share HBM
        compiler_params=pltpu.CompilerParams(
            vmem_limit_bytes=32 * 1024 * 1024),
    )(x_p, wm1, pad_c(g1), pad_c(b1), wm2, pad_c(g2), pad_c(b2))
    return out_p.reshape(n, hh, ww, cp)[..., :c]


def basic_block_ref(x_nhwc, w1_hwio, g1, b1, w2_hwio, g2, b2):
    """Pure-JAX reference (same NHWC semantics as the PyTorch module)."""
    def conv(x, w):
        return lax.conv_general_dilated(
            x, w, window_strides=(1, 1), padding='SAME',
            dimension_numbers=('NHWC', 'HWIO', 'NHWC'))

    def bn(x, g, b):
        mu = jnp.mean(x, axis=(0, 1, 2), keepdims=True)
        var = jnp.mean((x - mu) ** 2, axis=(0, 1, 2), keepdims=True)
        return (x - mu) * lax.rsqrt(var + BN_EPS) * g + b

    out = jax.nn.relu(bn(conv(x_nhwc, w1_hwio), g1, b1))
    out = bn(conv(out, w2_hwio), g2, b2)
    return jax.nn.relu(out + x_nhwc)


if __name__ == "__main__":
    # BasicBlock(inplanes=8, planes=8, stride=1, downsample=None)
    N, C, H, W = 2, 8, 16, 16

    key = jax.random.PRNGKey(0)
    k_x, k_w1, k_w2, k_g1, k_b1, k_g2, k_b2 = jax.random.split(key, 7)

    # Input in PyTorch NCHW convention, converted to NHWC for the kernel.
    x_nchw = jax.random.normal(k_x, (N, C, H, W), jnp.float32)
    x_nhwc = jnp.transpose(x_nchw, (0, 2, 3, 1))

    # Conv weights in PyTorch OIHW convention, converted to HWIO.
    w1_oihw = 0.1 * jax.random.normal(k_w1, (C, C, 3, 3), jnp.float32)
    w2_oihw = 0.1 * jax.random.normal(k_w2, (C, C, 3, 3), jnp.float32)
    w1_hwio = jnp.transpose(w1_oihw, (2, 3, 1, 0))
    w2_hwio = jnp.transpose(w2_oihw, (2, 3, 1, 0))

    # BatchNorm affine params (deterministic synthetic init).
    g1 = 1.0 + 0.1 * jax.random.normal(k_g1, (C,), jnp.float32)
    b1 = 0.1 * jax.random.normal(k_b1, (C,), jnp.float32)
    g2 = 1.0 + 0.1 * jax.random.normal(k_g2, (C,), jnp.float32)
    b2 = 0.1 * jax.random.normal(k_b2, (C,), jnp.float32)

    ref = basic_block_ref(x_nhwc, w1_hwio, g1, b1, w2_hwio, g2, b2)

    # f32 MXU operands: tight agreement with the f32 reference.
    out32 = basic_block_pallas(x_nhwc, w1_hwio, g1, b1, w2_hwio, g2, b2,
                               mxu_dtype=jnp.float32)
    out32 = jax.block_until_ready(out32)
    assert out32.shape == (N, H, W, C)
    assert jnp.allclose(out32, ref, atol=1e-4, rtol=1e-4), (
        float(jnp.max(jnp.abs(out32 - ref))))

    # bf16 MXU operands (default fast path on v6e/v7x), f32 accumulation:
    # expected max abs deviation ~1e-2 at these activation magnitudes.
    out16 = basic_block_pallas(x_nhwc, w1_hwio, g1, b1, w2_hwio, g2, b2,
                               mxu_dtype=jnp.bfloat16)
    out16 = jax.block_until_ready(out16)
    assert out16.shape == (N, H, W, C)
    assert jnp.allclose(out16, ref, atol=3e-2, rtol=3e-2), (
        float(jnp.max(jnp.abs(out16 - ref))))

    print("KERNEL_OK")
</pallas_src>

<mosaic_0001>
module attributes {stable_mosaic.version = 11 : i64} {
  func.func @_basic_block_kernel(%arg0: memref<512x128xf32, #tpu.memory_space<vmem>>, %arg1: memref<1152x128xf32, #tpu.memory_space<vmem>>, %arg2: memref<1x128xf32, #tpu.memory_space<vmem>>, %arg3: memref<1x128xf32, #tpu.memory_space<vmem>>, %arg4: memref<1152x128xf32, #tpu.memory_space<vmem>>, %arg5: memref<1x128xf32, #tpu.memory_space<vmem>>, %arg6: memref<1x128xf32, #tpu.memory_space<vmem>>, %arg7: memref<512x128xf32, #tpu.memory_space<vmem>>, %arg8: memref<2x18x18x128xf32, #tpu.memory_space<vmem>>, %arg9: memref<512x1152xf32, #tpu.memory_space<vmem>>) attributes {dimension_semantics = [], scalar_prefetch = 0 : i64, scratch_operands = 2 : i64, tpu.core_type = #tpu.core_type<tc>} {
    %cst = arith.constant 0.000000e+00 : f32
    %0 = vector.broadcast %cst : f32 to vector<2x1x18x128xf32>
    %c0 = arith.constant 0 : index
    %c0_0 = arith.constant 0 : index
    %c0_1 = arith.constant 0 : index
    %c0_2 = arith.constant 0 : index
    %1 = vector.load %arg8[%c0, %c0_0, %c0_1, %c0_2] : memref<2x18x18x128xf32, #tpu.memory_space<vmem>>, vector<2x1x18x128xf32>
    tpu.vector_store %arg8[%c0, %c0_0, %c0_1, %c0_2], %0 {strides = array<i32>} : memref<2x18x18x128xf32, #tpu.memory_space<vmem>>, vector<2x1x18x128xf32>,
    %cst_3 = arith.constant 0.000000e+00 : f32
    %2 = vector.broadcast %cst_3 : f32 to vector<2x1x18x128xf32>
    %c0_4 = arith.constant 0 : index
    %c17 = arith.constant 17 : index
    %c0_5 = arith.constant 0 : index
    %c0_6 = arith.constant 0 : index
    %3 = vector.load %arg8[%c0_4, %c17, %c0_5, %c0_6] : memref<2x18x18x128xf32, #tpu.memory_space<vmem>>, vector<2x1x18x128xf32>
    tpu.vector_store %arg8[%c0_4, %c17, %c0_5, %c0_6], %2 {strides = array<i32>} : memref<2x18x18x128xf32, #tpu.memory_space<vmem>>, vector<2x1x18x128xf32>,
    %cst_7 = arith.constant 0.000000e+00 : f32
    %4 = vector.broadcast %cst_7 : f32 to vector<2x18x1x128xf32>
    %c0_8 = arith.constant 0 : index
    %c0_9 = arith.constant 0 : index
    %c0_10 = arith.constant 0 : index
    %c0_11 = arith.constant 0 : index
    %5 = vector.load %arg8[%c0_8, %c0_9, %c0_10, %c0_11] : memref<2x18x18x128xf32, #tpu.memory_space<vmem>>, vector<2x18x1x128xf32>
    tpu.vector_store %arg8[%c0_8, %c0_9, %c0_10, %c0_11], %4 {strides = array<i32>} : memref<2x18x18x128xf32, #tpu.memory_space<vmem>>, vector<2x18x1x128xf32>,
    %cst_12 = arith.constant 0.000000e+00 : f32
    %6 = vector.broadcast %cst_12 : f32 to vector<2x18x1x128xf32>
    %c0_13 = arith.constant 0 : index
    %c0_14 = arith.constant 0 : index
    %c17_15 = arith.constant 17 : index
    %c0_16 = arith.constant 0 : index
    %7 = vector.load %arg8[%c0_13, %c0_14, %c17_15, %c0_16] : memref<2x18x18x128xf32, #tpu.memory_space<vmem>>, vector<2x18x1x128xf32>
    tpu.vector_store %arg8[%c0_13, %c0_14, %c17_15, %c0_16], %6 {strides = array<i32>} : memref<2x18x18x128xf32, #tpu.memory_space<vmem>>, vector<2x18x1x128xf32>,
    %c0_17 = arith.constant 0 : index
    %c0_18 = arith.constant 0 : index
    %8 = vector.load %arg0[%c0_17, %c0_18] : memref<512x128xf32, #tpu.memory_space<vmem>>, vector<512x128xf32>
    %9 = vector.shape_cast %8 : vector<512x128xf32> to vector<2x16x16x128xf32>
    %c0_19 = arith.constant 0 : index
    %c1 = arith.constant 1 : index
    %c1_20 = arith.constant 1 : index
    %c0_21 = arith.constant 0 : index
    %10 = vector.load %arg8[%c0_19, %c1, %c1_20, %c0_21] : memref<2x18x18x128xf32, #tpu.memory_space<vmem>>, vector<2x16x16x128xf32>
    tpu.vector_store %arg8[%c0_19, %c1, %c1_20, %c0_21], %9 {strides = array<i32>} : memref<2x18x18x128xf32, #tpu.memory_space<vmem>>, vector<2x16x16x128xf32>,
    %c0_22 = arith.constant 0 : index
    %c0_23 = arith.constant 0 : index
    %c0_24 = arith.constant 0 : index
    %c0_25 = arith.constant 0 : index
    %11 = vector.load %arg8[%c0_22, %c0_23, %c0_24, %c0_25] : memref<2x18x18x128xf32, #tpu.memory_space<vmem>>, vector<2x16x16x128xf32>
    %12 = vector.shape_cast %11 : vector<2x16x16x128xf32> to vector<512x128xf32>
    %c0_26 = arith.constant 0 : index
    %c0_27 = arith.constant 0 : index
    %13 = vector.load %arg9[%c0_26, %c0_27] : memref<512x1152xf32, #tpu.memory_space<vmem>>, vector<512x128xf32>
    tpu.vector_store %arg9[%c0_26, %c0_27], %12 {strides = array<i32>} : memref<512x1152xf32, #tpu.memory_space<vmem>>, vector<512x128xf32>,
    %c0_28 = arith.constant 0 : index
    %c0_29 = arith.constant 0 : index
    %c1_30 = arith.constant 1 : index
    %c0_31 = arith.constant 0 : index
    %14 = vector.load %arg8[%c0_28, %c0_29, %c1_30, %c0_31] : memref<2x18x18x128xf32, #tpu.memory_space<vmem>>, vector<2x16x16x128xf32>
    %15 = vector.shape_cast %14 : vector<2x16x16x128xf32> to vector<512x128xf32>
    %c0_32 = arith.constant 0 : index
    %c128 = arith.constant 128 : index
    %16 = vector.load %arg9[%c0_32, %c128] : memref<512x1152xf32, #tpu.memory_space<vmem>>, vector<512x128xf32>
    tpu.vector_store %arg9[%c0_32, %c128], %15 {strides = array<i32>} : memref<512x1152xf32, #tpu.memory_space<vmem>>, vector<512x128xf32>,
    %c0_33 = arith.constant 0 : index
    %c0_34 = arith.constant 0 : index
    %c2 = arith.constant 2 : index
    %c0_35 = arith.constant 0 : index
    %17 = vector.load %arg8[%c0_33, %c0_34, %c2, %c0_35] : memref<2x18x18x128xf32, #tpu.memory_space<vmem>>, vector<2x16x16x128xf32>
    %18 = vector.shape_cast %17 : vector<2x16x16x128xf32> to vector<512x128xf32>
    %c0_36 = arith.constant 0 : index
    %c256 = arith.constant 256 : index
    %19 = vector.load %arg9[%c0_36, %c256] : memref<512x1152xf32, #tpu.memory_space<vmem>>, vector<512x128xf32>
    tpu.vector_store %arg9[%c0_36, %c256], %18 {strides = array<i32>} : memref<512x1152xf32, #tpu.memory_space<vmem>>, vector<512x128xf32>,
    %c0_37 = arith.constant 0 : index
    %c1_38 = arith.constant 1 : index
    %c0_39 = arith.constant 0 : index
    %c0_40 = arith.constant 0 : index
    %20 = vector.load %arg8[%c0_37, %c1_38, %c0_39, %c0_40] : memref<2x18x18x128xf32, #tpu.memory_space<vmem>>, vector<2x16x16x128xf32>
    %21 = vector.shape_cast %20 : vector<2x16x16x128xf32> to vector<512x128xf32>
    %c0_41 = arith.constant 0 : index
    %c384 = arith.constant 384 : index
    %22 = vector.load %arg9[%c0_41, %c384] : memref<512x1152xf32, #tpu.memory_space<vmem>>, vector<512x128xf32>
    tpu.vector_store %arg9[%c0_41, %c384], %21 {strides = array<i32>} : memref<512x1152xf32, #tpu.memory_space<vmem>>, vector<512x128xf32>,
    %c0_42 = arith.constant 0 : index
    %c1_43 = arith.constant 1 : index
    %c1_44 = arith.constant 1 : index
    %c0_45 = arith.constant 0 : index
    %23 = vector.load %arg8[%c0_42, %c1_43, %c1_44, %c0_45] : memref<2x18x18x128xf32, #tpu.memory_space<vmem>>, vector<2x16x16x128xf32>
    %24 = vector.shape_cast %23 : vector<2x16x16x128xf32> to vector<512x128xf32>
    %c0_46 = arith.constant 0 : index
    %c512 = arith.constant 512 : index
    %25 = vector.load %arg9[%c0_46, %c512] : memref<512x1152xf32, #tpu.memory_space<vmem>>, vector<512x128xf32>
    tpu.vector_store %arg9[%c0_46, %c512], %24 {strides = array<i32>} : memref<512x1152xf32, #tpu.memory_space<vmem>>, vector<512x128xf32>,
    %c0_47 = arith.constant 0 : index
    %c1_48 = arith.constant 1 : index
    %c2_49 = arith.constant 2 : index
    %c0_50 = arith.constant 0 : index
    %26 = vector.load %arg8[%c0_47, %c1_48, %c2_49, %c0_50] : memref<2x18x18x128xf32, #tpu.memory_space<vmem>>, vector<2x16x16x128xf32>
    %27 = vector.shape_cast %26 : vector<2x16x16x128xf32> to vector<512x128xf32>
    %c0_51 = arith.constant 0 : index
    %c640 = arith.constant 640 : index
    %28 = vector.load %arg9[%c0_51, %c640] : memref<512x1152xf32, #tpu.memory_space<vmem>>, vector<512x128xf32>
    tpu.vector_store %arg9[%c0_51, %c640], %27 {strides = array<i32>} : memref<512x1152xf32, #tpu.memory_space<vmem>>, vector<512x128xf32>,
    %c0_52 = arith.constant 0 : index
    %c2_53 = arith.constant 2 : index
    %c0_54 = arith.constant 0 : index
    %c0_55 = arith.constant 0 : index
    %29 = vector.load %arg8[%c0_52, %c2_53, %c0_54, %c0_55] : memref<2x18x18x128xf32, #tpu.memory_space<vmem>>, vector<2x16x16x128xf32>
    %30 = vector.shape_cast %29 : vector<2x16x16x128xf32> to vector<512x128xf32>
    %c0_56 = arith.constant 0 : index
    %c768 = arith.constant 768 : index
    %31 = vector.load %arg9[%c0_56, %c768] : memref<512x1152xf32, #tpu.memory_space<vmem>>, vector<512x128xf32>
    tpu.vector_store %arg9[%c0_56, %c768], %30 {strides = array<i32>} : memref<512x1152xf32, #tpu.memory_space<vmem>>, vector<512x128xf32>,
    %c0_57 = arith.constant 0 : index
    %c2_58 = arith.constant 2 : index
    %c1_59 = arith.constant 1 : index
    %c0_60 = arith.constant 0 : index
    %32 = vector.load %arg8[%c0_57, %c2_58, %c1_59, %c0_60] : memref<2x18x18x128xf32, #tpu.memory_space<vmem>>, vector<2x16x16x128xf32>
    %33 = vector.shape_cast %32 : vector<2x16x16x128xf32> to vector<512x128xf32>
    %c0_61 = arith.constant 0 : index
    %c896 = arith.constant 896 : index
    %34 = vector.load %arg9[%c0_61, %c896] : memref<512x1152xf32, #tpu.memory_space<vmem>>, vector<512x128xf32>
    tpu.vector_store %arg9[%c0_61, %c896], %33 {strides = array<i32>} : memref<512x1152xf32, #tpu.memory_space<vmem>>, vector<512x128xf32>,
    %c0_62 = arith.constant 0 : index
    %c2_63 = arith.constant 2 : index
    %c2_64 = arith.constant 2 : index
    %c0_65 = arith.constant 0 : index
    %35 = vector.load %arg8[%c0_62, %c2_63, %c2_64, %c0_65] : memref<2x18x18x128xf32, #tpu.memory_space<vmem>>, vector<2x16x16x128xf32>
    %36 = vector.shape_cast %35 : vector<2x16x16x128xf32> to vector<512x128xf32>
    %c0_66 = arith.constant 0 : index
    %c1024 = arith.constant 1024 : index
    %37 = vector.load %arg9[%c0_66, %c1024] : memref<512x1152xf32, #tpu.memory_space<vmem>>, vector<512x128xf32>
    tpu.vector_store %arg9[%c0_66, %c1024], %36 {strides = array<i32>} : memref<512x1152xf32, #tpu.memory_space<vmem>>, vector<512x128xf32>,
    %c0_67 = arith.constant 0 : index
    %c0_68 = arith.constant 0 : index
    %38 = vector.load %arg9[%c0_67, %c0_68] : memref<512x1152xf32, #tpu.memory_space<vmem>>, vector<512x1152xf32>
    %c0_69 = arith.constant 0 : index
    %c0_70 = arith.constant 0 : index
    %39 = vector.load %arg1[%c0_69, %c0_70] : memref<1152x128xf32, #tpu.memory_space<vmem>>, vector<1152x128xf32>
    %cst_71 = arith.constant dense<0.000000e+00> : vector<512x128xf32>
    %40 = tpu.matmul %38, %39, %cst_71 {dimension_numbers = #tpu.dot_dimension_numbers<[1], [0], [0], [1], [0, 0, 1, 1], [], []>} : vector<512x1152xf32>, vector<1152x128xf32>, vector<512x128xf32> -> vector<512x128xf32>
    %cst_72 = arith.constant dense<0.000000e+00> : vector<128xf32>
    %41 = vector.multi_reduction <add>, %40, %cst_72 [0] : vector<512x128xf32> to vector<128xf32>
    %42 = vector.shape_cast %41 : vector<128xf32> to vector<1x128xf32>
    %cst_73 = arith.constant 0.001953125 : f32
    %43 = vector.broadcast %cst_73 : f32 to vector<1x128xf32>
    %44 = arith.mulf %42, %43 : vector<1x128xf32>
    %45 = vector.broadcast %44 : vector<1x128xf32> to vector<512x128xf32>
    %46 = arith.subf %40, %45 : vector<512x128xf32>
    %47 = arith.mulf %46, %46 : vector<512x128xf32>
    %cst_74 = arith.constant dense<0.000000e+00> : vector<128xf32>
    %48 = vector.multi_reduction <add>, %47, %cst_74 [0] : vector<512x128xf32> to vector<128xf32>
    %49 = vector.shape_cast %48 : vector<128xf32> to vector<1x128xf32>
    %cst_75 = arith.constant 0.001953125 : f32
    %50 = vector.broadcast %cst_75 : f32 to vector<1x128xf32>
    %51 = arith.mulf %49, %50 : vector<1x128xf32>
    %c0_76 = arith.constant 0 : index
    %c0_77 = arith.constant 0 : index
    %52 = vector.load %arg2[%c0_76, %c0_77] : memref<1x128xf32, #tpu.memory_space<vmem>>, vector<1x128xf32>
    %cst_78 = arith.constant 9.99999974E-6 : f32
    %53 = vector.broadcast %cst_78 : f32 to vector<1x128xf32>
    %54 = arith.addf %51, %53 : vector<1x128xf32>
    %55 = math.rsqrt %54 : vector<1x128xf32>
    %56 = arith.mulf %52, %55 : vector<1x128xf32>
    %57 = vector.broadcast %56 : vector<1x128xf32> to vector<512x128xf32>
    %58 = arith.mulf %46, %57 : vector<512x128xf32>
    %c0_79 = arith.constant 0 : index
    %c0_80 = arith.constant 0 : index
    %59 = vector.load %arg3[%c0_79, %c0_80] : memref<1x128xf32, #tpu.memory_space<vmem>>, vector<1x128xf32>
    %60 = vector.broadcast %59 : vector<1x128xf32> to vector<512x128xf32>
    %61 = arith.addf %58, %60 : vector<512x128xf32>
    %cst_81 = arith.constant 0.000000e+00 : f32
    %62 = vector.broadcast %cst_81 : f32 to vector<512x128xf32>
    %63 = arith.maximumf %61, %62 : vector<512x128xf32>
    %64 = vector.shape_cast %63 : vector<512x128xf32> to vector<2x16x16x128xf32>
    %c0_82 = arith.constant 0 : index
    %c1_83 = arith.constant 1 : index
    %c1_84 = arith.constant 1 : index
    %c0_85 = arith.constant 0 : index
    %65 = vector.load %arg8[%c0_82, %c1_83, %c1_84, %c0_85] : memref<2x18x18x128xf32, #tpu.memory_space<vmem>>, vector<2x16x16x128xf32>
    tpu.vector_store %arg8[%c0_82, %c1_83, %c1_84, %c0_85], %64 {strides = array<i32>} : memref<2x18x18x128xf32, #tpu.memory_space<vmem>>, vector<2x16x16x128xf32>,
    %c0_86 = arith.constant 0 : index
    %c0_87 = arith.constant 0 : index
    %c0_88 = arith.constant 0 : index
    %c0_89 = arith.constant 0 : index
    %66 = vector.load %arg8[%c0_86, %c0_87, %c0_88, %c0_89] : memref<2x18x18x128xf32, #tpu.memory_space<vmem>>, vector<2x16x16x128xf32>
    %67 = vector.shape_cast %66 : vector<2x16x16x128xf32> to vector<512x128xf32>
    %c0_90 = arith.constant 0 : index
    %c0_91 = arith.constant 0 : index
    %68 = vector.load %arg9[%c0_90, %c0_91] : memref<512x1152xf32, #tpu.memory_space<vmem>>, vector<512x128xf32>
    tpu.vector_store %arg9[%c0_90, %c0_91], %67 {strides = array<i32>} : memref<512x1152xf32, #tpu.memory_space<vmem>>, vector<512x128xf32>,
    %c0_92 = arith.constant 0 : index
    %c0_93 = arith.constant 0 : index
    %c1_94 = arith.constant 1 : index
    %c0_95 = arith.constant 0 : index
    %69 = vector.load %arg8[%c0_92, %c0_93, %c1_94, %c0_95] : memref<2x18x18x128xf32, #tpu.memory_space<vmem>>, vector<2x16x16x128xf32>
    %70 = vector.shape_cast %69 : vector<2x16x16x128xf32> to vector<512x128xf32>
    %c0_96 = arith.constant 0 : index
    %c128_97 = arith.constant 128 : index
    %71 = vector.load %arg9[%c0_96, %c128_97] : memref<512x1152xf32, #tpu.memory_space<vmem>>, vector<512x128xf32>
    tpu.vector_store %arg9[%c0_96, %c128_97], %70 {strides = array<i32>} : memref<512x1152xf32, #tpu.memory_space<vmem>>, vector<512x128xf32>,
    %c0_98 = arith.constant 0 : index
    %c0_99 = arith.constant 0 : index
    %c2_100 = arith.constant 2 : index
    %c0_101 = arith.constant 0 : index
    %72 = vector.load %arg8[%c0_98, %c0_99, %c2_100, %c0_101] : memref<2x18x18x128xf32, #tpu.memory_space<vmem>>, vector<2x16x16x128xf32>
    %73 = vector.shape_cast %72 : vector<2x16x16x128xf32> to vector<512x128xf32>
    %c0_102 = arith.constant 0 : index
    %c256_103 = arith.constant 256 : index
    %74 = vector.load %arg9[%c0_102, %c256_103] : memref<512x1152xf32, #tpu.memory_space<vmem>>, vector<512x128xf32>
    tpu.vector_store %arg9[%c0_102, %c256_103], %73 {strides = array<i32>} : memref<512x1152xf32, #tpu.memory_space<vmem>>, vector<512x128xf32>,
    %c0_104 = arith.constant 0 : index
    %c1_105 = arith.constant 1 : index
    %c0_106 = arith.constant 0 : index
    %c0_107 = arith.constant 0 : index
    %75 = vector.load %arg8[%c0_104, %c1_105, %c0_106, %c0_107] : memref<2x18x18x128xf32, #tpu.memory_space<vmem>>, vector<2x16x16x128xf32>
    %76 = vector.shape_cast %75 : vector<2x16x16x128xf32> to vector<512x128xf32>
    %c0_108 = arith.constant 0 : index
    %c384_109 = arith.constant 384 : index
    %77 = vector.load %arg9[%c0_108, %c384_109] : memref<512x1152xf32, #tpu.memory_space<vmem>>, vector<512x128xf32>
    tpu.vector_store %arg9[%c0_108, %c384_109], %76 {strides = array<i32>} : memref<512x1152xf32, #tpu.memory_space<vmem>>, vector<512x128xf32>,
    %c0_110 = arith.constant 0 : index
    %c1_111 = arith.constant 1 : index
    %c1_112 = arith.constant 1 : index
    %c0_113 = arith.constant 0 : index
    %78 = vector.load %arg8[%c0_110, %c1_111, %c1_112, %c0_113] : memref<2x18x18x128xf32, #tpu.memory_space<vmem>>, vector<2x16x16x128xf32>
    %79 = vector.shape_cast %78 : vector<2x16x16x128xf32> to vector<512x128xf32>
    %c0_114 = arith.constant 0 : index
    %c512_115 = arith.constant 512 : index
    %80 = vector.load %arg9[%c0_114, %c512_115] : memref<512x1152xf32, #tpu.memory_space<vmem>>, vector<512x128xf32>
    tpu.vector_store %arg9[%c0_114, %c512_115], %79 {strides = array<i32>} : memref<512x1152xf32, #tpu.memory_space<vmem>>, vector<512x128xf32>,
    %c0_116 = arith.constant 0 : index
    %c1_117 = arith.constant 1 : index
    %c2_118 = arith.constant 2 : index
    %c0_119 = arith.constant 0 : index
    %81 = vector.load %arg8[%c0_116, %c1_117, %c2_118, %c0_119] : memref<2x18x18x128xf32, #tpu.memory_space<vmem>>, vector<2x16x16x128xf32>
    %82 = vector.shape_cast %81 : vector<2x16x16x128xf32> to vector<512x128xf32>
    %c0_120 = arith.constant 0 : index
    %c640_121 = arith.constant 640 : index
    %83 = vector.load %arg9[%c0_120, %c640_121] : memref<512x1152xf32, #tpu.memory_space<vmem>>, vector<512x128xf32>
    tpu.vector_store %arg9[%c0_120, %c640_121], %82 {strides = array<i32>} : memref<512x1152xf32, #tpu.memory_space<vmem>>, vector<512x128xf32>,
    %c0_122 = arith.constant 0 : index
    %c2_123 = arith.constant 2 : index
    %c0_124 = arith.constant 0 : index
    %c0_125 = arith.constant 0 : index
    %84 = vector.load %arg8[%c0_122, %c2_123, %c0_124, %c0_125] : memref<2x18x18x128xf32, #tpu.memory_space<vmem>>, vector<2x16x16x128xf32>
    %85 = vector.shape_cast %84 : vector<2x16x16x128xf32> to vector<512x128xf32>
    %c0_126 = arith.constant 0 : index
    %c768_127 = arith.constant 768 : index
    %86 = vector.load %arg9[%c0_126, %c768_127] : memref<512x1152xf32, #tpu.memory_space<vmem>>, vector<512x128xf32>
    tpu.vector_store %arg9[%c0_126, %c768_127], %85 {strides = array<i32>} : memref<512x1152xf32, #tpu.memory_space<vmem>>, vector<512x128xf32>,
    %c0_128 = arith.constant 0 : index
    %c2_129 = arith.constant 2 : index
    %c1_130 = arith.constant 1 : index
    %c0_131 = arith.constant 0 : index
    %87 = vector.load %arg8[%c0_128, %c2_129, %c1_130, %c0_131] : memref<2x18x18x128xf32, #tpu.memory_space<vmem>>, vector<2x16x16x128xf32>
    %88 = vector.shape_cast %87 : vector<2x16x16x128xf32> to vector<512x128xf32>
    %c0_132 = arith.constant 0 : index
    %c896_133 = arith.constant 896 : index
    %89 = vector.load %arg9[%c0_132, %c896_133] : memref<512x1152xf32, #tpu.memory_space<vmem>>, vector<512x128xf32>
    tpu.vector_store %arg9[%c0_132, %c896_133], %88 {strides = array<i32>} : memref<512x1152xf32, #tpu.memory_space<vmem>>, vector<512x128xf32>,
    %c0_134 = arith.constant 0 : index
    %c2_135 = arith.constant 2 : index
    %c2_136 = arith.constant 2 : index
    %c0_137 = arith.constant 0 : index
    %90 = vector.load %arg8[%c0_134, %c2_135, %c2_136, %c0_137] : memref<2x18x18x128xf32, #tpu.memory_space<vmem>>, vector<2x16x16x128xf32>
    %91 = vector.shape_cast %90 : vector<2x16x16x128xf32> to vector<512x128xf32>
    %c0_138 = arith.constant 0 : index
    %c1024_139 = arith.constant 1024 : index
    %92 = vector.load %arg9[%c0_138, %c1024_139] : memref<512x1152xf32, #tpu.memory_space<vmem>>, vector<512x128xf32>
    tpu.vector_store %arg9[%c0_138, %c1024_139], %91 {strides = array<i32>} : memref<512x1152xf32, #tpu.memory_space<vmem>>, vector<512x128xf32>,
    %c0_140 = arith.constant 0 : index
    %c0_141 = arith.constant 0 : index
    %93 = vector.load %arg9[%c0_140, %c0_141] : memref<512x1152xf32, #tpu.memory_space<vmem>>, vector<512x1152xf32>
    %c0_142 = arith.constant 0 : index
    %c0_143 = arith.constant 0 : index
    %94 = vector.load %arg4[%c0_142, %c0_143] : memref<1152x128xf32, #tpu.memory_space<vmem>>, vector<1152x128xf32>
    %cst_144 = arith.constant dense<0.000000e+00> : vector<512x128xf32>
    %95 = tpu.matmul %93, %94, %cst_144 {dimension_numbers = #tpu.dot_dimension_numbers<[1], [0], [0], [1], [0, 0, 1, 1], [], []>} : vector<512x1152xf32>, vector<1152x128xf32>, vector<512x128xf32> -> vector<512x128xf32>
    %cst_145 = arith.constant dense<0.000000e+00> : vector<128xf32>
    %96 = vector.multi_reduction <add>, %95, %cst_145 [0] : vector<512x128xf32> to vector<128xf32>
    %97 = vector.shape_cast %96 : vector<128xf32> to vector<1x128xf32>
    %cst_146 = arith.constant 0.001953125 : f32
    %98 = vector.broadcast %cst_146 : f32 to vector<1x128xf32>
    %99 = arith.mulf %97, %98 : vector<1x128xf32>
    %100 = vector.broadcast %99 : vector<1x128xf32> to vector<512x128xf32>
    %101 = arith.subf %95, %100 : vector<512x128xf32>
    %102 = arith.mulf %101, %101 : vector<512x128xf32>
    %cst_147 = arith.constant dense<0.000000e+00> : vector<128xf32>
    %103 = vector.multi_reduction <add>, %102, %cst_147 [0] : vector<512x128xf32> to vector<128xf32>
    %104 = vector.shape_cast %103 : vector<128xf32> to vector<1x128xf32>
    %cst_148 = arith.constant 0.001953125 : f32
    %105 = vector.broadcast %cst_148 : f32 to vector<1x128xf32>
    %106 = arith.mulf %104, %105 : vector<1x128xf32>
    %c0_149 = arith.constant 0 : index
    %c0_150 = arith.constant 0 : index
    %107 = vector.load %arg5[%c0_149, %c0_150] : memref<1x128xf32, #tpu.memory_space<vmem>>, vector<1x128xf32>
    %cst_151 = arith.constant 9.99999974E-6 : f32
    %108 = vector.broadcast %cst_151 : f32 to vector<1x128xf32>
    %109 = arith.addf %106, %108 : vector<1x128xf32>
    %110 = math.rsqrt %109 : vector<1x128xf32>
    %111 = arith.mulf %107, %110 : vector<1x128xf32>
    %112 = vector.broadcast %111 : vector<1x128xf32> to vector<512x128xf32>
    %113 = arith.mulf %101, %112 : vector<512x128xf32>
    %c0_152 = arith.constant 0 : index
    %c0_153 = arith.constant 0 : index
    %114 = vector.load %arg6[%c0_152, %c0_153] : memref<1x128xf32, #tpu.memory_space<vmem>>, vector<1x128xf32>
    %115 = vector.broadcast %114 : vector<1x128xf32> to vector<512x128xf32>
    %116 = arith.addf %113, %115 : vector<512x128xf32>
    %117 = arith.addf %116, %8 : vector<512x128xf32>
    %cst_154 = arith.constant 0.000000e+00 : f32
    %118 = vector.broadcast %cst_154 : f32 to vector<512x128xf32>
    %119 = arith.maximumf %117, %118 : vector<512x128xf32>
    %c0_155 = arith.constant 0 : index
    %c0_156 = arith.constant 0 : index
    %120 = vector.load %arg7[%c0_155, %c0_156] : memref<512x128xf32, #tpu.memory_space<vmem>>, vector<512x128xf32>
    tpu.vector_store %arg7[%c0_155, %c0_156], %119 {strides = array<i32>} : memref<512x128xf32, #tpu.memory_space<vmem>>, vector<512x128xf32>,
    return
  }
}

</mosaic_0001>

<bundles_post_ra>
// kernel: tpu_custom_call.1
= control target key start
LH: loop header
LB: loop body
LE: loop exit
PB: predicated region body
PF: predicated region fallthrough
CT: control target
= control target key end

     0   :  { %12 = vsyncpa [#allocation5], 0  ;;  %s13894_s0 = inlined_call_operand.hbm [shape: f32[512,128], index: 0, kind: input, shape index: {}, may-alias: {0,7}]   ;;  %s13895_s1 = inlined_call_operand.hbm [shape: f32[1152,128], index: 1, kind: input, shape index: {}]   ;;  %s13896_s2 = inlined_call_operand.vmem [shape: f32[1,128], index: 2, kind: input, shape index: {}]   ;;  %s13897_s3 = inlined_call_operand.vmem [shape: f32[1,128], index: 3, kind: input, shape index: {}]   ;;  %s13898_s4 = inlined_call_operand.hbm [shape: f32[1152,128], index: 4, kind: input, shape index: {}]   ;;  %s13899_s5 = inlined_call_operand.vmem [shape: f32[1,128], index: 5, kind: input, shape index: {}]   ;;  %s13900_s6 = inlined_call_operand.vmem [shape: f32[1,128], index: 6, kind: input, shape index: {}]   ;;  %s13901_s7 = inlined_call_operand.hbm [shape: f32[512,128], index: 7, kind: output, shape index: {}, may-alias: {0,7}]  }
   0x1   :  { %13 = vsyncpa [#allocation8], 0 }
   0x2   :  { %14 = vsyncpa [#allocation6], 0  ;;  %s32_s26 = sshll.u32 %s13895_s1, 4  ;;  %s9118_s27 = smov [#allocation7]   ;;  %s33_s26 = int_to_ptr.hbm [resolvable:$true] %s32_s26 }
   0x3   :  { %s34_s28 = sshll.u32 %s9118_s27, 4  ;;  %s19_s8 = sshll.u32 %s13894_s0, 4  ;;  %s35_s28 = int_to_ptr.vmem [resolvable:$true] %s34_s28  ;;  %s20_s8 = int_to_ptr.hbm [resolvable:$true] %s19_s8 }
   0x4   :  { %s9119_s9 = smov 128   ;;  %s9120_s10 = smov 8  }
   0x5   :  { %40 = dma.hbm_to_vmem [thread:$0]  %s33_s26, 18432, %s35_s28, [#allocation8], %s9119_s9, %s9119_s9, %s9120_s10  }
   0x6   :  { %s9121_s11 = smov [#allocation4]   ;;  %s49_s1 = sshll.u32 %s13898_s4, 4  ;;  %s50_s1 = int_to_ptr.hbm [resolvable:$true] %s49_s1 }
   0x7   :  { %s21_s12 = sshll.u32 %s9121_s11, 4  ;;  %s9122_s0 = smov [#allocation9]   ;;  %s22_s12 = int_to_ptr.vmem [resolvable:$true] %s21_s12 }
   0x8   :  { %27 = dma.hbm_to_vmem [thread:$0]  %s20_s8, 8192, %s22_s12, [#allocation5], %s9119_s9, %s9119_s9, %s9120_s10  }
   0x9   :  { %s51_s15 = sshll.u32 %s9122_s0, 4  ;;  %s52_s15 = int_to_ptr.vmem [resolvable:$true] %s51_s15 }
   0xa   :  { %57 = dma.hbm_to_vmem [thread:$0]  %s50_s1, 18432, %s52_s15, [#allocation8], %s9119_s9, %s9119_s9, %s9120_s10  }
   0xb   :  { %9112 = dma.done.wait [#allocation5], 8192  }
   0xc   :  { %9113 = vsyncadd [#allocation5], 4294959104 }
   0xd   :  { %9114 = dma.done.wait [#allocation8], 36864  }
   0xe   :  { %9115 = vsyncadd [#allocation8], 4294930432  ;;  %v9123_v0 = vmov 0.0   ;;  %v2032_v1 = vld [vmem:[#allocation7 + $0x78] sm:$0xff]  ;;  %v2031_v3 = vld [vmem:[#allocation7 + $0x70] sm:$0xff]  ;;  %s8953_s23 = sshll.u32 %s13901_s7, 4  ;;  %s8954_s23 = int_to_ptr.hbm [resolvable:$true] %s8953_s23 }
   0xf   :  { %77 = vst [vmem:[#allocation2 + $0x1b0] sm:$0xff] %v9123_v0  ;;  %v2048_v2 = vld [vmem:[#allocation7 + $0xf8] sm:$0xff]  ;;  %8967 = vmatpush.msra.mxu2 %v2032_v1  ;;  %v2047_v4 = vld [vmem:[#allocation7 + $0xf0] sm:$0xff]  ;;  %v2030_v5 = vld [vmem:[#allocation7 + $0x68] sm:$0xff]  ;;  %2161 = vmatpush.msra.mxu0 %v2032_v1 }
  0x10   :  { %105 = vst [vmem:[#allocation2 + $0x1b0] sm:$0x1] %v9123_v0  ;;  %8983 = vmatpush.msra.mxu3 %v2048_v2  ;;  %v2046_v6 = vld [vmem:[#allocation7 + $0xe8] sm:$0xff]  ;;  %2370 = vmatpush.msra.mxu1 %v2048_v2  ;;  %v2029_v7 = vld [vmem:[#allocation7 + $0x60] sm:$0xff]  ;;  %v2028_v9 = vld [vmem:[#allocation7 + $0x58] sm:$0xff] }
  0x11   :  { %74 = vst [vmem:[#allocation2] sm:$0xff] %v9123_v0  ;;  %8968 = vmatpush.msra.mxu2 %v2031_v3  ;;  %v2045_v8 = vld [vmem:[#allocation7 + $0xe0] sm:$0xff]  ;;  %2162 = vmatpush.msra.mxu0 %v2031_v3  ;;  %v2044_v10 = vld [vmem:[#allocation7 + $0xd8] sm:$0xff]  ;;  %v2027_v11 = vld [vmem:[#allocation7 + $0x50] sm:$0xff] }
  0x12   :  { %75 = vst [vmem:[#allocation2 + $0x8] sm:$0xff] %v9123_v0  ;;  %8984 = vmatpush.msra.mxu3 %v2047_v4  ;;  %2371 = vmatpush.msra.mxu1 %v2047_v4  ;;  %v2043_v12 = vld [vmem:[#allocation7 + $0xd0] sm:$0xff]  ;;  %v2026_v13 = vld [vmem:[#allocation7 + $0x48] sm:$0xff]  ;;  %v2025_v15 = vld [vmem:[#allocation7 + $0x40] sm:$0xff] }
  0x13   :  { %76 = vst [vmem:[#allocation2 + $0x10] sm:$0x3] %v9123_v0  ;;  %8969 = vmatpush.msra.mxu2 %v2030_v5  ;;  %2163 = vmatpush.msra.mxu0 %v2030_v5  ;;  %v2042_v14 = vld [vmem:[#allocation7 + $0xc8] sm:$0xff]  ;;  %v2041_v16 = vld [vmem:[#allocation7 + $0xc0] sm:$0xff]  ;;  %v2024_v17 = vld [vmem:[#allocation7 + $0x38] sm:$0xff] }
  0x14   :  { %78 = vst [vmem:[#allocation2 + $0x1b8] sm:$0xff] %v9123_v0  ;;  %8985 = vmatpush.msra.mxu3 %v2046_v6  ;;  %2372 = vmatpush.msra.mxu1 %v2046_v6  ;;  %v2040_v18 = vld [vmem:[#allocation7 + $0xb8] sm:$0xff]  ;;  %v2023_v19 = vld [vmem:[#allocation7 + $0x30] sm:$0xff]  ;;  %v2022_v21 = vld [vmem:[#allocation7 + $0x28] sm:$0xff] }
  0x15   :  { %79 = vst [vmem:[#allocation2 + $0x1c0] sm:$0x3] %v9123_v0  ;;  %8970 = vmatpush.msra.mxu2 %v2029_v7  ;;  %2164 = vmatpush.msra.mxu0 %v2029_v7  ;;  %v2039_v20 = vld [vmem:[#allocation7 + $0xb0] sm:$0xff]  ;;  %v2038_v22 = vld [vmem:[#allocation7 + $0xa8] sm:$0xff]  ;;  %v2021_v23 = vld [vmem:[#allocation7 + $0x20] sm:$0xff] }
  0x16   :  { %81 = vst [vmem:[#allocation2 + $0x198] sm:$0xff] %v9123_v0  ;;  %8986 = vmatpush.msra.mxu3 %v2045_v8  ;;  %2373 = vmatpush.msra.mxu1 %v2045_v8  ;;  %v2037_v24 = vld [vmem:[#allocation7 + $0xa0] sm:$0xff]  ;;  %v2020_v25 = vld [vmem:[#allocation7 + $0x18] sm:$0xff]  ;;  %v2019_v27 = vld [vmem:[#allocation7 + $0x10] sm:$0xff] }
  0x17   :  { %82 = vst [vmem:[#allocation2 + $0x1a0] sm:$0xff] %v9123_v0  ;;  %8971 = vmatpush.msra.mxu2 %v2028_v9  ;;  %2165 = vmatpush.msra.mxu0 %v2028_v9  ;;  %v2036_v26 = vld [vmem:[#allocation7 + $0x98] sm:$0xff]  ;;  %v2035_v28 = vld [vmem:[#allocation7 + $0x90] sm:$0xff]  ;;  %v2018_v29 = vld [vmem:[#allocation7 + $0x8] sm:$0xff] }
  0x18   :  { %83 = vst [vmem:[#allocation2 + $0x1a8] sm:$0x3] %v9123_v0  ;;  %8987 = vmatpush.msra.mxu3 %v2044_v10  ;;  %2374 = vmatpush.msra.mxu1 %v2044_v10  ;;  %v2034_v30 = vld [vmem:[#allocation7 + $0x88] sm:$0xff]  ;;  %v2017_v31 = vld [vmem:[#allocation7] sm:$0xff]  ;;  %v320_v33 = vld [vmem:[#allocation2 + $0x1b0] sm:$0xff] }
  0x19   :  { %84 = vst [vmem:[#allocation2 + $0x348] sm:$0xff] %v9123_v0  ;;  %8972 = vmatpush.msra.mxu2 %v2027_v11  ;;  %2166 = vmatpush.msra.mxu0 %v2027_v11  ;;  %v2033_v32 = vld [vmem:[#allocation7 + $0x80] sm:$0xff]  ;;  %v2064_v36 = vld [vmem:[#allocation7 + $0x178] sm:$0xff]  ;;  %v2063_v41 = vld [vmem:[#allocation7 + $0x170] sm:$0xff] }
  0x1a   :  { %85 = vst [vmem:[#allocation2 + $0x350] sm:$0xff] %v9123_v0  ;;  %8988 = vmatpush.msra.mxu3 %v2043_v12  ;;  %2375 = vmatpush.msra.mxu1 %v2043_v12  ;;  %v2080_v37 = vld [vmem:[#allocation7 + $0x1f8] sm:$0xff]  ;;  %v416_v38 = vld [vmem:[#allocation2 + $0x1] sm:$0xff]  ;;  %v417_v42 = vld [vmem:[#allocation2 + $0x9] sm:$0xff] }
  0x1b   :  { %86 = vst [vmem:[#allocation2 + $0x358] sm:$0x3] %v9123_v0  ;;  %8973 = vmatpush.msra.mxu2 %v2026_v13  ;;  %2167 = vmatpush.msra.mxu0 %v2026_v13  ;;  %v448_v34 = vld [vmem:[#allocation2 + $0x1b1] sm:$0xff]  ;;  %v9243_v40 = vld [vmem:[#allocation4 + $0x100] sm:$0xff]  ;;  %v9254_v44 = vld [vmem:[#allocation4 + $0x108] sm:$0xff] }
  0x1c   :  { %88 = vst [vmem:[#allocation2 + $0x18] sm:$0x1] %v9123_v0  ;;  %8989 = vmatpush.msra.mxu3 %v2042_v14  ;;  %2376 = vmatpush.msra.mxu1 %v2042_v14  ;;  %v449_v35 = vld [vmem:[#allocation2 + $0x1b9] sm:$0xff]  ;;  %v2079_v43 = vld [vmem:[#allocation7 + $0x1f0] sm:$0xff]  ;;  %v2062_v48 = vld [vmem:[#allocation7 + $0x168] sm:$0xff] }
  0x1d   :  { %89 = vst [vmem:[#allocation2 + $0x30] sm:$0x1] %v9123_v0  ;;  %8974 = vmatpush.msra.mxu2 %v2025_v15  ;;  %2168 = vmatpush.msra.mxu0 %v2025_v15  ;;  %v2096_v39 = vld [vmem:[#allocation7 + $0x278] sm:$0xff]  ;;  %v9260_v45 = vld [vmem:[#allocation4] sm:$0xff]  ;;  %v2095_v46 = vld [vmem:[#allocation7 + $0x270] sm:$0xff] }
  0x1e   :  { %90 = vst [vmem:[#allocation2 + $0x48] sm:$0x1] %v9123_v0  ;;  %8990 = vmatpush.msra.mxu3 %v2041_v16  ;;  %2377 = vmatpush.msra.mxu1 %v2041_v16  ;;  %v9268_v47 = vld [vmem:[#allocation4 + $0x110] sm:$0xff]  ;;  %v9274_v49 = vld [vmem:[#allocation4 + $0x8] sm:$0xff]  ;;  %v9282_v51 = vld [vmem:[#allocation4 + $0x118] sm:$0xff] }
  0x1f   :  { %91 = vst [vmem:[#allocation2 + $0x60] sm:$0x1] %v9123_v0  ;;  %8975 = vmatpush.msra.mxu2 %v2024_v17  ;;  %2169 = vmatpush.msra.mxu0 %v2024_v17  ;;  %v2078_v50 = vld [vmem:[#allocation7 + $0x1e8] sm:$0xff]  ;;  %v9288_v53 = vld [vmem:[#allocation4 + $0x10] sm:$0xff]  ;;  %v9294_v55 = vld [vmem:[#allocation4 + $0x120] sm:$0xff] }
  0x20   :  { %92 = vst [vmem:[#allocation2 + $0x78] sm:$0x1] %v9123_v0  ;;  %8991 = vmatpush.msra.mxu3 %v2040_v18  ;;  %2378 = vmatpush.msra.mxu1 %v2040_v18  ;;  %v2094_v54 = vld [vmem:[#allocation7 + $0x268] sm:$0xff]  ;;  %v9297_v56 = vld [vmem:[#allocation4 + $0x18] sm:$0xff]  ;;  %v2061_v59 = vld [vmem:[#allocation7 + $0x160] sm:$0xff] }
  0x21   :  { %93 = vst [vmem:[#allocation2 + $0x90] sm:$0x1] %v9123_v0  ;;  %8976 = vmatpush.msra.mxu2 %v2023_v19  ;;  %2170 = vmatpush.msra.mxu0 %v2023_v19  ;;  %v9302_v58 = vld [vmem:[#allocation4 + $0x128] sm:$0xff]  ;;  %v2077_v60 = vld [vmem:[#allocation7 + $0x1e0] sm:$0xff]  ;;  %v9312_v1 = vld [vmem:[#allocation4 + $0x130] sm:$0xff] }
  0x22   :  { %94 = vst [vmem:[#allocation2 + $0xa8] sm:$0x1] %v9123_v0  ;;  %8992 = vmatpush.msra.mxu3 %v2039_v20  ;;  %2379 = vmatpush.msra.mxu1 %v2039_v20  ;;  %v9307_v61 = vld [vmem:[#allocation4 + $0x20] sm:$0xff]  ;;  %v9315_v2 = vld [vmem:[#allocation4 + $0x28] sm:$0xff]  ;;  %v9320_v5 = vld [vmem:[#allocation4 + $0x138] sm:$0xff] }
  0x23   :  { %95 = vst [vmem:[#allocation2 + $0xc0] sm:$0x1] %v9123_v0  ;;  %8977 = vmatpush.msra.mxu2 %v2022_v21  ;;  %2171 = vmatpush.msra.mxu0 %v2022_v21  ;;  %v2060_v6 = vld [vmem:[#allocation7 + $0x158] sm:$0xff]  ;;  %v9323_v8 = vld [vmem:[#allocation4 + $0x30] sm:$0xff]  ;;  %v9328_v11 = vld [vmem:[#allocation4 + $0x140] sm:$0xff] }
  0x24   :  { %96 = vst [vmem:[#allocation2 + $0xd8] sm:$0x1] %v9123_v0  ;;  %8993 = vmatpush.msra.mxu3 %v2038_v22  ;;  %2380 = vmatpush.msra.mxu1 %v2038_v22  ;;  %v2076_v7 = vld [vmem:[#allocation7 + $0x1d8] sm:$0xff]  ;;  %v9336_v16 = vld [vmem:[#allocation4 + $0x148] sm:$0xff]  ;;  %v2059_v17 = vld [vmem:[#allocation7 + $0x150] sm:$0xff] }
  0x25   :  { %97 = vst [vmem:[#allocation2 + $0xf0] sm:$0x1] %v9123_v0  ;;  %8978 = vmatpush.msra.mxu2 %v2021_v23  ;;  %2172 = vmatpush.msra.mxu0 %v2021_v23  ;;  %v2092_v12 = vld [vmem:[#allocation7 + $0x258] sm:$0xff]  ;;  %v2075_v18 = vld [vmem:[#allocation7 + $0x1d0] sm:$0xff]  ;;  %v9339_v19 = vld [vmem:[#allocation4 + $0x40] sm:$0xff] }
  0x26   :  { %98 = vst [vmem:[#allocation2 + $0x108] sm:$0x1] %v9123_v0  ;;  %8994 = vmatpush.msra.mxu3 %v2037_v24  ;;  %2381 = vmatpush.msra.mxu1 %v2037_v24  ;;  %v9331_v13 = vld [vmem:[#allocation4 + $0x38] sm:$0xff]  ;;  %v9344_v22 = vld [vmem:[#allocation4 + $0x150] sm:$0xff]  ;;  %v9347_v24 = vld [vmem:[#allocation4 + $0x48] sm:$0xff] }
  0x27   :  { %99 = vst [vmem:[#allocation2 + $0x120] sm:$0x1] %v9123_v0  ;;  %8979 = vmatpush.msra.mxu2 %v2020_v25  ;;  %2173 = vmatpush.msra.mxu0 %v2020_v25  ;;  %v2091_v23 = vld [vmem:[#allocation7 + $0x250] sm:$0xff] }
  0x28   :  { %100 = vst [vmem:[#allocation2 + $0x138] sm:$0x1] %v9123_v0  ;;  %8995 = vmatpush.msra.mxu3 %v2036_v26  ;;  %2382 = vmatpush.msra.mxu1 %v2036_v26 }
  0x29   :  { %101 = vst [vmem:[#allocation2 + $0x150] sm:$0x1] %v9123_v0  ;;  %8980 = vmatpush.msra.mxu2 %v2019_v27  ;;  %2174 = vmatpush.msra.mxu0 %v2019_v27  ;;  %v9352_v27 = vld [vmem:[#allocation4 + $0x158] sm:$0xff] }
  0x2a   :  { %102 = vst [vmem:[#allocation2 + $0x168] sm:$0x1] %v9123_v0  ;;  %8996 = vmatpush.msra.mxu3 %v2035_v28  ;;  %2383 = vmatpush.msra.mxu1 %v2035_v28  ;;  %v2058_v28 = vld [vmem:[#allocation7 + $0x148] sm:$0xff] }
  0x2b   :  { %103 = vst [vmem:[#allocation2 + $0x180] sm:$0x1] %v9123_v0  ;;  %8981 = vmatpush.msra.mxu2 %v2018_v29  ;;  %2175 = vmatpush.msra.mxu0 %v2018_v29  ;;  %v2074_v29 = vld [vmem:[#allocation7 + $0x1c8] sm:$0xff] }
  0x2c   :  { %106 = vst [vmem:[#allocation2 + $0x1c8] sm:$0x1] %v9123_v0  ;;  %8997 = vmatpush.msra.mxu3 %v2034_v30  ;;  %2384 = vmatpush.msra.mxu1 %v2034_v30  ;;  %v9355_v30 = vld [vmem:[#allocation4 + $0x50] sm:$0xff] }
  0x2d   :  { %107 = vst [vmem:[#allocation2 + $0x1e0] sm:$0x1] %v9123_v0  ;;  %8982 = vmatpush.msra.mxu2 %v2017_v31  ;;  %2176 = vmatpush.msra.mxu0 %v2017_v31 }
  0x2e   :  { %108 = vst [vmem:[#allocation2 + $0x1f8] sm:$0x1] %v9123_v0  ;;  %8998 = vmatpush.msra.mxu3 %v2033_v32  ;;  %2273 = vmatmul.f32.vlgmr.msra.gmra.mxu2 %v320_v33  ;;  %v9360_v33 = vld [vmem:[#allocation4 + $0x160] sm:$0xff] }
  0x2f   :  { %109 = vst [vmem:[#allocation2 + $0x210] sm:$0x1] %v9123_v0  ;;  %2482 = vmatmul.f32.vlgmr.msra.gmra.mxu3 %v448_v34  ;;  %2385 = vmatpush.msra.mxu1 %v2033_v32  ;;  %v2090_v34 = vld [vmem:[#allocation7 + $0x248] sm:$0xff] }
  0x30   :  { %110 = vst [vmem:[#allocation2 + $0x228] sm:$0x1] %v9123_v0  ;;  %2579 = vmatpush.msrb.mxu2 %v2064_v36  ;;  %2788 = vmatpush.msrb.mxu3 %v2080_v37 }
  0x31   :  { %111 = vst [vmem:[#allocation2 + $0x240] sm:$0x1] %v9123_v0  ;;  %2386 = vmatmul.f32.vlgmr.msra.gmra.mxu1 %v416_v38  ;;  %2997 = vmatpush.msrb.mxu0 %v2096_v39  ;;  %v9368_v38 = vld [vmem:[#allocation4 + $0x168] sm:$0xff]  ;;  %v2057_v39 = vld [vmem:[#allocation7 + $0x140] sm:$0xff] }
  0x32   :  { %112 = vst [vmem:[#allocation2 + $0x258] sm:$0x1] %v9123_v0  ;;  %2580 = vmatpush.msrb.mxu2 %v2063_v41  ;;  %2789 = vmatpush.msrb.mxu3 %v2079_v43  ;;  %v2073_v41 = vld [vmem:[#allocation7 + $0x1c0] sm:$0xff] }
  0x33   :  { %113 = vst [vmem:[#allocation2 + $0x270] sm:$0x1] %v9123_v0  ;;  %2998 = vmatpush.msrb.mxu0 %v2095_v46 }
  0x34   :  { %114 = vst [vmem:[#allocation2 + $0x288] sm:$0x1] %v9123_v0  ;;  %2581 = vmatpush.msrb.mxu2 %v2062_v48  ;;  %2790 = vmatpush.msrb.mxu3 %v2078_v50  ;;  %v9376_v48 = vld [vmem:[#allocation4 + $0x170] sm:$0xff]  ;;  %v2089_v50 = vld [vmem:[#allocation7 + $0x240] sm:$0xff] }
  0x35   :  { %115 = vst [vmem:[#allocation2 + $0x2a0] sm:$0x1] %v9123_v0  ;;  %2999 = vmatpush.msrb.mxu0 %v2094_v54 }
  0x36   :  { %116 = vst [vmem:[#allocation2 + $0x2b8] sm:$0x1] %v9123_v0  ;;  %2276 = vmatmul.f32.gmra.mxu2 %v9123_v0  ;;  %2791 = vmatpush.msrb.mxu3 %v2077_v60  ;;  %v2056_v60 = vld [vmem:[#allocation7 + $0x138] sm:$0xff] }
  0x37   :  { %117 = vst [vmem:[#allocation2 + $0x2d0] sm:$0x1] %v9123_v0  ;;  %2485 = vmatmul.f32.gmra.mxu3 %v449_v35  ;;  %2582 = vmatpush.msrb.mxu2 %v2061_v59  ;;  %v9363_v35 = vld [vmem:[#allocation4 + $0x58] sm:$0xff] }
  0x38   :  { %118 = vst [vmem:[#allocation2 + $0x2e8] sm:$0x1] %v9123_v0  ;;  %2792 = vmatpush.msrb.mxu3 %v2076_v7  ;;  %v9384_v59 = vld [vmem:[#allocation4 + $0x178] sm:$0xff]  ;;  %v9396_v7 = vld [vmem:[#allocation4 + $0x180] sm:$0xff] }
  0x39   :  { %119 = vst [vmem:[#allocation2 + $0x300] sm:$0x1] %v9123_v0  ;;  %2389 = vmatmul.f32.gmra.mxu1 %v417_v42  ;;  %2583 = vmatpush.msrb.mxu2 %v2060_v6  ;;  %v9371_v42 = vld [vmem:[#allocation4 + $0x60] sm:$0xff] }
  0x3a   :  { %120 = vst [vmem:[#allocation2 + $0x318] sm:$0x1] %v9123_v0  ;;  %2793 = vmatpush.msrb.mxu3 %v2075_v18  ;;  %v9408_v18 = vld [vmem:[#allocation4 + $0x188] sm:$0xff] }
  0x3b   :  { %121 = vst [vmem:[#allocation2 + $0x330] sm:$0x1] %v9123_v0  ;;  %2584 = vmatpush.msrb.mxu2 %v2059_v17 }
  0x3c   :  { %124 = vst [vmem:[#allocation2 + $0x29] sm:$0x1] %v9123_v0  ;;  %2794 = vmatpush.msrb.mxu3 %v2074_v29 }
  0x3d   :  { %125 = vst [vmem:[#allocation2 + $0x41] sm:$0x1] %v9123_v0  ;;  %2585 = vmatpush.msrb.mxu2 %v2058_v28 }
  0x3e   :  { %126 = vst [vmem:[#allocation2 + $0x59] sm:$0x1] %v9123_v0  ;;  %2795 = vmatpush.msrb.mxu3 %v2073_v41 }
  0x3f   :  { %127 = vst [vmem:[#allocation2 + $0x71] sm:$0x1] %v9123_v0  ;;  %2488 = vmatmul.f32.gmra.mxu3 %v9243_v40  ;;  %2586 = vmatpush.msrb.mxu2 %v2057_v39 }
  0x40   :  { %128 = vst [vmem:[#allocation2 + $0x89] sm:$0x1] %v9123_v0 }
  0x41   :  { %129 = vst [vmem:[#allocation2 + $0xa1] sm:$0x1] %v9123_v0  ;;  %2392 = vmatmul.f32.gmra.mxu1 %v9260_v45  ;;  %2587 = vmatpush.msrb.mxu2 %v2056_v60 }
  0x42   :  { %130 = vst [vmem:[#allocation2 + $0xb9] sm:$0x1] %v9123_v0 }
  0x43   :  { %131 = vst [vmem:[#allocation2 + $0xd1] sm:$0x1] %v9123_v0 }
  0x44   :  { %132 = vst [vmem:[#allocation2 + $0xe9] sm:$0x1] %v9123_v0 }
  0x45   :  { %133 = vst [vmem:[#allocation2 + $0x101] sm:$0x1] %v9123_v0 }
  0x46   :  { %134 = vst [vmem:[#allocation2 + $0x119] sm:$0x1] %v9123_v0 }
  0x47   :  { %135 = vst [vmem:[#allocation2 + $0x131] sm:$0x1] %v9123_v0  ;;  %2491 = vmatmul.f32.gmra.mxu3 %v9254_v44 }
  0x48   :  { %136 = vst [vmem:[#allocation2 + $0x149] sm:$0x1] %v9123_v0 }
  0x49   :  { %137 = vst [vmem:[#allocation2 + $0x161] sm:$0x1] %v9123_v0  ;;  %2395 = vmatmul.f32.gmra.mxu1 %v9274_v49 }
  0x4a   :  { %14106 = vst [vmem:[#allocation14_spill] sm:$0xff] %v9243_v40 }
  0x4b   :  { %138 = vst [vmem:[#allocation2 + $0x179] sm:$0x1] %v9123_v0 }
  0x4c   :  { %139 = vst [vmem:[#allocation2 + $0x191] sm:$0x1] %v9123_v0 }
  0x4d   :  { %142 = vst [vmem:[#allocation2 + $0x1d9] sm:$0x1] %v9123_v0 }
  0x4e   :  { %143 = vst [vmem:[#allocation2 + $0x1f1] sm:$0x1] %v9123_v0 }
  0x4f   :  { %144 = vst [vmem:[#allocation2 + $0x209] sm:$0x1] %v9123_v0  ;;  %2494 = vmatmul.f32.gmra.mxu3 %v9268_v47 }
  0x50   :  { %145 = vst [vmem:[#allocation2 + $0x221] sm:$0x1] %v9123_v0 }
  0x51   :  { %146 = vst [vmem:[#allocation2 + $0x239] sm:$0x1] %v9123_v0  ;;  %2398 = vmatmul.f32.gmra.mxu1 %v9288_v53 }
  0x52   :  { %147 = vst [vmem:[#allocation2 + $0x251] sm:$0x1] %v9123_v0 }
  0x53   :  { %14107 = vst [vmem:[#allocation15_spill] sm:$0xff] %v9254_v44 }
  0x54   :  { %148 = vst [vmem:[#allocation2 + $0x269] sm:$0x1] %v9123_v0 }
  0x55   :  { %149 = vst [vmem:[#allocation2 + $0x281] sm:$0x1] %v9123_v0 }
  0x56   :  { %150 = vst [vmem:[#allocation2 + $0x299] sm:$0x1] %v9123_v0 }
  0x57   :  { %14108 = vst [vmem:[#allocation16_spill] sm:$0xff] %v9260_v45  ;;  %2497 = vmatmul.f32.gmra.mxu3 %v9282_v51 }
  0x58   :  { %151 = vst [vmem:[#allocation2 + $0x2b1] sm:$0x1] %v9123_v0 }
  0x59   :  { %152 = vst [vmem:[#allocation2 + $0x2c9] sm:$0x1] %v9123_v0  ;;  %2401 = vmatmul.f32.gmra.mxu1 %v9297_v56 }
  0x5a   :  { %153 = vst [vmem:[#allocation2 + $0x2e1] sm:$0x1] %v9123_v0 }
  0x5b   :  { %154 = vst [vmem:[#allocation2 + $0x2f9] sm:$0x1] %v9123_v0 }
  0x5c   :  { %155 = vst [vmem:[#allocation2 + $0x311] sm:$0x1] %v9123_v0 }
  0x5d   :  { %14109 = vst [vmem:[#allocation17_spill] sm:$0xff] %v9268_v47 }
  0x5e   :  { %156 = vst [vmem:[#allocation2 + $0x329] sm:$0x1] %v9123_v0 }
  0x5f   :  { %157 = vst [vmem:[#allocation2 + $0x341] sm:$0x1] %v9123_v0  ;;  %2500 = vmatmul.f32.gmra.mxu3 %v9294_v55 }
  0x60   :  { %87 = vst [vmem:[#allocation2] sm:$0x1] %v9123_v0 }
  0x61   :  { %14110 = vst [vmem:[#allocation18_spill] sm:$0xff] %v9274_v49  ;;  %2404 = vmatmul.f32.gmra.mxu1 %v9307_v61 }
  0x62   :  { %104 = vst [vmem:[#allocation2 + $0x198] sm:$0x1] %v9123_v0 }
  0x63   :  { %122 = vst [vmem:[#allocation2 + $0x348] sm:$0x1] %v9123_v0 }
  0x64   :  { %123 = vst [vmem:[#allocation2 + $0x11] sm:$0x1] %v9123_v0 }
  0x65   :  { %140 = vst [vmem:[#allocation2 + $0x1a9] sm:$0x1] %v9123_v0 }
  0x66   :  { %141 = vst [vmem:[#allocation2 + $0x1c1] sm:$0x1] %v9123_v0 }
  0x67   :  { %14111 = vst [vmem:[#allocation19_spill] sm:$0xff] %v9282_v51  ;;  %v288_v52 = vld [vmem:[#allocation2] sm:$0xff]  ;;  %2503 = vmatmul.f32.gmra.mxu3 %v9302_v58 }
  0x68   :  { %158 = vst [vmem:[#allocation2 + $0x359] sm:$0x1] %v9123_v0  ;;  %2177 = vmatmul.f32.vlgmr.msra.gmra.mxu0 %v288_v52  ;;  %v9379_v52 = vld [vmem:[#allocation4 + $0x68] sm:$0xff] }
  0x69   :  { %256 = vst [vmem:[#allocation2 + $0x1c9] sm:$0xff] %v9243_v40  ;;  %2407 = vmatmul.f32.gmra.mxu1 %v9315_v2  ;;  %v9552_v40 = vld [vmem:[#allocation4 + $0xc8] sm:$0xff] }
  0x6a   :  { %257 = vst [vmem:[#allocation2 + $0x1d1] sm:$0xff] %v9254_v44 }
  0x6b   :  { %14112 = vst [vmem:[#allocation20_spill] sm:$0xff] %v9288_v53 }
  0x6c   :  { %224 = vst [vmem:[#allocation2 + $0x19] sm:$0xff] %v9260_v45 }
  0x6d   :  { %258 = vst [vmem:[#allocation2 + $0x1e1] sm:$0xff] %v9268_v47 }
  0x6e   :  { %225 = vst [vmem:[#allocation2 + $0x21] sm:$0xff] %v9274_v49 }
  0x6f   :  { %14113 = vst [vmem:[#allocation21_spill] sm:$0xff] %v9294_v55  ;;  %2506 = vmatmul.f32.gmra.mxu3 %v9312_v1 }
  0x70   :  { %259 = vst [vmem:[#allocation2 + $0x1e9] sm:$0xff] %v9282_v51  ;;  %v322_v57 = vld [vmem:[#allocation2 + $0x1c8] sm:$0xff]  ;;  %2180 = vmatmul.f32.gmra.mxu0 %v9123_v0  ;;  %v2093_v0 = vld [vmem:[#allocation7 + $0x260] sm:$0xff] }
  0x71   :  { %14114 = vst [vmem:[#allocation22_spill] sm:$0xff] %v9297_v56  ;;  %2279 = vmatmul.f32.gmra.mxu2 %v322_v57  ;;  %v323_v62 = vld [vmem:[#allocation2 + $0x1d0] sm:$0xff]  ;;  %3000 = vmatpush.msrb.mxu0 %v2093_v0  ;;  %v9535_v51 = vld [vmem:[#allocation4 + $0xc0] sm:$0xff] }
  0x72   :  { %226 = vst [vmem:[#allocation2 + $0x31] sm:$0xff] %v9288_v53  ;;  %2410 = vmatmul.f32.gmra.mxu1 %v9323_v8  ;;  %v9389_v0 = vld [vmem:[#allocation4 + $0x70] sm:$0xff] }
  0x73   :  { %260 = vst [vmem:[#allocation2 + $0x1f9] sm:$0xff] %v9294_v55  ;;  %v290_v63 = vld [vmem:[#allocation2 + $0x18] sm:$0xff]  ;;  %3001 = vmatpush.msrb.mxu0 %v2092_v12  ;;  %v2067_v55 = vld [vmem:[#allocation7 + $0x190] sm:$0xff] }
  0x74   :  { %14115 = vst [vmem:[#allocation23_spill] sm:$0xff] %v9302_v58  ;;  %v324_v3 = vld [vmem:[#allocation2 + $0x1e0] sm:$0xff] }
  0x75   :  { %227 = vst [vmem:[#allocation2 + $0x39] sm:$0xff] %v9297_v56  ;;  %v291_v4 = vld [vmem:[#allocation2 + $0x20] sm:$0xff]  ;;  %3002 = vmatpush.msrb.mxu0 %v2091_v23 }
  0x76   :  { %261 = vst [vmem:[#allocation2 + $0x201] sm:$0xff] %v9302_v58  ;;  %v9411_v23 = vld [vmem:[#allocation4 + $0x80] sm:$0xff] }
  0x77   :  { %14116 = vst [vmem:[#allocation24_spill] sm:$0xff] %v9307_v61  ;;  %v325_v9 = vld [vmem:[#allocation2 + $0x1e8] sm:$0xff]  ;;  %2509 = vmatmul.f32.gmra.mxu3 %v9320_v5  ;;  %3003 = vmatpush.msrb.mxu0 %v2090_v34 }
  0x78   :  { %228 = vst [vmem:[#allocation2 + $0x49] sm:$0xff] %v9307_v61  ;;  %2183 = vmatmul.f32.gmra.mxu0 %v290_v63  ;;  %v9423_v34 = vld [vmem:[#allocation4 + $0x88] sm:$0xff] }
  0x79   :  { %14117 = vst [vmem:[#allocation25_spill] sm:$0xff] %v9312_v1  ;;  %2282 = vmatmul.f32.gmra.mxu2 %v323_v62  ;;  %v292_v10 = vld [vmem:[#allocation2 + $0x30] sm:$0xff]  ;;  %3004 = vmatpush.msrb.mxu0 %v2089_v50  ;;  %v2072_v62 = vld [vmem:[#allocation7 + $0x1b8] sm:$0xff]  ;;  %v2054_v50 = vld [vmem:[#allocation7 + $0x128] sm:$0xff] }
  0x7a   :  { %262 = vst [vmem:[#allocation2 + $0x211] sm:$0xff] %v9312_v1  ;;  %v326_v14 = vld [vmem:[#allocation2 + $0x1f8] sm:$0xff]  ;;  %2413 = vmatmul.f32.gmra.mxu1 %v9331_v13  ;;  %2796 = vmatpush.msrb.mxu3 %v2072_v62  ;;  %v929_v53 = vld [vmem:[#allocation2 + $0x22] sm:$0xff] }
  0x7b   :  { %14118 = vst [vmem:[#allocation26_spill] sm:$0xff] %v9315_v2 }
  0x7c   :  { %229 = vst [vmem:[#allocation2 + $0x51] sm:$0xff] %v9315_v2  ;;  %v293_v15 = vld [vmem:[#allocation2 + $0x38] sm:$0xff] }
  0x7d   :  { %14119 = vst [vmem:[#allocation27_spill] sm:$0xff] %v9320_v5  ;;  %v327_v20 = vld [vmem:[#allocation2 + $0x200] sm:$0xff] }
  0x7e   :  { %263 = vst [vmem:[#allocation2 + $0x219] sm:$0xff] %v9320_v5 }
  0x7f   :  { %14120 = vst [vmem:[#allocation28_spill] sm:$0xff] %v9323_v8  ;;  %2512 = vmatmul.f32.gmra.mxu3 %v9328_v11  ;;  %v294_v21 = vld [vmem:[#allocation2 + $0x48] sm:$0xff] }
  0x80   :  { %2186 = vmatmul.f32.gmra.mxu0 %v291_v4  ;;  %230 = vst [vmem:[#allocation2 + $0x61] sm:$0xff] %v9323_v8  ;;  %v2144_v8 = vld [vmem:[#allocation7 + $0x3f8] sm:$0xff] }
  0x81   :  { %2285 = vmatmul.f32.gmra.mxu2 %v324_v3  ;;  %14121 = vst [vmem:[#allocation29_spill] sm:$0xff] %v9328_v11  ;;  %v328_v25 = vld [vmem:[#allocation2 + $0x210] sm:$0xff] }
  0x82   :  { %264 = vst [vmem:[#allocation2 + $0x229] sm:$0xff] %v9328_v11  ;;  %2416 = vmatmul.f32.gmra.mxu1 %v9339_v19  ;;  %v9518_v11 = vld [vmem:[#allocation4 + $0xb8] sm:$0xff] }
  0x83   :  { %14122 = vst [vmem:[#allocation30_spill] sm:$0xff] %v9331_v13  ;;  %v295_v26 = vld [vmem:[#allocation2 + $0x50] sm:$0xff] }
  0x84   :  { %231 = vst [vmem:[#allocation2 + $0x69] sm:$0xff] %v9331_v13  ;;  %v2102_v13 = vld [vmem:[#allocation7 + $0x2a8] sm:$0xff] }
  0x85   :  { %14123 = vst [vmem:[#allocation31_spill] sm:$0xff] %v9336_v16  ;;  %v329_v31 = vld [vmem:[#allocation2 + $0x218] sm:$0xff] }
  0x86   :  { %265 = vst [vmem:[#allocation2 + $0x231] sm:$0xff] %v9336_v16 }
  0x87   :  { %14124 = vst [vmem:[#allocation32_spill] sm:$0xff] %v9339_v19  ;;  %2515 = vmatmul.f32.gmra.mxu3 %v9336_v16  ;;  %v296_v32 = vld [vmem:[#allocation2 + $0x60] sm:$0xff] }
  0x88   :  { %2189 = vmatmul.f32.gmra.mxu0 %v292_v10  ;;  %232 = vst [vmem:[#allocation2 + $0x79] sm:$0xff] %v9339_v19  ;;  %v9399_v10 = vld [vmem:[#allocation4 + $0x78] sm:$0xff]  ;;  %v2103_v19 = vld [vmem:[#allocation7 + $0x2b0] sm:$0xff] }
  0x89   :  { %2288 = vmatmul.f32.gmra.mxu2 %v325_v9  ;;  %14125 = vst [vmem:[#allocation33_spill] sm:$0xff] %v9344_v22  ;;  %v330_v36 = vld [vmem:[#allocation2 + $0x228] sm:$0xff]  ;;  %v2088_v9 = vld [vmem:[#allocation7 + $0x238] sm:$0xff] }
  0x8a   :  { %266 = vst [vmem:[#allocation2 + $0x241] sm:$0xff] %v9344_v22  ;;  %2419 = vmatmul.f32.gmra.mxu1 %v9347_v24  ;;  %3005 = vmatpush.msrb.mxu0 %v2088_v9 }
  0x8b   :  { %14126 = vst [vmem:[#allocation34_spill] sm:$0xff] %v9347_v24  ;;  %v297_v37 = vld [vmem:[#allocation2 + $0x68] sm:$0xff] }
  0x8c   :  { %233 = vst [vmem:[#allocation2 + $0x81] sm:$0xff] %v9347_v24  ;;  %v188_v24 = vld [vmem:[#allocation4 + $0xe8] sm:$0xff] }
  0x8d   :  { %14127 = vst [vmem:[#allocation35_spill] sm:$0xff] %v9352_v27  ;;  %v331_v43 = vld [vmem:[#allocation2 + $0x230] sm:$0xff] }
  0x8e   :  { %267 = vst [vmem:[#allocation2 + $0x249] sm:$0xff] %v9352_v27 }
  0x8f   :  { %2518 = vmatmul.f32.gmra.mxu3 %v9344_v22  ;;  %14128 = vst [vmem:[#allocation36_spill] sm:$0xff] %v9355_v30  ;;  %v298_v46 = vld [vmem:[#allocation2 + $0x78] sm:$0xff] }
  0x90   :  { %2192 = vmatmul.f32.gmra.mxu0 %v293_v15  ;;  %234 = vst [vmem:[#allocation2 + $0x91] sm:$0xff] %v9355_v30 }
  0x91   :  { %2291 = vmatmul.f32.gmra.mxu2 %v326_v14  ;;  %14129 = vst [vmem:[#allocation37_spill] sm:$0xff] %v9360_v33  ;;  %v332_v54 = vld [vmem:[#allocation2 + $0x240] sm:$0xff] }
  0x92   :  { %268 = vst [vmem:[#allocation2 + $0x259] sm:$0xff] %v9360_v33  ;;  %2422 = vmatmul.f32.gmra.mxu1 %v9355_v30  ;;  %v2081_v30 = vld [vmem:[#allocation7 + $0x200] sm:$0xff] }
  0x93   :  { %14130 = vst [vmem:[#allocation38_spill] sm:$0xff] %v9363_v35  ;;  %v299_v57 = vld [vmem:[#allocation2 + $0x80] sm:$0xff] }
  0x94   :  { %235 = vst [vmem:[#allocation2 + $0x99] sm:$0xff] %v9363_v35 }
  0x95   :  { %14131 = vst [vmem:[#allocation39_spill] sm:$0xff] %v9368_v38  ;;  %v333_v3 = vld [vmem:[#allocation2 + $0x248] sm:$0xff] }
  0x96   :  { %269 = vst [vmem:[#allocation2 + $0x261] sm:$0xff] %v9368_v38 }
  0x97   :  { %2521 = vmatmul.f32.gmra.mxu3 %v9352_v27  ;;  %14132 = vst [vmem:[#allocation40_spill] sm:$0xff] %v9371_v42  ;;  %v300_v4 = vld [vmem:[#allocation2 + $0x90] sm:$0xff] }
  0x98   :  { %2195 = vmatmul.f32.gmra.mxu0 %v294_v21  ;;  %236 = vst [vmem:[#allocation2 + $0xa9] sm:$0xff] %v9371_v42  ;;  %v2071_v21 = vld [vmem:[#allocation7 + $0x1b0] sm:$0xff] }
  0x99   :  { %2294 = vmatmul.f32.gmra.mxu2 %v327_v20  ;;  %14133 = vst [vmem:[#allocation41_spill] sm:$0xff] %v9376_v48  ;;  %v334_v14 = vld [vmem:[#allocation2 + $0x258] sm:$0xff]  ;;  %v2055_v20 = vld [vmem:[#allocation7 + $0x130] sm:$0xff]  ;;  %2797 = vmatpush.msrb.mxu3 %v2071_v21 }
  0x9a   :  { %2425 = vmatmul.f32.gmra.mxu1 %v9363_v35  ;;  %270 = vst [vmem:[#allocation2 + $0x271] sm:$0xff] %v9376_v48  ;;  %2588 = vmatpush.msrb.mxu2 %v2055_v20  ;;  %v2086_v20 = vld [vmem:[#allocation7 + $0x228] sm:$0xff]  ;;  %v9453_v21 = vld [vmem:[#allocation4 + $0x98] sm:$0xff]  ;;  %v9501_v27 = vld [vmem:[#allocation4 + $0xb0] sm:$0xff] }
  0x9b   :  { %14134 = vst [vmem:[#allocation42_spill] sm:$0xff] %v9379_v52  ;;  %v301_v15 = vld [vmem:[#allocation2 + $0x98] sm:$0xff] }
  0x9c   :  { %237 = vst [vmem:[#allocation2 + $0xb1] sm:$0xff] %v9379_v52  ;;  %2589 = vmatpush.msrb.mxu2 %v2054_v50  ;;  %v9464_v50 = vld [vmem:[#allocation4 + $0x1a8] sm:$0xff] }
  0x9d   :  { %14135 = vst [vmem:[#allocation43_spill] sm:$0xff] %v9384_v59 }
  0x9e   :  { %271 = vst [vmem:[#allocation2 + $0x279] sm:$0xff] %v9384_v59 }
  0x9f   :  { %2524 = vmatmul.f32.gmra.mxu3 %v9360_v33  ;;  %14137 = vst [vmem:[#allocation45_spill] sm:$0xff] %v9389_v0  ;;  %v302_v28 = vld [vmem:[#allocation2 + $0xa8] sm:$0xff]  ;;  %v2068_v33 = vld [vmem:[#allocation7 + $0x198] sm:$0xff] }
  0xa0   :  { %2198 = vmatmul.f32.gmra.mxu0 %v295_v26  ;;  %238 = vst [vmem:[#allocation2 + $0xc1] sm:$0xff] %v9389_v0  ;;  %v335_v26 = vld [vmem:[#allocation2 + $0x260] sm:$0xff] }
  0xa1   :  { %2297 = vmatmul.f32.gmra.mxu2 %v328_v25  ;;  %14138 = vst [vmem:[#allocation46_spill] sm:$0xff] %v9396_v7 }
  0xa2   :  { %2428 = vmatmul.f32.gmra.mxu1 %v9371_v42  ;;  %272 = vst [vmem:[#allocation2 + $0x289] sm:$0xff] %v9396_v7  ;;  %v2108_v42 = vld [vmem:[#allocation7 + $0x2d8] sm:$0xff] }
  0xa3   :  { %14139 = vst [vmem:[#allocation47_spill] sm:$0xff] %v9399_v10  ;;  %v303_v39 = vld [vmem:[#allocation2 + $0xb0] sm:$0xff] }
  0xa4   :  { %239 = vst [vmem:[#allocation2 + $0xc9] sm:$0xff] %v9399_v10 }
  0xa5   :  { %14141 = vst [vmem:[#allocation49_spill] sm:$0xff] %v9408_v18  ;;  %v337_v62 = vld [vmem:[#allocation2 + $0x278] sm:$0xff] }
  0xa6   :  { %273 = vst [vmem:[#allocation2 + $0x291] sm:$0xff] %v9408_v18 }
  0xa7   :  { %2527 = vmatmul.f32.gmra.mxu3 %v9368_v38  ;;  %14142 = vst [vmem:[#allocation50_spill] sm:$0xff] %v9411_v23 }
  0xa8   :  { %2201 = vmatmul.f32.gmra.mxu0 %v296_v32  ;;  %240 = vst [vmem:[#allocation2 + $0xd9] sm:$0xff] %v9411_v23  ;;  %v2087_v32 = vld [vmem:[#allocation7 + $0x230] sm:$0xff] }
  0xa9   :  { %2300 = vmatmul.f32.gmra.mxu2 %v329_v31  ;;  %v9420_v31 = vld [vmem:[#allocation4 + $0x190] sm:$0xff]  ;;  %14144 = vst [vmem:[#allocation52_spill] sm:$0xff] %v9423_v34  ;;  %3006 = vmatpush.msrb.mxu0 %v2087_v32 }
  0xaa   :  { %2431 = vmatmul.f32.gmra.mxu1 %v9379_v52  ;;  %14143 = vst [vmem:[#allocation51_spill] sm:$0xff] %v9420_v31  ;;  %v2110_v52 = vld [vmem:[#allocation7 + $0x2e8] sm:$0xff] }
  0xab   :  { %274 = vst [vmem:[#allocation2 + $0x2a1] sm:$0xff] %v9420_v31  ;;  %3007 = vmatpush.msrb.mxu0 %v2086_v20 }
  0xac   :  { %241 = vst [vmem:[#allocation2 + $0xe1] sm:$0xff] %v9423_v34 }
  0xad   :  { %14150 = vst [vmem:[#allocation58_spill] sm:$0xff] %v9453_v21 }
  0xae   :  { %v9393_v6 = vpop.f32.mrf.mxu1  ;;  %243 = vst [vmem:[#allocation2 + $0xf9] sm:$0xff] %v9453_v21 }
  0xaf   :  { %2530 = vmatmul.f32.gmra.mxu3 %v9376_v48  ;;  %14151 = vst [vmem:[#allocation59_spill] sm:$0xff] %v9464_v50 }
  0xb0   :  { %2204 = vmatmul.f32.gmra.mxu0 %v297_v37  ;;  %v336_v37 = vld [vmem:[#allocation2 + $0x270] sm:$0xff]  ;;  %277 = vst [vmem:[#allocation2 + $0x2c1] sm:$0xff] %v9464_v50 }
  0xb1   :  { %2303 = vmatmul.f32.gmra.mxu2 %v330_v36  ;;  %v9429_v41 = vpop.f32.mrf.mxu2  ;;  %14158 = vst [vmem:[#allocation66_spill] sm:$0xff] %v9501_v27 }
  0xb2   :  { %v9387_v63 = vpop.f32.mrf.mxu3  ;;  %2434 = vmatmul.f32.gmra.mxu1 %v9389_v0  ;;  %14145 = vst [vmem:[#allocation53_spill] sm:$0xff] %v9429_v41  ;;  %v934_v41 = vld [vmem:[#allocation2 + $0x62] sm:$0xff] }
  0xb3   :  { %14136 = vst [vmem:[#allocation44_spill] sm:$0xff] %v9387_v63 }
  0xb4   :  { %246 = vst [vmem:[#allocation2 + $0x121] sm:$0xff] %v9501_v27 }
  0xb5   :  { %14161 = vst [vmem:[#allocation69_spill] sm:$0xff] %v9518_v11 }
  0xb6   :  { %v9405_v17 = vpop.f32.mrf.mxu1  ;;  %247 = vst [vmem:[#allocation2 + $0x129] sm:$0xff] %v9518_v11 }
  0xb7   :  { %2533 = vmatmul.f32.gmra.mxu3 %v9384_v59  ;;  %14164 = vst [vmem:[#allocation72_spill] sm:$0xff] %v9535_v51 }
  0xb8   :  { %2207 = vmatmul.f32.gmra.mxu0 %v298_v46  ;;  %v9434_v46 = vld [vmem:[#allocation4 + $0x198] sm:$0xff]  ;;  %248 = vst [vmem:[#allocation2 + $0x139] sm:$0xff] %v9535_v51 }
  0xb9   :  { %2306 = vmatmul.f32.gmra.mxu2 %v331_v43  ;;  %14146 = vst [vmem:[#allocation54_spill] sm:$0xff] %v9434_v46 }
  0xba   :  { %v9402_v12 = vpop.f32.mrf.mxu3  ;;  %2437 = vmatmul.f32.gmra.mxu1 %v9399_v10  ;;  %275 = vst [vmem:[#allocation2 + $0x2a9] sm:$0xff] %v9434_v46  ;;  %v2111_v10 = vld [vmem:[#allocation7 + $0x2f0] sm:$0xff] }
  0xbb   :  { %14140 = vst [vmem:[#allocation48_spill] sm:$0xff] %v9402_v12  ;;  %v678_v12 = vld [vmem:[#allocation2 + $0x60] sm:$0xff] }
  0xbc   :  { %14167 = vst [vmem:[#allocation75_spill] sm:$0xff] %v9552_v40 }
  0xbd   :  { %249 = vst [vmem:[#allocation2 + $0x141] sm:$0xff] %v9552_v40 }
  0xbe   :  { %v9417_v29 = vpop.f32.mrf.mxu1  ;;  %253 = vst [vmem:[#allocation2 + $0x171] sm:$0xff] %v188_v24 }
  0xbf   :  { %2536 = vmatmul.f32.gmra.mxu3 %v9396_v7  ;;  %v9484_v7 = vld [vmem:[#allocation4 + $0xa8] sm:$0xff]  ;;  %v314_v35 = vld [vmem:[#allocation2 + $0x138] sm:$0xff] }
  0xc0   :  { %2210 = vmatmul.f32.gmra.mxu0 %v299_v57  ;;  %v9437_v57 = vld [vmem:[#allocation4 + $0x90] sm:$0xff]  ;;  %14155 = vst [vmem:[#allocation63_spill] sm:$0xff] %v9484_v7 }
  0xc1   :  { %2309 = vmatmul.f32.gmra.mxu2 %v332_v54  ;;  %v2070_v54 = vld [vmem:[#allocation7 + $0x1a8] sm:$0xff]  ;;  %14147 = vst [vmem:[#allocation55_spill] sm:$0xff] %v9437_v57 }
  0xc2   :  { %v9415_v25 = vpop.f32.mrf.mxu3  ;;  %2440 = vmatmul.f32.gmra.mxu1 %v9411_v23  ;;  %2798 = vmatpush.msrb.mxu3 %v2070_v54  ;;  %242 = vst [vmem:[#allocation2 + $0xf1] sm:$0xff] %v9437_v57  ;;  %v2053_v54 = vld [vmem:[#allocation7 + $0x120] sm:$0xff] }
  0xc3   :  { %2590 = vmatpush.msrb.mxu2 %v2053_v54  ;;  %v9481_v54 = vld [vmem:[#allocation4 + $0x1b0] sm:$0xff]  ;;  %245 = vst [vmem:[#allocation2 + $0x111] sm:$0xff] %v9484_v7 }
  0xc4   :  { %14154 = vst [vmem:[#allocation62_spill] sm:$0xff] %v9481_v54 }
  0xc5   :  { %278 = vst [vmem:[#allocation2 + $0x2d1] sm:$0xff] %v9481_v54 }
  0xc6   :  { %v9431_v43 = vpop.f32.mrf.mxu1 }
  0xc7   :  { %2539 = vmatmul.f32.gmra.mxu3 %v9408_v18  ;;  %v306_v18 = vld [vmem:[#allocation2 + $0xd8] sm:$0xff] }
  0xc8   :  { %2213 = vmatmul.f32.gmra.mxu0 %v300_v4  ;;  %v304_v4 = vld [vmem:[#allocation2 + $0xc0] sm:$0xff] }
  0xc9   :  { %2312 = vmatmul.f32.gmra.mxu2 %v333_v3  ;;  %v308_v16 = vld [vmem:[#allocation2 + $0xf0] sm:$0xff] }
  0xca   :  { %v9427_v36 = vpop.f32.mrf.mxu3  ;;  %2443 = vmatmul.f32.gmra.mxu1 %v9423_v34 }
  0xce   :  { %v9445_v9 = vpop.f32.mrf.mxu1 }
  0xcf   :  { %2542 = vmatmul.f32.gmra.mxu3 %v9420_v31 }
  0xd0   :  { %2216 = vmatmul.f32.gmra.mxu0 %v301_v15  ;;  %v9451_v15 = vpop.f32.mrf.mxu2 }
  0xd1   :  { %2315 = vmatmul.f32.gmra.mxu2 %v334_v14  ;;  %v9448_v14 = vld [vmem:[#allocation4 + $0x1a0] sm:$0xff]  ;;  %14149 = vst [vmem:[#allocation57_spill] sm:$0xff] %v9451_v15 }
  0xd2   :  { %v9441_v60 = vpop.f32.mrf.mxu3  ;;  %14148 = vst [vmem:[#allocation56_spill] sm:$0xff] %v9448_v14  ;;  %2446 = vmatmul.f32.gmra.mxu1 %v9437_v57  ;;  %v312_v57 = vld [vmem:[#allocation2 + $0x120] sm:$0xff] }
  0xd3   :  { %276 = vst [vmem:[#allocation2 + $0x2b9] sm:$0xff] %v9448_v14 }
  0xd7   :  { %2545 = vmatmul.f32.gmra.mxu3 %v9434_v46 }
  0xd8   :  { %2219 = vmatmul.f32.gmra.mxu0 %v302_v28  ;;  %v338_v28 = vld [vmem:[#allocation2 + $0x288] sm:$0xff] }
  0xd9   :  { %2318 = vmatmul.f32.gmra.mxu2 %v335_v26 }
  0xda   :  { %v9457_v26 = vpop.f32.mrf.mxu3  ;;  %2449 = vmatmul.f32.gmra.mxu1 %v9453_v21 }
  0xdf   :  { %2548 = vmatmul.f32.gmra.mxu3 %v9448_v14 }
  0xe0   :  { %2222 = vmatmul.f32.gmra.mxu0 %v303_v39  ;;  %v9461_v39 = vpop.f32.mrf.mxu1 }
  0xe1   :  { %2321 = vmatmul.f32.gmra.mxu2 %v336_v37  ;;  %v305_v37 = vld [vmem:[#allocation2 + $0xc8] sm:$0xff] }
  0xe2   :  { %v9471_v46 = vpop.f32.mrf.mxu3 }
  0xe5   :  { %v9443_v3 = vpop.f32.mrf.mxu0 }
  0xe7   :  { %2551 = vmatmul.f32.gmra.mxu3 %v9464_v50  ;;  %v340_v50 = vld [vmem:[#allocation2 + $0x2a0] sm:$0xff] }
  0xe8   :  { %2225 = vmatmul.f32.gmra.mxu0 %v304_v4  ;;  %v9467_v4 = vld [vmem:[#allocation4 + $0xa0] sm:$0xff] }
  0xe9   :  { %2324 = vmatmul.f32.gmra.mxu2 %v337_v62  ;;  %v2069_v62 = vld [vmem:[#allocation7 + $0x1a0] sm:$0xff]  ;;  %14152 = vst [vmem:[#allocation60_spill] sm:$0xff] %v9467_v4  ;;  %2452 = vmatmul.f32.gmra.mxu1 %v9467_v4 }
  0xea   :  { %2799 = vmatpush.msrb.mxu3 %v2069_v62  ;;  %244 = vst [vmem:[#allocation2 + $0x109] sm:$0xff] %v9467_v4  ;;  %v2085_v62 = vld [vmem:[#allocation7 + $0x220] sm:$0xff]  ;;  %v9569_v4 = vld [vmem:[#allocation4 + $0xd0] sm:$0xff] }
  0xeb   :  { %3008 = vmatpush.msrb.mxu0 %v2085_v62  ;;  %v2052_v62 = vld [vmem:[#allocation7 + $0x118] sm:$0xff]  ;;  %14170 = vst [vmem:[#allocation78_spill] sm:$0xff] %v9569_v4 }
  0xec   :  { %2591 = vmatpush.msrb.mxu2 %v2052_v62  ;;  %2800 = vmatpush.msrb.mxu3 %v2068_v33  ;;  %v9515_v62 = vld [vmem:[#allocation4 + $0x1c0] sm:$0xff]  ;;  %v2084_v33 = vld [vmem:[#allocation7 + $0x218] sm:$0xff]  ;;  %250 = vst [vmem:[#allocation2 + $0x151] sm:$0xff] %v9569_v4 }
  0xed   :  { %v9459_v32 = vpop.f32.mrf.mxu0  ;;  %14160 = vst [vmem:[#allocation68_spill] sm:$0xff] %v9515_v62  ;;  %3009 = vmatpush.msrb.mxu0 %v2084_v33  ;;  %v2051_v33 = vld [vmem:[#allocation7 + $0x110] sm:$0xff] }
  0xee   :  { %280 = vst [vmem:[#allocation2 + $0x2e9] sm:$0xff] %v9515_v62  ;;  %2592 = vmatpush.msrb.mxu2 %v2051_v33  ;;  %2801 = vmatpush.msrb.mxu3 %v2067_v55  ;;  %v9549_v33 = vld [vmem:[#allocation4 + $0x1d0] sm:$0xff] }
  0xef   :  { %2554 = vmatmul.f32.gmra.mxu3 %v9481_v54  ;;  %14166 = vst [vmem:[#allocation74_spill] sm:$0xff] %v9549_v33  ;;  %v2083_v55 = vld [vmem:[#allocation7 + $0x210] sm:$0xff] }
  0xf0   :  { %2228 = vmatmul.f32.gmra.mxu0 %v305_v37  ;;  %v9478_v37 = vpop.f32.mrf.mxu1  ;;  %282 = vst [vmem:[#allocation2 + $0x301] sm:$0xff] %v9549_v33 }
  0xf1   :  { %2327 = vmatmul.f32.gmra.mxu2 %v338_v28  ;;  %v339_v28 = vld [vmem:[#allocation2 + $0x290] sm:$0xff]  ;;  %2455 = vmatmul.f32.gmra.mxu1 %v9484_v7  ;;  %v310_v44 = vld [vmem:[#allocation2 + $0x108] sm:$0xff] }
  0xf2   :  { %3010 = vmatpush.msrb.mxu0 %v2083_v55  ;;  %v2050_v55 = vld [vmem:[#allocation7 + $0x108] sm:$0xff] }
  0xf3   :  { %2593 = vmatpush.msrb.mxu2 %v2050_v55  ;;  %v9583_v55 = vld [vmem:[#allocation4 + $0x1e0] sm:$0xff] }
  0xf4   :  { %v2280_v20 = vpop.f32.mrf.mxu2  ;;  %14172 = vst [vmem:[#allocation80_spill] sm:$0xff] %v9583_v55 }
  0xf5   :  { %v9474_v14 = vadd.f32 %v9415_v25, %v2280_v20  ;;  %v9476_v31 = vpop.f32.mrf.mxu0  ;;  %v9488_v20 = vpop.f32.mrf.mxu3  ;;  %284 = vst [vmem:[#allocation2 + $0x319] sm:$0xff] %v9583_v55  ;;  %v346_v23 = vld [vmem:[#allocation2 + $0x2e8] sm:$0xff] }
  0xf7   :  { %14153 = vst [vmem:[#allocation61_spill] sm:$0xff] %v9474_v14 }
  0xf8   :  { %2231 = vmatmul.f32.gmra.mxu0 %v306_v18  ;;  %v9495_v38 = vpop.f32.mrf.mxu1  ;;  %v9498_v18 = vld [vmem:[#allocation4 + $0x1b8] sm:$0xff] }
  0xf9   :  { %2330 = vmatmul.f32.gmra.mxu2 %v339_v28  ;;  %v307_v28 = vld [vmem:[#allocation2 + $0xe0] sm:$0xff]  ;;  %14157 = vst [vmem:[#allocation65_spill] sm:$0xff] %v9498_v18  ;;  %2557 = vmatmul.f32.gmra.mxu3 %v9498_v18 }
  0xfa   :  { %279 = vst [vmem:[#allocation2 + $0x2d9] sm:$0xff] %v9498_v18  ;;  %2458 = vmatmul.f32.gmra.mxu1 %v9501_v27  ;;  %v342_v18 = vld [vmem:[#allocation2 + $0x2b8] sm:$0xff] }
  0xfc   :  { %v2283_v25 = vpop.f32.mrf.mxu2 }
  0xfd   :  { %v9491_v59 = vadd.f32 %v9427_v36, %v2283_v25  ;;  %v9493_v48 = vpop.f32.mrf.mxu0  ;;  %v9505_v25 = vpop.f32.mrf.mxu3 }
  0xff   :  { %14156 = vst [vmem:[#allocation64_spill] sm:$0xff] %v9491_v59  ;;  %v932_v59 = vld [vmem:[#allocation2 + $0x4a] sm:$0xff] }
 0x100   :  { %2234 = vmatmul.f32.gmra.mxu0 %v307_v28  ;;  %v9512_v28 = vpop.f32.mrf.mxu1 }
 0x101   :  { %2333 = vmatmul.f32.gmra.mxu2 %v340_v50  ;;  %v341_v50 = vld [vmem:[#allocation2 + $0x2a8] sm:$0xff]  ;;  %2560 = vmatmul.f32.gmra.mxu3 %v9515_v62 }
 0x102   :  { %2461 = vmatmul.f32.gmra.mxu1 %v9518_v11 }
 0x104   :  { %v2286_v36 = vpop.f32.mrf.mxu2 }
 0x105   :  { %v9508_v54 = vadd.f32 %v9441_v60, %v2286_v36  ;;  %v9510_v22 = vpop.f32.mrf.mxu0  ;;  %v9522_v36 = vpop.f32.mrf.mxu3 }
 0x107   :  { %14159 = vst [vmem:[#allocation67_spill] sm:$0xff] %v9508_v54  ;;  %v677_v54 = vld [vmem:[#allocation2 + $0x50] sm:$0xff] }
 0x108   :  { %2237 = vmatmul.f32.gmra.mxu0 %v308_v16  ;;  %v9529_v58 = vpop.f32.mrf.mxu1  ;;  %v9532_v16 = vld [vmem:[#allocation4 + $0x1c8] sm:$0xff] }
 0x109   :  { %2336 = vmatmul.f32.gmra.mxu2 %v341_v50  ;;  %v309_v50 = vld [vmem:[#allocation2 + $0xf8] sm:$0xff]  ;;  %14163 = vst [vmem:[#allocation71_spill] sm:$0xff] %v9532_v16  ;;  %2563 = vmatmul.f32.gmra.mxu3 %v9532_v16 }
 0x10a   :  { %281 = vst [vmem:[#allocation2 + $0x2f1] sm:$0xff] %v9532_v16  ;;  %2464 = vmatmul.f32.gmra.mxu1 %v9535_v51  ;;  %v344_v16 = vld [vmem:[#allocation2 + $0x2d0] sm:$0xff]  ;;  %v2066_v51 = vld [vmem:[#allocation7 + $0x188] sm:$0xff] }
 0x10b   :  { %2802 = vmatpush.msrb.mxu3 %v2066_v51  ;;  %v2082_v51 = vld [vmem:[#allocation7 + $0x208] sm:$0xff] }
 0x10c   :  { %v2289_v60 = vpop.f32.mrf.mxu2  ;;  %3011 = vmatpush.msrb.mxu0 %v2082_v51  ;;  %v9600_v51 = vld [vmem:[#allocation4 + $0x1e8] sm:$0xff] }
 0x10d   :  { %v9525_v5 = vadd.f32 %v9457_v26, %v2289_v60  ;;  %v9527_v1 = vpop.f32.mrf.mxu0  ;;  %v9539_v60 = vpop.f32.mrf.mxu3  ;;  %14175 = vst [vmem:[#allocation83_spill] sm:$0xff] %v9600_v51 }
 0x10e   :  { %285 = vst [vmem:[#allocation2 + $0x321] sm:$0xff] %v9600_v51  ;;  %3012 = vmatpush.msrb.mxu0 %v2081_v30  ;;  %v2128_v30 = vld [vmem:[#allocation7 + $0x378] sm:$0xff] }
 0x10f   :  { %14162 = vst [vmem:[#allocation70_spill] sm:$0xff] %v9525_v5  ;;  %v800_v5 = vld [vmem:[#allocation2 + $0x19] sm:$0xff] }
 0x110   :  { %2240 = vmatmul.f32.gmra.mxu0 %v309_v50  ;;  %v9546_v50 = vpop.f32.mrf.mxu1 }
 0x111   :  { %2339 = vmatmul.f32.gmra.mxu2 %v342_v18  ;;  %v343_v18 = vld [vmem:[#allocation2 + $0x2c0] sm:$0xff]  ;;  %2566 = vmatmul.f32.gmra.mxu3 %v9549_v33 }
 0x112   :  { %2467 = vmatmul.f32.gmra.mxu1 %v9552_v40  ;;  %v9586_v40 = vld [vmem:[#allocation4 + $0xd8] sm:$0xff] }
 0x113   :  { %14173 = vst [vmem:[#allocation81_spill] sm:$0xff] %v9586_v40 }
 0x114   :  { %v2292_v26 = vpop.f32.mrf.mxu2  ;;  %251 = vst [vmem:[#allocation2 + $0x159] sm:$0xff] %v9586_v40 }
 0x115   :  { %v9542_v62 = vadd.f32 %v9471_v46, %v2292_v26  ;;  %v9544_v47 = vpop.f32.mrf.mxu0  ;;  %v9556_v26 = vpop.f32.mrf.mxu3 }
 0x117   :  { %14165 = vst [vmem:[#allocation73_spill] sm:$0xff] %v9542_v62 }
 0x118   :  { %2243 = vmatmul.f32.gmra.mxu0 %v310_v44  ;;  %v9563_v7 = vpop.f32.mrf.mxu1  ;;  %v9566_v44 = vld [vmem:[#allocation4 + $0x1d8] sm:$0xff] }
 0x119   :  { %2342 = vmatmul.f32.gmra.mxu2 %v343_v18  ;;  %v311_v18 = vld [vmem:[#allocation2 + $0x110] sm:$0xff]  ;;  %14169 = vst [vmem:[#allocation77_spill] sm:$0xff] %v9566_v44  ;;  %2569 = vmatmul.f32.gmra.mxu3 %v9566_v44 }
 0x11a   :  { %283 = vst [vmem:[#allocation2 + $0x309] sm:$0xff] %v9566_v44  ;;  %2470 = vmatmul.f32.gmra.mxu1 %v9569_v4  ;;  %v2112_v44 = vld [vmem:[#allocation7 + $0x2f8] sm:$0xff]  ;;  %v2049_v4 = vld [vmem:[#allocation7 + $0x100] sm:$0xff] }
 0x11b   :  { %3206 = vmatpush.msrb.mxu1 %v2112_v44  ;;  %2594 = vmatpush.msrb.mxu2 %v2049_v4  ;;  %v9603_v44 = vld [vmem:[#allocation4 + $0xe0] sm:$0xff] }
 0x11c   :  { %v2295_v46 = vpop.f32.mrf.mxu2  ;;  %14176 = vst [vmem:[#allocation84_spill] sm:$0xff] %v9603_v44 }
 0x11d   :  { %v9559_v11 = vadd.f32 %v9488_v20, %v2295_v46  ;;  %v9561_v27 = vpop.f32.mrf.mxu0  ;;  %v9573_v46 = vpop.f32.mrf.mxu3  ;;  %3207 = vmatpush.msrb.mxu1 %v2111_v10  ;;  %252 = vst [vmem:[#allocation2 + $0x169] sm:$0xff] %v9603_v44  ;;  %3415 = vmatpush.msra.mxu2 %v2128_v30  ;;  %v2099_v30 = vld [vmem:[#allocation7 + $0x290] sm:$0xff] }
 0x11f   :  { %14168 = vst [vmem:[#allocation76_spill] sm:$0xff] %v9559_v11  ;;  %3208 = vmatpush.msrb.mxu1 %v2110_v52  ;;  %v2107_v52 = vld [vmem:[#allocation7 + $0x2d0] sm:$0xff] }
 0x120   :  { %2246 = vmatmul.f32.gmra.mxu0 %v311_v18  ;;  %v9580_v18 = vpop.f32.mrf.mxu1  ;;  %v545_v11 = vld [vmem:[#allocation2 + $0xa] sm:$0xff] }
 0x121   :  { %2345 = vmatmul.f32.gmra.mxu2 %v344_v16  ;;  %v345_v16 = vld [vmem:[#allocation2 + $0x2d8] sm:$0xff]  ;;  %2572 = vmatmul.f32.gmra.mxu3 %v9583_v55 }
 0x122   :  { %2473 = vmatmul.f32.gmra.mxu1 %v9586_v40  ;;  %v2106_v40 = vld [vmem:[#allocation7 + $0x2c8] sm:$0xff] }
 0x124   :  { %v2298_v20 = vpop.f32.mrf.mxu2  ;;  %v9654_v49 = vld [vmem:[#allocation2 + $0x168] sm:$0xff] }
 0x125   :  { %v9576_v33 = vadd.f32 %v9505_v25, %v2298_v20  ;;  %v9578_v21 = vpop.f32.mrf.mxu0  ;;  %v9590_v20 = vpop.f32.mrf.mxu3 }
 0x127   :  { %14171 = vst [vmem:[#allocation79_spill] sm:$0xff] %v9576_v33 }
 0x128   :  { %2249 = vmatmul.f32.gmra.mxu0 %v312_v57  ;;  %v313_v57 = vld [vmem:[#allocation2 + $0x128] sm:$0xff]  ;;  %v9597_v0 = vpop.f32.mrf.mxu1 }
 0x129   :  { %2348 = vmatmul.f32.gmra.mxu2 %v345_v16  ;;  %2575 = vmatmul.f32.gmra.mxu3 %v9600_v51  ;;  %v2104_v51 = vld [vmem:[#allocation7 + $0x2b8] sm:$0xff] }
 0x12a   :  { %2476 = vmatmul.f32.gmra.mxu1 %v9603_v44  ;;  %v672_v44 = vld [vmem:[#allocation2 + $0x18] sm:$0xff] }
 0x12c   :  { %v2301_v25 = vpop.f32.mrf.mxu2 }
 0x12d   :  { %v9593_v34 = vadd.f32 %v9522_v36, %v2301_v25  ;;  %v9595_v16 = vpop.f32.mrf.mxu0  ;;  %v2065_v36 = vld [vmem:[#allocation7 + $0x180] sm:$0xff]  ;;  %v9607_v55 = vpop.f32.mrf.mxu3 }
 0x12e   :  { %2803 = vmatpush.msrb.mxu3 %v2065_v36  ;;  %v2109_v25 = vld [vmem:[#allocation7 + $0x2e0] sm:$0xff] }
 0x12f   :  { %14174 = vst [vmem:[#allocation82_spill] sm:$0xff] %v9593_v34  ;;  %3209 = vmatpush.msrb.mxu1 %v2109_v25  ;;  %v676_v34 = vld [vmem:[#allocation2 + $0x48] sm:$0xff] }
 0x130   :  { %2252 = vmatmul.f32.gmra.mxu0 %v313_v57  ;;  %v347_v57 = vld [vmem:[#allocation2 + $0x2f0] sm:$0xff]  ;;  %v9614_v36 = vpop.f32.mrf.mxu1  ;;  %3624 = vmatpush.msra.mxu3 %v2144_v8  ;;  %v2160_v8 = vld [vmem:[#allocation7 + $0x478] sm:$0xff] }
 0x131   :  { %2351 = vmatmul.f32.gmra.mxu2 %v346_v23  ;;  %3210 = vmatpush.msrb.mxu1 %v2108_v42 }
 0x132   :  { %2804 = vmatmul.f32.vlgmr.msrb.gmra.mxu3 %v672_v44  ;;  %2479 = vmatmul.f32.gmra.mxu1 %v188_v24  ;;  %v673_v24 = vld [vmem:[#allocation2 + $0x20] sm:$0xff] }
 0x133   :  { %3211 = vmatpush.msrb.mxu1 %v2107_v52  ;;  %3833 = vmatpush.msra.mxu0 %v2160_v8 }
 0x134   :  { %v2304_v10 = vpop.f32.mrf.mxu2 }
 0x135   :  { %v9610_v23 = vadd.f32 %v9539_v60, %v2304_v10  ;;  %v9612_v4 = vpop.f32.mrf.mxu0  ;;  %3212 = vmatpush.msrb.mxu1 %v2106_v40  ;;  %v2105_v60 = vld [vmem:[#allocation7 + $0x2c0] sm:$0xff]  ;;  %v9618_v10 = vpop.f32.mrf.mxu3 }
 0x137   :  { %14177 = vst [vmem:[#allocation85_spill] sm:$0xff] %v9610_v23  ;;  %3213 = vmatpush.msrb.mxu1 %v2105_v60 }
 0x138   :  { %2255 = vmatmul.f32.gmra.mxu0 %v314_v35  ;;  %v315_v35 = vld [vmem:[#allocation2 + $0x140] sm:$0xff]  ;;  %v9625_v40 = vpop.f32.mrf.mxu1 }
 0x139   :  { %2354 = vmatmul.f32.gmra.mxu2 %v347_v57  ;;  %v348_v57 = vld [vmem:[#allocation2 + $0x300] sm:$0xff]  ;;  %3214 = vmatpush.msrb.mxu1 %v2104_v51 }
 0x13a   :  { %2807 = vmatmul.f32.gmra.mxu3 %v673_v24 }
 0x13b   :  { %3215 = vmatpush.msrb.mxu1 %v2103_v19  ;;  %v349_v19 = vld [vmem:[#allocation2 + $0x308] sm:$0xff] }
 0x13c   :  { %v2307_v25 = vpop.f32.mrf.mxu2 }
 0x13d   :  { %v9621_v42 = vadd.f32 %v9556_v26, %v2307_v25  ;;  %v9623_v52 = vpop.f32.mrf.mxu0  ;;  %3216 = vmatpush.msrb.mxu1 %v2102_v13  ;;  %v2101_v26 = vld [vmem:[#allocation7 + $0x2a0] sm:$0xff]  ;;  %v9627_v25 = vpop.f32.mrf.mxu3  ;;  %v2098_v13 = vld [vmem:[#allocation7 + $0x288] sm:$0xff] }
 0x13f   :  { %14178 = vst [vmem:[#allocation86_spill] sm:$0xff] %v9621_v42  ;;  %3217 = vmatpush.msrb.mxu1 %v2101_v26 }
 0x140   :  { %2258 = vmatmul.f32.gmra.mxu0 %v315_v35  ;;  %v316_v35 = vld [vmem:[#allocation2 + $0x150] sm:$0xff]  ;;  %v9634_v61 = vpop.f32.mrf.mxu1 }
 0x141   :  { %2357 = vmatmul.f32.gmra.mxu2 %v348_v57  ;;  %v2100_v57 = vld [vmem:[#allocation7 + $0x298] sm:$0xff] }
 0x142   :  { %3218 = vmatpush.msrb.mxu1 %v2100_v57  ;;  %v350_v57 = vld [vmem:[#allocation2 + $0x318] sm:$0xff] }
 0x144   :  { %v2310_v60 = vpop.f32.mrf.mxu2  ;;  %3219 = vmatpush.msrb.mxu1 %v2099_v30  ;;  %v9644_v30 = vld [vmem:[#allocation2 + $0x158] sm:$0xff] }
 0x145   :  { %v9630_v51 = vadd.f32 %v9573_v46, %v2310_v60  ;;  %v9632_v2 = vpop.f32.mrf.mxu0  ;;  %v2097_v46 = vld [vmem:[#allocation7 + $0x280] sm:$0xff]  ;;  %v2534_v26 = vpop.f32.mrf.mxu3 }
 0x146   :  { %3220 = vmatpush.msrb.mxu1 %v2098_v13  ;;  %v9636_v60 = vld [vmem:[#allocation2 + $0x1a] sm:$0xff]  ;;  %v674_v13 = vld [vmem:[#allocation2 + $0x30] sm:$0xff] }
 0x147   :  { %14179 = vst [vmem:[#allocation87_spill] sm:$0xff] %v9630_v51  ;;  %2810 = vmatmul.f32.gmra.mxu3 %v674_v13  ;;  %v930_v51 = vld [vmem:[#allocation2 + $0x32] sm:$0xff] }
 0x148   :  { %2261 = vmatmul.f32.gmra.mxu0 %v316_v35  ;;  %3221 = vmatpush.msrb.mxu1 %v2097_v46  ;;  %v9646_v35 = vpop.f32.mrf.mxu1  ;;  %v351_v46 = vld [vmem:[#allocation2 + $0x320] sm:$0xff] }
 0x149   :  { %2360 = vmatmul.f32.gmra.mxu2 %v349_v19  ;;  %3222 = vmatmul.f32.vlgmr.msrb.gmra.mxu1 %v9636_v60 }
 0x14c   :  { %v2313_v44 = vpop.f32.mrf.mxu2 }
 0x14d   :  { %v9639_v56 = vadd.f32 %v9590_v20, %v2313_v44  ;;  %v9642_v19 = vpop.f32.mrf.mxu0  ;;  %v2537_v8 = vpop.f32.mrf.mxu3 }
 0x14f   :  { %14180 = vst [vmem:[#allocation88_spill] sm:$0xff] %v9639_v56 }
 0x150   :  { %2264 = vmatmul.f32.gmra.mxu0 %v9644_v30  ;;  %v9656_v45 = vpop.f32.mrf.mxu1 }
 0x151   :  { %2363 = vmatmul.f32.gmra.mxu2 %v350_v57  ;;  %3225 = vmatmul.f32.gmra.mxu1 %v929_v53  ;;  %14182 = vst [vmem:[#allocation90_spill] sm:$0xff] %v9656_v45  ;;  %v675_v57 = vld [vmem:[#allocation2 + $0x38] sm:$0xff]  ;;  %v9793_v45 = vld [vmem:[#allocation2 + $0x10a] sm:$0xff] }
 0x152   :  { %2813 = vmatmul.f32.gmra.mxu3 %v675_v57  ;;  %v2143_v57 = vld [vmem:[#allocation7 + $0x3f0] sm:$0xff] }
 0x153   :  { %3625 = vmatpush.msra.mxu3 %v2143_v57 }
 0x154   :  { %v2316_v24 = vpop.f32.mrf.mxu2 }
 0x155   :  { %v9650_v20 = vadd.f32 %v9607_v55, %v2316_v24  ;;  %v9652_v44 = vpop.f32.mrf.mxu0  ;;  %v2540_v56 = vpop.f32.mrf.mxu3  ;;  %v544_v55 = vld [vmem:[#allocation2 + $0x2] sm:$0xff] }
 0x157   :  { %14181 = vst [vmem:[#allocation89_spill] sm:$0xff] %v9650_v20  ;;  %v9664_v20 = vld [vmem:[#allocation2 + $0x170] sm:$0xff] }
 0x158   :  { %2267 = vmatmul.f32.gmra.mxu0 %v9654_v49  ;;  %v9666_v23 = vpop.f32.mrf.mxu1 }
 0x159   :  { %2366 = vmatmul.f32.gmra.mxu2 %v351_v46  ;;  %3228 = vmatmul.f32.gmra.mxu1 %v930_v51  ;;  %14184 = vst [vmem:[#allocation92_spill] sm:$0xff] %v9666_v23  ;;  %v2127_v46 = vld [vmem:[#allocation7 + $0x370] sm:$0xff] }
 0x15a   :  { %3416 = vmatpush.msra.mxu2 %v2127_v46  ;;  %2816 = vmatmul.f32.gmra.mxu3 %v676_v34  ;;  %v2159_v46 = vld [vmem:[#allocation7 + $0x470] sm:$0xff] }
 0x15b   :  { %3834 = vmatpush.msra.mxu0 %v2159_v46 }
 0x15c   :  { %v2319_v13 = vpop.f32.mrf.mxu2 }
 0x15d   :  { %v9660_v42 = vadd.f32 %v9618_v10, %v2319_v13  ;;  %v9662_v24 = vpop.f32.mrf.mxu0  ;;  %v2543_v10 = vpop.f32.mrf.mxu3  ;;  %v931_v13 = vld [vmem:[#allocation2 + $0x3a] sm:$0xff] }
 0x15f   :  { %14183 = vst [vmem:[#allocation91_spill] sm:$0xff] %v9660_v42 }
 0x160   :  { %2270 = vmatmul.f32.gmra.mxu0 %v9664_v20 }
 0x161   :  { %2595 = vmatmul.f32.vlgmr.msrb.gmra.mxu2 %v544_v55  ;;  %3231 = vmatmul.f32.gmra.mxu1 %v931_v13  ;;  %v9674_v55 = vpop.f32.mrf.mxu1 }
 0x162   :  { %14186 = vst [vmem:[#allocation94_spill] sm:$0xff] %v9674_v55  ;;  %2819 = vmatmul.f32.gmra.mxu3 %v677_v54  ;;  %v933_v54 = vld [vmem:[#allocation2 + $0x52] sm:$0xff] }
 0x164   :  { %v2322_v33 = vpop.f32.mrf.mxu2 }
 0x165   :  { %v9670_v42 = vadd.f32 %v9627_v25, %v2322_v33  ;;  %v9672_v62 = vpop.f32.mrf.mxu0  ;;  %v2546_v57 = vpop.f32.mrf.mxu3  ;;  %v801_v25 = vld [vmem:[#allocation2 + $0x21] sm:$0xff] }
 0x167   :  { %14185 = vst [vmem:[#allocation93_spill] sm:$0xff] %v9670_v42 }
 0x168   :  { %3013 = vmatmul.f32.vlgmr.msrb.gmra.mxu0 %v800_v5 }
 0x169   :  { %2598 = vmatmul.f32.gmra.mxu2 %v545_v11  ;;  %3234 = vmatmul.f32.gmra.mxu1 %v932_v59  ;;  %v9680_v42 = vpop.f32.mrf.mxu1 }
 0x16a   :  { %14188 = vst [vmem:[#allocation96_spill] sm:$0xff] %v9680_v42  ;;  %2822 = vmatmul.f32.gmra.mxu3 %v678_v12  ;;  %v680_v42 = vld [vmem:[#allocation2 + $0x78] sm:$0xff] }
 0x16c   :  { %v2325_v34 = vpop.f32.mrf.mxu2 }
 0x16d   :  { %v9676_v14 = vadd.f32 %v2534_v26, %v2325_v34  ;;  %v9678_v33 = vpop.f32.mrf.mxu0  ;;  %v2549_v11 = vpop.f32.mrf.mxu3  ;;  %v802_v26 = vld [vmem:[#allocation2 + $0x31] sm:$0xff] }
 0x16f   :  { %14187 = vst [vmem:[#allocation95_spill] sm:$0xff] %v9676_v14  ;;  %v679_v14 = vld [vmem:[#allocation2 + $0x68] sm:$0xff] }
 0x170   :  { %3016 = vmatmul.f32.gmra.mxu0 %v801_v25 }
 0x171   :  { %2601 = vmatmul.f32.gmra.mxu2 %v9636_v60  ;;  %3237 = vmatmul.f32.gmra.mxu1 %v933_v54  ;;  %v9687_v34 = vpop.f32.mrf.mxu1 }
 0x172   :  { %14190 = vst [vmem:[#allocation98_spill] sm:$0xff] %v9687_v34  ;;  %2825 = vmatmul.f32.gmra.mxu3 %v679_v14  ;;  %v935_v34 = vld [vmem:[#allocation2 + $0x6a] sm:$0xff] }
 0x174   :  { %v2328_v5 = vpop.f32.mrf.mxu2 }
 0x175   :  { %v9683_v46 = vadd.f32 %v2537_v8, %v2328_v5  ;;  %v9685_v15 = vpop.f32.mrf.mxu0  ;;  %v2552_v60 = vpop.f32.mrf.mxu3  ;;  %v803_v8 = vld [vmem:[#allocation2 + $0x39] sm:$0xff] }
 0x177   :  { %14189 = vst [vmem:[#allocation97_spill] sm:$0xff] %v9683_v46  ;;  %v2126_v46 = vld [vmem:[#allocation7 + $0x368] sm:$0xff] }
 0x178   :  { %3019 = vmatmul.f32.gmra.mxu0 %v802_v26  ;;  %3417 = vmatpush.msra.mxu2 %v2126_v46 }
 0x179   :  { %2604 = vmatmul.f32.gmra.mxu2 %v929_v53  ;;  %3240 = vmatmul.f32.gmra.mxu1 %v934_v41  ;;  %v9693_v5 = vpop.f32.mrf.mxu1  ;;  %v2142_v53 = vld [vmem:[#allocation7 + $0x3e8] sm:$0xff] }
 0x17a   :  { %14193 = vst [vmem:[#allocation101_spill] sm:$0xff] %v9693_v5  ;;  %2828 = vmatmul.f32.gmra.mxu3 %v680_v42  ;;  %v2158_v5 = vld [vmem:[#allocation7 + $0x468] sm:$0xff] }
 0x17b   :  { %3626 = vmatpush.msra.mxu3 %v2142_v53  ;;  %3835 = vmatpush.msra.mxu0 %v2158_v5 }
 0x17c   :  { %v2331_v63 = vpop.f32.mrf.mxu2 }
 0x17d   :  { %v9689_v25 = vadd.f32 %v2540_v56, %v2331_v63  ;;  %v9691_v12 = vpop.f32.mrf.mxu0  ;;  %v2555_v14 = vpop.f32.mrf.mxu3  ;;  %v804_v63 = vld [vmem:[#allocation2 + $0x49] sm:$0xff] }
 0x17e   :  { %14192 = vst [vmem:[#allocation100_spill] sm:$0xff] %v9691_v12 }
 0x17f   :  { %14191 = vst [vmem:[#allocation99_spill] sm:$0xff] %v9689_v25 }
 0x180   :  { %3022 = vmatmul.f32.gmra.mxu0 %v803_v8  ;;  %v936_v8 = vld [vmem:[#allocation2 + $0x7a] sm:$0xff] }
 0x181   :  { %2607 = vmatmul.f32.gmra.mxu2 %v930_v51  ;;  %3243 = vmatmul.f32.gmra.mxu1 %v935_v34  ;;  %v9699_v25 = vpop.f32.mrf.mxu1  ;;  %v681_v51 = vld [vmem:[#allocation2 + $0x80] sm:$0xff] }
 0x182   :  { %14196 = vst [vmem:[#allocation104_spill] sm:$0xff] %v9699_v25  ;;  %2831 = vmatmul.f32.gmra.mxu3 %v681_v51  ;;  %v937_v25 = vld [vmem:[#allocation2 + $0x82] sm:$0xff] }
 0x184   :  { %v2334_v26 = vpop.f32.mrf.mxu2 }
 0x185   :  { %v9695_v55 = vadd.f32 %v2543_v10, %v2334_v26  ;;  %v9697_v56 = vpop.f32.mrf.mxu0  ;;  %v2558_v42 = vpop.f32.mrf.mxu3  ;;  %v805_v26 = vld [vmem:[#allocation2 + $0x51] sm:$0xff] }
 0x186   :  { %14195 = vst [vmem:[#allocation103_spill] sm:$0xff] %v9697_v56  ;;  %v682_v56 = vld [vmem:[#allocation2 + $0x90] sm:$0xff] }
 0x187   :  { %14194 = vst [vmem:[#allocation102_spill] sm:$0xff] %v9695_v55 }
 0x188   :  { %3025 = vmatmul.f32.gmra.mxu0 %v804_v63 }
 0x189   :  { %2610 = vmatmul.f32.gmra.mxu2 %v931_v13  ;;  %3246 = vmatmul.f32.gmra.mxu1 %v936_v8  ;;  %v9705_v55 = vpop.f32.mrf.mxu1 }
 0x18a   :  { %14199 = vst [vmem:[#allocation107_spill] sm:$0xff] %v9705_v55  ;;  %2834 = vmatmul.f32.gmra.mxu3 %v682_v56 }
 0x18c   :  { %v2337_v46 = vpop.f32.mrf.mxu2 }
 0x18d   :  { %v9701_v53 = vadd.f32 %v2546_v57, %v2337_v46  ;;  %v9703_v10 = vpop.f32.mrf.mxu0  ;;  %v2561_v63 = vpop.f32.mrf.mxu3  ;;  %v806_v57 = vld [vmem:[#allocation2 + $0x61] sm:$0xff] }
 0x18e   :  { %14198 = vst [vmem:[#allocation106_spill] sm:$0xff] %v9703_v10  ;;  %v938_v10 = vld [vmem:[#allocation2 + $0x92] sm:$0xff] }
 0x18f   :  { %14197 = vst [vmem:[#allocation105_spill] sm:$0xff] %v9701_v53  ;;  %v683_v53 = vld [vmem:[#allocation2 + $0x98] sm:$0xff] }
 0x190   :  { %3028 = vmatmul.f32.gmra.mxu0 %v805_v26 }
 0x191   :  { %2613 = vmatmul.f32.gmra.mxu2 %v932_v59  ;;  %3249 = vmatmul.f32.gmra.mxu1 %v937_v25  ;;  %v9711_v46 = vpop.f32.mrf.mxu1 }
 0x192   :  { %14202 = vst [vmem:[#allocation110_spill] sm:$0xff] %v9711_v46  ;;  %2837 = vmatmul.f32.gmra.mxu3 %v683_v53  ;;  %v939_v46 = vld [vmem:[#allocation2 + $0x9a] sm:$0xff] }
 0x194   :  { %v2340_v13 = vpop.f32.mrf.mxu2 }
 0x195   :  { %v9707_v51 = vadd.f32 %v2549_v11, %v2340_v13  ;;  %v9709_v5 = vpop.f32.mrf.mxu0  ;;  %v2564_v59 = vpop.f32.mrf.mxu3  ;;  %v807_v11 = vld [vmem:[#allocation2 + $0x69] sm:$0xff] }
 0x196   :  { %14201 = vst [vmem:[#allocation109_spill] sm:$0xff] %v9709_v5  ;;  %v684_v5 = vld [vmem:[#allocation2 + $0xa8] sm:$0xff] }
 0x197   :  { %14200 = vst [vmem:[#allocation108_spill] sm:$0xff] %v9707_v51  ;;  %v2125_v51 = vld [vmem:[#allocation7 + $0x360] sm:$0xff] }
 0x198   :  { %3031 = vmatmul.f32.gmra.mxu0 %v806_v57  ;;  %3418 = vmatpush.msra.mxu2 %v2125_v51 }
 0x199   :  { %2616 = vmatmul.f32.gmra.mxu2 %v933_v54  ;;  %3252 = vmatmul.f32.gmra.mxu1 %v938_v10  ;;  %v9717_v13 = vpop.f32.mrf.mxu1  ;;  %v2141_v54 = vld [vmem:[#allocation7 + $0x3e0] sm:$0xff] }
 0x19a   :  { %14205 = vst [vmem:[#allocation113_spill] sm:$0xff] %v9717_v13  ;;  %2840 = vmatmul.f32.gmra.mxu3 %v684_v5  ;;  %v2157_v13 = vld [vmem:[#allocation7 + $0x460] sm:$0xff] }
 0x19b   :  { %3627 = vmatpush.msra.mxu3 %v2141_v54  ;;  %3836 = vmatpush.msra.mxu0 %v2157_v13 }
 0x19c   :  { %v2343_v55 = vpop.f32.mrf.mxu2 }
 0x19d   :  { %v9713_v26 = vadd.f32 %v2552_v60, %v2343_v55  ;;  %v9715_v56 = vpop.f32.mrf.mxu0  ;;  %v2567_v53 = vpop.f32.mrf.mxu3  ;;  %v808_v60 = vld [vmem:[#allocation2 + $0x79] sm:$0xff] }
 0x19e   :  { %14204 = vst [vmem:[#allocation112_spill] sm:$0xff] %v9715_v56 }
 0x19f   :  { %14203 = vst [vmem:[#allocation111_spill] sm:$0xff] %v9713_v26 }
 0x1a0   :  { %3034 = vmatmul.f32.gmra.mxu0 %v807_v11  ;;  %v940_v11 = vld [vmem:[#allocation2 + $0xaa] sm:$0xff] }
 0x1a1   :  { %2619 = vmatmul.f32.gmra.mxu2 %v934_v41  ;;  %3255 = vmatmul.f32.gmra.mxu1 %v939_v46  ;;  %v9723_v26 = vpop.f32.mrf.mxu1  ;;  %v685_v41 = vld [vmem:[#allocation2 + $0xb0] sm:$0xff] }
 0x1a2   :  { %14208 = vst [vmem:[#allocation116_spill] sm:$0xff] %v9723_v26  ;;  %2843 = vmatmul.f32.gmra.mxu3 %v685_v41  ;;  %v941_v26 = vld [vmem:[#allocation2 + $0xb2] sm:$0xff] }
 0x1a4   :  { %v2346_v57 = vpop.f32.mrf.mxu2 }
 0x1a5   :  { %v9719_v23 = vadd.f32 %v2555_v14, %v2346_v57  ;;  %v9721_v55 = vpop.f32.mrf.mxu0  ;;  %v2570_v5 = vpop.f32.mrf.mxu3  ;;  %v809_v57 = vld [vmem:[#allocation2 + $0x81] sm:$0xff] }
 0x1a6   :  { %14207 = vst [vmem:[#allocation115_spill] sm:$0xff] %v9721_v55  ;;  %v686_v55 = vld [vmem:[#allocation2 + $0xc0] sm:$0xff] }
 0x1a7   :  { %14206 = vst [vmem:[#allocation114_spill] sm:$0xff] %v9719_v23 }
 0x1a8   :  { %3037 = vmatmul.f32.gmra.mxu0 %v808_v60 }
 0x1a9   :  { %2622 = vmatmul.f32.gmra.mxu2 %v935_v34  ;;  %3258 = vmatmul.f32.gmra.mxu1 %v940_v11  ;;  %v9729_v23 = vpop.f32.mrf.mxu1 }
 0x1aa   :  { %14211 = vst [vmem:[#allocation119_spill] sm:$0xff] %v9729_v23  ;;  %2846 = vmatmul.f32.gmra.mxu3 %v686_v55  ;;  %v942_v23 = vld [vmem:[#allocation2 + $0xc2] sm:$0xff] }
 0x1ac   :  { %v2349_v51 = vpop.f32.mrf.mxu2 }
 0x1ad   :  { %v9725_v54 = vadd.f32 %v2558_v42, %v2349_v51  ;;  %v9727_v14 = vpop.f32.mrf.mxu0  ;;  %v2573_v60 = vpop.f32.mrf.mxu3  ;;  %v810_v42 = vld [vmem:[#allocation2 + $0x91] sm:$0xff] }
 0x1ae   :  { %14210 = vst [vmem:[#allocation118_spill] sm:$0xff] %v9727_v14 }
 0x1af   :  { %14209 = vst [vmem:[#allocation117_spill] sm:$0xff] %v9725_v54  ;;  %v687_v54 = vld [vmem:[#allocation2 + $0xc8] sm:$0xff] }
 0x1b0   :  { %3040 = vmatmul.f32.gmra.mxu0 %v809_v57 }
 0x1b1   :  { %2625 = vmatmul.f32.gmra.mxu2 %v936_v8  ;;  %3261 = vmatmul.f32.gmra.mxu1 %v941_v26  ;;  %v9735_v51 = vpop.f32.mrf.mxu1 }
 0x1b2   :  { %14214 = vst [vmem:[#allocation122_spill] sm:$0xff] %v9735_v51  ;;  %2849 = vmatmul.f32.gmra.mxu3 %v687_v54  ;;  %v9743_v54 = vld [vmem:[#allocation2 + $0xca] sm:$0xff]  ;;  %v2156_v51 = vld [vmem:[#allocation7 + $0x458] sm:$0xff] }
 0x1b3   :  { %3837 = vmatpush.msra.mxu0 %v2156_v51  ;;  %v814_v51 = vld [vmem:[#allocation2 + $0xc1] sm:$0xff] }
 0x1b4   :  { %v2352_v34 = vpop.f32.mrf.mxu2 }
 0x1b5   :  { %v9731_v41 = vadd.f32 %v2561_v63, %v2352_v34  ;;  %v9733_v13 = vpop.f32.mrf.mxu0  ;;  %v2576_v55 = vpop.f32.mrf.mxu3  ;;  %v811_v63 = vld [vmem:[#allocation2 + $0x99] sm:$0xff] }
 0x1b6   :  { %14213 = vst [vmem:[#allocation121_spill] sm:$0xff] %v9733_v13  ;;  %v2124_v34 = vld [vmem:[#allocation7 + $0x358] sm:$0xff] }
 0x1b7   :  { %14212 = vst [vmem:[#allocation120_spill] sm:$0xff] %v9731_v41  ;;  %v688_v41 = vld [vmem:[#allocation2 + $0xd8] sm:$0xff]  ;;  %3419 = vmatpush.msra.mxu2 %v2124_v34 }
 0x1b8   :  { %3043 = vmatmul.f32.gmra.mxu0 %v810_v42 }
 0x1b9   :  { %2628 = vmatmul.f32.gmra.mxu2 %v937_v25  ;;  %3264 = vmatmul.f32.gmra.mxu1 %v942_v23  ;;  %v2140_v25 = vld [vmem:[#allocation7 + $0x3d8] sm:$0xff]  ;;  %v9741_v13 = vpop.f32.mrf.mxu1 }
 0x1ba   :  { %14217 = vst [vmem:[#allocation125_spill] sm:$0xff] %v9741_v13  ;;  %2852 = vmatmul.f32.gmra.mxu3 %v688_v41  ;;  %v9750_v41 = vld [vmem:[#allocation2 + $0xda] sm:$0xff] }
 0x1bb   :  { %3628 = vmatpush.msra.mxu3 %v2140_v25 }
 0x1bc   :  { %v2355_v8 = vpop.f32.mrf.mxu2 }
 0x1bd   :  { %v9737_v14 = vadd.f32 %v2564_v59, %v2355_v8  ;;  %v9739_v57 = vpop.f32.mrf.mxu0  ;;  %v2805_v8 = vpop.f32.mrf.mxu3 }
 0x1be   :  { %14216 = vst [vmem:[#allocation124_spill] sm:$0xff] %v9739_v57 }
 0x1bf   :  { %14215 = vst [vmem:[#allocation123_spill] sm:$0xff] %v9737_v14 }
 0x1c0   :  { %3046 = vmatmul.f32.gmra.mxu0 %v811_v63  ;;  %v689_v63 = vld [vmem:[#allocation2 + $0xe0] sm:$0xff] }
 0x1c1   :  { %2631 = vmatmul.f32.gmra.mxu2 %v938_v10  ;;  %3267 = vmatmul.f32.gmra.mxu1 %v9743_v54  ;;  %v812_v10 = vld [vmem:[#allocation2 + $0xa9] sm:$0xff] }
 0x1c2   :  { %2855 = vmatmul.f32.gmra.mxu3 %v689_v63  ;;  %v9757_v63 = vld [vmem:[#allocation2 + $0xe2] sm:$0xff] }
 0x1c4   :  { %v2358_v42 = vpop.f32.mrf.mxu2 }
 0x1c5   :  { %v9745_v59 = vadd.f32 %v2567_v53, %v2358_v42  ;;  %v9748_v14 = vpop.f32.mrf.mxu0  ;;  %v2808_v53 = vpop.f32.mrf.mxu3 }
 0x1c6   :  { %14219 = vst [vmem:[#allocation127_spill] sm:$0xff] %v9748_v14  ;;  %v3223_v34 = vpop.f32.mrf.mxu1 }
 0x1c7   :  { %14218 = vst [vmem:[#allocation126_spill] sm:$0xff] %v9745_v59  ;;  %v813_v59 = vld [vmem:[#allocation2 + $0xb1] sm:$0xff] }
 0x1c8   :  { %3049 = vmatmul.f32.gmra.mxu0 %v812_v10 }
 0x1c9   :  { %2634 = vmatmul.f32.gmra.mxu2 %v939_v46  ;;  %3270 = vmatmul.f32.gmra.mxu1 %v9750_v41  ;;  %v690_v46 = vld [vmem:[#allocation2 + $0xf0] sm:$0xff] }
 0x1ca   :  { %2858 = vmatmul.f32.gmra.mxu3 %v690_v46  ;;  %v9768_v46 = vld [vmem:[#allocation2 + $0xf2] sm:$0xff] }
 0x1cc   :  { %v2361_v13 = vpop.f32.mrf.mxu2 }
 0x1cd   :  { %v9752_v25 = vadd.f32 %v2570_v5, %v2361_v13  ;;  %v9755_v42 = vpop.f32.mrf.mxu0  ;;  %v9762_v5 = vpop.f32.mrf.mxu3 }
 0x1ce   :  { %14221 = vst [vmem:[#allocation129_spill] sm:$0xff] %v9755_v42  ;;  %v3226_v10 = vpop.f32.mrf.mxu1 }
 0x1cf   :  { %14220 = vst [vmem:[#allocation128_spill] sm:$0xff] %v9752_v25  ;;  %v691_v25 = vld [vmem:[#allocation2 + $0xf8] sm:$0xff] }
 0x1d0   :  { %3052 = vmatmul.f32.gmra.mxu0 %v813_v59 }
 0x1d1   :  { %2637 = vmatmul.f32.gmra.mxu2 %v940_v11  ;;  %3273 = vmatmul.f32.gmra.mxu1 %v9757_v63 }
 0x1d2   :  { %2861 = vmatmul.f32.gmra.mxu3 %v691_v25  ;;  %v2388_v25 = vadd.f32 %v9393_v6, %v9443_v3  ;;  %v693_v6 = vld [vmem:[#allocation2 + $0x110] sm:$0xff]  ;;  %v2391_v3 = vadd.f32 %v9405_v17, %v9459_v32  ;;  %v694_v17 = vld [vmem:[#allocation2 + $0x120] sm:$0xff]  ;;  %v2394_v32 = vadd.f32 %v9417_v29, %v9476_v31  ;;  %v695_v29 = vld [vmem:[#allocation2 + $0x128] sm:$0xff]  ;;  %v2397_v31 = vadd.f32 %v9431_v43, %v9493_v48 }
 0x1d3   :  { %v2122_v48 = vld [vmem:[#allocation7 + $0x348] sm:$0xff]  ;;  %v696_v43 = vld [vmem:[#allocation2 + $0x138] sm:$0xff] }
 0x1d4   :  { %v2364_v14 = vpop.f32.mrf.mxu2 }
 0x1d5   :  { %v9759_v57 = vadd.f32 %v2573_v60, %v2364_v14  ;;  %v9764_v13 = vpop.f32.mrf.mxu0  ;;  %v9773_v14 = vpop.f32.mrf.mxu3 }
 0x1d6   :  { %14223 = vst [vmem:[#allocation131_spill] sm:$0xff] %v9764_v13  ;;  %v9766_v11 = vpop.f32.mrf.mxu1  ;;  %v2123_v13 = vld [vmem:[#allocation7 + $0x350] sm:$0xff] }
 0x1d7   :  { %14222 = vst [vmem:[#allocation130_spill] sm:$0xff] %v9759_v57  ;;  %v815_v57 = vld [vmem:[#allocation2 + $0xc9] sm:$0xff]  ;;  %3420 = vmatpush.msra.mxu2 %v2123_v13  ;;  %v816_v13 = vld [vmem:[#allocation2 + $0xd9] sm:$0xff] }
 0x1d8   :  { %3055 = vmatmul.f32.gmra.mxu0 %v814_v51 }
 0x1d9   :  { %2640 = vmatmul.f32.gmra.mxu2 %v941_v26  ;;  %3276 = vmatmul.f32.gmra.mxu1 %v9768_v46  ;;  %v692_v26 = vld [vmem:[#allocation2 + $0x108] sm:$0xff] }
 0x1da   :  { %2864 = vmatmul.f32.gmra.mxu3 %v692_v26  ;;  %3421 = vmatpush.msra.mxu2 %v2122_v48 }
 0x1dc   :  { %v2367_v59 = vpop.f32.mrf.mxu2 }
 0x1dd   :  { %v9770_v42 = vadd.f32 %v2576_v55, %v2367_v59  ;;  %v9775_v60 = vpop.f32.mrf.mxu0  ;;  %v2139_v55 = vld [vmem:[#allocation7 + $0x3d0] sm:$0xff] }
 0x1de   :  { %14225 = vst [vmem:[#allocation133_spill] sm:$0xff] %v9775_v60  ;;  %v9779_v51 = vpop.f32.mrf.mxu1  ;;  %3629 = vmatpush.msra.mxu3 %v2139_v55  ;;  %v9784_v60 = vpop.f32.mrf.mxu3 }
 0x1df   :  { %14224 = vst [vmem:[#allocation132_spill] sm:$0xff] %v9770_v42  ;;  %v9781_v42 = vld [vmem:[#allocation2 + $0xfa] sm:$0xff] }
 0x1e0   :  { %3058 = vmatmul.f32.gmra.mxu0 %v815_v57 }
 0x1e1   :  { %2643 = vmatmul.f32.gmra.mxu2 %v942_v23  ;;  %3279 = vmatmul.f32.gmra.mxu1 %v9781_v42 }
 0x1e2   :  { %2867 = vmatmul.f32.gmra.mxu3 %v693_v6 }
 0x1e4   :  { %v2596_v59 = vpop.f32.mrf.mxu2 }
 0x1e5   :  { %v2597_v56 = vadd.f32 %v2596_v59, %v2388_v25  ;;  %v3014_v57 = vpop.f32.mrf.mxu0  ;;  %v2155_v25 = vld [vmem:[#allocation7 + $0x450] sm:$0xff] }
 0x1e6   :  { %v9791_v55 = vpop.f32.mrf.mxu1  ;;  %3838 = vmatpush.msra.mxu0 %v2155_v25 }
 0x1e7   :  { %v2806_v23 = vadd.f32 %v2805_v8, %v2597_v56  ;;  %v9796_v8 = vpop.f32.mrf.mxu3 }
 0x1e8   :  { %3061 = vmatmul.f32.gmra.mxu0 %v816_v13 }
 0x1e9   :  { %v3015_v12 = vadd.f32 %v3014_v57, %v2806_v23  ;;  %2646 = vmatmul.f32.gmra.mxu2 %v9743_v54  ;;  %3282 = vmatmul.f32.gmra.mxu1 %v9793_v45  ;;  %v817_v57 = vld [vmem:[#allocation2 + $0xe1] sm:$0xff] }
 0x1ea   :  { %2870 = vmatmul.f32.gmra.mxu3 %v694_v17 }
 0x1eb   :  { %v9789_v26 = vadd.f32 %v3223_v34, %v3015_v12 }
 0x1ec   :  { %v2599_v59 = vpop.f32.mrf.mxu2 }
 0x1ed   :  { %v2600_v56 = vadd.f32 %v2599_v59, %v2391_v3  ;;  %v3017_v23 = vpop.f32.mrf.mxu0  ;;  %v9805_v3 = vld [vmem:[#allocation2 + $0x112] sm:$0xff] }
 0x1ee   :  { %v9803_v34 = vpop.f32.mrf.mxu1 }
 0x1ef   :  { %v2809_v54 = vadd.f32 %v2808_v53, %v2600_v56  ;;  %v9808_v53 = vpop.f32.mrf.mxu3  ;;  %v818_v56 = vld [vmem:[#allocation2 + $0xf1] sm:$0xff] }
 0x1f0   :  { %3064 = vmatmul.f32.gmra.mxu0 %v817_v57 }
 0x1f1   :  { %v3018_v13 = vadd.f32 %v3017_v23, %v2809_v54  ;;  %2649 = vmatmul.f32.gmra.mxu2 %v9750_v41  ;;  %3285 = vmatmul.f32.gmra.mxu1 %v9805_v3 }
 0x1f2   :  { %2873 = vmatmul.f32.gmra.mxu3 %v695_v29 }
 0x1f3   :  { %v9801_v12 = vadd.f32 %v3226_v10, %v3018_v13  ;;  %v9819_v13 = vld [vmem:[#allocation2 + $0x122] sm:$0xff] }
 0x1f4   :  { %v2602_v6 = vpop.f32.mrf.mxu2 }
 0x1f5   :  { %v2603_v25 = vadd.f32 %v2602_v6, %v2394_v32  ;;  %v3020_v59 = vpop.f32.mrf.mxu0  ;;  %v819_v6 = vld [vmem:[#allocation2 + $0xf9] sm:$0xff] }
 0x1f6   :  { %v9817_v23 = vpop.f32.mrf.mxu1 }
 0x1f7   :  { %v2812_v41 = vadd.f32 %v9762_v5, %v2603_v25  ;;  %v9822_v17 = vpop.f32.mrf.mxu3 }
 0x1f8   :  { %3067 = vmatmul.f32.gmra.mxu0 %v818_v56  ;;  %v2138_v56 = vld [vmem:[#allocation7 + $0x3c8] sm:$0xff] }
 0x1f9   :  { %v3021_v54 = vadd.f32 %v3020_v59, %v2812_v41  ;;  %2652 = vmatmul.f32.gmra.mxu2 %v9757_v63  ;;  %3288 = vmatmul.f32.gmra.mxu1 %v9819_v13 }
 0x1fa   :  { %2876 = vmatmul.f32.gmra.mxu3 %v696_v43 }
 0x1fb   :  { %v9815_v10 = vadd.f32 %v9766_v11, %v3021_v54  ;;  %v2400_v11 = vadd.f32 %v9445_v9, %v9510_v22  ;;  %3630 = vmatpush.msra.mxu3 %v2138_v56  ;;  %v9833_v54 = vld [vmem:[#allocation2 + $0x12a] sm:$0xff]  ;;  %v2406_v56 = vadd.f32 %v9478_v37, %v9544_v47  ;;  %v2409_v47 = vadd.f32 %v9495_v38, %v9561_v27  ;;  %v2121_v38 = vld [vmem:[#allocation7 + $0x340] sm:$0xff] }
 0x1fc   :  { %v2605_v57 = vpop.f32.mrf.mxu2  ;;  %v820_v22 = vld [vmem:[#allocation2 + $0x109] sm:$0xff]  ;;  %3422 = vmatpush.msra.mxu2 %v2121_v38 }
 0x1fd   :  { %v2606_v5 = vadd.f32 %v2605_v57, %v2397_v31  ;;  %v3023_v32 = vpop.f32.mrf.mxu0 }
 0x1fe   :  { %v9831_v59 = vpop.f32.mrf.mxu1 }
 0x1ff   :  { %v2815_v63 = vadd.f32 %v9773_v14, %v2606_v5  ;;  %v2403_v5 = vadd.f32 %v9461_v39, %v9527_v1  ;;  %v821_v1 = vld [vmem:[#allocation2 + $0x111] sm:$0xff] }
 0x200   :  { %3070 = vmatmul.f32.gmra.mxu0 %v819_v6  ;;  %v2154_v6 = vld [vmem:[#allocation7 + $0x448] sm:$0xff] }
 0x201   :  { %v3024_v25 = vadd.f32 %v3023_v32, %v2815_v63  ;;  %2655 = vmatmul.f32.gmra.mxu2 %v9768_v46  ;;  %3291 = vmatmul.f32.gmra.mxu1 %v9833_v54  ;;  %v9836_v46 = vpop.f32.mrf.mxu3 }
 0x202   :  { %3839 = vmatpush.msra.mxu0 %v2154_v6 }
 0x203   :  { %v9829_v41 = vadd.f32 %v9779_v51, %v3024_v25  ;;  %v697_v51 = vld [vmem:[#allocation2 + $0x140] sm:$0xff] }
 0x204   :  { %v2608_v14 = vpop.f32.mrf.mxu2  ;;  %2879 = vmatmul.f32.gmra.mxu3 %v697_v51  ;;  %v822_v51 = vld [vmem:[#allocation2 + $0x121] sm:$0xff] }
 0x205   :  { %v2609_v29 = vadd.f32 %v2608_v14, %v2400_v11  ;;  %v3026_v57 = vpop.f32.mrf.mxu0 }
 0x206   :  { %v9845_v32 = vpop.f32.mrf.mxu1 }
 0x207   :  { %v2818_v31 = vadd.f32 %v9784_v60, %v2609_v29  ;;  %v9847_v60 = vld [vmem:[#allocation2 + $0x13a] sm:$0xff] }
 0x208   :  { %3073 = vmatmul.f32.gmra.mxu0 %v820_v22 }
 0x209   :  { %v3027_v9 = vadd.f32 %v3026_v57, %v2818_v31  ;;  %2658 = vmatmul.f32.gmra.mxu2 %v9781_v42  ;;  %3294 = vmatmul.f32.gmra.mxu1 %v9847_v60  ;;  %v9850_v42 = vpop.f32.mrf.mxu3  ;;  %v9861_v57 = vld [vmem:[#allocation2 + $0x142] sm:$0xff] }
 0x20b   :  { %v9843_v63 = vadd.f32 %v9791_v55, %v3027_v9  ;;  %v698_v55 = vld [vmem:[#allocation2 + $0x150] sm:$0xff] }
 0x20c   :  { %v2611_v25 = vpop.f32.mrf.mxu2  ;;  %2882 = vmatmul.f32.gmra.mxu3 %v698_v55  ;;  %v9891_v55 = vld [vmem:[#allocation2 + $0x15a] sm:$0xff] }
 0x20d   :  { %v2612_v48 = vadd.f32 %v2611_v25, %v2403_v5  ;;  %v3029_v11 = vpop.f32.mrf.mxu0  ;;  %v9876_v25 = vld [vmem:[#allocation2 + $0x152] sm:$0xff] }
 0x20e   :  { %v9859_v29 = vpop.f32.mrf.mxu1 }
 0x20f   :  { %v2821_v43 = vadd.f32 %v9796_v8, %v2612_v48 }
 0x210   :  { %3076 = vmatmul.f32.gmra.mxu0 %v821_v1 }
 0x211   :  { %v3030_v39 = vadd.f32 %v3029_v11, %v2821_v43  ;;  %2661 = vmatmul.f32.gmra.mxu2 %v9793_v45  ;;  %3297 = vmatmul.f32.gmra.mxu1 %v9861_v57  ;;  %v9864_v22 = vpop.f32.mrf.mxu3  ;;  %v823_v11 = vld [vmem:[#allocation2 + $0x129] sm:$0xff] }
 0x213   :  { %v9857_v14 = vadd.f32 %v9803_v34, %v3030_v39  ;;  %v2137_v39 = vld [vmem:[#allocation7 + $0x3c0] sm:$0xff] }
 0x214   :  { %v2614_v31 = vpop.f32.mrf.mxu2  ;;  %2885 = vmatmul.f32.gmra.mxu3 %v9644_v30  ;;  %v2412_v30 = vadd.f32 %v9512_v28, %v9578_v21  ;;  %v824_v28 = vld [vmem:[#allocation2 + $0x139] sm:$0xff] }
 0x215   :  { %v2615_v8 = vadd.f32 %v2614_v31, %v2406_v56  ;;  %v3032_v9 = vpop.f32.mrf.mxu0  ;;  %3631 = vmatpush.msra.mxu3 %v2137_v39 }
 0x216   :  { %v9873_v34 = vpop.f32.mrf.mxu1 }
 0x217   :  { %v2824_v45 = vadd.f32 %v9808_v53, %v2615_v8  ;;  %v9898_v8 = vld [vmem:[#allocation4 + $0xf0] sm:$0xff] }
 0x218   :  { %3079 = vmatmul.f32.gmra.mxu0 %v822_v51  ;;  %14226 = vst [vmem:[#allocation134_spill] sm:$0xff] %v9898_v8  ;;  %v2153_v51 = vld [vmem:[#allocation7 + $0x440] sm:$0xff] }
 0x219   :  { %v3033_v5 = vadd.f32 %v3032_v9, %v2824_v45  ;;  %2664 = vmatmul.f32.gmra.mxu2 %v9805_v3  ;;  %3300 = vmatmul.f32.gmra.mxu1 %v9876_v25  ;;  %v9879_v48 = vpop.f32.mrf.mxu3  ;;  %254 = vst [vmem:[#allocation2 + $0x181] sm:$0xff] %v9898_v8 }
 0x21a   :  { %3840 = vmatpush.msra.mxu0 %v2153_v51  ;;  %v827_v51 = vld [vmem:[#allocation2 + $0x159] sm:$0xff] }
 0x21b   :  { %v9871_v37 = vadd.f32 %v9817_v23, %v3033_v5  ;;  %v9909_v5 = vld [vmem:[#allocation2 + $0x16a] sm:$0xff] }
 0x21c   :  { %v2617_v6 = vpop.f32.mrf.mxu2  ;;  %2888 = vmatmul.f32.gmra.mxu3 %v9654_v49  ;;  %v2415_v49 = vadd.f32 %v9529_v58, %v9595_v16 }
 0x21d   :  { %v2618_v53 = vadd.f32 %v2617_v6, %v2409_v47  ;;  %v3035_v43 = vpop.f32.mrf.mxu0 }
 0x21e   :  { %v9888_v1 = vpop.f32.mrf.mxu1 }
 0x21f   :  { %v2827_v3 = vadd.f32 %v9822_v17, %v2618_v53  ;;  %v9916_v53 = vld [vmem:[#allocation4 + $0xf8] sm:$0xff] }
 0x220   :  { %3082 = vmatmul.f32.gmra.mxu0 %v823_v11  ;;  %14227 = vst [vmem:[#allocation135_spill] sm:$0xff] %v9916_v53 }
 0x221   :  { %v3036_v27 = vadd.f32 %v3035_v43, %v2827_v3  ;;  %2667 = vmatmul.f32.gmra.mxu2 %v9819_v13  ;;  %3303 = vmatmul.f32.gmra.mxu1 %v9891_v55  ;;  %v9894_v13 = vpop.f32.mrf.mxu3  ;;  %v2418_v3 = vadd.f32 %v9546_v50, %v9612_v4  ;;  %255 = vst [vmem:[#allocation2 + $0x189] sm:$0xff] %v9916_v53  ;;  %v826_v50 = vld [vmem:[#allocation2 + $0x151] sm:$0xff] }
 0x223   :  { %v9886_v23 = vadd.f32 %v9831_v59, %v3036_v27  ;;  %v9926_v27 = vld [vmem:[#allocation2 + $0x172] sm:$0xff] }
 0x224   :  { %v2620_v17 = vpop.f32.mrf.mxu2  ;;  %2891 = vmatmul.f32.gmra.mxu3 %v9664_v20  ;;  %v702_v20 = vld [vmem:[#allocation2 + $0x180] sm:$0xff] }
 0x225   :  { %v2621_v56 = vadd.f32 %v2620_v17, %v2412_v30  ;;  %v3038_v21 = vpop.f32.mrf.mxu0  ;;  %v2421_v17 = vadd.f32 %v9563_v7, %v9623_v52  ;;  %v2120_v7 = vld [vmem:[#allocation7 + $0x338] sm:$0xff]  ;;  %v704_v52 = vld [vmem:[#allocation2 + $0x1c8] sm:$0xff] }
 0x226   :  { %v9905_v9 = vpop.f32.mrf.mxu1  ;;  %3423 = vmatpush.msra.mxu2 %v2120_v7 }
 0x227   :  { %v2830_v31 = vadd.f32 %v9836_v46, %v2621_v56 }
 0x228   :  { %3085 = vmatmul.f32.gmra.mxu0 %v824_v28  ;;  %v958_v28 = vld [vmem:[#allocation2 + $0x182] sm:$0xff] }
 0x229   :  { %v3039_v59 = vadd.f32 %v3038_v21, %v2830_v31  ;;  %2670 = vmatmul.f32.gmra.mxu2 %v9833_v54  ;;  %3306 = vmatmul.f32.gmra.mxu1 %v9909_v5  ;;  %v9912_v47 = vpop.f32.mrf.mxu3 }
 0x22b   :  { %v9903_v45 = vadd.f32 %v9845_v32, %v3039_v59  ;;  %v825_v32 = vld [vmem:[#allocation2 + $0x141] sm:$0xff] }
 0x22c   :  { %v2623_v46 = vpop.f32.mrf.mxu2  ;;  %2894 = vmatmul.f32.gmra.mxu3 %v702_v20 }
 0x22d   :  { %v2624_v54 = vadd.f32 %v2623_v46, %v2415_v49  ;;  %v3041_v16 = vpop.f32.mrf.mxu0 }
 0x22e   :  { %v9923_v11 = vpop.f32.mrf.mxu1 }
 0x22f   :  { %v2833_v58 = vadd.f32 %v9850_v42, %v2624_v54 }
 0x230   :  { %3088 = vmatmul.f32.gmra.mxu0 %v825_v32  ;;  %v959_v32 = vld [vmem:[#allocation2 + $0x18a] sm:$0xff] }
 0x231   :  { %v3042_v6 = vadd.f32 %v3041_v16, %v2833_v58  ;;  %2673 = vmatmul.f32.gmra.mxu2 %v9847_v60  ;;  %3309 = vmatmul.f32.gmra.mxu1 %v9926_v27  ;;  %v9929_v60 = vpop.f32.mrf.mxu3  ;;  %v2136_v16 = vld [vmem:[#allocation7 + $0x3b8] sm:$0xff] }
 0x232   :  { %3632 = vmatpush.msra.mxu3 %v2136_v16  ;;  %v9994_v16 = vld [vmem:[#allocation2 + $0x1e2] sm:$0xff] }
 0x233   :  { %v9921_v43 = vadd.f32 %v9859_v29, %v3042_v6  ;;  %v703_v29 = vld [vmem:[#allocation2 + $0x188] sm:$0xff] }
 0x234   :  { %v2626_v42 = vpop.f32.mrf.mxu2  ;;  %2897 = vmatmul.f32.gmra.mxu3 %v703_v29 }
 0x235   :  { %v2627_v38 = vadd.f32 %v2626_v42, %v2418_v3  ;;  %v3044_v39 = vpop.f32.mrf.mxu0  ;;  %v828_v42 = vld [vmem:[#allocation2 + $0x169] sm:$0xff] }
 0x236   :  { %v9938_v31 = vpop.f32.mrf.mxu1 }
 0x237   :  { %v2836_v30 = vadd.f32 %v9864_v22, %v2627_v38 }
 0x238   :  { %3091 = vmatmul.f32.gmra.mxu0 %v826_v50 }
 0x239   :  { %v3045_v4 = vadd.f32 %v3044_v39, %v2836_v30  ;;  %2676 = vmatmul.f32.gmra.mxu2 %v9861_v57  ;;  %3312 = vmatmul.f32.gmra.mxu1 %v958_v28  ;;  %v9940_v22 = vpop.f32.mrf.mxu3  ;;  %v2152_v39 = vld [vmem:[#allocation7 + $0x438] sm:$0xff] }
 0x23a   :  { %3841 = vmatpush.msra.mxu0 %v2152_v39  ;;  %v577_v39 = vld [vmem:[#allocation2 + $0x1ba] sm:$0xff] }
 0x23b   :  { %v9936_v56 = vadd.f32 %v9873_v34, %v3045_v4  ;;  %v2424_v34 = vadd.f32 %v9580_v18, %v9632_v2  ;;  %v705_v2 = vld [vmem:[#allocation2 + $0x1d0] sm:$0xff]  ;;  %v2427_v18 = vadd.f32 %v9597_v0, %v9642_v19 }
 0x23c   :  { %v2629_v21 = vpop.f32.mrf.mxu2  ;;  %2900 = vmatmul.f32.gmra.mxu3 %v704_v52  ;;  %v9969_v19 = vld [vmem:[#allocation2 + $0x171] sm:$0xff] }
 0x23d   :  { %v2630_v59 = vadd.f32 %v2629_v21, %v2421_v17  ;;  %v3047_v57 = vpop.f32.mrf.mxu0  ;;  %14228 = vst [vmem:[#allocation136_spill] sm:$0xff] %v9969_v19  ;;  %v2430_v21 = vadd.f32 %v9614_v36, %v9652_v44  ;;  %v707_v36 = vld [vmem:[#allocation2 + $0x1e8] sm:$0xff]  ;;  %v2433_v44 = vadd.f32 %v9625_v40, %v9662_v24  ;;  %v2119_v40 = vld [vmem:[#allocation7 + $0x330] sm:$0xff]  ;;  %v708_v24 = vld [vmem:[#allocation2 + $0x1f8] sm:$0xff] }
 0x23e   :  { %v9949_v58 = vpop.f32.mrf.mxu1  ;;  %3424 = vmatpush.msra.mxu2 %v2119_v40  ;;  %v834_v40 = vld [vmem:[#allocation2 + $0x1e1] sm:$0xff] }
 0x23f   :  { %v2839_v49 = vadd.f32 %v9879_v48, %v2630_v59 }
 0x240   :  { %3094 = vmatmul.f32.gmra.mxu0 %v827_v51 }
 0x241   :  { %v3048_v46 = vadd.f32 %v3047_v57, %v2839_v49  ;;  %2679 = vmatmul.f32.gmra.mxu2 %v9876_v25  ;;  %3315 = vmatmul.f32.gmra.mxu1 %v959_v32  ;;  %v9951_v25 = vpop.f32.mrf.mxu3 }
 0x243   :  { %v9947_v54 = vadd.f32 %v9888_v1, %v3048_v46 }
 0x244   :  { %v2632_v48 = vpop.f32.mrf.mxu2  ;;  %2903 = vmatmul.f32.gmra.mxu3 %v705_v2 }
 0x245   :  { %v2633_v6 = vadd.f32 %v2632_v48, %v2424_v34  ;;  %v3050_v3 = vpop.f32.mrf.mxu0  ;;  %v576_v48 = vld [vmem:[#allocation2 + $0x1b2] sm:$0xff] }
 0x246   :  { %v9960_v30 = vpop.f32.mrf.mxu1 }
 0x247   :  { %v2842_v20 = vadd.f32 %v9894_v13, %v2633_v6  ;;  %v9962_v13 = vld [vmem:[#allocation2 + $0x1ca] sm:$0xff] }
 0x248   :  { %3097 = vmatmul.f32.gmra.mxu0 %v828_v42 }
 0x249   :  { %v3051_v38 = vadd.f32 %v3050_v3, %v2842_v20  ;;  %2682 = vmatmul.f32.gmra.mxu2 %v9891_v55  ;;  %3318 = vmatmul.f32.gmra.mxu1 %v9962_v13  ;;  %v9965_v55 = vpop.f32.mrf.mxu3 }
 0x24b   :  { %v9958_v1 = vadd.f32 %v9905_v9, %v3051_v38  ;;  %v706_v9 = vld [vmem:[#allocation2 + $0x1e0] sm:$0xff]  ;;  %v2135_v38 = vld [vmem:[#allocation7 + $0x3b0] sm:$0xff] }
 0x24c   :  { %v2635_v50 = vpop.f32.mrf.mxu2  ;;  %2906 = vmatmul.f32.gmra.mxu3 %v706_v9 }
 0x24d   :  { %v2636_v4 = vadd.f32 %v2635_v50, %v2427_v18  ;;  %v3053_v17 = vpop.f32.mrf.mxu0  ;;  %3633 = vmatpush.msra.mxu3 %v2135_v38 }
 0x24e   :  { %v9977_v59 = vpop.f32.mrf.mxu1 }
 0x24f   :  { %v2845_v29 = vadd.f32 %v9912_v47, %v2636_v4  ;;  %v9979_v47 = vld [vmem:[#allocation2 + $0x1d2] sm:$0xff] }
 0x250   :  { %3100 = vmatmul.f32.gmra.mxu0 %v9969_v19 }
 0x251   :  { %v3054_v0 = vadd.f32 %v3053_v17, %v2845_v29  ;;  %2685 = vmatmul.f32.gmra.mxu2 %v9909_v5  ;;  %3321 = vmatmul.f32.gmra.mxu1 %v9979_v47  ;;  %v9982_v5 = vpop.f32.mrf.mxu3  ;;  %v709_v29 = vld [vmem:[#allocation2 + $0x200] sm:$0xff]  ;;  %v2439_v17 = vadd.f32 %v9646_v35, %v9678_v33  ;;  %v833_v35 = vld [vmem:[#allocation2 + $0x1d1] sm:$0xff] }
 0x253   :  { %v9975_v28 = vadd.f32 %v9923_v11, %v3054_v0 }
 0x254   :  { %v2638_v49 = vpop.f32.mrf.mxu2  ;;  %2909 = vmatmul.f32.gmra.mxu3 %v707_v36  ;;  %v14229_v36 = vld [vmem:[#allocation90_spill] sm:$0xff] }
 0x255   :  { %v2639_v57 = vadd.f32 %v2638_v49, %v2430_v21  ;;  %v3056_v46 = vpop.f32.mrf.mxu0  ;;  %v2151_v21 = vld [vmem:[#allocation7 + $0x430] sm:$0xff] }
 0x256   :  { %v9992_v52 = vpop.f32.mrf.mxu1  ;;  %3842 = vmatpush.msra.mxu0 %v2151_v21  ;;  %v14232_v21 = vld [vmem:[#allocation103_spill] sm:$0xff] }
 0x257   :  { %v2848_v51 = vadd.f32 %v9929_v60, %v2639_v57  ;;  %v10021_v57 = vld [vmem:[#allocation2 + $0x1fa] sm:$0xff] }
 0x258   :  { %3103 = vmatmul.f32.gmra.mxu0 %v9898_v8 }
 0x259   :  { %v3057_v7 = vadd.f32 %v3056_v46, %v2848_v51  ;;  %2688 = vmatmul.f32.gmra.mxu2 %v9926_v27  ;;  %3324 = vmatmul.f32.gmra.mxu1 %v9994_v16  ;;  %v9997_v27 = vpop.f32.mrf.mxu3 }
 0x25b   :  { %v9990_v11 = vadd.f32 %v9938_v31, %v3057_v7  ;;  %v2436_v31 = vadd.f32 %v9634_v61, %v9672_v62  ;;  %v832_v62 = vld [vmem:[#allocation2 + $0x1c9] sm:$0xff] }
 0x25c   :  { %v2641_v34 = vpop.f32.mrf.mxu2  ;;  %2912 = vmatmul.f32.gmra.mxu3 %v708_v24 }
 0x25d   :  { %v2642_v60 = vadd.f32 %v2641_v34, %v2433_v44  ;;  %v3059_v6 = vpop.f32.mrf.mxu0  ;;  %v2442_v44 = vadd.f32 %v14229_v36, %v9685_v15  ;;  %v711_v15 = vld [vmem:[#allocation2 + $0x218] sm:$0xff] }
 0x25e   :  { %v10006_v42 = vpop.f32.mrf.mxu1 }
 0x25f   :  { %v2851_v32 = vadd.f32 %v9940_v22, %v2642_v60  ;;  %v10008_v22 = vld [vmem:[#allocation2 + $0x1ea] sm:$0xff] }
 0x260   :  { %3106 = vmatmul.f32.gmra.mxu0 %v9916_v53  ;;  %v855_v53 = vld [vmem:[#allocation2 + $0x2d9] sm:$0xff] }
 0x261   :  { %v3060_v20 = vadd.f32 %v3059_v6, %v2851_v32  ;;  %2691 = vmatmul.f32.gmra.mxu2 %v576_v48  ;;  %3327 = vmatmul.f32.gmra.mxu1 %v10008_v22  ;;  %v10011_v50 = vpop.f32.mrf.mxu3  ;;  %v10035_v32 = vld [vmem:[#allocation2 + $0x202] sm:$0xff] }
 0x263   :  { %v10004_v3 = vadd.f32 %v9949_v58, %v3060_v20 }
 0x264   :  { %v2644_v2 = vpop.f32.mrf.mxu2  ;;  %2915 = vmatmul.f32.gmra.mxu3 %v709_v29 }
 0x265   :  { %v2645_v18 = vadd.f32 %v2644_v2, %v2436_v31  ;;  %v3062_v61 = vpop.f32.mrf.mxu0  ;;  %v14231_v31 = vld [vmem:[#allocation92_spill] sm:$0xff] }
 0x266   :  { %v10019_v9 = vpop.f32.mrf.mxu1 }
 0x267   :  { %v2854_v4 = vadd.f32 %v9951_v25, %v2645_v18 }
 0x268   :  { %3109 = vmatmul.f32.gmra.mxu0 %v832_v62 }
 0x269   :  { %v3063_v58 = vadd.f32 %v3062_v61, %v2854_v4  ;;  %2694 = vmatmul.f32.gmra.mxu2 %v577_v39  ;;  %3330 = vmatmul.f32.gmra.mxu1 %v10021_v57  ;;  %v10024_v51 = vpop.f32.mrf.mxu3  ;;  %v10049_v4 = vld [vmem:[#allocation2 + $0x212] sm:$0xff] }
 0x26b   :  { %v10017_v0 = vadd.f32 %v9960_v30, %v3063_v58  ;;  %v710_v30 = vld [vmem:[#allocation2 + $0x210] sm:$0xff] }
 0x26c   :  { %v2647_v49 = vpop.f32.mrf.mxu2  ;;  %2918 = vmatmul.f32.gmra.mxu3 %v710_v30  ;;  %v835_v58 = vld [vmem:[#allocation2 + $0x1e9] sm:$0xff] }
 0x26d   :  { %v2648_v25 = vadd.f32 %v2647_v49, %v2439_v17  ;;  %v3065_v7 = vpop.f32.mrf.mxu0  ;;  %v712_v17 = vld [vmem:[#allocation2 + $0x228] sm:$0xff]  ;;  %v14233_v49 = vld [vmem:[#allocation94_spill] sm:$0xff] }
 0x26e   :  { %v10033_v60 = vpop.f32.mrf.mxu1 }
 0x26f   :  { %v2857_v46 = vadd.f32 %v9965_v55, %v2648_v25  ;;  %v2448_v25 = vadd.f32 %v14233_v49, %v14232_v21 }
 0x270   :  { %3112 = vmatmul.f32.gmra.mxu0 %v833_v35  ;;  %v2134_v35 = vld [vmem:[#allocation7 + $0x3a8] sm:$0xff] }
 0x271   :  { %v3066_v33 = vadd.f32 %v3065_v7, %v2857_v46  ;;  %2697 = vmatmul.f32.gmra.mxu2 %v9962_v13  ;;  %3333 = vmatmul.f32.gmra.mxu1 %v10035_v32  ;;  %v10038_v6 = vpop.f32.mrf.mxu3 }
 0x272   :  { %3634 = vmatpush.msra.mxu3 %v2134_v35 }
 0x273   :  { %v10031_v34 = vadd.f32 %v9977_v59, %v3066_v33  ;;  %v14230_v59 = vld [vmem:[#allocation100_spill] sm:$0xff]  ;;  %v10063_v33 = vld [vmem:[#allocation2 + $0x21a] sm:$0xff] }
 0x274   :  { %v2650_v48 = vpop.f32.mrf.mxu2  ;;  %v2445_v38 = vadd.f32 %v14231_v31, %v14230_v59  ;;  %2921 = vmatmul.f32.gmra.mxu3 %v711_v15  ;;  %v2150_v59 = vld [vmem:[#allocation7 + $0x428] sm:$0xff] }
 0x275   :  { %v2651_v55 = vadd.f32 %v2650_v48, %v2442_v44  ;;  %v3068_v20 = vpop.f32.mrf.mxu0  ;;  %v836_v48 = vld [vmem:[#allocation2 + $0x1f9] sm:$0xff]  ;;  %3843 = vmatpush.msra.mxu0 %v2150_v59 }
 0x276   :  { %v10047_v18 = vpop.f32.mrf.mxu1 }
 0x277   :  { %v2860_v13 = vadd.f32 %v9982_v5, %v2651_v55 }
 0x278   :  { %3115 = vmatmul.f32.gmra.mxu0 %v834_v40 }
 0x279   :  { %v3069_v24 = vadd.f32 %v3068_v20, %v2860_v13  ;;  %2700 = vmatmul.f32.gmra.mxu2 %v9979_v47  ;;  %3336 = vmatmul.f32.gmra.mxu1 %v10049_v4  ;;  %v10052_v61 = vpop.f32.mrf.mxu3  ;;  %v14234_v13 = vld [vmem:[#allocation106_spill] sm:$0xff]  ;;  %v14235_v20 = vld [vmem:[#allocation96_spill] sm:$0xff] }
 0x27a   :  { %v2451_v40 = vadd.f32 %v14235_v20, %v14234_v13  ;;  %v10103_v20 = vld [vmem:[#allocation2 + $0x242] sm:$0xff] }
 0x27b   :  { %v10045_v2 = vadd.f32 %v9992_v52, %v3069_v24  ;;  %v2118_v52 = vld [vmem:[#allocation7 + $0x328] sm:$0xff] }
 0x27c   :  { %v2653_v39 = vpop.f32.mrf.mxu2  ;;  %3425 = vmatpush.msra.mxu2 %v2118_v52  ;;  %2924 = vmatmul.f32.gmra.mxu3 %v712_v17 }
 0x27d   :  { %v2654_v5 = vadd.f32 %v2653_v39, %v2445_v38  ;;  %v3071_v62 = vpop.f32.mrf.mxu0 }
 0x27e   :  { %v10061_v7 = vpop.f32.mrf.mxu1 }
 0x27f   :  { %v2863_v47 = vadd.f32 %v9997_v27, %v2654_v5 }
 0x280   :  { %3118 = vmatmul.f32.gmra.mxu0 %v835_v58  ;;  %v14236_v58 = vld [vmem:[#allocation109_spill] sm:$0xff] }
 0x281   :  { %v3072_v29 = vadd.f32 %v3071_v62, %v2863_v47  ;;  %2703 = vmatmul.f32.gmra.mxu2 %v9994_v16  ;;  %3339 = vmatmul.f32.gmra.mxu1 %v10063_v33  ;;  %v10066_v16 = vpop.f32.mrf.mxu3  ;;  %v837_v47 = vld [vmem:[#allocation2 + $0x201] sm:$0xff] }
 0x283   :  { %v10059_v46 = vadd.f32 %v10006_v42, %v3072_v29  ;;  %v713_v42 = vld [vmem:[#allocation2 + $0x230] sm:$0xff]  ;;  %v14237_v29 = vld [vmem:[#allocation98_spill] sm:$0xff] }
 0x284   :  { %v2656_v27 = vpop.f32.mrf.mxu2  ;;  %2927 = vmatmul.f32.gmra.mxu3 %v713_v42  ;;  %v2454_v52 = vadd.f32 %v14237_v29, %v14236_v58  ;;  %v2133_v29 = vld [vmem:[#allocation7 + $0x3a0] sm:$0xff] }
 0x285   :  { %v2657_v30 = vadd.f32 %v2656_v27, %v2448_v25  ;;  %v3074_v44 = vpop.f32.mrf.mxu0  ;;  %v10091_v25 = vld [vmem:[#allocation2 + $0x232] sm:$0xff]  ;;  %3635 = vmatpush.msra.mxu3 %v2133_v29 }
 0x286   :  { %v10075_v15 = vpop.f32.mrf.mxu1 }
 0x287   :  { %v2866_v36 = vadd.f32 %v10011_v50, %v2657_v30  ;;  %v10077_v50 = vld [vmem:[#allocation2 + $0x22a] sm:$0xff] }
 0x288   :  { %3121 = vmatmul.f32.gmra.mxu0 %v836_v48  ;;  %v838_v30 = vld [vmem:[#allocation2 + $0x211] sm:$0xff] }
 0x289   :  { %v3075_v55 = vadd.f32 %v3074_v44, %v2866_v36  ;;  %2706 = vmatmul.f32.gmra.mxu2 %v10008_v22  ;;  %3342 = vmatmul.f32.gmra.mxu1 %v10077_v50  ;;  %v10080_v22 = vpop.f32.mrf.mxu3  ;;  %v14238_v44 = vld [vmem:[#allocation112_spill] sm:$0xff]  ;;  %v14239_v48 = vld [vmem:[#allocation101_spill] sm:$0xff] }
 0x28b   :  { %v10073_v24 = vadd.f32 %v10019_v9, %v3075_v55  ;;  %v714_v9 = vld [vmem:[#allocation2 + $0x240] sm:$0xff]  ;;  %v2457_v55 = vadd.f32 %v14239_v48, %v14238_v44  ;;  %v14243_v44 = vld [vmem:[#allocation107_spill] sm:$0xff] }
 0x28c   :  { %v2659_v31 = vpop.f32.mrf.mxu2  ;;  %2930 = vmatmul.f32.gmra.mxu3 %v714_v9 }
 0x28d   :  { %v2660_v38 = vadd.f32 %v2659_v31, %v2451_v40  ;;  %v3077_v5 = vpop.f32.mrf.mxu0 }
 0x28e   :  { %v10089_v49 = vpop.f32.mrf.mxu1 }
 0x28f   :  { %v2869_v39 = vadd.f32 %v10024_v51, %v2660_v38  ;;  %v839_v38 = vld [vmem:[#allocation2 + $0x219] sm:$0xff] }
 0x290   :  { %3124 = vmatmul.f32.gmra.mxu0 %v837_v47  ;;  %v14240_v47 = vld [vmem:[#allocation115_spill] sm:$0xff] }
 0x291   :  { %v3078_v62 = vadd.f32 %v3077_v5, %v2869_v39  ;;  %2709 = vmatmul.f32.gmra.mxu2 %v10021_v57  ;;  %3345 = vmatmul.f32.gmra.mxu1 %v10091_v25  ;;  %v10094_v35 = vpop.f32.mrf.mxu3  ;;  %v716_v5 = vld [vmem:[#allocation2 + $0x258] sm:$0xff] }
 0x293   :  { %v10087_v17 = vadd.f32 %v10033_v60, %v3078_v62  ;;  %v715_v60 = vld [vmem:[#allocation2 + $0x248] sm:$0xff]  ;;  %v14241_v62 = vld [vmem:[#allocation104_spill] sm:$0xff] }
 0x294   :  { %v2662_v21 = vpop.f32.mrf.mxu2  ;;  %2933 = vmatmul.f32.gmra.mxu3 %v715_v60  ;;  %v2460_v9 = vadd.f32 %v14241_v62, %v14240_v47  ;;  %v14242_v60 = vld [vmem:[#allocation118_spill] sm:$0xff]  ;;  %v14244_v47 = vld [vmem:[#allocation121_spill] sm:$0xff] }
 0x295   :  { %v2663_v51 = vadd.f32 %v2662_v21, %v2454_v52  ;;  %v3080_v27 = vpop.f32.mrf.mxu0  ;;  %v2463_v48 = vadd.f32 %v14243_v44, %v14242_v60  ;;  %v14245_v62 = vld [vmem:[#allocation110_spill] sm:$0xff]  ;;  %v14247_v60 = vld [vmem:[#allocation113_spill] sm:$0xff] }
 0x296   :  { %v10105_v59 = vpop.f32.mrf.mxu1 }
 0x297   :  { %v2872_v57 = vadd.f32 %v10038_v6, %v2663_v51 }
 0x298   :  { %3127 = vmatmul.f32.gmra.mxu0 %v838_v30 }
 0x299   :  { %v3081_v36 = vadd.f32 %v3080_v27, %v2872_v57  ;;  %2712 = vmatmul.f32.gmra.mxu2 %v10035_v32  ;;  %3348 = vmatmul.f32.gmra.mxu1 %v10103_v20  ;;  %v10108_v6 = vpop.f32.mrf.mxu3  ;;  %v840_v27 = vld [vmem:[#allocation2 + $0x229] sm:$0xff] }
 0x29b   :  { %v10101_v42 = vadd.f32 %v10047_v18, %v3081_v36  ;;  %v2117_v18 = vld [vmem:[#allocation7 + $0x320] sm:$0xff] }
 0x29c   :  { %v2665_v13 = vpop.f32.mrf.mxu2  ;;  %3426 = vmatpush.msra.mxu2 %v2117_v18  ;;  %2936 = vmatmul.f32.gmra.mxu3 %v716_v5  ;;  %v718_v5 = vld [vmem:[#allocation2 + $0x270] sm:$0xff] }
 0x29d   :  { %v2666_v40 = vadd.f32 %v2665_v13, %v2457_v55  ;;  %v3083_v31 = vpop.f32.mrf.mxu0  ;;  %v2149_v13 = vld [vmem:[#allocation7 + $0x420] sm:$0xff] }
 0x29e   :  { %v3304_v30 = vpop.f32.mrf.mxu1  ;;  %3844 = vmatpush.msra.mxu0 %v2149_v13 }
 0x29f   :  { %v2875_v32 = vadd.f32 %v10052_v61, %v2666_v40  ;;  %v10117_v61 = vld [vmem:[#allocation2 + $0x24a] sm:$0xff] }
 0x2a0   :  { %3130 = vmatmul.f32.gmra.mxu0 %v839_v38 }
 0x2a1   :  { %v3084_v39 = vadd.f32 %v3083_v31, %v2875_v32  ;;  %2715 = vmatmul.f32.gmra.mxu2 %v10049_v4  ;;  %3351 = vmatmul.f32.gmra.mxu1 %v10117_v61  ;;  %v10120_v4 = vpop.f32.mrf.mxu3  ;;  %v10129_v32 = vld [vmem:[#allocation2 + $0x25a] sm:$0xff] }
 0x2a3   :  { %v10115_v58 = vadd.f32 %v10061_v7, %v3084_v39  ;;  %v717_v7 = vld [vmem:[#allocation2 + $0x260] sm:$0xff]  ;;  %v841_v39 = vld [vmem:[#allocation2 + $0x231] sm:$0xff] }
 0x2a4   :  { %v2668_v52 = vpop.f32.mrf.mxu2  ;;  %2939 = vmatmul.f32.gmra.mxu3 %v717_v7  ;;  %v719_v7 = vld [vmem:[#allocation2 + $0x278] sm:$0xff] }
 0x2a5   :  { %v2669_v21 = vadd.f32 %v2668_v52, %v2460_v9  ;;  %v3086_v57 = vpop.f32.mrf.mxu0  ;;  %v2466_v9 = vadd.f32 %v14245_v62, %v14244_v47  ;;  %v14248_v47 = vld [vmem:[#allocation127_spill] sm:$0xff]  ;;  %v14249_v62 = vld [vmem:[#allocation116_spill] sm:$0xff] }
 0x2a7   :  { %v2878_v51 = vadd.f32 %v10066_v16, %v2669_v21  ;;  %v10141_v21 = vld [vmem:[#allocation2 + $0x262] sm:$0xff] }
 0x2a8   :  { %3133 = vmatmul.f32.gmra.mxu0 %v840_v27  ;;  %v842_v27 = vld [vmem:[#allocation2 + $0x241] sm:$0xff] }
 0x2a9   :  { %v3087_v36 = vadd.f32 %v3086_v57, %v2878_v51  ;;  %2718 = vmatmul.f32.gmra.mxu2 %v10063_v33  ;;  %3354 = vmatmul.f32.gmra.mxu1 %v10129_v32  ;;  %v10132_v31 = vpop.f32.mrf.mxu3 }
 0x2ab   :  { %v10127_v55 = vadd.f32 %v10075_v15, %v3087_v36  ;;  %v3307_v15 = vpop.f32.mrf.mxu1 }
 0x2ac   :  { %v2671_v40 = vpop.f32.mrf.mxu2  ;;  %2942 = vmatmul.f32.gmra.mxu3 %v718_v5  ;;  %v2116_v5 = vld [vmem:[#allocation7 + $0x318] sm:$0xff] }
 0x2ad   :  { %v2672_v16 = vadd.f32 %v2671_v40, %v2463_v48  ;;  %v3089_v38 = vpop.f32.mrf.mxu0  ;;  %3427 = vmatpush.msra.mxu2 %v2116_v5 }
 0x2af   :  { %v2881_v33 = vadd.f32 %v10080_v22, %v2672_v16  ;;  %v10153_v16 = vld [vmem:[#allocation2 + $0x272] sm:$0xff] }
 0x2b0   :  { %3136 = vmatmul.f32.gmra.mxu0 %v841_v39  ;;  %v843_v39 = vld [vmem:[#allocation2 + $0x249] sm:$0xff] }
 0x2b1   :  { %v3090_v18 = vadd.f32 %v3089_v38, %v2881_v33  ;;  %2721 = vmatmul.f32.gmra.mxu2 %v10077_v50  ;;  %3357 = vmatmul.f32.gmra.mxu1 %v10141_v21  ;;  %v10144_v22 = vpop.f32.mrf.mxu3 }
 0x2b3   :  { %v10139_v29 = vadd.f32 %v10089_v49, %v3090_v18  ;;  %v14246_v49 = vld [vmem:[#allocation124_spill] sm:$0xff]  ;;  %v3310_v40 = vpop.f32.mrf.mxu1 }
 0x2b4   :  { %v2674_v52 = vpop.f32.mrf.mxu2  ;;  %v2469_v44 = vadd.f32 %v14247_v60, %v14246_v49  ;;  %2945 = vmatmul.f32.gmra.mxu3 %v719_v7  ;;  %v844_v49 = vld [vmem:[#allocation2 + $0x259] sm:$0xff] }
 0x2b5   :  { %v2675_v51 = vadd.f32 %v2674_v52, %v2466_v9  ;;  %v3092_v57 = vpop.f32.mrf.mxu0  ;;  %v2472_v9 = vadd.f32 %v14249_v62, %v14248_v47  ;;  %v845_v47 = vld [vmem:[#allocation2 + $0x261] sm:$0xff] }
 0x2b7   :  { %v2884_v50 = vadd.f32 %v10094_v35, %v2675_v51  ;;  %v2132_v51 = vld [vmem:[#allocation7 + $0x398] sm:$0xff] }
 0x2b8   :  { %3139 = vmatmul.f32.gmra.mxu0 %v842_v27  ;;  %3636 = vmatpush.msra.mxu3 %v2132_v51  ;;  %v14252_v51 = vld [vmem:[#allocation131_spill] sm:$0xff] }
 0x2b9   :  { %v3093_v36 = vadd.f32 %v3092_v57, %v2884_v50  ;;  %2724 = vmatmul.f32.gmra.mxu2 %v10091_v25  ;;  %3360 = vmatmul.f32.gmra.mxu1 %v10153_v16  ;;  %v10156_v35 = vpop.f32.mrf.mxu3  ;;  %v10164_v57 = vld [vmem:[#allocation2 + $0x27a] sm:$0xff] }
 0x2bb   :  { %v10151_v48 = vadd.f32 %v10105_v59, %v3093_v36  ;;  %v720_v59 = vld [vmem:[#allocation2 + $0x288] sm:$0xff]  ;;  %v3313_v27 = vpop.f32.mrf.mxu1 }
 0x2bc   :  { %v2677_v13 = vpop.f32.mrf.mxu2  ;;  %2948 = vmatmul.f32.gmra.mxu3 %v720_v59 }
 0x2bd   :  { %v2678_v33 = vadd.f32 %v2677_v13, %v2469_v44  ;;  %v3095_v38 = vpop.f32.mrf.mxu0  ;;  %v14250_v44 = vld [vmem:[#allocation129_spill] sm:$0xff]  ;;  %v14251_v13 = vld [vmem:[#allocation119_spill] sm:$0xff] }
 0x2bf   :  { %v2887_v25 = vadd.f32 %v10108_v6, %v2678_v33  ;;  %v2475_v33 = vadd.f32 %v14251_v13, %v14250_v44 }
 0x2c0   :  { %3142 = vmatmul.f32.gmra.mxu0 %v843_v39 }
 0x2c1   :  { %v3096_v18 = vadd.f32 %v3095_v38, %v2887_v25  ;;  %2727 = vmatmul.f32.gmra.mxu2 %v10103_v20  ;;  %3363 = vmatmul.f32.gmra.mxu1 %v10164_v57  ;;  %v10167_v20 = vpop.f32.mrf.mxu3  ;;  %v2148_v38 = vld [vmem:[#allocation7 + $0x418] sm:$0xff] }
 0x2c2   :  { %3845 = vmatpush.msra.mxu0 %v2148_v38  ;;  %v14254_v38 = vld [vmem:[#allocation133_spill] sm:$0xff] }
 0x2c3   :  { %v10162_v52 = vadd.f32 %v3304_v30, %v3096_v18  ;;  %v721_v30 = vld [vmem:[#allocation2 + $0x290] sm:$0xff]  ;;  %v3316_v62 = vpop.f32.mrf.mxu1 }
 0x2c4   :  { %v2680_v50 = vpop.f32.mrf.mxu2  ;;  %2951 = vmatmul.f32.gmra.mxu3 %v721_v30  ;;  %v10175_v18 = vld [vmem:[#allocation2 + $0x28a] sm:$0xff] }
 0x2c5   :  { %v2681_v6 = vadd.f32 %v2680_v50, %v2472_v9  ;;  %v3098_v7 = vpop.f32.mrf.mxu0  ;;  %v14253_v50 = vld [vmem:[#allocation122_spill] sm:$0xff] }
 0x2c7   :  { %v2890_v36 = vadd.f32 %v10120_v4, %v2681_v6  ;;  %v2478_v6 = vadd.f32 %v14253_v50, %v14252_v51  ;;  %v847_v51 = vld [vmem:[#allocation2 + $0x279] sm:$0xff] }
 0x2c8   :  { %3145 = vmatmul.f32.gmra.mxu0 %v844_v49  ;;  %v10186_v49 = vld [vmem:[#allocation2 + $0x292] sm:$0xff] }
 0x2c9   :  { %v3099_v60 = vadd.f32 %v3098_v7, %v2890_v36  ;;  %2730 = vmatmul.f32.gmra.mxu2 %v10117_v61  ;;  %3366 = vmatmul.f32.gmra.mxu1 %v10175_v18  ;;  %v10178_v4 = vpop.f32.mrf.mxu3 }
 0x2cb   :  { %v10173_v25 = vadd.f32 %v3307_v15, %v3099_v60  ;;  %v722_v15 = vld [vmem:[#allocation2 + $0x2a0] sm:$0xff] }
 0x2cc   :  { %v2683_v39 = vpop.f32.mrf.mxu2  ;;  %2954 = vmatmul.f32.gmra.mxu3 %v722_v15 }
 0x2cd   :  { %v2684_v5 = vadd.f32 %v2683_v39, %v2475_v33  ;;  %v3101_v59 = vpop.f32.mrf.mxu0  ;;  %v3319_v33 = vpop.f32.mrf.mxu1  ;;  %v14255_v39 = vld [vmem:[#allocation125_spill] sm:$0xff] }
 0x2cf   :  { %v2893_v61 = vadd.f32 %v10132_v31, %v2684_v5  ;;  %v2481_v5 = vadd.f32 %v14255_v39, %v14254_v38 }
 0x2d0   :  { %3148 = vmatmul.f32.gmra.mxu0 %v845_v47  ;;  %v10197_v47 = vld [vmem:[#allocation2 + $0x2a2] sm:$0xff] }
 0x2d1   :  { %v3102_v9 = vadd.f32 %v3101_v59, %v2893_v61  ;;  %2733 = vmatmul.f32.gmra.mxu2 %v10129_v32  ;;  %3369 = vmatmul.f32.gmra.mxu1 %v10186_v49  ;;  %v10189_v31 = vpop.f32.mrf.mxu3  ;;  %v846_v32 = vld [vmem:[#allocation2 + $0x271] sm:$0xff] }
 0x2d3   :  { %v10184_v36 = vadd.f32 %v3310_v40, %v3102_v9  ;;  %v723_v40 = vld [vmem:[#allocation2 + $0x2a8] sm:$0xff] }
 0x2d4   :  { %v2686_v7 = vpop.f32.mrf.mxu2  ;;  %2957 = vmatmul.f32.gmra.mxu3 %v723_v40 }
 0x2d5   :  { %v2687_v60 = vadd.f32 %v2686_v7, %v2478_v6  ;;  %v3104_v44 = vpop.f32.mrf.mxu0  ;;  %v2115_v6 = vld [vmem:[#allocation7 + $0x310] sm:$0xff]  ;;  %v14256_v7 = vld [vmem:[#allocation53_spill] sm:$0xff]  ;;  %v3322_v40 = vpop.f32.mrf.mxu1 }
 0x2d6   :  { %3428 = vmatpush.msra.mxu2 %v2115_v6  ;;  %v2147_v6 = vld [vmem:[#allocation7 + $0x410] sm:$0xff] }
 0x2d7   :  { %v2896_v30 = vadd.f32 %v10144_v22, %v2687_v60  ;;  %v14257_v60 = vld [vmem:[#allocation44_spill] sm:$0xff]  ;;  %3846 = vmatpush.msra.mxu0 %v2147_v6 }
 0x2d8   :  { %3151 = vmatmul.f32.gmra.mxu0 %v846_v32  ;;  %v2131_v32 = vld [vmem:[#allocation7 + $0x390] sm:$0xff] }
 0x2d9   :  { %v3105_v13 = vadd.f32 %v3104_v44, %v2896_v30  ;;  %2736 = vmatmul.f32.gmra.mxu2 %v10141_v21  ;;  %3372 = vmatmul.f32.gmra.mxu1 %v10197_v47  ;;  %v10200_v22 = vpop.f32.mrf.mxu3  ;;  %v2484_v30 = vadd.f32 %v14257_v60, %v14256_v7  ;;  %v10219_v7 = vld [vmem:[#allocation2 + $0x2ba] sm:$0xff] }
 0x2da   :  { %3637 = vmatpush.msra.mxu3 %v2131_v32 }
 0x2db   :  { %v10195_v61 = vadd.f32 %v3313_v27, %v3105_v13  ;;  %v724_v27 = vld [vmem:[#allocation2 + $0x2b8] sm:$0xff] }
 0x2dc   :  { %v2689_v59 = vpop.f32.mrf.mxu2  ;;  %2960 = vmatmul.f32.gmra.mxu3 %v724_v27 }
 0x2dd   :  { %v2690_v9 = vadd.f32 %v2689_v59, %v2481_v5  ;;  %v3107_v21 = vpop.f32.mrf.mxu0  ;;  %v848_v59 = vld [vmem:[#allocation2 + $0x289] sm:$0xff] }
 0x2df   :  { %v2899_v15 = vadd.f32 %v10156_v35, %v2690_v9  ;;  %v10208_v35 = vld [vmem:[#allocation2 + $0x2aa] sm:$0xff] }
 0x2e0   :  { %3154 = vmatmul.f32.gmra.mxu0 %v847_v51 }
 0x2e1   :  { %v3108_v50 = vadd.f32 %v3107_v21, %v2899_v15  ;;  %2739 = vmatmul.f32.gmra.mxu2 %v10153_v16  ;;  %3375 = vmatmul.f32.gmra.mxu1 %v10208_v35  ;;  %v10211_v16 = vpop.f32.mrf.mxu3  ;;  %v14258_v15 = vld [vmem:[#allocation57_spill] sm:$0xff]  ;;  %v14259_v21 = vld [vmem:[#allocation48_spill] sm:$0xff] }
 0x2e2   :  { %v2487_v51 = vadd.f32 %v14259_v21, %v14258_v15 }
 0x2e3   :  { %v10206_v44 = vadd.f32 %v3316_v62, %v3108_v50  ;;  %v725_v62 = vld [vmem:[#allocation2 + $0x2c0] sm:$0xff] }
 0x2e4   :  { %v2692_v13 = vpop.f32.mrf.mxu2  ;;  %2963 = vmatmul.f32.gmra.mxu3 %v725_v62 }
 0x2e5   :  { %v2693_v38 = vadd.f32 %v2692_v13, %v2484_v30  ;;  %v3110_v5 = vpop.f32.mrf.mxu0  ;;  %v849_v13 = vld [vmem:[#allocation2 + $0x291] sm:$0xff] }
 0x2e7   :  { %v2902_v39 = vadd.f32 %v10167_v20, %v2693_v38  ;;  %v3325_v20 = vpop.f32.mrf.mxu1 }
 0x2e8   :  { %3157 = vmatmul.f32.gmra.mxu0 %v848_v59  ;;  %v10228_v59 = vld [vmem:[#allocation2 + $0x2c2] sm:$0xff] }
 0x2e9   :  { %v3111_v9 = vadd.f32 %v3110_v5, %v2902_v39  ;;  %2742 = vmatmul.f32.gmra.mxu2 %v10164_v57  ;;  %3378 = vmatmul.f32.gmra.mxu1 %v10219_v7  ;;  %v10222_v30 = vpop.f32.mrf.mxu3 }
 0x2eb   :  { %v10217_v50 = vadd.f32 %v3319_v33, %v3111_v9  ;;  %v726_v33 = vld [vmem:[#allocation2 + $0x2d0] sm:$0xff]  ;;  %v14260_v9 = vld [vmem:[#allocation61_spill] sm:$0xff] }
 0x2ec   :  { %v2695_v27 = vpop.f32.mrf.mxu2  ;;  %2966 = vmatmul.f32.gmra.mxu3 %v726_v33 }
 0x2ed   :  { %v2696_v60 = vadd.f32 %v2695_v27, %v2487_v51  ;;  %v3113_v32 = vpop.f32.mrf.mxu0  ;;  %v850_v51 = vld [vmem:[#allocation2 + $0x2a1] sm:$0xff] }
 0x2ef   :  { %v2905_v57 = vadd.f32 %v10178_v4, %v2696_v60  ;;  %v3328_v6 = vpop.f32.mrf.mxu1 }
 0x2f0   :  { %3160 = vmatmul.f32.gmra.mxu0 %v849_v13 }
 0x2f1   :  { %v3114_v38 = vadd.f32 %v3113_v32, %v2905_v57  ;;  %2745 = vmatmul.f32.gmra.mxu2 %v10175_v18  ;;  %3381 = vmatmul.f32.gmra.mxu1 %v10228_v59  ;;  %v10232_v15 = vpop.f32.mrf.mxu3  ;;  %v10238_v57 = vld [vmem:[#allocation2 + $0x2d2] sm:$0xff] }
 0x2f2   :  { %v14261_v32 = vld [vmem:[#allocation64_spill] sm:$0xff] }
 0x2f3   :  { %v10226_v39 = vadd.f32 %v3322_v40, %v3114_v38  ;;  %v727_v40 = vld [vmem:[#allocation2 + $0x2d8] sm:$0xff] }
 0x2f4   :  { %v2698_v5 = vpop.f32.mrf.mxu2  ;;  %2969 = vmatmul.f32.gmra.mxu3 %v727_v40  ;;  %v14262_v40 = vld [vmem:[#allocation67_spill] sm:$0xff] }
 0x2f5   :  { %v2699_v62 = vadd.f32 %v2698_v5, %v14260_v9  ;;  %v3116_v21 = vpop.f32.mrf.mxu0  ;;  %v851_v5 = vld [vmem:[#allocation2 + $0x2a9] sm:$0xff] }
 0x2f7   :  { %v2908_v4 = vadd.f32 %v10189_v31, %v2699_v62  ;;  %v728_v62 = vld [vmem:[#allocation2 + $0x2e8] sm:$0xff] }
 0x2f8   :  { %3163 = vmatmul.f32.gmra.mxu0 %v850_v51 }
 0x2f9   :  { %v3117_v18 = vadd.f32 %v3116_v21, %v2908_v4  ;;  %2748 = vmatmul.f32.gmra.mxu2 %v10186_v49  ;;  %3384 = vmatmul.f32.gmra.mxu1 %v10238_v57  ;;  %v10242_v38 = vpop.f32.mrf.mxu3  ;;  %v2114_v49 = vld [vmem:[#allocation7 + $0x308] sm:$0xff] }
 0x2fa   :  { %3429 = vmatpush.msra.mxu2 %v2114_v49  ;;  %v2130_v21 = vld [vmem:[#allocation7 + $0x388] sm:$0xff] }
 0x2fb   :  { %v10236_v27 = vadd.f32 %v3325_v20, %v3117_v18  ;;  %v3331_v20 = vpop.f32.mrf.mxu1  ;;  %3638 = vmatpush.msra.mxu3 %v2130_v21  ;;  %v10248_v18 = vld [vmem:[#allocation2 + $0x2da] sm:$0xff] }
 0x2fc   :  { %v2701_v60 = vpop.f32.mrf.mxu2  ;;  %2972 = vmatmul.f32.gmra.mxu3 %v728_v62  ;;  %v10258_v62 = vld [vmem:[#allocation2 + $0x2ea] sm:$0xff]  ;;  %v14263_v21 = vld [vmem:[#allocation70_spill] sm:$0xff] }
 0x2fd   :  { %v2702_v13 = vadd.f32 %v2701_v60, %v14261_v32  ;;  %v3119_v33 = vpop.f32.mrf.mxu0 }
 0x2ff   :  { %v2911_v31 = vadd.f32 %v10200_v22, %v2702_v13  ;;  %v852_v13 = vld [vmem:[#allocation2 + $0x2b9] sm:$0xff] }
 0x300   :  { %3166 = vmatmul.f32.gmra.mxu0 %v851_v5  ;;  %v2146_v5 = vld [vmem:[#allocation7 + $0x408] sm:$0xff] }
 0x301   :  { %v3120_v9 = vadd.f32 %v3119_v33, %v2911_v31  ;;  %2751 = vmatmul.f32.gmra.mxu2 %v10197_v47  ;;  %3387 = vmatmul.f32.gmra.mxu1 %v10248_v18  ;;  %v10252_v60 = vpop.f32.mrf.mxu3 }
 0x302   :  { %3847 = vmatpush.msra.mxu0 %v2146_v5 }
 0x303   :  { %v10246_v4 = vadd.f32 %v3328_v6, %v3120_v9  ;;  %v729_v6 = vld [vmem:[#allocation2 + $0x2f0] sm:$0xff]  ;;  %v3334_v49 = vpop.f32.mrf.mxu1 }
 0x304   :  { %v2704_v51 = vpop.f32.mrf.mxu2  ;;  %2975 = vmatmul.f32.gmra.mxu3 %v729_v6  ;;  %v14264_v6 = vld [vmem:[#allocation73_spill] sm:$0xff] }
 0x305   :  { %v2705_v22 = vadd.f32 %v2704_v51, %v14262_v40  ;;  %v3122_v32 = vpop.f32.mrf.mxu0 }
 0x307   :  { %v2914_v47 = vadd.f32 %v10211_v16, %v2705_v22  ;;  %v853_v22 = vld [vmem:[#allocation2 + $0x2c1] sm:$0xff] }
 0x308   :  { %3169 = vmatmul.f32.gmra.mxu0 %v852_v13 }
 0x309   :  { %v3123_v31 = vadd.f32 %v3122_v32, %v2914_v47  ;;  %2754 = vmatmul.f32.gmra.mxu2 %v10208_v35  ;;  %3390 = vmatmul.f32.gmra.mxu1 %v10258_v62  ;;  %v10262_v16 = vpop.f32.mrf.mxu3 }
 0x30b   :  { %v10256_v33 = vadd.f32 %v3331_v20, %v3123_v31  ;;  %v730_v20 = vld [vmem:[#allocation2 + $0x300] sm:$0xff]  ;;  %v10268_v31 = vld [vmem:[#allocation2 + $0x2f2] sm:$0xff] }
 0x30c   :  { %v2707_v9 = vpop.f32.mrf.mxu2  ;;  %2978 = vmatmul.f32.gmra.mxu3 %v730_v20  ;;  %v14265_v20 = vld [vmem:[#allocation76_spill] sm:$0xff] }
 0x30d   :  { %v2708_v51 = vadd.f32 %v2707_v9, %v14263_v21  ;;  %v3125_v35 = vpop.f32.mrf.mxu0  ;;  %v3337_v9 = vpop.f32.mrf.mxu1 }
 0x30f   :  { %v2917_v40 = vadd.f32 %v10222_v30, %v2708_v51 }
 0x310   :  { %3172 = vmatmul.f32.gmra.mxu0 %v853_v22 }
 0x311   :  { %v3126_v47 = vadd.f32 %v3125_v35, %v2917_v40  ;;  %2757 = vmatmul.f32.gmra.mxu2 %v10219_v7  ;;  %3393 = vmatmul.f32.gmra.mxu1 %v10268_v31  ;;  %v10272_v21 = vpop.f32.mrf.mxu3  ;;  %v854_v40 = vld [vmem:[#allocation2 + $0x2d1] sm:$0xff] }
 0x313   :  { %v10266_v32 = vadd.f32 %v3334_v49, %v3126_v47  ;;  %v731_v49 = vld [vmem:[#allocation2 + $0x308] sm:$0xff] }
 0x314   :  { %v2710_v13 = vpop.f32.mrf.mxu2  ;;  %2981 = vmatmul.f32.gmra.mxu3 %v731_v49  ;;  %v10278_v47 = vld [vmem:[#allocation2 + $0x302] sm:$0xff] }
 0x315   :  { %v2711_v5 = vadd.f32 %v2710_v13, %v14264_v6  ;;  %v3128_v51 = vpop.f32.mrf.mxu0 }
 0x317   :  { %v2920_v30 = vadd.f32 %v10232_v15, %v2711_v5 }
 0x318   :  { %3175 = vmatmul.f32.gmra.mxu0 %v854_v40 }
 0x319   :  { %v3129_v7 = vadd.f32 %v3128_v51, %v2920_v30  ;;  %2760 = vmatmul.f32.gmra.mxu2 %v10228_v59  ;;  %3396 = vmatmul.f32.gmra.mxu1 %v10278_v47  ;;  %v2934_v6 = vpop.f32.mrf.mxu3  ;;  %v3340_v30 = vpop.f32.mrf.mxu1  ;;  %v2113_v59 = vld [vmem:[#allocation7 + $0x300] sm:$0xff] }
 0x31a   :  { %3430 = vmatpush.msra.mxu2 %v2113_v59  ;;  %v988_v59 = vld [vmem:[#allocation2 + $0x31a] sm:$0xff] }
 0x31b   :  { %v10276_v35 = vadd.f32 %v3337_v9, %v3129_v7  ;;  %v732_v9 = vld [vmem:[#allocation2 + $0x318] sm:$0xff]  ;;  %v2129_v7 = vld [vmem:[#allocation7 + $0x380] sm:$0xff] }
 0x31c   :  { %v2713_v22 = vpop.f32.mrf.mxu2  ;;  %2984 = vmatmul.f32.gmra.mxu3 %v732_v9  ;;  %v14271_v9 = vld [vmem:[#allocation82_spill] sm:$0xff] }
 0x31d   :  { %v2714_v13 = vadd.f32 %v2713_v22, %v14265_v20  ;;  %v3131_v5 = vpop.f32.mrf.mxu0  ;;  %3639 = vmatpush.msra.mxu3 %v2129_v7  ;;  %v987_v22 = vld [vmem:[#allocation2 + $0x30a] sm:$0xff] }
 0x31e   :  { %v14267_v20 = vld [vmem:[#allocation79_spill] sm:$0xff] }
 0x31f   :  { %v2923_v15 = vadd.f32 %v10242_v38, %v2714_v13 }
 0x320   :  { %3178 = vmatmul.f32.gmra.mxu0 %v855_v53  ;;  %v733_v53 = vld [vmem:[#allocation2 + $0x320] sm:$0xff] }
 0x321   :  { %v3132_v51 = vadd.f32 %v3131_v5, %v2923_v15  ;;  %2763 = vmatmul.f32.gmra.mxu2 %v10238_v57  ;;  %3399 = vmatmul.f32.gmra.mxu1 %v987_v22  ;;  %v2937_v38 = vpop.f32.mrf.mxu3  ;;  %v856_v57 = vld [vmem:[#allocation2 + $0x2e9] sm:$0xff] }
 0x322   :  { %v10293_v5 = vld [vmem:[#allocation4 + $0x1f0] sm:$0xff] }
 0x323   :  { %v10284_v40 = vadd.f32 %v3340_v30, %v3132_v51  ;;  %14270 = vst [vmem:[#allocation103_spill] sm:$0xff] %v10293_v5  ;;  %v2145_v30 = vld [vmem:[#allocation7 + $0x400] sm:$0xff] }
 0x324   :  { %v2716_v49 = vpop.f32.mrf.mxu2  ;;  %2987 = vmatmul.f32.gmra.mxu3 %v733_v53  ;;  %286 = vst [vmem:[#allocation2 + $0x331] sm:$0xff] %v10293_v5  ;;  %3848 = vmatpush.msra.mxu0 %v2145_v30  ;;  %v989_v30 = vld [vmem:[#allocation2 + $0x322] sm:$0xff] }
 0x325   :  { %14266 = vst [vmem:[#allocation90_spill] sm:$0xff] %v10284_v40  ;;  %v2717_v8 = vadd.f32 %v2716_v49, %v14267_v20  ;;  %v10290_v15 = vpop.f32.mrf.mxu0 }
 0x326   :  { %14269 = vst [vmem:[#allocation92_spill] sm:$0xff] %v10290_v15 }
 0x327   :  { %v10288_v13 = vadd.f32 %v10252_v60, %v2717_v8 }
 0x328   :  { %3181 = vmatmul.f32.gmra.mxu0 %v856_v57  ;;  %v10303_v57 = vld [vmem:[#allocation4 + $0x1f8] sm:$0xff] }
 0x329   :  { %14268 = vst [vmem:[#allocation100_spill] sm:$0xff] %v10288_v13  ;;  %2766 = vmatmul.f32.gmra.mxu2 %v10248_v18  ;;  %3402 = vmatmul.f32.gmra.mxu1 %v988_v59  ;;  %v2940_v8 = vpop.f32.mrf.mxu3  ;;  %v857_v18 = vld [vmem:[#allocation2 + $0x2f1] sm:$0xff] }
 0x32a   :  { %14274 = vst [vmem:[#allocation96_spill] sm:$0xff] %v10303_v57 }
 0x32b   :  { %v734_v20 = vld [vmem:[#allocation2 + $0x330] sm:$0xff]  ;;  %287 = vst [vmem:[#allocation2 + $0x339] sm:$0xff] %v10303_v57 }
 0x32c   :  { %v2719_v51 = vpop.f32.mrf.mxu2  ;;  %2990 = vmatmul.f32.gmra.mxu3 %v734_v20 }
 0x32d   :  { %v2720_v7 = vadd.f32 %v2719_v51, %v14271_v9  ;;  %v10300_v49 = vpop.f32.mrf.mxu0  ;;  %v14275_v51 = vld [vmem:[#allocation85_spill] sm:$0xff] }
 0x32e   :  { %14273 = vst [vmem:[#allocation106_spill] sm:$0xff] %v10300_v49  ;;  %v858_v49 = vld [vmem:[#allocation2 + $0x301] sm:$0xff] }
 0x32f   :  { %v10298_v60 = vadd.f32 %v10262_v16, %v2720_v7 }
 0x330   :  { %3184 = vmatmul.f32.gmra.mxu0 %v857_v18 }
 0x331   :  { %14272 = vst [vmem:[#allocation94_spill] sm:$0xff] %v10298_v60  ;;  %2769 = vmatmul.f32.gmra.mxu2 %v10258_v62  ;;  %3405 = vmatmul.f32.gmra.mxu1 %v989_v30  ;;  %v2943_v19 = vpop.f32.mrf.mxu3  ;;  %v14278_v60 = vld [vmem:[#allocation86_spill] sm:$0xff] }
 0x332   :  { %v735_v62 = vld [vmem:[#allocation2 + $0x338] sm:$0xff] }
 0x333   :  { %v990_v20 = vld [vmem:[#allocation2 + $0x332] sm:$0xff] }
 0x334   :  { %v2722_v53 = vpop.f32.mrf.mxu2  ;;  %2993 = vmatmul.f32.gmra.mxu3 %v735_v62 }
 0x335   :  { %v2723_v9 = vadd.f32 %v2722_v53, %v14275_v51  ;;  %v10310_v7 = vpop.f32.mrf.mxu0 }
 0x336   :  { %14277 = vst [vmem:[#allocation98_spill] sm:$0xff] %v10310_v7  ;;  %v14281_v7 = vld [vmem:[#allocation87_spill] sm:$0xff] }
 0x337   :  { %v10308_v16 = vadd.f32 %v10272_v21, %v2723_v9  ;;  %v859_v21 = vld [vmem:[#allocation2 + $0x309] sm:$0xff]  ;;  %v1185_v9 = vld [vmem:[#allocation2 + $0x31] sm:$0xff] }
 0x338   :  { %3187 = vmatmul.f32.gmra.mxu0 %v858_v49  ;;  %v991_v49 = vld [vmem:[#allocation2 + $0x33a] sm:$0xff] }
 0x339   :  { %14276 = vst [vmem:[#allocation109_spill] sm:$0xff] %v10308_v16  ;;  %2772 = vmatmul.f32.gmra.mxu2 %v10268_v31  ;;  %3408 = vmatmul.f32.gmra.mxu1 %v990_v20  ;;  %v2946_v13 = vpop.f32.mrf.mxu3 }
 0x33c   :  { %v2725_v18 = vpop.f32.mrf.mxu2  ;;  %3640 = vmatmul.f32.vlgmr.msra.gmra.mxu3 %v1185_v9 }
 0x33d   :  { %v2726_v15 = vadd.f32 %v2725_v18, %v14278_v60  ;;  %v10316_v51 = vpop.f32.mrf.mxu0 }
 0x33e   :  { %14280 = vst [vmem:[#allocation101_spill] sm:$0xff] %v10316_v51 }
 0x33f   :  { %v10314_v53 = vadd.f32 %v2934_v6, %v2726_v15  ;;  %v860_v6 = vld [vmem:[#allocation2 + $0x319] sm:$0xff] }
 0x340   :  { %3190 = vmatmul.f32.gmra.mxu0 %v859_v21  ;;  %v1186_v15 = vld [vmem:[#allocation2 + $0x39] sm:$0xff] }
 0x341   :  { %14279 = vst [vmem:[#allocation112_spill] sm:$0xff] %v10314_v53  ;;  %2775 = vmatmul.f32.gmra.mxu2 %v10278_v47  ;;  %3411 = vmatmul.f32.gmra.mxu1 %v991_v49  ;;  %v2949_v16 = vpop.f32.mrf.mxu3  ;;  %v14284_v47 = vld [vmem:[#allocation88_spill] sm:$0xff]  ;;  %v14287_v49 = vld [vmem:[#allocation89_spill] sm:$0xff] }
 0x344   :  { %v2728_v31 = vpop.f32.mrf.mxu2  ;;  %3643 = vmatmul.f32.gmra.mxu3 %v1186_v15 }
 0x345   :  { %v2729_v62 = vadd.f32 %v2728_v31, %v14281_v7  ;;  %v10322_v60 = vpop.f32.mrf.mxu0  ;;  %v861_v7 = vld [vmem:[#allocation2 + $0x321] sm:$0xff] }
 0x346   :  { %14283 = vst [vmem:[#allocation104_spill] sm:$0xff] %v10322_v60 }
 0x347   :  { %v10320_v40 = vadd.f32 %v2937_v38, %v2729_v62  ;;  %v1187_v38 = vld [vmem:[#allocation2 + $0x49] sm:$0xff] }
 0x348   :  { %3193 = vmatmul.f32.gmra.mxu0 %v860_v6 }
 0x349   :  { %14282 = vst [vmem:[#allocation115_spill] sm:$0xff] %v10320_v40  ;;  %2778 = vmatmul.f32.gmra.mxu2 %v987_v22  ;;  %v2952_v21 = vpop.f32.mrf.mxu3 }
 0x34c   :  { %v2731_v18 = vpop.f32.mrf.mxu2  ;;  %3646 = vmatmul.f32.gmra.mxu3 %v1187_v38 }
 0x34d   :  { %v2732_v20 = vadd.f32 %v2731_v18, %v14284_v47  ;;  %v10327_v51 = vpop.f32.mrf.mxu0  ;;  %v14290_v47 = vld [vmem:[#allocation91_spill] sm:$0xff] }
 0x34e   :  { %14286 = vst [vmem:[#allocation107_spill] sm:$0xff] %v10327_v51 }
 0x34f   :  { %v10325_v9 = vadd.f32 %v2940_v8, %v2732_v20  ;;  %v1188_v8 = vld [vmem:[#allocation2 + $0x51] sm:$0xff] }
 0x350   :  { %3196 = vmatmul.f32.gmra.mxu0 %v861_v7 }
 0x351   :  { %14285 = vst [vmem:[#allocation118_spill] sm:$0xff] %v10325_v9  ;;  %2781 = vmatmul.f32.gmra.mxu2 %v988_v59  ;;  %v2955_v22 = vpop.f32.mrf.mxu3  ;;  %v1057_v59 = vld [vmem:[#allocation2 + $0x30] sm:$0xff] }
 0x354   :  { %v2734_v31 = vpop.f32.mrf.mxu2  ;;  %3649 = vmatmul.f32.gmra.mxu3 %v1188_v8 }
 0x355   :  { %v2735_v62 = vadd.f32 %v2734_v31, %v14287_v49  ;;  %v10332_v15 = vpop.f32.mrf.mxu0 }
 0x356   :  { %14289 = vst [vmem:[#allocation110_spill] sm:$0xff] %v10332_v15 }
 0x357   :  { %v10330_v6 = vadd.f32 %v2943_v19, %v2735_v62  ;;  %v1189_v19 = vld [vmem:[#allocation2 + $0x61] sm:$0xff]  ;;  %v1058_v62 = vld [vmem:[#allocation2 + $0x38] sm:$0xff] }
 0x358   :  { %3199 = vmatmul.f32.gmra.mxu0 %v10293_v5 }
 0x359   :  { %14288 = vst [vmem:[#allocation121_spill] sm:$0xff] %v10330_v6  ;;  %2784 = vmatmul.f32.gmra.mxu2 %v989_v30  ;;  %v2958_v7 = vpop.f32.mrf.mxu3  ;;  %v14293_v30 = vld [vmem:[#allocation93_spill] sm:$0xff] }
 0x35c   :  { %v2737_v18 = vpop.f32.mrf.mxu2  ;;  %3652 = vmatmul.f32.gmra.mxu3 %v1189_v19 }
 0x35d   :  { %v2738_v20 = vadd.f32 %v2737_v18, %v14290_v47  ;;  %v10338_v38 = vpop.f32.mrf.mxu0  ;;  %v1313_v18 = vld [vmem:[#allocation2 + $0x32] sm:$0xff] }
 0x35e   :  { %14292 = vst [vmem:[#allocation113_spill] sm:$0xff] %v10338_v38 }
 0x35f   :  { %v10336_v51 = vadd.f32 %v2946_v13, %v2738_v20  ;;  %v1190_v13 = vld [vmem:[#allocation2 + $0x69] sm:$0xff] }
 0x360   :  { %3202 = vmatmul.f32.gmra.mxu0 %v10303_v57  ;;  %v14296_v20 = vld [vmem:[#allocation95_spill] sm:$0xff] }
 0x361   :  { %14291 = vst [vmem:[#allocation124_spill] sm:$0xff] %v10336_v51  ;;  %3431 = vmatmul.f32.vlgmr.msra.gmra.mxu2 %v1057_v59  ;;  %v2961_v5 = vpop.f32.mrf.mxu3  ;;  %v1059_v57 = vld [vmem:[#allocation2 + $0x48] sm:$0xff] }
 0x364   :  { %v2740_v31 = vpop.f32.mrf.mxu2  ;;  %3655 = vmatmul.f32.gmra.mxu3 %v1190_v13 }
 0x365   :  { %v2741_v49 = vadd.f32 %v2740_v31, %v14293_v30  ;;  %v10344_v15 = vpop.f32.mrf.mxu0  ;;  %v1314_v31 = vld [vmem:[#allocation2 + $0x3a] sm:$0xff] }
 0x366   :  { %14295 = vst [vmem:[#allocation116_spill] sm:$0xff] %v10344_v15 }
 0x367   :  { %v10342_v8 = vadd.f32 %v2949_v16, %v2741_v49  ;;  %v1191_v16 = vld [vmem:[#allocation2 + $0x79] sm:$0xff] }
 0x368   :  { %3849 = vmatmul.f32.vlgmr.msra.gmra.mxu0 %v1313_v18  ;;  %v14299_v49 = vld [vmem:[#allocation97_spill] sm:$0xff]  ;;  %v1060_v18 = vld [vmem:[#allocation2 + $0x50] sm:$0xff] }
 0x369   :  { %14294 = vst [vmem:[#allocation127_spill] sm:$0xff] %v10342_v8  ;;  %3434 = vmatmul.f32.gmra.mxu2 %v1058_v62  ;;  %v2964_v38 = vpop.f32.mrf.mxu3 }
 0x36c   :  { %v2743_v47 = vpop.f32.mrf.mxu2  ;;  %3658 = vmatmul.f32.gmra.mxu3 %v1191_v16 }
 0x36d   :  { %v2744_v59 = vadd.f32 %v2743_v47, %v14296_v20  ;;  %v10349_v51 = vpop.f32.mrf.mxu0  ;;  %v1315_v47 = vld [vmem:[#allocation2 + $0x4a] sm:$0xff] }
 0x36e   :  { %14298 = vst [vmem:[#allocation119_spill] sm:$0xff] %v10349_v51 }
 0x36f   :  { %v10347_v19 = vadd.f32 %v2952_v21, %v2744_v59  ;;  %v1192_v21 = vld [vmem:[#allocation2 + $0x81] sm:$0xff] }
 0x370   :  { %3852 = vmatmul.f32.gmra.mxu0 %v1314_v31  ;;  %v14302_v59 = vld [vmem:[#allocation99_spill] sm:$0xff]  ;;  %v1061_v31 = vld [vmem:[#allocation2 + $0x60] sm:$0xff] }
 0x371   :  { %14297 = vst [vmem:[#allocation129_spill] sm:$0xff] %v10347_v19  ;;  %3437 = vmatmul.f32.gmra.mxu2 %v1059_v57  ;;  %v2967_v15 = vpop.f32.mrf.mxu3 }
 0x374   :  { %v2746_v30 = vpop.f32.mrf.mxu2  ;;  %3661 = vmatmul.f32.gmra.mxu3 %v1192_v21 }
 0x375   :  { %v2747_v62 = vadd.f32 %v2746_v30, %v14299_v49  ;;  %v10354_v8 = vpop.f32.mrf.mxu0  ;;  %v1316_v30 = vld [vmem:[#allocation2 + $0x52] sm:$0xff] }
 0x376   :  { %14301 = vst [vmem:[#allocation122_spill] sm:$0xff] %v10354_v8 }
 0x377   :  { %v10352_v13 = vadd.f32 %v2955_v22, %v2747_v62  ;;  %v1193_v22 = vld [vmem:[#allocation2 + $0x91] sm:$0xff]  ;;  %v14305_v62 = vld [vmem:[#allocation102_spill] sm:$0xff] }
 0x378   :  { %3855 = vmatmul.f32.gmra.mxu0 %v1315_v47  ;;  %v1062_v47 = vld [vmem:[#allocation2 + $0x68] sm:$0xff] }
 0x379   :  { %14300 = vst [vmem:[#allocation131_spill] sm:$0xff] %v10352_v13  ;;  %3440 = vmatmul.f32.gmra.mxu2 %v1060_v18  ;;  %v2970_v51 = vpop.f32.mrf.mxu3 }
 0x37c   :  { %v2749_v20 = vpop.f32.mrf.mxu2  ;;  %3664 = vmatmul.f32.gmra.mxu3 %v1193_v22 }
 0x37d   :  { %v2750_v57 = vadd.f32 %v2749_v20, %v14302_v59  ;;  %v10359_v19 = vpop.f32.mrf.mxu0  ;;  %v1317_v20 = vld [vmem:[#allocation2 + $0x62] sm:$0xff] }
 0x37e   :  { %14304 = vst [vmem:[#allocation125_spill] sm:$0xff] %v10359_v19 }
 0x37f   :  { %v10357_v16 = vadd.f32 %v2958_v7, %v2750_v57  ;;  %v1194_v7 = vld [vmem:[#allocation2 + $0x99] sm:$0xff] }
 0x380   :  { %3858 = vmatmul.f32.gmra.mxu0 %v1316_v30  ;;  %v14308_v57 = vld [vmem:[#allocation105_spill] sm:$0xff] }
 0x381   :  { %14303 = vst [vmem:[#allocation133_spill] sm:$0xff] %v10357_v16  ;;  %3443 = vmatmul.f32.gmra.mxu2 %v1061_v31  ;;  %v2973_v8 = vpop.f32.mrf.mxu3  ;;  %v1063_v30 = vld [vmem:[#allocation2 + $0x78] sm:$0xff] }
 0x384   :  { %v2752_v49 = vpop.f32.mrf.mxu2  ;;  %3667 = vmatmul.f32.gmra.mxu3 %v1194_v7 }
 0x385   :  { %v2753_v18 = vadd.f32 %v2752_v49, %v14305_v62  ;;  %v10364_v13 = vpop.f32.mrf.mxu0  ;;  %v1318_v49 = vld [vmem:[#allocation2 + $0x6a] sm:$0xff] }
 0x386   :  { %14307 = vst [vmem:[#allocation44_spill] sm:$0xff] %v10364_v13 }
 0x387   :  { %v10362_v21 = vadd.f32 %v2961_v5, %v2753_v18  ;;  %v1195_v5 = vld [vmem:[#allocation2 + $0xa9] sm:$0xff] }
 0x388   :  { %3861 = vmatmul.f32.gmra.mxu0 %v1317_v20  ;;  %v14311_v18 = vld [vmem:[#allocation108_spill] sm:$0xff]  ;;  %v1064_v20 = vld [vmem:[#allocation2 + $0x80] sm:$0xff] }
 0x389   :  { %14306 = vst [vmem:[#allocation53_spill] sm:$0xff] %v10362_v21  ;;  %3446 = vmatmul.f32.gmra.mxu2 %v1062_v47  ;;  %v2976_v19 = vpop.f32.mrf.mxu3 }
 0x38c   :  { %v2755_v59 = vpop.f32.mrf.mxu2  ;;  %3670 = vmatmul.f32.gmra.mxu3 %v1195_v5 }
 0x38d   :  { %v2756_v31 = vadd.f32 %v2755_v59, %v14308_v57  ;;  %v10369_v16 = vpop.f32.mrf.mxu0  ;;  %v1319_v59 = vld [vmem:[#allocation2 + $0x7a] sm:$0xff] }
 0x38e   :  { %14310 = vst [vmem:[#allocation48_spill] sm:$0xff] %v10369_v16 }
 0x38f   :  { %v10367_v22 = vadd.f32 %v2964_v38, %v2756_v31  ;;  %v1196_v38 = vld [vmem:[#allocation2 + $0xb1] sm:$0xff]  ;;  %v14314_v31 = vld [vmem:[#allocation111_spill] sm:$0xff] }
 0x390   :  { %3864 = vmatmul.f32.gmra.mxu0 %v1318_v49  ;;  %v1065_v49 = vld [vmem:[#allocation2 + $0x90] sm:$0xff] }
 0x391   :  { %14309 = vst [vmem:[#allocation57_spill] sm:$0xff] %v10367_v22  ;;  %3449 = vmatmul.f32.gmra.mxu2 %v1063_v30  ;;  %v2979_v13 = vpop.f32.mrf.mxu3 }
 0x394   :  { %v2758_v62 = vpop.f32.mrf.mxu2  ;;  %3673 = vmatmul.f32.gmra.mxu3 %v1196_v38 }
 0x395   :  { %v2759_v47 = vadd.f32 %v2758_v62, %v14311_v18  ;;  %v10374_v21 = vpop.f32.mrf.mxu0  ;;  %v1320_v62 = vld [vmem:[#allocation2 + $0x82] sm:$0xff] }
 0x396   :  { %14313 = vst [vmem:[#allocation64_spill] sm:$0xff] %v10374_v21 }
 0x397   :  { %v10372_v7 = vadd.f32 %v2967_v15, %v2759_v47  ;;  %v1197_v15 = vld [vmem:[#allocation2 + $0xc1] sm:$0xff] }
 0x398   :  { %3867 = vmatmul.f32.gmra.mxu0 %v1319_v59  ;;  %v14317_v47 = vld [vmem:[#allocation114_spill] sm:$0xff]  ;;  %v1066_v59 = vld [vmem:[#allocation2 + $0x98] sm:$0xff] }
 0x399   :  { %14312 = vst [vmem:[#allocation61_spill] sm:$0xff] %v10372_v7  ;;  %3452 = vmatmul.f32.gmra.mxu2 %v1064_v20  ;;  %v2982_v16 = vpop.f32.mrf.mxu3 }
 0x39c   :  { %v2761_v57 = vpop.f32.mrf.mxu2  ;;  %3676 = vmatmul.f32.gmra.mxu3 %v1197_v15 }
 0x39d   :  { %v2762_v30 = vadd.f32 %v2761_v57, %v14314_v31  ;;  %v10379_v22 = vpop.f32.mrf.mxu0  ;;  %v1321_v57 = vld [vmem:[#allocation2 + $0x92] sm:$0xff] }
 0x39e   :  { %14316 = vst [vmem:[#allocation70_spill] sm:$0xff] %v10379_v22 }
 0x39f   :  { %v10377_v5 = vadd.f32 %v2970_v51, %v2762_v30  ;;  %v1198_v51 = vld [vmem:[#allocation2 + $0xc9] sm:$0xff]  ;;  %v14320_v30 = vld [vmem:[#allocation117_spill] sm:$0xff] }
 0x3a0   :  { %3870 = vmatmul.f32.gmra.mxu0 %v1320_v62  ;;  %v1067_v62 = vld [vmem:[#allocation2 + $0xa8] sm:$0xff] }
 0x3a1   :  { %14315 = vst [vmem:[#allocation67_spill] sm:$0xff] %v10377_v5  ;;  %3455 = vmatmul.f32.gmra.mxu2 %v1065_v49  ;;  %v2985_v21 = vpop.f32.mrf.mxu3 }
 0x3a4   :  { %v2764_v18 = vpop.f32.mrf.mxu2  ;;  %3679 = vmatmul.f32.gmra.mxu3 %v1198_v51 }
 0x3a5   :  { %v2765_v20 = vadd.f32 %v2764_v18, %v14317_v47  ;;  %v10384_v7 = vpop.f32.mrf.mxu0  ;;  %v1322_v18 = vld [vmem:[#allocation2 + $0x9a] sm:$0xff] }
 0x3a6   :  { %14319 = vst [vmem:[#allocation76_spill] sm:$0xff] %v10384_v7 }
 0x3a7   :  { %v10382_v38 = vadd.f32 %v2973_v8, %v2765_v20  ;;  %v1199_v8 = vld [vmem:[#allocation2 + $0xd9] sm:$0xff]  ;;  %v14323_v20 = vld [vmem:[#allocation120_spill] sm:$0xff] }
 0x3a8   :  { %3873 = vmatmul.f32.gmra.mxu0 %v1321_v57  ;;  %v1068_v57 = vld [vmem:[#allocation2 + $0xb0] sm:$0xff] }
 0x3a9   :  { %14318 = vst [vmem:[#allocation73_spill] sm:$0xff] %v10382_v38  ;;  %3458 = vmatmul.f32.gmra.mxu2 %v1066_v59  ;;  %v2988_v22 = vpop.f32.mrf.mxu3 }
 0x3ac   :  { %v2767_v31 = vpop.f32.mrf.mxu2  ;;  %3682 = vmatmul.f32.gmra.mxu3 %v1199_v8 }
 0x3ad   :  { %v2768_v49 = vadd.f32 %v2767_v31, %v14320_v30  ;;  %v10389_v5 = vpop.f32.mrf.mxu0  ;;  %v1323_v31 = vld [vmem:[#allocation2 + $0xaa] sm:$0xff] }
 0x3ae   :  { %14322 = vst [vmem:[#allocation82_spill] sm:$0xff] %v10389_v5 }
 0x3af   :  { %v10387_v15 = vadd.f32 %v2976_v19, %v2768_v49  ;;  %v1200_v19 = vld [vmem:[#allocation2 + $0xe1] sm:$0xff] }
 0x3b0   :  { %3876 = vmatmul.f32.gmra.mxu0 %v1322_v18  ;;  %v14326_v49 = vld [vmem:[#allocation123_spill] sm:$0xff]  ;;  %v1069_v18 = vld [vmem:[#allocation2 + $0xc0] sm:$0xff] }
 0x3b1   :  { %14321 = vst [vmem:[#allocation79_spill] sm:$0xff] %v10387_v15  ;;  %3461 = vmatmul.f32.gmra.mxu2 %v1067_v62  ;;  %v2991_v7 = vpop.f32.mrf.mxu3 }
 0x3b4   :  { %v2770_v47 = vpop.f32.mrf.mxu2  ;;  %3685 = vmatmul.f32.gmra.mxu3 %v1200_v19 }
 0x3b5   :  { %v2771_v59 = vadd.f32 %v2770_v47, %v14323_v20  ;;  %v10394_v38 = vpop.f32.mrf.mxu0  ;;  %v1324_v47 = vld [vmem:[#allocation2 + $0xb2] sm:$0xff] }
 0x3b6   :  { %14325 = vst [vmem:[#allocation86_spill] sm:$0xff] %v10394_v38 }
 0x3b7   :  { %v10392_v51 = vadd.f32 %v2979_v13, %v2771_v59  ;;  %v1201_v13 = vld [vmem:[#allocation2 + $0xf1] sm:$0xff]  ;;  %v14329_v59 = vld [vmem:[#allocation126_spill] sm:$0xff] }
 0x3b8   :  { %3879 = vmatmul.f32.gmra.mxu0 %v1323_v31  ;;  %v1070_v31 = vld [vmem:[#allocation2 + $0xc8] sm:$0xff] }
 0x3b9   :  { %14324 = vst [vmem:[#allocation85_spill] sm:$0xff] %v10392_v51  ;;  %3464 = vmatmul.f32.gmra.mxu2 %v1068_v57  ;;  %v2994_v5 = vpop.f32.mrf.mxu3 }
 0x3bc   :  { %v2773_v30 = vpop.f32.mrf.mxu2  ;;  %3688 = vmatmul.f32.gmra.mxu3 %v1201_v13 }
 0x3bd   :  { %v2774_v62 = vadd.f32 %v2773_v30, %v14326_v49  ;;  %v10399_v15 = vpop.f32.mrf.mxu0  ;;  %v1325_v30 = vld [vmem:[#allocation2 + $0xc2] sm:$0xff] }
 0x3be   :  { %14328 = vst [vmem:[#allocation88_spill] sm:$0xff] %v10399_v15 }
 0x3bf   :  { %v10397_v8 = vadd.f32 %v2982_v16, %v2774_v62  ;;  %v1202_v16 = vld [vmem:[#allocation2 + $0xf9] sm:$0xff]  ;;  %v14332_v62 = vld [vmem:[#allocation128_spill] sm:$0xff] }
 0x3c0   :  { %3882 = vmatmul.f32.gmra.mxu0 %v1324_v47  ;;  %v1071_v47 = vld [vmem:[#allocation2 + $0xd8] sm:$0xff] }
 0x3c1   :  { %14327 = vst [vmem:[#allocation87_spill] sm:$0xff] %v10397_v8  ;;  %3467 = vmatmul.f32.gmra.mxu2 %v1069_v18  ;;  %v3641_v38 = vpop.f32.mrf.mxu3 }
 0x3c4   :  { %v2776_v20 = vpop.f32.mrf.mxu2  ;;  %3691 = vmatmul.f32.gmra.mxu3 %v1202_v16 }
 0x3c5   :  { %v2777_v57 = vadd.f32 %v2776_v20, %v14329_v59  ;;  %v10404_v51 = vpop.f32.mrf.mxu0  ;;  %v1326_v20 = vld [vmem:[#allocation2 + $0xca] sm:$0xff] }
 0x3c6   :  { %14331 = vst [vmem:[#allocation91_spill] sm:$0xff] %v10404_v51  ;;  %v1072_v51 = vld [vmem:[#allocation2 + $0xe0] sm:$0xff] }
 0x3c7   :  { %v10402_v19 = vadd.f32 %v2985_v21, %v2777_v57  ;;  %v1203_v21 = vld [vmem:[#allocation2 + $0x109] sm:$0xff]  ;;  %v14335_v57 = vld [vmem:[#allocation130_spill] sm:$0xff] }
 0x3c8   :  { %3885 = vmatmul.f32.gmra.mxu0 %v1325_v30 }
 0x3c9   :  { %14330 = vst [vmem:[#allocation89_spill] sm:$0xff] %v10402_v19  ;;  %3470 = vmatmul.f32.gmra.mxu2 %v1070_v31  ;;  %v3644_v15 = vpop.f32.mrf.mxu3 }
 0x3cc   :  { %v2779_v49 = vpop.f32.mrf.mxu2  ;;  %3694 = vmatmul.f32.gmra.mxu3 %v1203_v21 }
 0x3cd   :  { %v2780_v18 = vadd.f32 %v2779_v49, %v14332_v62  ;;  %v10409_v8 = vpop.f32.mrf.mxu0  ;;  %v1327_v49 = vld [vmem:[#allocation2 + $0xda] sm:$0xff] }
 0x3ce   :  { %14334 = vst [vmem:[#allocation95_spill] sm:$0xff] %v10409_v8 }
 0x3cf   :  { %v10407_v13 = vadd.f32 %v2988_v22, %v2780_v18  ;;  %v1204_v22 = vld [vmem:[#allocation2 + $0x111] sm:$0xff] }
 0x3d0   :  { %3888 = vmatmul.f32.gmra.mxu0 %v1326_v20  ;;  %v14338_v18 = vld [vmem:[#allocation132_spill] sm:$0xff] }
 0x3d1   :  { %14333 = vst [vmem:[#allocation93_spill] sm:$0xff] %v10407_v13  ;;  %3473 = vmatmul.f32.gmra.mxu2 %v1071_v47  ;;  %v3647_v30 = vpop.f32.mrf.mxu3  ;;  %v1073_v20 = vld [vmem:[#allocation2 + $0xf0] sm:$0xff] }
 0x3d4   :  { %v2782_v59 = vpop.f32.mrf.mxu2  ;;  %3697 = vmatmul.f32.gmra.mxu3 %v1204_v22 }
 0x3d5   :  { %v2783_v31 = vadd.f32 %v2782_v59, %v14335_v57  ;;  %v10414_v19 = vpop.f32.mrf.mxu0  ;;  %v1328_v59 = vld [vmem:[#allocation2 + $0xe2] sm:$0xff] }
 0x3d6   :  { %14337 = vst [vmem:[#allocation99_spill] sm:$0xff] %v10414_v19 }
 0x3d7   :  { %v10412_v16 = vadd.f32 %v2991_v7, %v2783_v31  ;;  %v1205_v7 = vld [vmem:[#allocation2 + $0x121] sm:$0xff]  ;;  %v1074_v31 = vld [vmem:[#allocation2 + $0xf8] sm:$0xff] }
 0x3d8   :  { %3891 = vmatmul.f32.gmra.mxu0 %v1327_v49 }
 0x3d9   :  { %14336 = vst [vmem:[#allocation97_spill] sm:$0xff] %v10412_v16  ;;  %3476 = vmatmul.f32.gmra.mxu2 %v1072_v51  ;;  %v3650_v8 = vpop.f32.mrf.mxu3 }
 0x3dc   :  { %v2785_v62 = vpop.f32.mrf.mxu2  ;;  %3700 = vmatmul.f32.gmra.mxu3 %v1205_v7 }
 0x3dd   :  { %v2786_v47 = vadd.f32 %v2785_v62, %v14338_v18  ;;  %v10419_v13 = vpop.f32.mrf.mxu0  ;;  %v1329_v62 = vld [vmem:[#allocation2 + $0xf2] sm:$0xff] }
 0x3de   :  { %14340 = vst [vmem:[#allocation105_spill] sm:$0xff] %v10419_v13 }
 0x3df   :  { %v10417_v21 = vadd.f32 %v2994_v5, %v2786_v47  ;;  %v1206_v5 = vld [vmem:[#allocation2 + $0x129] sm:$0xff] }
 0x3e0   :  { %3894 = vmatmul.f32.gmra.mxu0 %v1328_v59 }
 0x3e1   :  { %14339 = vst [vmem:[#allocation102_spill] sm:$0xff] %v10417_v21  ;;  %3479 = vmatmul.f32.gmra.mxu2 %v1073_v20  ;;  %v3653_v49 = vpop.f32.mrf.mxu3  ;;  %v1075_v20 = vld [vmem:[#allocation2 + $0x108] sm:$0xff] }
 0x3e4   :  { %v3432_v57 = vpop.f32.mrf.mxu2  ;;  %3703 = vmatmul.f32.gmra.mxu3 %v1206_v5 }
 0x3e5   :  { %v3433_v51 = vadd.f32 %v3432_v57, %v9789_v26  ;;  %v10424_v19 = vpop.f32.mrf.mxu0  ;;  %v1330_v26 = vld [vmem:[#allocation2 + $0xfa] sm:$0xff] }
 0x3e7   :  { %v10422_v22 = vadd.f32 %v3641_v38, %v3433_v51  ;;  %v1207_v38 = vld [vmem:[#allocation2 + $0x139] sm:$0xff] }
 0x3e8   :  { %3897 = vmatmul.f32.gmra.mxu0 %v1329_v62 }
 0x3e9   :  { %3482 = vmatmul.f32.gmra.mxu2 %v1074_v31  ;;  %v3656_v59 = vpop.f32.mrf.mxu3  ;;  %v1076_v31 = vld [vmem:[#allocation2 + $0x110] sm:$0xff] }
 0x3ec   :  { %v3435_v18 = vpop.f32.mrf.mxu2  ;;  %3706 = vmatmul.f32.gmra.mxu3 %v1207_v38 }
 0x3ed   :  { %v3436_v47 = vadd.f32 %v3435_v18, %v9801_v12  ;;  %v10429_v13 = vpop.f32.mrf.mxu0  ;;  %v1331_v12 = vld [vmem:[#allocation2 + $0x10a] sm:$0xff] }
 0x3ef   :  { %v10427_v7 = vadd.f32 %v3644_v15, %v3436_v47  ;;  %v1208_v15 = vld [vmem:[#allocation2 + $0x141] sm:$0xff] }
 0x3f0   :  { %3900 = vmatmul.f32.gmra.mxu0 %v1330_v26 }
 0x3f1   :  { %3485 = vmatmul.f32.gmra.mxu2 %v1075_v20  ;;  %v3659_v62 = vpop.f32.mrf.mxu3  ;;  %v1077_v20 = vld [vmem:[#allocation2 + $0x120] sm:$0xff] }
 0x3f4   :  { %v3438_v57 = vpop.f32.mrf.mxu2  ;;  %3709 = vmatmul.f32.gmra.mxu3 %v1208_v15 }
 0x3f5   :  { %v3439_v51 = vadd.f32 %v3438_v57, %v9815_v10  ;;  %v10434_v21 = vpop.f32.mrf.mxu0  ;;  %v1332_v10 = vld [vmem:[#allocation2 + $0x112] sm:$0xff] }
 0x3f7   :  { %v10432_v5 = vadd.f32 %v3647_v30, %v3439_v51  ;;  %v1209_v30 = vld [vmem:[#allocation2 + $0x151] sm:$0xff] }
 0x3f8   :  { %3903 = vmatmul.f32.gmra.mxu0 %v1331_v12 }
 0x3f9   :  { %3488 = vmatmul.f32.gmra.mxu2 %v1076_v31  ;;  %v3662_v26 = vpop.f32.mrf.mxu3  ;;  %v1078_v31 = vld [vmem:[#allocation2 + $0x128] sm:$0xff] }
 0x3fc   :  { %v3441_v18 = vpop.f32.mrf.mxu2  ;;  %3712 = vmatmul.f32.gmra.mxu3 %v1209_v30 }
 0x3fd   :  { %v3442_v47 = vadd.f32 %v3441_v18, %v9829_v41  ;;  %v10439_v16 = vpop.f32.mrf.mxu0  ;;  %v1333_v41 = vld [vmem:[#allocation2 + $0x122] sm:$0xff] }
 0x3ff   :  { %v10437_v38 = vadd.f32 %v3650_v8, %v3442_v47  ;;  %v1210_v8 = vld [vmem:[#allocation2 + $0x159] sm:$0xff] }
 0x400   :  { %3906 = vmatmul.f32.gmra.mxu0 %v1332_v10 }
 0x401   :  { %3491 = vmatmul.f32.gmra.mxu2 %v1077_v20  ;;  %v3665_v12 = vpop.f32.mrf.mxu3  ;;  %v1079_v20 = vld [vmem:[#allocation2 + $0x138] sm:$0xff] }
 0x404   :  { %v3444_v57 = vpop.f32.mrf.mxu2  ;;  %3715 = vmatmul.f32.gmra.mxu3 %v1210_v8 }
 0x405   :  { %v3445_v51 = vadd.f32 %v3444_v57, %v9843_v63  ;;  %v10444_v6 = vpop.f32.mrf.mxu0  ;;  %v1334_v63 = vld [vmem:[#allocation2 + $0x12a] sm:$0xff] }
 0x407   :  { %v10442_v15 = vadd.f32 %v3653_v49, %v3445_v51  ;;  %v1211_v49 = vld [vmem:[#allocation2 + $0x169] sm:$0xff] }
 0x408   :  { %3909 = vmatmul.f32.gmra.mxu0 %v1333_v41 }
 0x409   :  { %3494 = vmatmul.f32.gmra.mxu2 %v1078_v31  ;;  %v3668_v10 = vpop.f32.mrf.mxu3  ;;  %v1080_v31 = vld [vmem:[#allocation2 + $0x140] sm:$0xff] }
 0x40c   :  { %v3447_v18 = vpop.f32.mrf.mxu2  ;;  %3718 = vmatmul.f32.gmra.mxu3 %v1211_v49 }
 0x40d   :  { %v3448_v47 = vadd.f32 %v3447_v18, %v9857_v14  ;;  %v10449_v9 = vpop.f32.mrf.mxu0  ;;  %v1335_v14 = vld [vmem:[#allocation2 + $0x13a] sm:$0xff] }
 0x40f   :  { %v10447_v30 = vadd.f32 %v3656_v59, %v3448_v47  ;;  %v1212_v59 = vld [vmem:[#allocation2 + $0x171] sm:$0xff] }
 0x410   :  { %3912 = vmatmul.f32.gmra.mxu0 %v1334_v63 }
 0x411   :  { %3497 = vmatmul.f32.gmra.mxu2 %v1079_v20  ;;  %v3671_v41 = vpop.f32.mrf.mxu3  ;;  %v1081_v20 = vld [vmem:[#allocation2 + $0x150] sm:$0xff] }
 0x414   :  { %v3450_v57 = vpop.f32.mrf.mxu2  ;;  %3721 = vmatmul.f32.gmra.mxu3 %v1212_v59 }
 0x415   :  { %v3451_v51 = vadd.f32 %v3450_v57, %v9871_v37  ;;  %v10454_v60 = vpop.f32.mrf.mxu0  ;;  %v1336_v37 = vld [vmem:[#allocation2 + $0x142] sm:$0xff] }
 0x417   :  { %v10452_v8 = vadd.f32 %v3659_v62, %v3451_v51  ;;  %v1213_v62 = vld [vmem:[#allocation2 + $0x181] sm:$0xff] }
 0x418   :  { %3915 = vmatmul.f32.gmra.mxu0 %v1335_v14 }
 0x419   :  { %3500 = vmatmul.f32.gmra.mxu2 %v1080_v31  ;;  %v3674_v63 = vpop.f32.mrf.mxu3  ;;  %v1082_v31 = vld [vmem:[#allocation2 + $0x158] sm:$0xff] }
 0x41c   :  { %v3453_v18 = vpop.f32.mrf.mxu2  ;;  %3724 = vmatmul.f32.gmra.mxu3 %v1213_v62 }
 0x41d   :  { %v3454_v47 = vadd.f32 %v3453_v18, %v9886_v23  ;;  %v10459_v40 = vpop.f32.mrf.mxu0  ;;  %v1337_v23 = vld [vmem:[#allocation2 + $0x152] sm:$0xff] }
 0x41e   :  { %14341 = vst [vmem:[#allocation108_spill] sm:$0xff] %v10459_v40 }
 0x41f   :  { %v10457_v49 = vadd.f32 %v3662_v26, %v3454_v47  ;;  %v1214_v26 = vld [vmem:[#allocation2 + $0x189] sm:$0xff] }
 0x420   :  { %3918 = vmatmul.f32.gmra.mxu0 %v1336_v37 }
 0x421   :  { %3503 = vmatmul.f32.gmra.mxu2 %v1081_v20  ;;  %v3677_v14 = vpop.f32.mrf.mxu3  ;;  %v1083_v20 = vld [vmem:[#allocation2 + $0x168] sm:$0xff] }
 0x424   :  { %v3456_v57 = vpop.f32.mrf.mxu2  ;;  %3727 = vmatmul.f32.gmra.mxu3 %v1214_v26 }
 0x425   :  { %v3457_v51 = vadd.f32 %v3456_v57, %v9903_v45  ;;  %v10464_v53 = vpop.f32.mrf.mxu0  ;;  %v1338_v45 = vld [vmem:[#allocation2 + $0x15a] sm:$0xff] }
 0x426   :  { %14342 = vst [vmem:[#allocation111_spill] sm:$0xff] %v10464_v53 }
 0x427   :  { %v10462_v59 = vadd.f32 %v3665_v12, %v3457_v51  ;;  %v1215_v12 = vld [vmem:[#allocation2 + $0x199] sm:$0xff] }
 0x428   :  { %3921 = vmatmul.f32.gmra.mxu0 %v1337_v23 }
 0x429   :  { %3506 = vmatmul.f32.gmra.mxu2 %v1082_v31  ;;  %v3680_v37 = vpop.f32.mrf.mxu3  ;;  %v1084_v31 = vld [vmem:[#allocation2 + $0x170] sm:$0xff] }
 0x42c   :  { %v3459_v18 = vpop.f32.mrf.mxu2  ;;  %3730 = vmatmul.f32.gmra.mxu3 %v1215_v12 }
 0x42d   :  { %v3460_v47 = vadd.f32 %v3459_v18, %v9921_v43  ;;  %v10469_v40 = vpop.f32.mrf.mxu0  ;;  %v1339_v43 = vld [vmem:[#allocation2 + $0x16a] sm:$0xff] }
 0x42e   :  { %14343 = vst [vmem:[#allocation114_spill] sm:$0xff] %v10469_v40 }
 0x42f   :  { %v10467_v62 = vadd.f32 %v3668_v10, %v3460_v47  ;;  %v1216_v10 = vld [vmem:[#allocation2 + $0x1a1] sm:$0xff] }
 0x430   :  { %3924 = vmatmul.f32.gmra.mxu0 %v1338_v45 }
 0x431   :  { %3509 = vmatmul.f32.gmra.mxu2 %v1083_v20  ;;  %v3683_v23 = vpop.f32.mrf.mxu3  ;;  %v1085_v20 = vld [vmem:[#allocation2 + $0x180] sm:$0xff] }
 0x434   :  { %v3462_v57 = vpop.f32.mrf.mxu2  ;;  %3733 = vmatmul.f32.gmra.mxu3 %v1216_v10 }
 0x435   :  { %v3463_v51 = vadd.f32 %v3462_v57, %v9936_v56  ;;  %v10474_v53 = vpop.f32.mrf.mxu0  ;;  %v1340_v56 = vld [vmem:[#allocation2 + $0x172] sm:$0xff] }
 0x436   :  { %14344 = vst [vmem:[#allocation117_spill] sm:$0xff] %v10474_v53 }
 0x437   :  { %v10472_v26 = vadd.f32 %v3671_v41, %v3463_v51  ;;  %v1217_v41 = vld [vmem:[#allocation2 + $0x1e1] sm:$0xff] }
 0x438   :  { %3927 = vmatmul.f32.gmra.mxu0 %v1339_v43 }
 0x439   :  { %3512 = vmatmul.f32.gmra.mxu2 %v1084_v31  ;;  %v3686_v45 = vpop.f32.mrf.mxu3  ;;  %v1086_v31 = vld [vmem:[#allocation2 + $0x188] sm:$0xff] }
 0x43c   :  { %v3465_v18 = vpop.f32.mrf.mxu2  ;;  %3736 = vmatmul.f32.gmra.mxu3 %v1217_v41 }
 0x43d   :  { %v3466_v47 = vadd.f32 %v3465_v18, %v9947_v54  ;;  %v10479_v40 = vpop.f32.mrf.mxu0  ;;  %v1341_v54 = vld [vmem:[#allocation2 + $0x182] sm:$0xff] }
 0x43e   :  { %14345 = vst [vmem:[#allocation120_spill] sm:$0xff] %v10479_v40 }
 0x43f   :  { %v10477_v12 = vadd.f32 %v3674_v63, %v3466_v47  ;;  %v1218_v63 = vld [vmem:[#allocation2 + $0x1e9] sm:$0xff] }
 0x440   :  { %3930 = vmatmul.f32.gmra.mxu0 %v1340_v56 }
 0x441   :  { %3515 = vmatmul.f32.gmra.mxu2 %v1085_v20  ;;  %v3689_v43 = vpop.f32.mrf.mxu3  ;;  %v1087_v20 = vld [vmem:[#allocation2 + $0x198] sm:$0xff] }
 0x444   :  { %v3468_v57 = vpop.f32.mrf.mxu2  ;;  %3739 = vmatmul.f32.gmra.mxu3 %v1218_v63 }
 0x445   :  { %v3469_v51 = vadd.f32 %v3468_v57, %v9958_v1  ;;  %v10484_v53 = vpop.f32.mrf.mxu0  ;;  %v1342_v1 = vld [vmem:[#allocation2 + $0x18a] sm:$0xff] }
 0x447   :  { %v10482_v10 = vadd.f32 %v3677_v14, %v3469_v51  ;;  %v1219_v14 = vld [vmem:[#allocation2 + $0x1f9] sm:$0xff] }
 0x448   :  { %3933 = vmatmul.f32.gmra.mxu0 %v1341_v54 }
 0x449   :  { %3518 = vmatmul.f32.gmra.mxu2 %v1086_v31  ;;  %v3692_v56 = vpop.f32.mrf.mxu3 }
 0x44c   :  { %v3471_v18 = vpop.f32.mrf.mxu2  ;;  %3742 = vmatmul.f32.gmra.mxu3 %v1219_v14 }
 0x44d   :  { %v3472_v47 = vadd.f32 %v3471_v18, %v9975_v28  ;;  %v10489_v40 = vpop.f32.mrf.mxu0  ;;  %v1343_v28 = vld [vmem:[#allocation2 + $0x19a] sm:$0xff]  ;;  %v10496_v18 = vld [vmem:[#allocation2 + $0x8] sm:$0xff] }
 0x44e   :  { %14347 = vst [vmem:[#allocation126_spill] sm:$0xff] %v10489_v40 }
 0x44f   :  { %v10487_v41 = vadd.f32 %v3680_v37, %v3472_v47  ;;  %v1220_v37 = vld [vmem:[#allocation2 + $0x201] sm:$0xff] }
 0x450   :  { %3936 = vmatmul.f32.gmra.mxu0 %v1342_v1  ;;  %v1089_v1 = vld [vmem:[#allocation2 + $0x1e0] sm:$0xff] }
 0x451   :  { %14346 = vst [vmem:[#allocation123_spill] sm:$0xff] %v10487_v41  ;;  %3521 = vmatmul.f32.gmra.mxu2 %v1087_v20  ;;  %v3695_v31 = vpop.f32.mrf.mxu3 }
 0x454   :  { %v3474_v57 = vpop.f32.mrf.mxu2  ;;  %3745 = vmatmul.f32.gmra.mxu3 %v1220_v37 }
 0x455   :  { %v3475_v51 = vadd.f32 %v3474_v57, %v9990_v11  ;;  %v10494_v63 = vpop.f32.mrf.mxu0  ;;  %v1221_v57 = vld [vmem:[#allocation2 + $0x211] sm:$0xff] }
 0x456   :  { %14349 = vst [vmem:[#allocation130_spill] sm:$0xff] %v10494_v63 }
 0x457   :  { %v10492_v54 = vadd.f32 %v3683_v23, %v3475_v51  ;;  %v1344_v23 = vld [vmem:[#allocation2 + $0x1a2] sm:$0xff] }
 0x458   :  { %3939 = vmatmul.f32.gmra.mxu0 %v1343_v28  ;;  %v1090_v28 = vld [vmem:[#allocation2 + $0x1e8] sm:$0xff] }
 0x459   :  { %14348 = vst [vmem:[#allocation128_spill] sm:$0xff] %v10492_v54  ;;  %3524 = vmatmul.f32.gmra.mxu2 %v10496_v18  ;;  %v3698_v14 = vpop.f32.mrf.mxu3 }
 0x45c   :  { %v3477_v47 = vpop.f32.mrf.mxu2  ;;  %3748 = vmatmul.f32.gmra.mxu3 %v1221_v57 }
 0x45d   :  { %v3478_v20 = vadd.f32 %v3477_v47, %v10004_v3  ;;  %v10502_v11 = vpop.f32.mrf.mxu0  ;;  %v1345_v3 = vld [vmem:[#allocation2 + $0x1e2] sm:$0xff] }
 0x45e   :  { %14350 = vst [vmem:[#allocation132_spill] sm:$0xff] %v10502_v11 }
 0x45f   :  { %v10500_v40 = vadd.f32 %v3686_v45, %v3478_v20  ;;  %v1222_v45 = vld [vmem:[#allocation2 + $0x219] sm:$0xff] }
 0x460   :  { %3942 = vmatmul.f32.gmra.mxu0 %v1344_v23 }
 0x461   :  { %3527 = vmatmul.f32.gmra.mxu2 %v1089_v1  ;;  %v3701_v54 = vpop.f32.mrf.mxu3  ;;  %v1091_v1 = vld [vmem:[#allocation2 + $0x1f8] sm:$0xff] }
 0x464   :  { %v3480_v51 = vpop.f32.mrf.mxu2  ;;  %3751 = vmatmul.f32.gmra.mxu3 %v1222_v45 }
 0x465   :  { %v3481_v63 = vadd.f32 %v3480_v51, %v10017_v0  ;;  %v10507_v41 = vpop.f32.mrf.mxu0  ;;  %v1346_v0 = vld [vmem:[#allocation2 + $0x1ea] sm:$0xff] }
 0x466   :  { %14351 = vst [vmem:[#allocation137_spill] sm:$0xff] %v10507_v41 }
 0x467   :  { %v10505_v37 = vadd.f32 %v3689_v43, %v3481_v63  ;;  %v1223_v43 = vld [vmem:[#allocation2 + $0x229] sm:$0xff] }
 0x468   :  { %3945 = vmatmul.f32.gmra.mxu0 %v1345_v3 }
 0x469   :  { %3530 = vmatmul.f32.gmra.mxu2 %v1090_v28  ;;  %v3704_v23 = vpop.f32.mrf.mxu3  ;;  %v1092_v28 = vld [vmem:[#allocation2 + $0x200] sm:$0xff] }
 0x46c   :  { %v3483_v47 = vpop.f32.mrf.mxu2  ;;  %3754 = vmatmul.f32.gmra.mxu3 %v1223_v43 }
 0x46d   :  { %v3484_v20 = vadd.f32 %v3483_v47, %v10031_v34  ;;  %v10512_v11 = vpop.f32.mrf.mxu0  ;;  %v1347_v34 = vld [vmem:[#allocation2 + $0x1fa] sm:$0xff] }
 0x46e   :  { %14352 = vst [vmem:[#allocation138_spill] sm:$0xff] %v10512_v11  ;;  %v6329_v47 = vld [vmem:[#allocation9 + $0x78] sm:$0xff] }
 0x46f   :  { %v10510_v57 = vadd.f32 %v3692_v56, %v3484_v20  ;;  %v1224_v56 = vld [vmem:[#allocation2 + $0x231] sm:$0xff]  ;;  %6458 = vmatpush.msra.mxu1 %v6329_v47 }
 0x470   :  { %3948 = vmatmul.f32.gmra.mxu0 %v1346_v0  ;;  %v1093_v0 = vld [vmem:[#allocation2 + $0x210] sm:$0xff] }
 0x471   :  { %3533 = vmatmul.f32.gmra.mxu2 %v1091_v1  ;;  %v3707_v3 = vpop.f32.mrf.mxu3 }
 0x474   :  { %v3486_v63 = vpop.f32.mrf.mxu2  ;;  %3757 = vmatmul.f32.gmra.mxu3 %v1224_v56 }
 0x475   :  { %v3487_v51 = vadd.f32 %v3486_v63, %v10045_v2  ;;  %v10517_v41 = vpop.f32.mrf.mxu0  ;;  %v1225_v63 = vld [vmem:[#allocation2 + $0x241] sm:$0xff] }
 0x476   :  { %14353 = vst [vmem:[#allocation139_spill] sm:$0xff] %v10517_v41 }
 0x477   :  { %v10515_v45 = vadd.f32 %v3695_v31, %v3487_v51  ;;  %v1348_v31 = vld [vmem:[#allocation2 + $0x202] sm:$0xff] }
 0x478   :  { %3951 = vmatmul.f32.gmra.mxu0 %v1347_v34  ;;  %v1094_v34 = vld [vmem:[#allocation2 + $0x218] sm:$0xff] }
 0x479   :  { %3536 = vmatmul.f32.gmra.mxu2 %v1092_v28  ;;  %v3710_v43 = vpop.f32.mrf.mxu3 }
 0x47c   :  { %v3489_v20 = vpop.f32.mrf.mxu2  ;;  %3760 = vmatmul.f32.gmra.mxu3 %v1225_v63 }
 0x47d   :  { %v3490_v1 = vadd.f32 %v3489_v20, %v10059_v46  ;;  %v10522_v2 = vpop.f32.mrf.mxu0  ;;  %v1349_v46 = vld [vmem:[#allocation2 + $0x212] sm:$0xff] }
 0x47e   :  { %14354 = vst [vmem:[#allocation140_spill] sm:$0xff] %v10522_v2 }
 0x47f   :  { %v10520_v11 = vadd.f32 %v3698_v14, %v3490_v1  ;;  %v1226_v14 = vld [vmem:[#allocation2 + $0x249] sm:$0xff] }
 0x480   :  { %3954 = vmatmul.f32.gmra.mxu0 %v1348_v31 }
 0x481   :  { %3539 = vmatmul.f32.gmra.mxu2 %v1093_v0  ;;  %v3713_v56 = vpop.f32.mrf.mxu3  ;;  %v1095_v0 = vld [vmem:[#allocation2 + $0x228] sm:$0xff] }
 0x484   :  { %v3492_v51 = vpop.f32.mrf.mxu2  ;;  %3763 = vmatmul.f32.gmra.mxu3 %v1226_v14 }
 0x485   :  { %v3493_v28 = vadd.f32 %v3492_v51, %v10073_v24  ;;  %v10527_v47 = vpop.f32.mrf.mxu0  ;;  %v1350_v24 = vld [vmem:[#allocation2 + $0x21a] sm:$0xff] }
 0x486   :  { %14355 = vst [vmem:[#allocation141_spill] sm:$0xff] %v10527_v47 }
 0x487   :  { %v10525_v41 = vadd.f32 %v3701_v54, %v3493_v28  ;;  %v1227_v54 = vld [vmem:[#allocation2 + $0x259] sm:$0xff] }
 0x488   :  { %3957 = vmatmul.f32.gmra.mxu0 %v1349_v46 }
 0x489   :  { %3542 = vmatmul.f32.gmra.mxu2 %v1094_v34  ;;  %v3716_v31 = vpop.f32.mrf.mxu3  ;;  %v1096_v34 = vld [vmem:[#allocation2 + $0x230] sm:$0xff] }
 0x48c   :  { %v3495_v20 = vpop.f32.mrf.mxu2  ;;  %3766 = vmatmul.f32.gmra.mxu3 %v1227_v54 }
 0x48d   :  { %v3496_v1 = vadd.f32 %v3495_v20, %v10087_v17  ;;  %v10532_v2 = vpop.f32.mrf.mxu0  ;;  %v1351_v17 = vld [vmem:[#allocation2 + $0x22a] sm:$0xff] }
 0x48e   :  { %14356 = vst [vmem:[#allocation142_spill] sm:$0xff] %v10532_v2  ;;  %v6328_v20 = vld [vmem:[#allocation9 + $0x70] sm:$0xff] }
 0x48f   :  { %v10530_v63 = vadd.f32 %v3704_v23, %v3496_v1  ;;  %v1228_v23 = vld [vmem:[#allocation2 + $0x261] sm:$0xff]  ;;  %6459 = vmatpush.msra.mxu1 %v6328_v20 }
 0x490   :  { %3960 = vmatmul.f32.gmra.mxu0 %v1350_v24  ;;  %v1097_v24 = vld [vmem:[#allocation2 + $0x240] sm:$0xff] }
 0x491   :  { %3545 = vmatmul.f32.gmra.mxu2 %v1095_v0  ;;  %v3719_v46 = vpop.f32.mrf.mxu3 }
 0x494   :  { %v3498_v51 = vpop.f32.mrf.mxu2  ;;  %3769 = vmatmul.f32.gmra.mxu3 %v1228_v23 }
 0x495   :  { %v3499_v28 = vadd.f32 %v3498_v51, %v10101_v42  ;;  %v10537_v47 = vpop.f32.mrf.mxu0  ;;  %v1229_v51 = vld [vmem:[#allocation2 + $0x271] sm:$0xff] }
 0x496   :  { %14357 = vst [vmem:[#allocation143_spill] sm:$0xff] %v10537_v47 }
 0x497   :  { %v10535_v14 = vadd.f32 %v3707_v3, %v3499_v28  ;;  %v1352_v3 = vld [vmem:[#allocation2 + $0x232] sm:$0xff] }
 0x498   :  { %3963 = vmatmul.f32.gmra.mxu0 %v1351_v17  ;;  %v1098_v17 = vld [vmem:[#allocation2 + $0x248] sm:$0xff] }
 0x499   :  { %3548 = vmatmul.f32.gmra.mxu2 %v1096_v34  ;;  %v3722_v54 = vpop.f32.mrf.mxu3 }
 0x49c   :  { %v3501_v1 = vpop.f32.mrf.mxu2  ;;  %3772 = vmatmul.f32.gmra.mxu3 %v1229_v51 }
 0x49d   :  { %v3502_v0 = vadd.f32 %v3501_v1, %v10115_v58  ;;  %v10542_v42 = vpop.f32.mrf.mxu0  ;;  %v1353_v58 = vld [vmem:[#allocation2 + $0x242] sm:$0xff] }
 0x49e   :  { %14358 = vst [vmem:[#allocation144_spill] sm:$0xff] %v10542_v42 }
 0x49f   :  { %v10540_v2 = vadd.f32 %v3710_v43, %v3502_v0  ;;  %v1230_v43 = vld [vmem:[#allocation2 + $0x279] sm:$0xff] }
 0x4a0   :  { %3966 = vmatmul.f32.gmra.mxu0 %v1352_v3 }
 0x4a1   :  { %3551 = vmatmul.f32.gmra.mxu2 %v1097_v24  ;;  %v3725_v23 = vpop.f32.mrf.mxu3  ;;  %v1099_v24 = vld [vmem:[#allocation2 + $0x258] sm:$0xff] }
 0x4a4   :  { %v3504_v28 = vpop.f32.mrf.mxu2  ;;  %3775 = vmatmul.f32.gmra.mxu3 %v1230_v43 }
 0x4a5   :  { %v3505_v34 = vadd.f32 %v3504_v28, %v10127_v55  ;;  %v10547_v20 = vpop.f32.mrf.mxu0  ;;  %v1354_v55 = vld [vmem:[#allocation2 + $0x24a] sm:$0xff] }
 0x4a6   :  { %14359 = vst [vmem:[#allocation145_spill] sm:$0xff] %v10547_v20 }
 0x4a7   :  { %v10545_v47 = vadd.f32 %v3713_v56, %v3505_v34  ;;  %v1231_v56 = vld [vmem:[#allocation2 + $0x289] sm:$0xff] }
 0x4a8   :  { %3969 = vmatmul.f32.gmra.mxu0 %v1353_v58 }
 0x4a9   :  { %3554 = vmatmul.f32.gmra.mxu2 %v1098_v17  ;;  %v3728_v3 = vpop.f32.mrf.mxu3  ;;  %v1100_v17 = vld [vmem:[#allocation2 + $0x260] sm:$0xff] }
 0x4ac   :  { %v3507_v1 = vpop.f32.mrf.mxu2  ;;  %3778 = vmatmul.f32.gmra.mxu3 %v1231_v56 }
 0x4ad   :  { %v3508_v0 = vadd.f32 %v3507_v1, %v10139_v29  ;;  %v10552_v42 = vpop.f32.mrf.mxu0  ;;  %v1355_v29 = vld [vmem:[#allocation2 + $0x25a] sm:$0xff]  ;;  %v6327_v1 = vld [vmem:[#allocation9 + $0x68] sm:$0xff] }
 0x4ae   :  { %14360 = vst [vmem:[#allocation146_spill] sm:$0xff] %v10552_v42  ;;  %6460 = vmatpush.msra.mxu1 %v6327_v1 }
 0x4af   :  { %v10550_v51 = vadd.f32 %v3716_v31, %v3508_v0  ;;  %v1232_v31 = vld [vmem:[#allocation2 + $0x291] sm:$0xff] }
 0x4b0   :  { %3972 = vmatmul.f32.gmra.mxu0 %v1354_v55  ;;  %v1101_v55 = vld [vmem:[#allocation2 + $0x270] sm:$0xff] }
 0x4b1   :  { %3557 = vmatmul.f32.gmra.mxu2 %v1099_v24  ;;  %v3731_v58 = vpop.f32.mrf.mxu3 }
 0x4b4   :  { %v3510_v28 = vpop.f32.mrf.mxu2  ;;  %3781 = vmatmul.f32.gmra.mxu3 %v1232_v31 }
 0x4b5   :  { %v3511_v34 = vadd.f32 %v3510_v28, %v10151_v48  ;;  %v10557_v20 = vpop.f32.mrf.mxu0  ;;  %v1233_v28 = vld [vmem:[#allocation2 + $0x2a1] sm:$0xff] }
 0x4b6   :  { %14361 = vst [vmem:[#allocation147_spill] sm:$0xff] %v10557_v20 }
 0x4b7   :  { %v10555_v43 = vadd.f32 %v3719_v46, %v3511_v34  ;;  %v1356_v46 = vld [vmem:[#allocation2 + $0x262] sm:$0xff] }
 0x4b8   :  { %3975 = vmatmul.f32.gmra.mxu0 %v1355_v29  ;;  %v1102_v29 = vld [vmem:[#allocation2 + $0x278] sm:$0xff] }
 0x4b9   :  { %3560 = vmatmul.f32.gmra.mxu2 %v1100_v17  ;;  %v3734_v56 = vpop.f32.mrf.mxu3 }
 0x4bc   :  { %v3513_v0 = vpop.f32.mrf.mxu2  ;;  %3784 = vmatmul.f32.gmra.mxu3 %v1233_v28 }
 0x4bd   :  { %v3514_v24 = vadd.f32 %v3513_v0, %v10162_v52  ;;  %v10562_v48 = vpop.f32.mrf.mxu0  ;;  %v1357_v52 = vld [vmem:[#allocation2 + $0x272] sm:$0xff] }
 0x4be   :  { %14362 = vst [vmem:[#allocation148_spill] sm:$0xff] %v10562_v48 }
 0x4bf   :  { %v10560_v42 = vadd.f32 %v3722_v54, %v3514_v24  ;;  %v1234_v54 = vld [vmem:[#allocation2 + $0x2a9] sm:$0xff] }
 0x4c0   :  { %3978 = vmatmul.f32.gmra.mxu0 %v1356_v46 }
 0x4c1   :  { %3563 = vmatmul.f32.gmra.mxu2 %v1101_v55  ;;  %v3737_v31 = vpop.f32.mrf.mxu3  ;;  %v1103_v55 = vld [vmem:[#allocation2 + $0x288] sm:$0xff] }
 0x4c4   :  { %v3516_v34 = vpop.f32.mrf.mxu2  ;;  %3787 = vmatmul.f32.gmra.mxu3 %v1234_v54 }
 0x4c5   :  { %v3517_v17 = vadd.f32 %v3516_v34, %v10173_v25  ;;  %v10567_v1 = vpop.f32.mrf.mxu0  ;;  %v1358_v25 = vld [vmem:[#allocation2 + $0x27a] sm:$0xff] }
 0x4c6   :  { %14363 = vst [vmem:[#allocation149_spill] sm:$0xff] %v10567_v1 }
 0x4c7   :  { %v10565_v20 = vadd.f32 %v3725_v23, %v3517_v17  ;;  %v1235_v23 = vld [vmem:[#allocation2 + $0x2b9] sm:$0xff] }
 0x4c8   :  { %3981 = vmatmul.f32.gmra.mxu0 %v1357_v52 }
 0x4c9   :  { %3566 = vmatmul.f32.gmra.mxu2 %v1102_v29  ;;  %v3740_v46 = vpop.f32.mrf.mxu3  ;;  %v1104_v29 = vld [vmem:[#allocation2 + $0x290] sm:$0xff] }
 0x4cc   :  { %v3519_v0 = vpop.f32.mrf.mxu2  ;;  %3790 = vmatmul.f32.gmra.mxu3 %v1235_v23 }
 0x4cd   :  { %v3520_v24 = vadd.f32 %v3519_v0, %v10184_v36  ;;  %v10572_v48 = vpop.f32.mrf.mxu0  ;;  %v1359_v36 = vld [vmem:[#allocation2 + $0x28a] sm:$0xff]  ;;  %v6326_v0 = vld [vmem:[#allocation9 + $0x60] sm:$0xff] }
 0x4ce   :  { %14364 = vst [vmem:[#allocation150_spill] sm:$0xff] %v10572_v48  ;;  %6461 = vmatpush.msra.mxu1 %v6326_v0 }
 0x4cf   :  { %v10570_v28 = vadd.f32 %v3728_v3, %v3520_v24  ;;  %v1236_v3 = vld [vmem:[#allocation2 + $0x2c1] sm:$0xff] }
 0x4d0   :  { %3984 = vmatmul.f32.gmra.mxu0 %v1358_v25  ;;  %v1105_v25 = vld [vmem:[#allocation2 + $0x2a0] sm:$0xff] }
 0x4d1   :  { %3569 = vmatmul.f32.gmra.mxu2 %v1103_v55  ;;  %v3743_v52 = vpop.f32.mrf.mxu3 }
 0x4d4   :  { %v3522_v34 = vpop.f32.mrf.mxu2  ;;  %3793 = vmatmul.f32.gmra.mxu3 %v1236_v3 }
 0x4d5   :  { %v3523_v17 = vadd.f32 %v3522_v34, %v10195_v61  ;;  %v10577_v1 = vpop.f32.mrf.mxu0  ;;  %v1237_v34 = vld [vmem:[#allocation2 + $0x2d1] sm:$0xff] }
 0x4d6   :  { %14365 = vst [vmem:[#allocation151_spill] sm:$0xff] %v10577_v1 }
 0x4d7   :  { %v10575_v54 = vadd.f32 %v3731_v58, %v3523_v17  ;;  %v1360_v58 = vld [vmem:[#allocation2 + $0x292] sm:$0xff] }
 0x4d8   :  { %3987 = vmatmul.f32.gmra.mxu0 %v1359_v36  ;;  %v1106_v36 = vld [vmem:[#allocation2 + $0x2a8] sm:$0xff] }
 0x4d9   :  { %3572 = vmatmul.f32.gmra.mxu2 %v1104_v29  ;;  %v3746_v23 = vpop.f32.mrf.mxu3 }
 0x4dc   :  { %v3525_v24 = vpop.f32.mrf.mxu2  ;;  %3796 = vmatmul.f32.gmra.mxu3 %v1237_v34 }
 0x4dd   :  { %v3526_v55 = vadd.f32 %v3525_v24, %v10206_v44  ;;  %v10582_v61 = vpop.f32.mrf.mxu0  ;;  %v1361_v44 = vld [vmem:[#allocation2 + $0x2a2] sm:$0xff] }
 0x4de   :  { %14366 = vst [vmem:[#allocation152_spill] sm:$0xff] %v10582_v61 }
 0x4df   :  { %v10580_v48 = vadd.f32 %v3734_v56, %v3526_v55  ;;  %v1238_v56 = vld [vmem:[#allocation2 + $0x2d9] sm:$0xff] }
 0x4e0   :  { %3990 = vmatmul.f32.gmra.mxu0 %v1360_v58 }
 0x4e1   :  { %3575 = vmatmul.f32.gmra.mxu2 %v1105_v25  ;;  %v3749_v3 = vpop.f32.mrf.mxu3  ;;  %v1107_v25 = vld [vmem:[#allocation2 + $0x2b8] sm:$0xff] }
 0x4e4   :  { %v3528_v17 = vpop.f32.mrf.mxu2  ;;  %3799 = vmatmul.f32.gmra.mxu3 %v1238_v56 }
 0x4e5   :  { %v3529_v29 = vadd.f32 %v3528_v17, %v10217_v50  ;;  %v10587_v0 = vpop.f32.mrf.mxu0  ;;  %v1362_v50 = vld [vmem:[#allocation2 + $0x2aa] sm:$0xff] }
 0x4e6   :  { %14367 = vst [vmem:[#allocation153_spill] sm:$0xff] %v10587_v0  ;;  %v1239_v17 = vld [vmem:[#allocation2 + $0x2e9] sm:$0xff] }
 0x4e7   :  { %v10585_v1 = vadd.f32 %v3737_v31, %v3529_v29  ;;  %v10594_v31 = vpop.f32.mrf.mxu1 }
 0x4e8   :  { %3993 = vmatmul.f32.gmra.mxu0 %v1361_v44  ;;  %14368 = vst [vmem:[#allocation154_spill] sm:$0xff] %v10594_v31  ;;  %v1108_v44 = vld [vmem:[#allocation2 + $0x2c0] sm:$0xff]  ;;  %v1109_v31 = vld [vmem:[#allocation2 + $0x2d0] sm:$0xff] }
 0x4e9   :  { %3578 = vmatmul.f32.gmra.mxu2 %v1106_v36  ;;  %v3752_v58 = vpop.f32.mrf.mxu3 }
 0x4ec   :  { %v3531_v24 = vpop.f32.mrf.mxu2  ;;  %3802 = vmatmul.f32.gmra.mxu3 %v1239_v17 }
 0x4ed   :  { %v3532_v55 = vadd.f32 %v3531_v24, %v10226_v39  ;;  %v10592_v61 = vpop.f32.mrf.mxu0  ;;  %v1240_v24 = vld [vmem:[#allocation2 + $0x2f1] sm:$0xff] }
 0x4ef   :  { %v10590_v34 = vadd.f32 %v3740_v46, %v3532_v55  ;;  %v1363_v46 = vld [vmem:[#allocation2 + $0x2ba] sm:$0xff] }
 0x4f0   :  { %3996 = vmatmul.f32.gmra.mxu0 %v1362_v50  ;;  %v6325_v55 = vld [vmem:[#allocation9 + $0x58] sm:$0xff] }
 0x4f1   :  { %3581 = vmatmul.f32.gmra.mxu2 %v1107_v25  ;;  %v3755_v56 = vpop.f32.mrf.mxu3  ;;  %v10601_v25 = vpop.f32.mrf.mxu1  ;;  %6462 = vmatpush.msra.mxu1 %v6325_v55 }
 0x4f2   :  { %14370 = vst [vmem:[#allocation156_spill] sm:$0xff] %v10601_v25  ;;  %v1110_v25 = vld [vmem:[#allocation2 + $0x2d8] sm:$0xff] }
 0x4f4   :  { %v3534_v29 = vpop.f32.mrf.mxu2  ;;  %3805 = vmatmul.f32.gmra.mxu3 %v1240_v24 }
 0x4f5   :  { %v3535_v36 = vadd.f32 %v3534_v29, %v10236_v27  ;;  %v10599_v39 = vpop.f32.mrf.mxu0 }
 0x4f6   :  { %14369 = vst [vmem:[#allocation155_spill] sm:$0xff] %v10599_v39 }
 0x4f7   :  { %v10597_v0 = vadd.f32 %v3743_v52, %v3535_v36  ;;  %v1364_v36 = vld [vmem:[#allocation2 + $0x2c2] sm:$0xff] }
 0x4f8   :  { %3999 = vmatmul.f32.gmra.mxu0 %v1363_v46 }
 0x4f9   :  { %3584 = vmatmul.f32.gmra.mxu2 %v1108_v44  ;;  %v3758_v27 = vpop.f32.mrf.mxu3  ;;  %v1241_v44 = vld [vmem:[#allocation2 + $0x301] sm:$0xff]  ;;  %v10609_v39 = vpop.f32.mrf.mxu1 }
 0x4fa   :  { %14372 = vst [vmem:[#allocation158_spill] sm:$0xff] %v10609_v39 }
 0x4fc   :  { %v3537_v50 = vpop.f32.mrf.mxu2  ;;  %3808 = vmatmul.f32.gmra.mxu3 %v1241_v44  ;;  %v1111_v44 = vld [vmem:[#allocation2 + $0x2e8] sm:$0xff] }
 0x4fd   :  { %v3538_v17 = vadd.f32 %v3537_v50, %v10246_v4  ;;  %v10606_v52 = vpop.f32.mrf.mxu0 }
 0x4fe   :  { %14371 = vst [vmem:[#allocation157_spill] sm:$0xff] %v10606_v52 }
 0x4ff   :  { %v10604_v29 = vadd.f32 %v3746_v23, %v3538_v17  ;;  %v1365_v23 = vld [vmem:[#allocation2 + $0x2d2] sm:$0xff]  ;;  %v1242_v17 = vld [vmem:[#allocation2 + $0x309] sm:$0xff] }
 0x500   :  { %4002 = vmatmul.f32.gmra.mxu0 %v1364_v36 }
 0x501   :  { %3587 = vmatmul.f32.gmra.mxu2 %v1109_v31  ;;  %v10611_v55 = vpop.f32.mrf.mxu3 }
 0x502   :  { %14373 = vst [vmem:[#allocation159_spill] sm:$0xff] %v10611_v55  ;;  %v1366_v55 = vld [vmem:[#allocation2 + $0x2da] sm:$0xff] }
 0x504   :  { %v3540_v46 = vpop.f32.mrf.mxu2  ;;  %3811 = vmatmul.f32.gmra.mxu3 %v1242_v17  ;;  %v1112_v17 = vld [vmem:[#allocation2 + $0x2f0] sm:$0xff] }
 0x505   :  { %v3541_v24 = vadd.f32 %v3540_v46, %v10256_v33  ;;  %v10615_v50 = vpop.f32.mrf.mxu0 }
 0x507   :  { %v10613_v4 = vadd.f32 %v3749_v3, %v3541_v24  ;;  %v10624_v3 = vpop.f32.mrf.mxu1  ;;  %v1243_v24 = vld [vmem:[#allocation2 + $0x319] sm:$0xff] }
 0x508   :  { %4005 = vmatmul.f32.gmra.mxu0 %v1365_v23  ;;  %14375 = vst [vmem:[#allocation161_spill] sm:$0xff] %v10624_v3 }
 0x509   :  { %3590 = vmatmul.f32.gmra.mxu2 %v1110_v25  ;;  %v10618_v52 = vpop.f32.mrf.mxu3 }
 0x50a   :  { %14374 = vst [vmem:[#allocation160_spill] sm:$0xff] %v10618_v52  ;;  %v1244_v52 = vld [vmem:[#allocation2 + $0x321] sm:$0xff] }
 0x50c   :  { %v3543_v31 = vpop.f32.mrf.mxu2  ;;  %3814 = vmatmul.f32.gmra.mxu3 %v1243_v24  ;;  %v14378_v24 = vld [vmem:[#allocation90_spill] sm:$0xff] }
 0x50d   :  { %v3544_v36 = vadd.f32 %v3543_v31, %v10266_v32  ;;  %v10622_v46 = vpop.f32.mrf.mxu0 }
 0x50f   :  { %v10620_v33 = vadd.f32 %v3752_v58, %v3544_v36  ;;  %v1367_v58 = vld [vmem:[#allocation2 + $0x2ea] sm:$0xff]  ;;  %v10633_v36 = vpop.f32.mrf.mxu1 }
 0x510   :  { %4008 = vmatmul.f32.gmra.mxu0 %v1366_v55  ;;  %14377 = vst [vmem:[#allocation163_spill] sm:$0xff] %v10633_v36 }
 0x511   :  { %3593 = vmatmul.f32.gmra.mxu2 %v1111_v44  ;;  %v10627_v39 = vpop.f32.mrf.mxu3  ;;  %v6324_v44 = vld [vmem:[#allocation9 + $0x50] sm:$0xff] }
 0x512   :  { %14376 = vst [vmem:[#allocation162_spill] sm:$0xff] %v10627_v39  ;;  %6463 = vmatpush.msra.mxu1 %v6324_v44 }
 0x514   :  { %v3546_v25 = vpop.f32.mrf.mxu2  ;;  %3817 = vmatmul.f32.gmra.mxu3 %v1244_v52  ;;  %v1114_v52 = vld [vmem:[#allocation2 + $0x308] sm:$0xff] }
 0x515   :  { %v3547_v23 = vadd.f32 %v3546_v25, %v10276_v35  ;;  %v10631_v31 = vpop.f32.mrf.mxu0  ;;  %v1113_v35 = vld [vmem:[#allocation2 + $0x300] sm:$0xff] }
 0x517   :  { %v10629_v32 = vadd.f32 %v3755_v56, %v3547_v23  ;;  %v1368_v23 = vld [vmem:[#allocation2 + $0x2f2] sm:$0xff] }
 0x518   :  { %4011 = vmatmul.f32.gmra.mxu0 %v1367_v58  ;;  %v10642_v58 = vpop.f32.mrf.mxu1 }
 0x519   :  { %3596 = vmatmul.f32.gmra.mxu2 %v1112_v17  ;;  %v10636_v25 = vpop.f32.mrf.mxu3  ;;  %v1245_v17 = vld [vmem:[#allocation2 + $0x331] sm:$0xff]  ;;  %14382 = vst [vmem:[#allocation166_spill] sm:$0xff] %v10642_v58 }
 0x51a   :  { %14379 = vst [vmem:[#allocation90_spill] sm:$0xff] %v10636_v25  ;;  %v1370_v58 = vld [vmem:[#allocation2 + $0x30a] sm:$0xff] }
 0x51c   :  { %v3549_v55 = vpop.f32.mrf.mxu2  ;;  %3820 = vmatmul.f32.gmra.mxu3 %v1245_v17 }
 0x51d   :  { %v3550_v3 = vadd.f32 %v3549_v55, %v14378_v24  ;;  %v10640_v56 = vpop.f32.mrf.mxu0  ;;  %v1369_v24 = vld [vmem:[#allocation2 + $0x302] sm:$0xff] }
 0x51e   :  { %14381 = vst [vmem:[#allocation165_spill] sm:$0xff] %v10640_v56  ;;  %v1371_v56 = vld [vmem:[#allocation2 + $0x31a] sm:$0xff] }
 0x51f   :  { %v10638_v39 = vadd.f32 %v3758_v27, %v3550_v3  ;;  %v1246_v27 = vld [vmem:[#allocation2 + $0x339] sm:$0xff] }
 0x520   :  { %4014 = vmatmul.f32.gmra.mxu0 %v1368_v23  ;;  %v1115_v23 = vld [vmem:[#allocation2 + $0x318] sm:$0xff] }
 0x521   :  { %14380 = vst [vmem:[#allocation164_spill] sm:$0xff] %v10638_v39  ;;  %3599 = vmatmul.f32.gmra.mxu2 %v1113_v35  ;;  %v10646_v44 = vpop.f32.mrf.mxu3  ;;  %v10652_v35 = vpop.f32.mrf.mxu1 }
 0x522   :  { %14383 = vst [vmem:[#allocation167_spill] sm:$0xff] %v10646_v44  ;;  %v1247_v44 = vld [vmem:[#allocation2 + $0x349] sm:$0xff] }
 0x523   :  { %14385 = vst [vmem:[#allocation169_spill] sm:$0xff] %v10652_v35  ;;  %v6323_v35 = vld [vmem:[#allocation9 + $0x48] sm:$0xff] }
 0x524   :  { %v10644_v36 = vpop.f32.mrf.mxu2  ;;  %3823 = vmatmul.f32.gmra.mxu3 %v1246_v27  ;;  %6464 = vmatpush.msra.mxu1 %v6323_v35 }
 0x525   :  { %v10648_v55 = vpop.f32.mrf.mxu0 }
 0x526   :  { %14384 = vst [vmem:[#allocation168_spill] sm:$0xff] %v10648_v55 }
 0x528   :  { %4017 = vmatmul.f32.gmra.mxu0 %v1369_v24 }
 0x529   :  { %3602 = vmatmul.f32.gmra.mxu2 %v1114_v52  ;;  %v10654_v17 = vpop.f32.mrf.mxu3  ;;  %v1116_v52 = vld [vmem:[#allocation2 + $0x320] sm:$0xff]  ;;  %v10664_v39 = vpop.f32.mrf.mxu1 }
 0x52a   :  { %14386 = vst [vmem:[#allocation170_spill] sm:$0xff] %v10654_v17  ;;  %v1248_v17 = vld [vmem:[#allocation2 + $0x351] sm:$0xff] }
 0x52b   :  { %14391 = vst [vmem:[#allocation175_spill] sm:$0xff] %v10664_v39 }
 0x52c   :  { %v10650_v3 = vpop.f32.mrf.mxu2  ;;  %3826 = vmatmul.f32.gmra.mxu3 %v1247_v44 }
 0x52d   :  { %v10656_v25 = vpop.f32.mrf.mxu0 }
 0x52e   :  { %14387 = vst [vmem:[#allocation171_spill] sm:$0xff] %v10656_v25 }
 0x530   :  { %4020 = vmatmul.f32.gmra.mxu0 %v1370_v58  ;;  %v1117_v58 = vld [vmem:[#allocation2 + $0x330] sm:$0xff] }
 0x531   :  { %3605 = vmatmul.f32.gmra.mxu2 %v1115_v23  ;;  %v10660_v24 = vpop.f32.mrf.mxu3 }
 0x532   :  { %14389 = vst [vmem:[#allocation173_spill] sm:$0xff] %v10660_v24  ;;  %v10672_v24 = vpop.f32.mrf.mxu1 }
 0x533   :  { %14395 = vst [vmem:[#allocation179_spill] sm:$0xff] %v10672_v24 }
 0x534   :  { %v10658_v55 = vpop.f32.mrf.mxu2  ;;  %3829 = vmatmul.f32.gmra.mxu3 %v1248_v17  ;;  %v1373_v17 = vld [vmem:[#allocation2 + $0x332] sm:$0xff] }
 0x535   :  { %14388 = vst [vmem:[#allocation172_spill] sm:$0xff] %v10658_v55  ;;  %v10662_v27 = vpop.f32.mrf.mxu0  ;;  %v1372_v55 = vld [vmem:[#allocation2 + $0x322] sm:$0xff] }
 0x536   :  { %14390 = vst [vmem:[#allocation174_spill] sm:$0xff] %v10662_v27 }
 0x538   :  { %4023 = vmatmul.f32.gmra.mxu0 %v1371_v56 }
 0x539   :  { %3608 = vmatmul.f32.gmra.mxu2 %v1116_v52  ;;  %v10668_v44 = vpop.f32.mrf.mxu3  ;;  %v1118_v52 = vld [vmem:[#allocation2 + $0x338] sm:$0xff] }
 0x53a   :  { %14393 = vst [vmem:[#allocation177_spill] sm:$0xff] %v10668_v44  ;;  %v10680_v35 = vpop.f32.mrf.mxu1 }
 0x53c   :  { %v10666_v25 = vpop.f32.mrf.mxu2 }
 0x53d   :  { %14392 = vst [vmem:[#allocation176_spill] sm:$0xff] %v10666_v25  ;;  %v10670_v23 = vpop.f32.mrf.mxu0 }
 0x53e   :  { %14394 = vst [vmem:[#allocation178_spill] sm:$0xff] %v10670_v23  ;;  %v1119_v23 = vld [vmem:[#allocation2 + $0x348] sm:$0xff] }
 0x540   :  { %4026 = vmatmul.f32.gmra.mxu0 %v1372_v55  ;;  %v10690_v55 = vadd.f32 %v10429_v13, %v10427_v7 }
 0x541   :  { %3611 = vmatmul.f32.gmra.mxu2 %v1117_v58  ;;  %v10676_v56 = vpop.f32.mrf.mxu3  ;;  %v1374_v58 = vld [vmem:[#allocation2 + $0x33a] sm:$0xff] }
 0x542   :  { %14396 = vst [vmem:[#allocation180_spill] sm:$0xff] %v10676_v56  ;;  %v10708_v13 = vpop.f32.mrf.mxu1 }
 0x543   :  { %14399 = vst [vmem:[#allocation183_spill] sm:$0xff] %v10690_v55 }
 0x544   :  { %v10674_v27 = vpop.f32.mrf.mxu2 }
 0x545   :  { %v10678_v39 = vpop.f32.mrf.mxu0 }
 0x548   :  { %4029 = vmatmul.f32.gmra.mxu0 %v1373_v17  ;;  %v10698_v17 = vadd.f32 %v10434_v21, %v10432_v5  ;;  %v1375_v21 = vld [vmem:[#allocation2 + $0x34a] sm:$0xff] }
 0x549   :  { %3614 = vmatmul.f32.gmra.mxu2 %v1118_v52  ;;  %v10686_v24 = vpop.f32.mrf.mxu3  ;;  %v10694_v52 = vadd.f32 %v10424_v19, %v10422_v22  ;;  %v10713_v19 = vadd.f32 %v10444_v6, %v10442_v15  ;;  %v10728_v6 = vadd.f32 %v10454_v60, %v10452_v8  ;;  %v6322_v15 = vld [vmem:[#allocation9 + $0x40] sm:$0xff]  ;;  %v1376_v60 = vld [vmem:[#allocation2 + $0x352] sm:$0xff] }
 0x54a   :  { %14398 = vst [vmem:[#allocation182_spill] sm:$0xff] %v10686_v24  ;;  %v10706_v24 = vadd.f32 %v10439_v16, %v10437_v38  ;;  %6465 = vmatpush.msra.mxu1 %v6322_v15  ;;  %v10744_v8 = vpop.f32.mrf.mxu1  ;;  %v14410_v15 = vld [vmem:[#allocation114_spill] sm:$0xff] }
 0x54b   :  { %14400 = vst [vmem:[#allocation184_spill] sm:$0xff] %v10694_v52 }
 0x54c   :  { %v10682_v44 = vpop.f32.mrf.mxu2  ;;  %14401 = vst [vmem:[#allocation185_spill] sm:$0xff] %v10698_v17 }
 0x54d   :  { %v10684_v25 = vpop.f32.mrf.mxu0  ;;  %14402 = vst [vmem:[#allocation186_spill] sm:$0xff] %v10706_v24 }
 0x54e   :  { %14397 = vst [vmem:[#allocation181_spill] sm:$0xff] %v10684_v25  ;;  %v4042_v25 = vadd.f32 %v10690_v55, %v10694_v52  ;;  %v14497_v52 = vld [vmem:[#allocation168_spill] sm:$0xff] }
 0x54f   :  { %14403 = vst [vmem:[#allocation187_spill] sm:$0xff] %v10713_v19 }
 0x550   :  { %4032 = vmatmul.f32.gmra.mxu0 %v1374_v58  ;;  %v4043_v7 = vadd.f32 %v4042_v25, %v10698_v17  ;;  %14405 = vst [vmem:[#allocation189_spill] sm:$0xff] %v10728_v6 }
 0x551   :  { %3617 = vmatmul.f32.gmra.mxu2 %v1119_v23  ;;  %v10720_v23 = vadd.f32 %v10449_v9, %v10447_v30  ;;  %v10723_v16 = vpop.f32.mrf.mxu3  ;;  %v14406_v9 = vld [vmem:[#allocation108_spill] sm:$0xff] }
 0x552   :  { %v4044_v5 = vadd.f32 %v4043_v7, %v10706_v24  ;;  %v10735_v30 = vadd.f32 %v14406_v9, %v10457_v49  ;;  %v14408_v7 = vld [vmem:[#allocation111_spill] sm:$0xff] }
 0x553   :  { %14404 = vst [vmem:[#allocation188_spill] sm:$0xff] %v10720_v23 }
 0x554   :  { %v10700_v56 = vpop.f32.mrf.mxu2  ;;  %v4045_v38 = vadd.f32 %v4044_v5, %v10713_v19  ;;  %14407 = vst [vmem:[#allocation108_spill] sm:$0xff] %v10735_v30 }
 0x555   :  { %v10715_v22 = vpop.f32.mrf.mxu0 }
 0x556   :  { %v4046_v58 = vadd.f32 %v4045_v38, %v10720_v23  ;;  %v10749_v38 = vadd.f32 %v14410_v15, %v10467_v62  ;;  %v14414_v23 = vld [vmem:[#allocation120_spill] sm:$0xff]  ;;  %v14417_v15 = vld [vmem:[#allocation123_spill] sm:$0xff] }
 0x558   :  { %4035 = vmatmul.f32.gmra.mxu0 %v1375_v21  ;;  %v10740_v21 = vadd.f32 %v14408_v7, %v10462_v59  ;;  %14411 = vst [vmem:[#allocation114_spill] sm:$0xff] %v10749_v38 }
 0x559   :  { %3620 = vmatmul.f32.gmra.mxu2 %v10496_v18  ;;  %v4047_v18 = vadd.f32 %v4046_v58, %v10728_v6  ;;  %v14412_v58 = vld [vmem:[#allocation117_spill] sm:$0xff]  ;;  %v10758_v7 = vpop.f32.mrf.mxu3 }
 0x55a   :  { %14409 = vst [vmem:[#allocation111_spill] sm:$0xff] %v10740_v21  ;;  %v10754_v9 = vadd.f32 %v14412_v58, %v10472_v26  ;;  %v14418_v58 = vld [vmem:[#allocation126_spill] sm:$0xff] }
 0x55b   :  { %v4048_v19 = vadd.f32 %v4047_v18, %v10735_v30  ;;  %v10763_v18 = vadd.f32 %v14414_v23, %v10477_v12  ;;  %v10777_v30 = vpop.f32.mrf.mxu1  ;;  %v14420_v12 = vld [vmem:[#allocation128_spill] sm:$0xff]  ;;  %v14421_v23 = vld [vmem:[#allocation130_spill] sm:$0xff] }
 0x55c   :  { %v10730_v25 = vpop.f32.mrf.mxu2  ;;  %14413 = vst [vmem:[#allocation117_spill] sm:$0xff] %v10754_v9 }
 0x55d   :  { %v10742_v5 = vpop.f32.mrf.mxu0  ;;  %v4049_v49 = vadd.f32 %v4048_v19, %v10740_v21  ;;  %14415 = vst [vmem:[#allocation120_spill] sm:$0xff] %v10763_v18  ;;  %v10775_v21 = vadd.f32 %v14418_v58, %v14417_v15  ;;  %v14425_v58 = vld [vmem:[#allocation137_spill] sm:$0xff] }
 0x55f   :  { %v4050_v6 = vadd.f32 %v4049_v49, %v10749_v38  ;;  %14419 = vst [vmem:[#allocation123_spill] sm:$0xff] %v10775_v21  ;;  %v10782_v38 = vadd.f32 %v14421_v23, %v14420_v12  ;;  %v14427_v23 = vld [vmem:[#allocation138_spill] sm:$0xff] }
 0x560   :  { %4038 = vmatmul.f32.gmra.mxu0 %v1376_v60  ;;  %v10768_v60 = vadd.f32 %v10484_v53, %v10482_v10  ;;  %v14423_v10 = vld [vmem:[#allocation132_spill] sm:$0xff] }
 0x561   :  { %v4051_v62 = vadd.f32 %v4050_v6, %v10754_v9  ;;  %14422 = vst [vmem:[#allocation126_spill] sm:$0xff] %v10782_v38  ;;  %v10789_v9 = vadd.f32 %v14423_v10, %v10500_v40  ;;  %v14429_v40 = vld [vmem:[#allocation139_spill] sm:$0xff] }
 0x562   :  { %14416 = vst [vmem:[#allocation190_spill] sm:$0xff] %v10768_v60  ;;  %v10808_v10 = vadd.f32 %v14429_v40, %v10515_v45 }
 0x563   :  { %v4052_v26 = vadd.f32 %v4051_v62, %v10763_v18  ;;  %14424 = vst [vmem:[#allocation128_spill] sm:$0xff] %v10789_v9  ;;  %v10791_v62 = vpop.f32.mrf.mxu3  ;;  %v10796_v18 = vadd.f32 %v14425_v58, %v10505_v37  ;;  %v14431_v58 = vld [vmem:[#allocation140_spill] sm:$0xff] }
 0x564   :  { %v10756_v59 = vpop.f32.mrf.mxu2  ;;  %14430 = vst [vmem:[#allocation137_spill] sm:$0xff] %v10808_v10 }
 0x565   :  { %v10770_v19 = vpop.f32.mrf.mxu0  ;;  %v4053_v49 = vadd.f32 %v4052_v26, %v10768_v60  ;;  %14426 = vst [vmem:[#allocation130_spill] sm:$0xff] %v10796_v18  ;;  %v10803_v60 = vadd.f32 %v14427_v23, %v10510_v57  ;;  %v14433_v57 = vld [vmem:[#allocation141_spill] sm:$0xff] }
 0x566   :  { %v10822_v23 = vadd.f32 %v14433_v57, %v10525_v41  ;;  %v14439_v57 = vld [vmem:[#allocation144_spill] sm:$0xff] }
 0x567   :  { %v4054_v53 = vadd.f32 %v4053_v49, %v10775_v21  ;;  %14428 = vst [vmem:[#allocation132_spill] sm:$0xff] %v10803_v60  ;;  %v10810_v21 = vpop.f32.mrf.mxu1 }
 0x568   :  { %14434 = vst [vmem:[#allocation139_spill] sm:$0xff] %v10822_v23 }
 0x569   :  { %v4055_v15 = vadd.f32 %v4054_v53, %v10782_v38  ;;  %v10817_v38 = vadd.f32 %v14431_v58, %v10520_v11  ;;  %v14437_v11 = vld [vmem:[#allocation143_spill] sm:$0xff] }
 0x56a   :  { %v10836_v58 = vadd.f32 %v14437_v11, %v10535_v14 }
 0x56b   :  { %v4056_v12 = vadd.f32 %v4055_v15, %v10789_v9  ;;  %14432 = vst [vmem:[#allocation138_spill] sm:$0xff] %v10817_v38  ;;  %v10826_v45 = vpop.f32.mrf.mxu3 }
 0x56c   :  { %v10784_v6 = vpop.f32.mrf.mxu2  ;;  %14438 = vst [vmem:[#allocation141_spill] sm:$0xff] %v10836_v58 }
 0x56d   :  { %v10798_v26 = vpop.f32.mrf.mxu0  ;;  %v4057_v49 = vadd.f32 %v4056_v12, %v10796_v18  ;;  %v14435_v18 = vld [vmem:[#allocation142_spill] sm:$0xff] }
 0x56e   :  { %v10831_v9 = vadd.f32 %v14435_v18, %v10530_v63  ;;  %v14441_v18 = vld [vmem:[#allocation145_spill] sm:$0xff] }
 0x56f   :  { %v4058_v37 = vadd.f32 %v4057_v49, %v10803_v60  ;;  %v10843_v60 = vadd.f32 %v14439_v57, %v10540_v2  ;;  %v14445_v57 = vld [vmem:[#allocation147_spill] sm:$0xff] }
 0x570   :  { %14436 = vst [vmem:[#allocation140_spill] sm:$0xff] %v10831_v9 }
 0x571   :  { %v4059_v15 = vadd.f32 %v4058_v37, %v10808_v10  ;;  %v6321_v37 = vld [vmem:[#allocation9 + $0x38] sm:$0xff]  ;;  %14440 = vst [vmem:[#allocation142_spill] sm:$0xff] %v10843_v60 }
 0x572   :  { %6466 = vmatpush.msra.mxu1 %v6321_v37  ;;  %v14443_v37 = vld [vmem:[#allocation146_spill] sm:$0xff] }
 0x573   :  { %v4060_v40 = vadd.f32 %v4059_v15, %v10817_v38  ;;  %v10845_v15 = vpop.f32.mrf.mxu1 }
 0x574   :  { %v10812_v53 = vpop.f32.mrf.mxu2 }
 0x575   :  { %v10824_v12 = vpop.f32.mrf.mxu0  ;;  %v4061_v49 = vadd.f32 %v4060_v40, %v10822_v23  ;;  %v10850_v40 = vadd.f32 %v14441_v18, %v10545_v47  ;;  %v10857_v23 = vadd.f32 %v14443_v37, %v10550_v51  ;;  %v14447_v18 = vld [vmem:[#allocation148_spill] sm:$0xff]  ;;  %v14449_v51 = vld [vmem:[#allocation149_spill] sm:$0xff] }
 0x576   :  { %v10876_v37 = vadd.f32 %v14449_v51, %v10565_v20 }
 0x577   :  { %v4062_v41 = vadd.f32 %v4061_v49, %v10831_v9  ;;  %14442 = vst [vmem:[#allocation143_spill] sm:$0xff] %v10850_v40  ;;  %v10859_v49 = vpop.f32.mrf.mxu3  ;;  %v10864_v9 = vadd.f32 %v14445_v57, %v10555_v43  ;;  %v14451_v57 = vld [vmem:[#allocation150_spill] sm:$0xff] }
 0x578   :  { %14444 = vst [vmem:[#allocation144_spill] sm:$0xff] %v10857_v23 }
 0x579   :  { %v4063_v63 = vadd.f32 %v4062_v41, %v10836_v58  ;;  %14446 = vst [vmem:[#allocation145_spill] sm:$0xff] %v10864_v9  ;;  %v10871_v58 = vadd.f32 %v14447_v18, %v10560_v42  ;;  %v14453_v42 = vld [vmem:[#allocation151_spill] sm:$0xff] }
 0x57a   :  { %14450 = vst [vmem:[#allocation147_spill] sm:$0xff] %v10876_v37  ;;  %v10890_v18 = vadd.f32 %v14453_v42, %v10575_v54  ;;  %v14459_v54 = vld [vmem:[#allocation100_spill] sm:$0xff] }
 0x57b   :  { %v4064_v11 = vadd.f32 %v4063_v63, %v10843_v60  ;;  %14448 = vst [vmem:[#allocation146_spill] sm:$0xff] %v10871_v58  ;;  %v14460_v42 = vld [vmem:[#allocation92_spill] sm:$0xff] }
 0x57c   :  { %v10838_v10 = vpop.f32.mrf.mxu2  ;;  %14454 = vst [vmem:[#allocation149_spill] sm:$0xff] %v10890_v18 }
 0x57d   :  { %v10852_v14 = vpop.f32.mrf.mxu0  ;;  %v4065_v2 = vadd.f32 %v4064_v11, %v10850_v40  ;;  %v10880_v11 = vpop.f32.mrf.mxu1  ;;  %v10885_v40 = vadd.f32 %v14451_v57, %v10570_v28  ;;  %v14457_v28 = vld [vmem:[#allocation153_spill] sm:$0xff] }
 0x57e   :  { %v10904_v57 = vadd.f32 %v14457_v28, %v10585_v1  ;;  %v14464_v1 = vld [vmem:[#allocation155_spill] sm:$0xff] }
 0x57f   :  { %v4066_v47 = vadd.f32 %v4065_v2, %v10857_v23  ;;  %14452 = vst [vmem:[#allocation148_spill] sm:$0xff] %v10885_v40  ;;  %v10894_v20 = vpop.f32.mrf.mxu3  ;;  %v10922_v28 = vadd.f32 %v14464_v1, %v10597_v0  ;;  %v14474_v0 = vld [vmem:[#allocation156_spill] sm:$0xff] }
 0x580   :  { %14458 = vst [vmem:[#allocation151_spill] sm:$0xff] %v10904_v57 }
 0x581   :  { %v4067_v63 = vadd.f32 %v4066_v47, %v10864_v9  ;;  %v14455_v9 = vld [vmem:[#allocation152_spill] sm:$0xff]  ;;  %14465 = vst [vmem:[#allocation153_spill] sm:$0xff] %v10922_v28 }
 0x582   :  { %v10899_v23 = vadd.f32 %v14455_v9, %v10580_v48  ;;  %v14462_v48 = vld [vmem:[#allocation94_spill] sm:$0xff] }
 0x583   :  { %v4068_v43 = vadd.f32 %v4067_v63, %v10871_v58  ;;  %v14463_v9 = vld [vmem:[#allocation106_spill] sm:$0xff] }
 0x584   :  { %v10866_v41 = vpop.f32.mrf.mxu2  ;;  %14456 = vst [vmem:[#allocation150_spill] sm:$0xff] %v10899_v23 }
 0x585   :  { %v10878_v60 = vpop.f32.mrf.mxu0  ;;  %v4069_v2 = vadd.f32 %v4068_v43, %v10876_v37  ;;  %v3135_v37 = vadd.f32 %v14460_v42, %v14459_v54  ;;  %v14466_v54 = vld [vmem:[#allocation154_spill] sm:$0xff] }
 0x587   :  { %v4070_v51 = vadd.f32 %v4069_v2, %v10885_v40  ;;  %v10913_v2 = vadd.f32 %v10592_v61, %v10590_v34  ;;  %v10915_v40 = vpop.f32.mrf.mxu1  ;;  %v3344_v42 = vadd.f32 %v14466_v54, %v3135_v37  ;;  %v14469_v34 = vld [vmem:[#allocation157_spill] sm:$0xff]  ;;  %v10942_v37 = vadd.f32 %v10615_v50, %v10613_v4  ;;  %v14476_v54 = vld [vmem:[#allocation115_spill] sm:$0xff]  ;;  %v14481_v50 = vld [vmem:[#allocation118_spill] sm:$0xff] }
 0x588   :  { %v10932_v17 = vadd.f32 %v14469_v34, %v10604_v29  ;;  %v14477_v29 = vld [vmem:[#allocation104_spill] sm:$0xff]  ;;  %v14478_v34 = vld [vmem:[#allocation158_spill] sm:$0xff] }
 0x589   :  { %v4071_v63 = vadd.f32 %v4070_v51, %v10890_v18  ;;  %14461 = vst [vmem:[#allocation152_spill] sm:$0xff] %v10913_v2  ;;  %v3138_v51 = vadd.f32 %v14463_v9, %v14462_v48  ;;  %v14471_v48 = vld [vmem:[#allocation112_spill] sm:$0xff]  ;;  %v14472_v9 = vld [vmem:[#allocation101_spill] sm:$0xff] }
 0x58a   :  { %14470 = vst [vmem:[#allocation100_spill] sm:$0xff] %v10932_v17 }
 0x58b   :  { %v4072_v58 = vadd.f32 %v4071_v63, %v10899_v23  ;;  %v14467_v63 = vld [vmem:[#allocation109_spill] sm:$0xff]  ;;  %v14468_v23 = vld [vmem:[#allocation98_spill] sm:$0xff]  ;;  %v3347_v1 = vadd.f32 %v14474_v0, %v3138_v51  ;;  %14475 = vst [vmem:[#allocation94_spill] sm:$0xff] %v10942_v37  ;;  %v10953_v51 = vadd.f32 %v10622_v46, %v10620_v33  ;;  %v14482_v0 = vld [vmem:[#allocation107_spill] sm:$0xff] }
 0x58c   :  { %v10892_v47 = vpop.f32.mrf.mxu2  ;;  %v3141_v24 = vadd.f32 %v14468_v23, %v14467_v63  ;;  %v3553_v23 = vadd.f32 %v10644_v36, %v3344_v42  ;;  %v3147_v63 = vadd.f32 %v14477_v29, %v14476_v54  ;;  %v3150_v36 = vadd.f32 %v14482_v0, %v14481_v50  ;;  %v14486_v33 = vld [vmem:[#allocation163_spill] sm:$0xff]  ;;  %v14489_v50 = vld [vmem:[#allocation164_spill] sm:$0xff] }
 0x58d   :  { %v10906_v43 = vpop.f32.mrf.mxu0  ;;  %v4073_v18 = vadd.f32 %v4072_v58, %v10904_v57  ;;  %v3144_v58 = vadd.f32 %v14472_v9, %v14471_v48  ;;  %v10936_v57 = vpop.f32.mrf.mxu3  ;;  %14479 = vst [vmem:[#allocation106_spill] sm:$0xff] %v10953_v51  ;;  %v14480_v9 = vld [vmem:[#allocation161_spill] sm:$0xff]  ;;  %v10962_v54 = vadd.f32 %v10631_v31, %v10629_v32 }
 0x58e   :  { %14473 = vst [vmem:[#allocation92_spill] sm:$0xff] %v10936_v57  ;;  %v3356_v46 = vadd.f32 %v14486_v33, %v3147_v63  ;;  %v14490_v32 = vld [vmem:[#allocation165_spill] sm:$0xff]  ;;  %v14495_v33 = vld [vmem:[#allocation124_spill] sm:$0xff] }
 0x58f   :  { %v4074_v61 = vadd.f32 %v4073_v18, %v10913_v2  ;;  %v3350_v2 = vadd.f32 %v14478_v34, %v3141_v24  ;;  %v3353_v4 = vadd.f32 %v14480_v9, %v3144_v58  ;;  %14483 = vst [vmem:[#allocation155_spill] sm:$0xff] %v10962_v54  ;;  %v14484_v24 = vld [vmem:[#allocation159_spill] sm:$0xff]  ;;  %v10969_v58 = vpop.f32.mrf.mxu1  ;;  %v10976_v31 = vadd.f32 %v14490_v32, %v14489_v50  ;;  %v14499_v32 = vld [vmem:[#allocation169_spill] sm:$0xff] }
 0x590   :  { %v3762_v29 = vadd.f32 %v14484_v24, %v3553_v23  ;;  %v14492_v23 = vld [vmem:[#allocation160_spill] sm:$0xff] }
 0x591   :  { %v4075_v55 = vadd.f32 %v4074_v61, %v10922_v28  ;;  %v3556_v61 = vadd.f32 %v10650_v3, %v3347_v1  ;;  %v14487_v28 = vld [vmem:[#allocation121_spill] sm:$0xff]  ;;  %v14488_v3 = vld [vmem:[#allocation110_spill] sm:$0xff]  ;;  %14491 = vst [vmem:[#allocation154_spill] sm:$0xff] %v10976_v31 }
 0x592   :  { %v3153_v1 = vadd.f32 %v14488_v3, %v14487_v28  ;;  %v10985_v57 = vadd.f32 %v14497_v52, %v3762_v29  ;;  %v14504_v52 = vld [vmem:[#allocation90_spill] sm:$0xff] }
 0x593   :  { %v4076_v48 = vadd.f32 %v4075_v55, %v10932_v17  ;;  %v14485_v55 = vld [vmem:[#allocation172_spill] sm:$0xff]  ;;  %v3765_v0 = vadd.f32 %v14492_v23, %v3556_v61  ;;  %v14500_v23 = vld [vmem:[#allocation127_spill] sm:$0xff] }
 0x594   :  { %v10924_v38 = vpop.f32.mrf.mxu2  ;;  %v3559_v34 = vadd.f32 %v14485_v55, %v3350_v2  ;;  %v6320_v17 = vld [vmem:[#allocation9 + $0x30] sm:$0xff]  ;;  %v14494_v55 = vld [vmem:[#allocation166_spill] sm:$0xff]  ;;  %v3362_v61 = vadd.f32 %v14499_v32, %v3153_v1 }
 0x595   :  { %v10945_v18 = vpop.f32.mrf.mxu0  ;;  %v4077_v42 = vadd.f32 %v4076_v48, %v10942_v37  ;;  %6467 = vmatpush.msra.mxu1 %v6320_v17  ;;  %v14493_v2 = vld [vmem:[#allocation176_spill] sm:$0xff]  ;;  %v3359_v63 = vadd.f32 %v14494_v55, %v3150_v36  ;;  %v14496_v37 = vld [vmem:[#allocation113_spill] sm:$0xff]  ;;  %v14498_v17 = vld [vmem:[#allocation162_spill] sm:$0xff]  ;;  %v10994_v36 = vpop.f32.mrf.mxu3 }
 0x596   :  { %v3562_v24 = vadd.f32 %v14493_v2, %v3353_v4  ;;  %v3156_v28 = vadd.f32 %v14496_v37, %v14495_v33  ;;  %v14501_v4 = vld [vmem:[#allocation116_spill] sm:$0xff]  ;;  %14502 = vst [vmem:[#allocation109_spill] sm:$0xff] %v10994_v36  ;;  %v14503_v55 = vld [vmem:[#allocation171_spill] sm:$0xff]  ;;  %v14508_v32 = vld [vmem:[#allocation174_spill] sm:$0xff] }
 0x597   :  { %v4078_v48 = vadd.f32 %v4077_v42, %v10953_v51  ;;  %v3768_v42 = vadd.f32 %v14498_v17, %v3559_v34  ;;  %v3565_v51 = vadd.f32 %v10674_v27, %v3356_v46  ;;  %v3159_v2 = vadd.f32 %v14501_v4, %v14500_v23  ;;  %v14505_v33 = vld [vmem:[#allocation175_spill] sm:$0xff]  ;;  %v14506_v46 = vld [vmem:[#allocation129_spill] sm:$0xff] }
 0x598   :  { %v3771_v29 = vadd.f32 %v14504_v52, %v3562_v24  ;;  %v3568_v34 = vadd.f32 %v10682_v44, %v3359_v63  ;;  %v3365_v27 = vadd.f32 %v14505_v33, %v3156_v28  ;;  %v14507_v17 = vld [vmem:[#allocation119_spill] sm:$0xff]  ;;  %v14512_v24 = vld [vmem:[#allocation122_spill] sm:$0xff] }
 0x599   :  { %v4079_v3 = vadd.f32 %v4078_v48, %v10962_v54  ;;  %v10998_v48 = vadd.f32 %v14503_v55, %v3765_v0  ;;  %v3162_v54 = vadd.f32 %v14507_v17, %v14506_v46  ;;  %v11007_v23 = vadd.f32 %v14508_v32, %v3768_v42  ;;  %v14509_v4 = vld [vmem:[#allocation167_spill] sm:$0xff]  ;;  %v14513_v28 = vld [vmem:[#allocation178_spill] sm:$0xff]  ;;  %v14515_v17 = vld [vmem:[#allocation133_spill] sm:$0xff] }
 0x59a   :  { %v3774_v36 = vadd.f32 %v14509_v4, %v3565_v51  ;;  %v14510_v0 = vld [vmem:[#allocation179_spill] sm:$0xff]  ;;  %v11018_v33 = vadd.f32 %v14513_v28, %v3771_v29  ;;  %v3574_v42 = vadd.f32 %v10730_v25, %v3365_v27  ;;  %v14517_v4 = vld [vmem:[#allocation173_spill] sm:$0xff]  ;;  %v14519_v27 = vld [vmem:[#allocation44_spill] sm:$0xff] }
 0x59b   :  { %v4080_v37 = vadd.f32 %v4079_v3, %v10976_v31  ;;  %v3571_v3 = vadd.f32 %v10700_v56, %v3362_v61  ;;  %v3368_v55 = vadd.f32 %v14510_v0, %v3159_v2  ;;  %v14511_v31 = vld [vmem:[#allocation131_spill] sm:$0xff]  ;;  %v3371_v51 = vadd.f32 %v10680_v35, %v3162_v54  ;;  %v14516_v56 = vld [vmem:[#allocation125_spill] sm:$0xff]  ;;  %v3397_v2 = vpop.f32.mrf.mxu1 }
 0x59c   :  { %v10971_v9 = vpop.f32.mrf.mxu2  ;;  %v3165_v52 = vadd.f32 %v14512_v24, %v14511_v31  ;;  %v3168_v61 = vadd.f32 %v14516_v56, %v14515_v17  ;;  %v11027_v31 = vadd.f32 %v10678_v39, %v3774_v36  ;;  %v14518_v25 = vld [vmem:[#allocation53_spill] sm:$0xff]  ;;  %v14524_v56 = vld [vmem:[#allocation180_spill] sm:$0xff] }
 0x59d   :  { %v10989_v50 = vpop.f32.mrf.mxu0  ;;  %v4081_v1 = vadd.f32 %v4080_v37, %v10985_v57  ;;  %v14514_v37 = vld [vmem:[#allocation170_spill] sm:$0xff]  ;;  %v3577_v29 = vadd.f32 %v10756_v59, %v3368_v55  ;;  %v3171_v35 = vadd.f32 %v14519_v27, %v14518_v25  ;;  %v14520_v24 = vld [vmem:[#allocation181_spill] sm:$0xff]  ;;  %v3580_v39 = vadd.f32 %v10784_v6, %v3371_v51  ;;  %v14523_v59 = vld [vmem:[#allocation48_spill] sm:$0xff]  ;;  %v11045_v17 = vpop.f32.mrf.mxu3 }
 0x59e   :  { %v3777_v46 = vadd.f32 %v14514_v37, %v3568_v34  ;;  %v3374_v34 = vadd.f32 %v10708_v13, %v3165_v52  ;;  %v3377_v36 = vadd.f32 %v10744_v8, %v3168_v61  ;;  %v14526_v6 = vld [vmem:[#allocation64_spill] sm:$0xff]  ;;  %v14527_v27 = vld [vmem:[#allocation182_spill] sm:$0xff] }
 0x59f   :  { %v4082_v63 = vadd.f32 %v4081_v1, %v10998_v48  ;;  %v3780_v1 = vadd.f32 %v14517_v4, %v3571_v3  ;;  %v14522_v3 = vld [vmem:[#allocation57_spill] sm:$0xff] }
 0x5a0   :  { %v11038_v28 = vadd.f32 %v14520_v24, %v3777_v46  ;;  %v3174_v55 = vadd.f32 %v14523_v59, %v14522_v3  ;;  %v3583_v46 = vadd.f32 %v10812_v53, %v3374_v34  ;;  %v14525_v4 = vld [vmem:[#allocation61_spill] sm:$0xff]  ;;  %v14529_v24 = vld [vmem:[#allocation70_spill] sm:$0xff]  ;;  %v14531_v3 = vld [vmem:[#allocation76_spill] sm:$0xff] }
 0x5a1   :  { %v4083_v32 = vadd.f32 %v4082_v63, %v11007_v23  ;;  %v14521_v63 = vld [vmem:[#allocation177_spill] sm:$0xff]  ;;  %v11049_v52 = vadd.f32 %v10715_v22, %v3780_v1  ;;  %v3177_v51 = vadd.f32 %v14526_v6, %v14525_v4  ;;  %v3586_v22 = vadd.f32 %v10838_v10, %v3377_v36 }
 0x5a2   :  { %v3783_v37 = vadd.f32 %v14521_v63, %v3574_v42  ;;  %v3380_v42 = vadd.f32 %v10777_v30, %v3171_v35  ;;  %v3383_v1 = vadd.f32 %v10810_v21, %v3174_v55  ;;  %v3792_v35 = vadd.f32 %v10723_v16, %v3583_v46  ;;  %v14534_v4 = vld [vmem:[#allocation85_spill] sm:$0xff] }
 0x5a3   :  { %v4084_v54 = vadd.f32 %v4083_v32, %v11018_v33  ;;  %v3786_v32 = vadd.f32 %v14524_v56, %v3577_v29  ;;  %v14528_v29 = vld [vmem:[#allocation67_spill] sm:$0xff]  ;;  %v3400_v36 = vpop.f32.mrf.mxu1  ;;  %v3795_v55 = vadd.f32 %v10758_v7, %v3586_v22  ;;  %v14535_v7 = vld [vmem:[#allocation86_spill] sm:$0xff] }
 0x5a4   :  { %v11014_v44 = vpop.f32.mrf.mxu2  ;;  %v11058_v25 = vadd.f32 %v10742_v5, %v3783_v37  ;;  %v3180_v53 = vadd.f32 %v14529_v24, %v14528_v29  ;;  %v3589_v63 = vadd.f32 %v10866_v41, %v3380_v42  ;;  %v3386_v37 = vadd.f32 %v10845_v15, %v3177_v51  ;;  %v14533_v41 = vld [vmem:[#allocation82_spill] sm:$0xff] }
 0x5a5   :  { %v11031_v0 = vpop.f32.mrf.mxu0  ;;  %v4085_v13 = vadd.f32 %v4084_v54, %v11027_v31  ;;  %v3789_v54 = vadd.f32 %v14527_v27, %v3580_v39  ;;  %v11067_v34 = vadd.f32 %v10770_v19, %v3786_v32  ;;  %v14530_v39 = vld [vmem:[#allocation73_spill] sm:$0xff]  ;;  %v3592_v19 = vadd.f32 %v10892_v47, %v3383_v1  ;;  %v3818_v51 = vpop.f32.mrf.mxu3 }
 0x5a6   :  { %v3183_v10 = vadd.f32 %v14531_v3, %v14530_v39  ;;  %v3389_v16 = vadd.f32 %v10880_v11, %v3180_v53  ;;  %v11085_v32 = vadd.f32 %v10824_v12, %v3792_v35  ;;  %v3798_v46 = vadd.f32 %v10791_v62, %v3589_v63  ;;  %v6319_v3 = vld [vmem:[#allocation9 + $0x28] sm:$0xff] }
 0x5a7   :  { %v4086_v61 = vadd.f32 %v4085_v13, %v11038_v28  ;;  %v11076_v59 = vadd.f32 %v10798_v26, %v3789_v54  ;;  %v14532_v13 = vld [vmem:[#allocation79_spill] sm:$0xff]  ;;  %v3595_v42 = vadd.f32 %v10924_v38, %v3386_v37  ;;  %v3189_v6 = vadd.f32 %v14535_v7, %v14534_v4  ;;  %v14537_v38 = vld [vmem:[#allocation88_spill] sm:$0xff]  ;;  %6468 = vmatpush.msra.mxu1 %v6319_v3 }
 0x5a8   :  { %v3186_v56 = vadd.f32 %v14533_v41, %v14532_v13  ;;  %v3392_v26 = vadd.f32 %v10915_v40, %v3183_v10  ;;  %v3801_v27 = vadd.f32 %v10826_v45, %v3592_v19  ;;  %v3598_v12 = vadd.f32 %v10971_v9, %v3389_v16  ;;  %v14536_v54 = vld [vmem:[#allocation87_spill] sm:$0xff] }
 0x5a9   :  { %v4087_v30 = vadd.f32 %v4086_v61, %v11049_v52  ;;  %v11094_v61 = vadd.f32 %v10852_v14, %v3795_v55  ;;  %v3192_v22 = vadd.f32 %v14537_v38, %v14536_v54  ;;  %v11103_v1 = vadd.f32 %v10878_v60, %v3798_v46  ;;  %v14540_v55 = vld [vmem:[#allocation89_spill] sm:$0xff]  ;;  %v14541_v19 = vld [vmem:[#allocation91_spill] sm:$0xff] }
 0x5aa   :  { %v3395_v62 = vadd.f32 %v10969_v58, %v3186_v56  ;;  %v3804_v29 = vadd.f32 %v10859_v49, %v3595_v42  ;;  %v3601_v24 = vadd.f32 %v11014_v44, %v3392_v26  ;;  %v3398_v53 = vadd.f32 %v3397_v2, %v3189_v6  ;;  %v14538_v49 = vld [vmem:[#allocation92_spill] sm:$0xff] }
 0x5ab   :  { %v4088_v21 = vadd.f32 %v4087_v30, %v11058_v25  ;;  %v11109_v9 = vadd.f32 %v10906_v43, %v3801_v27  ;;  %v3807_v58 = vadd.f32 %v10894_v20, %v3598_v12  ;;  %v3401_v35 = vadd.f32 %v3400_v36, %v3192_v22  ;;  %v3403_v63 = vpop.f32.mrf.mxu1  ;;  %v14539_v20 = vld [vmem:[#allocation109_spill] sm:$0xff]  ;;  %v14543_v12 = vld [vmem:[#allocation95_spill] sm:$0xff] }
 0x5ac   :  { %v3603_v8 = vpop.f32.mrf.mxu2  ;;  %v11114_v60 = vadd.f32 %v10945_v18, %v3804_v29  ;;  %v3810_v39 = vadd.f32 %v14538_v49, %v3601_v24  ;;  %v3195_v16 = vadd.f32 %v14541_v19, %v14540_v55  ;;  %v14542_v27 = vld [vmem:[#allocation93_spill] sm:$0xff] }
 0x5ad   :  { %v4021_v5 = vpop.f32.mrf.mxu0  ;;  %v4089_v15 = vadd.f32 %v4088_v21, %v11067_v34  ;;  %v3604_v30 = vadd.f32 %v3603_v8, %v3395_v62  ;;  %v11119_v43 = vadd.f32 %v10989_v50, %v3807_v58  ;;  %v3821_v21 = vpop.f32.mrf.mxu3  ;;  %v14545_v58 = vld [vmem:[#allocation99_spill] sm:$0xff] }
 0x5ae   :  { %v11126_v13 = vadd.f32 %v11031_v0, %v3810_v39  ;;  %v3404_v42 = vadd.f32 %v3403_v63, %v3195_v16 }
 0x5af   :  { %v4090_v11 = vadd.f32 %v4089_v15, %v11076_v59  ;;  %v3813_v8 = vadd.f32 %v14539_v20, %v3604_v30  ;;  %v14547_v20 = vld [vmem:[#allocation105_spill] sm:$0xff] }
 0x5b1   :  { %v4091_v40 = vadd.f32 %v4090_v11, %v11085_v32  ;;  %v11130_v46 = vadd.f32 %v4021_v5, %v3813_v8 }
 0x5b3   :  { %v4092_v45 = vadd.f32 %v4091_v40, %v11094_v61  ;;  %v3406_v7 = vpop.f32.mrf.mxu1 }
 0x5b4   :  { %v3606_v47 = vpop.f32.mrf.mxu2 }
 0x5b5   :  { %v4024_v14 = vpop.f32.mrf.mxu0  ;;  %v4093_v37 = vadd.f32 %v4092_v45, %v11103_v1  ;;  %v3607_v44 = vadd.f32 %v3606_v47, %v3398_v53  ;;  %v3824_v38 = vpop.f32.mrf.mxu3  ;;  %v14544_v45 = vld [vmem:[#allocation97_spill] sm:$0xff] }
 0x5b6   :  { %v3201_v30 = vadd.f32 %v14545_v58, %v14544_v45 }
 0x5b7   :  { %v4094_v10 = vadd.f32 %v4093_v37, %v11109_v9  ;;  %v3816_v41 = vadd.f32 %v11045_v17, %v3607_v44  ;;  %v3198_v17 = vadd.f32 %v14543_v12, %v14542_v27 }
 0x5b9   :  { %v4095_v18 = vadd.f32 %v4094_v10, %v11114_v60  ;;  %v11133_v4 = vadd.f32 %v4024_v14, %v3816_v41  ;;  %v3407_v40 = vadd.f32 %v3406_v7, %v3198_v17  ;;  %v14546_v10 = vld [vmem:[#allocation102_spill] sm:$0xff] }
 0x5ba   :  { %v3204_v8 = vadd.f32 %v14547_v20, %v14546_v10  ;;  %v14554_v20 = vld [vmem:[#allocation189_spill] sm:$0xff] }
 0x5bb   :  { %v4096_v15 = vadd.f32 %v4095_v18, %v11119_v43  ;;  %v3409_v53 = vpop.f32.mrf.mxu1 }
 0x5bc   :  { %v3609_v2 = vpop.f32.mrf.mxu2  ;;  %v3410_v39 = vadd.f32 %v3409_v53, %v3201_v30  ;;  %v14551_v30 = vld [vmem:[#allocation186_spill] sm:$0xff] }
 0x5bd   :  { %v3610_v36 = vadd.f32 %v3609_v2, %v3401_v35  ;;  %v4027_v56 = vpop.f32.mrf.mxu0  ;;  %v4097_v26 = vadd.f32 %v4096_v15, %v11126_v13  ;;  %v3827_v49 = vpop.f32.mrf.mxu3 }
 0x5bf   :  { %v3819_v50 = vadd.f32 %v3818_v51, %v3610_v36  ;;  %v4098_v47 = vadd.f32 %v4097_v26, %v11130_v46 }
 0x5c1   :  { %v4028_v11 = vadd.f32 %v4027_v56, %v3819_v50  ;;  %v4099_v62 = vadd.f32 %v4098_v47, %v11133_v4 }
 0x5c3   :  { %v4100_v51 = vadd.f32 %v4099_v62, %v4028_v11  ;;  %v3412_v55 = vpop.f32.mrf.mxu1 }
 0x5c4   :  { %v3612_v6 = vpop.f32.mrf.mxu2  ;;  %v3413_v16 = vadd.f32 %v3412_v55, %v3204_v8  ;;  %v14555_v55 = vld [vmem:[#allocation108_spill] sm:$0xff] }
 0x5c5   :  { %v3613_v0 = vadd.f32 %v3612_v6, %v3404_v42  ;;  %v4030_v5 = vpop.f32.mrf.mxu0  ;;  %v3830_v56 = vpop.f32.mrf.mxu3 }
 0x5c7   :  { %v3822_v54 = vadd.f32 %v3821_v21, %v3613_v0 }
 0x5c9   :  { %v4031_v22 = vadd.f32 %v4030_v5, %v3822_v54 }
 0x5cb   :  { %v4101_v29 = vadd.f32 %v4100_v51, %v4031_v22 }
 0x5cc   :  { %v3615_v24 = vpop.f32.mrf.mxu2 }
 0x5cd   :  { %v3616_v14 = vadd.f32 %v3615_v24, %v3407_v40  ;;  %v4033_v63 = vpop.f32.mrf.mxu0 }
 0x5cf   :  { %v3825_v35 = vadd.f32 %v3824_v38, %v3616_v14  ;;  %v14549_v14 = vld [vmem:[#allocation183_spill] sm:$0xff] }
 0x5d1   :  { %v4034_v37 = vadd.f32 %v4033_v63, %v3825_v35  ;;  %v14552_v63 = vld [vmem:[#allocation187_spill] sm:$0xff] }
 0x5d3   :  { %v4102_v44 = vadd.f32 %v4101_v29, %v4034_v37  ;;  %v14548_v29 = vld [vmem:[#allocation184_spill] sm:$0xff] }
 0x5d4   :  { %v3618_v3 = vpop.f32.mrf.mxu2 }
 0x5d5   :  { %v3619_v2 = vadd.f32 %v3618_v3, %v3410_v39  ;;  %v4036_v21 = vpop.f32.mrf.mxu0 }
 0x5d7   :  { %v3828_v36 = vadd.f32 %v3827_v49, %v3619_v2 }
 0x5d9   :  { %v4037_v19 = vadd.f32 %v4036_v21, %v3828_v36 }
 0x5db   :  { %v4103_v18 = vadd.f32 %v4102_v44, %v4037_v19  ;;  %v14553_v44 = vld [vmem:[#allocation188_spill] sm:$0xff] }
 0x5dc   :  { %v3621_v41 = vpop.f32.mrf.mxu2 }
 0x5dd   :  { %v3622_v15 = vadd.f32 %v3621_v41, %v3413_v16  ;;  %v4039_v42 = vpop.f32.mrf.mxu0  ;;  %v14556_v41 = vld [vmem:[#allocation111_spill] sm:$0xff] }
 0x5df   :  { %v3831_v50 = vadd.f32 %v3830_v56, %v3622_v15 }
 0x5e1   :  { %v4040_v26 = vadd.f32 %v4039_v42, %v3831_v50  ;;  %v14557_v42 = vld [vmem:[#allocation114_spill] sm:$0xff] }
 0x5e3   :  { %v4104_v7 = vadd.f32 %v4103_v18, %v4040_v26 }
 0x5e5   :  { %v4105_v6 = vrot.slane %v4104_v7, 4 }
 0x5e7   :  { %v4106_v47 = vadd.f32 %v4105_v6, %v4104_v7 }
 0x5e9   :  { %v4107_v0 = vrot.slane %v4106_v47, 2 }
 0x5eb   :  { %v4108_v27 = vadd.f32 %v4107_v0, %v4106_v47  ;;  %v14558_v47 = vld [vmem:[#allocation117_spill] sm:$0xff] }
 0x5ed   :  { %v4109_v12 = vrot.slane %v4108_v27, 1 }
 0x5ef   :  { %v4110_v17 = vadd.f32 %v4109_v12, %v4108_v27 }
 0x5f1   :  { %v11143_v62 = vmul.f32 0.001953125, %v4110_v17  ;;  %v14559_v17 = vld [vmem:[#allocation120_spill] sm:$0xff] }
 0x5f3   :  { %v11146_v54 = vsub.f32 %v4028_v11, %v11143_v62  ;;  %v11149_v5 = vsub.f32 %v4031_v22, %v11143_v62  ;;  %v11152_v38 = vsub.f32 %v4034_v37, %v11143_v62  ;;  %v11155_v51 = vsub.f32 %v4037_v19, %v11143_v62  ;;  %v14550_v22 = vld [vmem:[#allocation185_spill] sm:$0xff] }
 0x5f4   :  { %v11158_v40 = vsub.f32 %v4040_v26, %v11143_v62  ;;  %v11162_v24 = vsub.f32 %v14548_v29, %v11143_v62  ;;  %v11166_v11 = vsub.f32 %v14549_v14, %v11143_v62  ;;  %v11170_v53 = vsub.f32 %v14550_v22, %v11143_v62 }
 0x5f5   :  { %v11178_v35 = vsub.f32 %v14551_v30, %v11143_v62  ;;  %v11182_v37 = vsub.f32 %v14552_v63, %v11143_v62  ;;  %v11188_v3 = vsub.f32 %v14553_v44, %v11143_v62  ;;  %v11194_v8 = vsub.f32 %v14554_v20, %v11143_v62 }
 0x5f6   :  { %v4176_v45 = vmul.f32 %v11162_v24, %v11162_v24  ;;  %v4177_v58 = vmul.f32 %v11166_v11, %v11166_v11  ;;  %v4178_v49 = vmul.f32 %v11170_v53, %v11170_v53  ;;  %v11200_v19 = vsub.f32 %v14555_v55, %v11143_v62  ;;  %v14563_v55 = vld [vmem:[#allocation128_spill] sm:$0xff] }
 0x5f7   :  { %v4179_v2 = vmul.f32 %v11178_v35, %v11178_v35  ;;  %v4180_v36 = vmul.f32 %v11182_v37, %v11182_v37  ;;  %v4181_v16 = vmul.f32 %v11188_v3, %v11188_v3  ;;  %v11206_v56 = vsub.f32 %v14556_v41, %v11143_v62 }
 0x5f8   :  { %v4240_v39 = vadd.f32 %v4177_v58, %v4176_v45  ;;  %v4182_v15 = vmul.f32 %v11194_v8, %v11194_v8  ;;  %v11212_v26 = vsub.f32 %v14557_v42, %v11143_v62  ;;  %v4183_v7 = vmul.f32 %v11200_v19, %v11200_v19  ;;  %v14560_v45 = vld [vmem:[#allocation190_spill] sm:$0xff] }
 0x5f9   :  { %v11218_v0 = vsub.f32 %v14558_v47, %v11143_v62  ;;  %v4184_v27 = vmul.f32 %v11206_v56, %v11206_v56  ;;  %v11224_v29 = vsub.f32 %v14559_v17, %v11143_v62  ;;  %v11230_v58 = vsub.f32 %v14560_v45, %v11143_v62  ;;  %v14569_v17 = vld [vmem:[#allocation137_spill] sm:$0xff] }
 0x5fa   :  { %v4241_v10 = vadd.f32 %v4240_v39, %v4178_v49  ;;  %v4185_v14 = vmul.f32 %v11212_v26, %v11212_v26  ;;  %v14561_v49 = vld [vmem:[#allocation123_spill] sm:$0xff] }
 0x5fb   :  { %v4186_v30 = vmul.f32 %v11218_v0, %v11218_v0  ;;  %v11236_v39 = vsub.f32 %v14561_v49, %v11143_v62  ;;  %v4187_v44 = vmul.f32 %v11224_v29, %v11224_v29 }
 0x5fc   :  { %v4242_v21 = vadd.f32 %v4241_v10, %v4179_v2  ;;  %v14562_v10 = vld [vmem:[#allocation126_spill] sm:$0xff] }
 0x5fd   :  { %v11242_v20 = vsub.f32 %v14562_v10, %v11143_v62 }
 0x5fe   :  { %v4243_v18 = vadd.f32 %v4242_v21, %v4180_v36  ;;  %v4188_v36 = vmul.f32 %v11230_v58, %v11230_v58 }
 0x5ff   :  { %v4190_v42 = vmul.f32 %v11242_v20, %v11242_v20 }
 0x600   :  { %v4244_v50 = vadd.f32 %v4243_v18, %v4181_v16  ;;  %v11248_v16 = vsub.f32 %v14563_v55, %v11143_v62  ;;  %v4189_v18 = vmul.f32 %v11236_v39, %v11236_v39  ;;  %v14575_v55 = vld [vmem:[#allocation140_spill] sm:$0xff] }
 0x602   :  { %v4245_v6 = vadd.f32 %v4244_v50, %v4182_v15  ;;  %14564 = vst [vmem:[#allocation98_spill] sm:$0xff] %v11248_v16  ;;  %v14565_v15 = vld [vmem:[#allocation130_spill] sm:$0xff] }
 0x603   :  { %v11254_v50 = vsub.f32 %v14565_v15, %v11143_v62 }
 0x604   :  { %v4246_v12 = vadd.f32 %v4245_v6, %v4183_v7  ;;  %v14567_v6 = vld [vmem:[#allocation132_spill] sm:$0xff] }
 0x605   :  { %14566 = vst [vmem:[#allocation157_spill] sm:$0xff] %v11254_v50  ;;  %v11260_v47 = vsub.f32 %v14567_v6, %v11143_v62 }
 0x606   :  { %v4247_v22 = vadd.f32 %v4246_v12, %v4184_v27  ;;  %v4191_v27 = vmul.f32 %v11248_v16, %v11248_v16 }
 0x607   :  { %14568 = vst [vmem:[#allocation112_spill] sm:$0xff] %v11260_v47  ;;  %v4193_v49 = vmul.f32 %v11260_v47, %v11260_v47 }
 0x608   :  { %v4248_v63 = vadd.f32 %v4247_v22, %v4185_v14  ;;  %v11266_v14 = vsub.f32 %v14569_v17, %v11143_v62  ;;  %v4192_v22 = vmul.f32 %v11254_v50, %v11254_v50 }
 0x60a   :  { %v4249_v2 = vadd.f32 %v4248_v63, %v4186_v30  ;;  %14570 = vst [vmem:[#allocation101_spill] sm:$0xff] %v11266_v14  ;;  %v14571_v30 = vld [vmem:[#allocation138_spill] sm:$0xff] }
 0x60b   :  { %v11272_v63 = vsub.f32 %v14571_v30, %v11143_v62  ;;  %v14581_v30 = vld [vmem:[#allocation143_spill] sm:$0xff] }
 0x60c   :  { %v4250_v21 = vadd.f32 %v4249_v2, %v4187_v44  ;;  %v14573_v2 = vld [vmem:[#allocation139_spill] sm:$0xff] }
 0x60d   :  { %14572 = vst [vmem:[#allocation156_spill] sm:$0xff] %v11272_v63  ;;  %v11278_v10 = vsub.f32 %v14573_v2, %v11143_v62 }
 0x60e   :  { %v4251_v41 = vadd.f32 %v4250_v21, %v4188_v36  ;;  %v4194_v36 = vmul.f32 %v11266_v14, %v11266_v14 }
 0x60f   :  { %14574 = vst [vmem:[#allocation115_spill] sm:$0xff] %v11278_v10  ;;  %v4196_v6 = vmul.f32 %v11278_v10, %v11278_v10 }
 0x610   :  { %v4252_v7 = vadd.f32 %v4251_v41, %v4189_v18  ;;  %v11284_v18 = vsub.f32 %v14575_v55, %v11143_v62  ;;  %v4195_v41 = vmul.f32 %v11272_v63, %v11272_v63 }
 0x612   :  { %v4253_v12 = vadd.f32 %v4252_v7, %v4190_v42  ;;  %14576 = vst [vmem:[#allocation104_spill] sm:$0xff] %v11284_v18  ;;  %v14577_v42 = vld [vmem:[#allocation141_spill] sm:$0xff] }
 0x613   :  { %v11290_v7 = vsub.f32 %v14577_v42, %v11143_v62 }
 0x614   :  { %v4254_v45 = vadd.f32 %v4253_v12, %v4191_v27  ;;  %v14579_v12 = vld [vmem:[#allocation142_spill] sm:$0xff] }
 0x615   :  { %14578 = vst [vmem:[#allocation158_spill] sm:$0xff] %v11290_v7  ;;  %v11296_v17 = vsub.f32 %v14579_v12, %v11143_v62  ;;  %v14587_v12 = vld [vmem:[#allocation146_spill] sm:$0xff] }
 0x616   :  { %v4255_v44 = vadd.f32 %v4254_v45, %v4192_v22  ;;  %v4197_v22 = vmul.f32 %v11284_v18, %v11284_v18 }
 0x617   :  { %14580 = vst [vmem:[#allocation161_spill] sm:$0xff] %v11296_v17  ;;  %v4199_v55 = vmul.f32 %v11296_v17, %v11296_v17 }
 0x618   :  { %v4256_v21 = vadd.f32 %v4255_v44, %v4193_v49  ;;  %v11302_v49 = vsub.f32 %v14581_v30, %v11143_v62  ;;  %v4198_v44 = vmul.f32 %v11290_v7, %v11290_v7  ;;  %v11320_v30 = vsub.f32 %v14587_v12, %v11143_v62  ;;  %v14593_v12 = vld [vmem:[#allocation149_spill] sm:$0xff] }
 0x619   :  { %v4235_v7 = vmul.f32 %v11146_v54, %v11146_v54 }
 0x61a   :  { %v4257_v15 = vadd.f32 %v4256_v21, %v4194_v36  ;;  %14582 = vst [vmem:[#allocation118_spill] sm:$0xff] %v11302_v49  ;;  %v14583_v36 = vld [vmem:[#allocation144_spill] sm:$0xff] }
 0x61b   :  { %v11308_v21 = vsub.f32 %v14583_v36, %v11143_v62  ;;  %14588 = vst [vmem:[#allocation172_spill] sm:$0xff] %v11320_v30  ;;  %v14589_v36 = vld [vmem:[#allocation147_spill] sm:$0xff] }
 0x61c   :  { %v4258_v27 = vadd.f32 %v4257_v15, %v4195_v41  ;;  %v14585_v15 = vld [vmem:[#allocation145_spill] sm:$0xff]  ;;  %v11326_v17 = vsub.f32 %v14589_v36, %v11143_v62  ;;  %v14595_v36 = vld [vmem:[#allocation150_spill] sm:$0xff] }
 0x61d   :  { %14584 = vst [vmem:[#allocation107_spill] sm:$0xff] %v11308_v21  ;;  %v11314_v42 = vsub.f32 %v14585_v15, %v11143_v62  ;;  %v14591_v15 = vld [vmem:[#allocation148_spill] sm:$0xff] }
 0x61e   :  { %v4259_v45 = vadd.f32 %v4258_v27, %v4196_v6  ;;  %v4200_v6 = vmul.f32 %v11302_v49, %v11302_v49  ;;  %14590 = vst [vmem:[#allocation163_spill] sm:$0xff] %v11326_v17  ;;  %v11332_v49 = vsub.f32 %v14591_v15, %v11143_v62  ;;  %v14597_v15 = vld [vmem:[#allocation151_spill] sm:$0xff] }
 0x61f   :  { %14586 = vst [vmem:[#allocation159_spill] sm:$0xff] %v11314_v42 }
 0x620   :  { %v4260_v2 = vadd.f32 %v4259_v45, %v4197_v22  ;;  %v4201_v22 = vmul.f32 %v11308_v21, %v11308_v21  ;;  %14592 = vst [vmem:[#allocation121_spill] sm:$0xff] %v11332_v49  ;;  %v11338_v21 = vsub.f32 %v14593_v12, %v11143_v62  ;;  %v14599_v12 = vld [vmem:[#allocation152_spill] sm:$0xff] }
 0x622   :  { %v4261_v41 = vadd.f32 %v4260_v2, %v4198_v44  ;;  %v4202_v44 = vmul.f32 %v11314_v42, %v11314_v42  ;;  %14594 = vst [vmem:[#allocation110_spill] sm:$0xff] %v11338_v21  ;;  %v11344_v42 = vsub.f32 %v14595_v36, %v11143_v62  ;;  %v14601_v36 = vld [vmem:[#allocation153_spill] sm:$0xff] }
 0x624   :  { %v4262_v27 = vadd.f32 %v4261_v41, %v4199_v55  ;;  %v4203_v55 = vmul.f32 %v11320_v30, %v11320_v30  ;;  %14596 = vst [vmem:[#allocation164_spill] sm:$0xff] %v11344_v42  ;;  %v11350_v30 = vsub.f32 %v14597_v15, %v11143_v62  ;;  %v14603_v15 = vld [vmem:[#allocation100_spill] sm:$0xff] }
 0x626   :  { %v4263_v45 = vadd.f32 %v4262_v27, %v4200_v6  ;;  %v4204_v6 = vmul.f32 %v11326_v17, %v11326_v17  ;;  %14598 = vst [vmem:[#allocation165_spill] sm:$0xff] %v11350_v30  ;;  %v11356_v17 = vsub.f32 %v14599_v12, %v11143_v62  ;;  %v14604_v12 = vld [vmem:[#allocation94_spill] sm:$0xff] }
 0x628   :  { %v4264_v2 = vadd.f32 %v4263_v45, %v4201_v22  ;;  %v4205_v22 = vmul.f32 %v11332_v49, %v11332_v49  ;;  %14600 = vst [vmem:[#allocation160_spill] sm:$0xff] %v11356_v17  ;;  %v11362_v49 = vsub.f32 %v14601_v36, %v11143_v62  ;;  %v14605_v36 = vld [vmem:[#allocation106_spill] sm:$0xff] }
 0x62a   :  { %v4265_v41 = vadd.f32 %v4264_v2, %v4202_v44  ;;  %v4206_v44 = vmul.f32 %v11338_v21, %v11338_v21  ;;  %14602 = vst [vmem:[#allocation176_spill] sm:$0xff] %v11362_v49  ;;  %v11368_v21 = vsub.f32 %v14603_v15, %v11143_v62  ;;  %v14606_v15 = vld [vmem:[#allocation155_spill] sm:$0xff] }
 0x62c   :  { %v4266_v27 = vadd.f32 %v4265_v41, %v4203_v55  ;;  %v4207_v55 = vmul.f32 %v11344_v42, %v11344_v42  ;;  %v11374_v42 = vsub.f32 %v14604_v12, %v11143_v62  ;;  %v14607_v12 = vld [vmem:[#allocation154_spill] sm:$0xff] }
 0x62e   :  { %v4267_v45 = vadd.f32 %v4266_v27, %v4204_v6  ;;  %v4208_v6 = vmul.f32 %v11350_v30, %v11350_v30  ;;  %v11380_v30 = vsub.f32 %v14605_v36, %v11143_v62  ;;  %v11398_v36 = vsub.f32 %v10985_v57, %v11143_v62 }
 0x630   :  { %v4268_v2 = vadd.f32 %v4267_v45, %v4205_v22  ;;  %v4209_v22 = vmul.f32 %v11356_v17, %v11356_v17  ;;  %v11386_v17 = vsub.f32 %v14606_v15, %v11143_v62  ;;  %v11404_v15 = vsub.f32 %v10998_v48, %v11143_v62 }
 0x631   :  { %v4216_v57 = vmul.f32 %v11398_v36, %v11398_v36 }
 0x632   :  { %v4269_v41 = vadd.f32 %v4268_v2, %v4206_v44  ;;  %v4210_v44 = vmul.f32 %v11362_v49, %v11362_v49  ;;  %v11392_v49 = vsub.f32 %v14607_v12, %v11143_v62  ;;  %v11410_v12 = vsub.f32 %v11007_v23, %v11143_v62 }
 0x633   :  { %v4217_v48 = vmul.f32 %v11404_v15, %v11404_v15 }
 0x634   :  { %v4270_v27 = vadd.f32 %v4269_v41, %v4207_v55  ;;  %v4211_v55 = vmul.f32 %v11368_v21, %v11368_v21  ;;  %v4218_v23 = vmul.f32 %v11410_v12, %v11410_v12 }
 0x636   :  { %v4271_v45 = vadd.f32 %v4270_v27, %v4208_v6  ;;  %v4212_v6 = vmul.f32 %v11374_v42, %v11374_v42 }
 0x638   :  { %v4272_v2 = vadd.f32 %v4271_v45, %v4209_v22  ;;  %v4213_v22 = vmul.f32 %v11380_v30, %v11380_v30 }
 0x63a   :  { %v4273_v41 = vadd.f32 %v4272_v2, %v4210_v44  ;;  %v4214_v44 = vmul.f32 %v11386_v17, %v11386_v17 }
 0x63c   :  { %v4274_v27 = vadd.f32 %v4273_v41, %v4211_v55  ;;  %v4215_v55 = vmul.f32 %v11392_v49, %v11392_v49 }
 0x63e   :  { %v4275_v45 = vadd.f32 %v4274_v27, %v4212_v6  ;;  %v11416_v27 = vsub.f32 %v11018_v33, %v11143_v62 }
 0x640   :  { %v4276_v2 = vadd.f32 %v4275_v45, %v4213_v22  ;;  %v11422_v45 = vsub.f32 %v11027_v31, %v11143_v62  ;;  %v4219_v33 = vmul.f32 %v11416_v27, %v11416_v27 }
 0x642   :  { %v4277_v41 = vadd.f32 %v4276_v2, %v4214_v44  ;;  %v11428_v2 = vsub.f32 %v11038_v28, %v11143_v62  ;;  %v4220_v31 = vmul.f32 %v11422_v45, %v11422_v45 }
 0x644   :  { %v4278_v6 = vadd.f32 %v4277_v41, %v4215_v55  ;;  %v11434_v41 = vsub.f32 %v11049_v52, %v11143_v62  ;;  %v4221_v28 = vmul.f32 %v11428_v2, %v11428_v2 }
 0x646   :  { %v4279_v22 = vadd.f32 %v4278_v6, %v4216_v57  ;;  %v11440_v6 = vsub.f32 %v11058_v25, %v11143_v62  ;;  %v4222_v52 = vmul.f32 %v11434_v41, %v11434_v41 }
 0x648   :  { %v4280_v44 = vadd.f32 %v4279_v22, %v4217_v48  ;;  %v11446_v22 = vsub.f32 %v11067_v34, %v11143_v62  ;;  %v4223_v25 = vmul.f32 %v11440_v6, %v11440_v6 }
 0x64a   :  { %v4281_v55 = vadd.f32 %v4280_v44, %v4218_v23  ;;  %v11452_v44 = vsub.f32 %v11076_v59, %v11143_v62  ;;  %v4224_v34 = vmul.f32 %v11446_v22, %v11446_v22 }
 0x64c   :  { %v4282_v57 = vadd.f32 %v4281_v55, %v4219_v33  ;;  %v11458_v55 = vsub.f32 %v11085_v32, %v11143_v62  ;;  %v4225_v59 = vmul.f32 %v11452_v44, %v11452_v44 }
 0x64e   :  { %v4283_v48 = vadd.f32 %v4282_v57, %v4220_v31  ;;  %v11464_v57 = vsub.f32 %v11094_v61, %v11143_v62  ;;  %v4226_v32 = vmul.f32 %v11458_v55, %v11458_v55 }
 0x650   :  { %v4284_v23 = vadd.f32 %v4283_v48, %v4221_v28  ;;  %v11470_v48 = vsub.f32 %v11103_v1, %v11143_v62  ;;  %v4227_v61 = vmul.f32 %v11464_v57, %v11464_v57 }
 0x652   :  { %v4285_v33 = vadd.f32 %v4284_v23, %v4222_v52  ;;  %v11476_v23 = vsub.f32 %v11109_v9, %v11143_v62  ;;  %v4228_v1 = vmul.f32 %v11470_v48, %v11470_v48 }
 0x654   :  { %v4286_v31 = vadd.f32 %v4285_v33, %v4223_v25  ;;  %v11482_v33 = vsub.f32 %v11114_v60, %v11143_v62  ;;  %v4229_v9 = vmul.f32 %v11476_v23, %v11476_v23 }
 0x656   :  { %v4287_v28 = vadd.f32 %v4286_v31, %v4224_v34  ;;  %v11488_v31 = vsub.f32 %v11119_v43, %v11143_v62  ;;  %v4230_v60 = vmul.f32 %v11482_v33, %v11482_v33 }
 0x658   :  { %v4288_v52 = vadd.f32 %v4287_v28, %v4225_v59  ;;  %v11494_v28 = vsub.f32 %v11126_v13, %v11143_v62  ;;  %v4231_v43 = vmul.f32 %v11488_v31, %v11488_v31 }
 0x65a   :  { %v4289_v25 = vadd.f32 %v4288_v52, %v4226_v32  ;;  %v11500_v52 = vsub.f32 %v11130_v46, %v11143_v62  ;;  %v4232_v13 = vmul.f32 %v11494_v28, %v11494_v28 }
 0x65c   :  { %v4290_v34 = vadd.f32 %v4289_v25, %v4227_v61  ;;  %v11506_v25 = vsub.f32 %v11133_v4, %v11143_v62  ;;  %v4236_v4 = vmul.f32 %v11149_v5, %v11149_v5 }
 0x65e   :  { %v4291_v59 = vadd.f32 %v4290_v34, %v4228_v1  ;;  %v4233_v34 = vmul.f32 %v11500_v52, %v11500_v52  ;;  %v4234_v46 = vmul.f32 %v11506_v25, %v11506_v25 }
 0x660   :  { %v4292_v32 = vadd.f32 %v4291_v59, %v4229_v9 }
 0x662   :  { %v4293_v61 = vadd.f32 %v4292_v32, %v4230_v60  ;;  %v4237_v32 = vmul.f32 %v11152_v38, %v11152_v38 }
 0x664   :  { %v4294_v1 = vadd.f32 %v4293_v61, %v4231_v43  ;;  %v4238_v61 = vmul.f32 %v11155_v51, %v11155_v51 }
 0x666   :  { %v4295_v9 = vadd.f32 %v4294_v1, %v4232_v13  ;;  %v4239_v1 = vmul.f32 %v11158_v40, %v11158_v40 }
 0x668   :  { %v4296_v59 = vadd.f32 %v4295_v9, %v4233_v34 }
 0x66a   :  { %v4297_v60 = vadd.f32 %v4296_v59, %v4234_v46 }
 0x66c   :  { %v4298_v62 = vadd.f32 %v4297_v60, %v4235_v7 }
 0x66e   :  { %v4299_v43 = vadd.f32 %v4298_v62, %v4236_v4 }
 0x670   :  { %v4300_v13 = vadd.f32 %v4299_v43, %v4237_v32  ;;  %v4310_v32 = vld [vmem:[%s13896_s2] sm:$0x1] }
 0x672   :  { %v4301_v34 = vadd.f32 %v4300_v13, %v4238_v61  ;;  %v6318_v61 = vld [vmem:[#allocation9 + $0x20] sm:$0xff] }
 0x673   :  { %6469 = vmatpush.msra.mxu1 %v6318_v61 }
 0x674   :  { %v4302_v9 = vadd.f32 %v4301_v34, %v4239_v1 }
 0x676   :  { %v4303_v18 = vrot.slane %v4302_v9, 4 }
 0x678   :  { %v4304_v10 = vadd.f32 %v4303_v18, %v4302_v9 }
 0x67a   :  { %v4305_v46 = vrot.slane %v4304_v10, 2 }
 0x67c   :  { %v4306_v59 = vadd.f32 %v4305_v46, %v4304_v10 }
 0x67e   :  { %v4307_v63 = vrot.slane %v4306_v59, 1 }
 0x680   :  { %v4308_v14 = vadd.f32 %v4307_v63, %v4306_v59 }
 0x682   :  { %v4309_v7 = vmul.f32 0.001953125, %v4308_v14  ;;  %v11530_v14 = vld [vmem:[%s13897_s3] ss:$0 sm:$0xff] }
 0x684   :  { %v4311_v60 = vadd.f32 1e-05, %v4309_v7 }
 0x686   :  { %9008 = vrsqrt.f32 %v4311_v60  ;;  %vm4318_vm1 = vweird.f32 %v4311_v60 }
 0x68c   :  { %v9009_v47 = vpop.eup %9008 }
 0x68d   :  { %v4313_v4 = vmul.f32 %v9009_v47, %v4311_v60  ;;  %vm4319_vm0 = vweird.f32 %v9009_v47 }
 0x68e   :  { %vm4320_vm2 = vmor %vm4318_vm1, %vm4319_vm0 }
 0x68f   :  { %v4314_v62 = vmul.f32 %v9009_v47, %v4313_v4  ;;  %v6343_v4 = vld [vmem:[#allocation9 + $0xe8] sm:$0xff] }
 0x691   :  { %v4315_v50 = vmul.f32 0.5, %v4314_v62 }
 0x693   :  { %v4316_v16 = vsub.f32 1.5, %v4315_v50 }
 0x695   :  { %v4317_v43 = vmul.f32 %v9009_v47, %v4316_v16 }
 0x697   :  { %v4321_v18 = vsel %vm4320_vm2, %v9009_v47, %v4317_v43 }
 0x698   :  { %v4322_v10 = vmul.f32 %v4321_v18, %v4310_v32  ;;  %v6342_v32 = vld [vmem:[#allocation9 + $0xe0] sm:$0xff]  ;;  %v6341_v18 = vld [vmem:[#allocation9 + $0xd8] sm:$0xff] }
 0x69a   :  { %v11532_v63 = vperm.slane %v4322_v10, 0 }
 0x69c   :  { %v4389_v50 = vmul.f32 %v11532_v63, %v11158_v40  ;;  %v4326_v16 = vmul.f32 %v11532_v63, %v11162_v24  ;;  %v4327_v47 = vmul.f32 %v11532_v63, %v11166_v11  ;;  %v4328_v34 = vmul.f32 %v11532_v63, %v11170_v53 }
 0x69d   :  { %v4329_v9 = vmul.f32 %v11532_v63, %v11178_v35  ;;  %v4330_v40 = vmul.f32 %v11532_v63, %v11182_v37  ;;  %v4331_v46 = vmul.f32 %v11532_v63, %v11188_v3  ;;  %v4332_v59 = vmul.f32 %v11532_v63, %v11194_v8  ;;  %v6345_v8 = vld [vmem:[#allocation9 + $0xf8] sm:$0xff] }
 0x69e   :  { %v4457_v13 = vadd.f32 %v11530_v14, %v4389_v50  ;;  %v11553_v24 = vmul.f32 %v11532_v63, %v11200_v19  ;;  %v11557_v11 = vmul.f32 %v11532_v63, %v11206_v56  ;;  %v11561_v53 = vmul.f32 %v11532_v63, %v11212_v26  ;;  %6667 = vmatpush.msrb.mxu2 %v6345_v8 }
 0x69f   :  { %v11565_v35 = vmul.f32 %v11532_v63, %v11218_v0  ;;  %v4361_v37 = vmul.f32 %v11532_v63, %v11368_v21  ;;  %v4362_v3 = vmul.f32 %v11532_v63, %v11374_v42  ;;  %v4363_v19 = vmul.f32 %v11532_v63, %v11380_v30 }
 0x6a0   :  { %v4521_v1 = vmax.f32 %v4457_v13, 0.0  ;;  %v4364_v56 = vmul.f32 %v11532_v63, %v11386_v17  ;;  %v4365_v26 = vmul.f32 %v11532_v63, %v11392_v49  ;;  %v4366_v0 = vmul.f32 %v11532_v63, %v11398_v36  ;;  %v6344_v17 = vld [vmem:[#allocation9 + $0xf0] sm:$0xff] }
 0x6a1   :  { %v4367_v21 = vmul.f32 %v11532_v63, %v11404_v15  ;;  %v4368_v42 = vmul.f32 %v11532_v63, %v11410_v12  ;;  %v4369_v7 = vmul.f32 %v11532_v63, %v11416_v27  ;;  %v4370_v30 = vmul.f32 %v11532_v63, %v11422_v45  ;;  %6668 = vmatpush.msrb.mxu2 %v6344_v17 }
 0x6a2   :  { %4585 = vst [vmem:[#allocation2 + $0x339] sm:$0xff] %v4521_v1  ;;  %v4371_v49 = vmul.f32 %v11532_v63, %v11428_v2  ;;  %v4372_v36 = vmul.f32 %v11532_v63, %v11434_v41  ;;  %v4373_v60 = vmul.f32 %v11532_v63, %v11440_v6  ;;  %v4374_v15 = vmul.f32 %v11532_v63, %v11446_v22  ;;  %v6361_v41 = vld [vmem:[#allocation9 + $0x178] sm:$0xff] }
 0x6a3   :  { %v4375_v12 = vmul.f32 %v11532_v63, %v11452_v44  ;;  %v4376_v27 = vmul.f32 %v11532_v63, %v11458_v55  ;;  %v4377_v45 = vmul.f32 %v11532_v63, %v11464_v57  ;;  %v4378_v2 = vmul.f32 %v11532_v63, %v11470_v48  ;;  %6876 = vmatpush.msrb.mxu3 %v6361_v41 }
 0x6a4   :  { %v4379_v6 = vmul.f32 %v11532_v63, %v11476_v23  ;;  %v4380_v22 = vmul.f32 %v11532_v63, %v11482_v33  ;;  %v4381_v44 = vmul.f32 %v11532_v63, %v11488_v31  ;;  %v4382_v55 = vmul.f32 %v11532_v63, %v11494_v28  ;;  %6669 = vmatpush.msrb.mxu2 %v6343_v4  ;;  %v6360_v33 = vld [vmem:[#allocation9 + $0x170] sm:$0xff] }
 0x6a5   :  { %v4383_v57 = vmul.f32 %v11532_v63, %v11500_v52  ;;  %v4384_v48 = vmul.f32 %v11532_v63, %v11506_v25  ;;  %v4385_v62 = vmul.f32 %v11532_v63, %v11146_v54  ;;  %v4386_v23 = vmul.f32 %v11532_v63, %v11149_v5  ;;  %6877 = vmatpush.msrb.mxu3 %v6360_v33 }
 0x6a6   :  { %v4387_v31 = vmul.f32 %v11532_v63, %v11152_v38  ;;  %v4388_v28 = vmul.f32 %v11532_v63, %v11155_v51  ;;  %v11624_v52 = vadd.f32 %v11530_v14, %v4326_v16  ;;  %v11627_v25 = vadd.f32 %v11530_v14, %v4327_v47  ;;  %6670 = vmatpush.msrb.mxu2 %v6342_v32  ;;  %v6359_v51 = vld [vmem:[#allocation9 + $0x168] sm:$0xff] }
 0x6a7   :  { %v11630_v54 = vadd.f32 %v11530_v14, %v4328_v34  ;;  %v11633_v5 = vadd.f32 %v11530_v14, %v4329_v9  ;;  %v11636_v43 = vadd.f32 %v11530_v14, %v4330_v40  ;;  %v11639_v38 = vadd.f32 %v11530_v14, %v4331_v46  ;;  %6878 = vmatpush.msrb.mxu3 %v6359_v51  ;;  %v6358_v9 = vld [vmem:[#allocation9 + $0x160] sm:$0xff]  ;;  %v6340_v40 = vld [vmem:[#allocation9 + $0xd0] sm:$0xff] }
 0x6a8   :  { %v11642_v10 = vadd.f32 %v11530_v14, %v4332_v59  ;;  %v11645_v61 = vadd.f32 %v11530_v14, %v4361_v37  ;;  %v11648_v50 = vadd.f32 %v11530_v14, %v4362_v3  ;;  %v11651_v13 = vadd.f32 %v11530_v14, %v4363_v19  ;;  %6671 = vmatpush.msrb.mxu2 %v6341_v18 }
 0x6a9   :  { %v11654_v1 = vadd.f32 %v11530_v14, %v4364_v56  ;;  %v11657_v16 = vadd.f32 %v11530_v14, %v4365_v26  ;;  %v11660_v47 = vadd.f32 %v11530_v14, %v4366_v0  ;;  %v11663_v34 = vadd.f32 %v11530_v14, %v4367_v21  ;;  %6879 = vmatpush.msrb.mxu3 %v6358_v9  ;;  %v6357_v0 = vld [vmem:[#allocation9 + $0x158] sm:$0xff]  ;;  %v6339_v21 = vld [vmem:[#allocation9 + $0xc8] sm:$0xff] }
 0x6aa   :  { %14608 = vst [vmem:[#allocation166_spill] sm:$0xff] %v11642_v10  ;;  %v11666_v46 = vadd.f32 %v11530_v14, %v4368_v42  ;;  %v11669_v59 = vadd.f32 %v11530_v14, %v4369_v7  ;;  %v11672_v37 = vadd.f32 %v11530_v14, %v4370_v30  ;;  %v11675_v3 = vadd.f32 %v11530_v14, %v4371_v49 }
 0x6ab   :  { %v11678_v8 = vadd.f32 %v11530_v14, %v4372_v36  ;;  %v11681_v19 = vadd.f32 %v11530_v14, %v4373_v60  ;;  %v11684_v56 = vadd.f32 %v11530_v14, %v4374_v15  ;;  %v11687_v26 = vadd.f32 %v11530_v14, %v4375_v12  ;;  %6672 = vmatpush.msrb.mxu2 %v6340_v40  ;;  %v6356_v12 = vld [vmem:[#allocation9 + $0x150] sm:$0xff]  ;;  %v14613_v40 = vld [vmem:[#allocation98_spill] sm:$0xff] }
 0x6ac   :  { %v11690_v42 = vadd.f32 %v11530_v14, %v4376_v27  ;;  %v11693_v7 = vadd.f32 %v11530_v14, %v4377_v45  ;;  %v11696_v30 = vadd.f32 %v11530_v14, %v4378_v2  ;;  %v11699_v17 = vadd.f32 %v11530_v14, %v4379_v6  ;;  %6880 = vmatpush.msrb.mxu3 %v6357_v0  ;;  %v6338_v27 = vld [vmem:[#allocation9 + $0xc0] sm:$0xff] }
 0x6ad   :  { %v11702_v49 = vadd.f32 %v11530_v14, %v4380_v22  ;;  %v11705_v36 = vadd.f32 %v11530_v14, %v4381_v44  ;;  %v11708_v60 = vadd.f32 %v11530_v14, %v4382_v55  ;;  %v11711_v15 = vadd.f32 %v11530_v14, %v4383_v57  ;;  %6673 = vmatpush.msrb.mxu2 %v6339_v21  ;;  %v6355_v57 = vld [vmem:[#allocation9 + $0x148] sm:$0xff] }
 0x6ae   :  { %v11714_v45 = vadd.f32 %v11530_v14, %v4384_v48  ;;  %v11717_v2 = vadd.f32 %v11530_v14, %v4385_v62  ;;  %v11720_v41 = vadd.f32 %v11530_v14, %v4386_v23  ;;  %v11723_v4 = vadd.f32 %v11530_v14, %v4387_v31  ;;  %6881 = vmatpush.msrb.mxu3 %v6356_v12  ;;  %v6337_v48 = vld [vmem:[#allocation9 + $0xb8] sm:$0xff] }
 0x6af   :  { %v11726_v6 = vadd.f32 %v11530_v14, %v4388_v28  ;;  %v14032_v22 = vmax.f32 %v11624_v52, 0.0  ;;  %v14030_v44 = vmax.f32 %v11627_v25, 0.0  ;;  %v14028_v55 = vmax.f32 %v11630_v54, 0.0  ;;  %6674 = vmatpush.msrb.mxu2 %v6338_v27 }
 0x6b0   :  { %v4337_v62 = vmul.f32 %v11532_v63, %v11224_v29  ;;  %v11735_v23 = vadd.f32 %v11530_v14, %v11553_v24  ;;  %v14026_v33 = vmax.f32 %v11633_v5, 0.0  ;;  %6882 = vmatpush.msrb.mxu3 %v6355_v57  ;;  %v4338_v32 = vmul.f32 %v11532_v63, %v11230_v58  ;;  %v6354_v29 = vld [vmem:[#allocation9 + $0x140] sm:$0xff] }
 0x6b1   :  { %v11742_v31 = vadd.f32 %v11530_v14, %v11557_v11  ;;  %v14027_v28 = vmax.f32 %v11636_v43, 0.0  ;;  %4522 = vst [vmem:[#allocation2 + $0x19] sm:$0xff] %v14032_v22  ;;  %6675 = vmatpush.msrb.mxu2 %v6337_v48  ;;  %v4339_v24 = vmul.f32 %v11532_v63, %v11236_v39  ;;  %v11751_v51 = vadd.f32 %v11530_v14, %v11561_v53  ;;  %v6336_v11 = vld [vmem:[#allocation9 + $0xb0] sm:$0xff]  ;;  %v6353_v53 = vld [vmem:[#allocation9 + $0x138] sm:$0xff] }
 0x6b2   :  { %14609 = vst [vmem:[#allocation124_spill] sm:$0xff] %v11735_v23  ;;  %v14029_v58 = vmax.f32 %v11639_v38, 0.0  ;;  %6883 = vmatpush.msrb.mxu3 %v6354_v29  ;;  %v4340_v18 = vmul.f32 %v11532_v63, %v11242_v20  ;;  %v11760_v9 = vadd.f32 %v11530_v14, %v11565_v35  ;;  %v14031_v39 = vmax.f32 %v11642_v10, 0.0  ;;  %v6335_v20 = vld [vmem:[#allocation9 + $0xa8] sm:$0xff]  ;;  %v14615_v35 = vld [vmem:[#allocation157_spill] sm:$0xff]  ;;  %v14617_v29 = vld [vmem:[#allocation112_spill] sm:$0xff] }
 0x6b3   :  { %14610 = vst [vmem:[#allocation113_spill] sm:$0xff] %v11742_v31  ;;  %6676 = vmatpush.msrb.mxu2 %v6336_v11  ;;  %v4341_v0 = vmul.f32 %v11532_v63, %v14613_v40  ;;  %v11768_v21 = vadd.f32 %v11530_v14, %v4337_v62  ;;  %v14033_v12 = vmax.f32 %v11735_v23, 0.0  ;;  %v4342_v27 = vmul.f32 %v11532_v63, %v14615_v35  ;;  %v6352_v62 = vld [vmem:[#allocation9 + $0x130] sm:$0xff]  ;;  %v14619_v35 = vld [vmem:[#allocation101_spill] sm:$0xff]  ;;  %v6315_v10 = vld [vmem:[#allocation9 + $0x8] sm:$0xff] }
 0x6b4   :  { %14611 = vst [vmem:[#allocation168_spill] sm:$0xff] %v11751_v51  ;;  %6884 = vmatpush.msrb.mxu3 %v6353_v53  ;;  %v11776_v57 = vadd.f32 %v11530_v14, %v4338_v32  ;;  %v14034_v48 = vmax.f32 %v11742_v31, 0.0  ;;  %v4343_v11 = vmul.f32 %v11532_v63, %v14617_v29  ;;  %v11784_v40 = vadd.f32 %v11530_v14, %v4339_v24  ;;  %v6334_v32 = vld [vmem:[#allocation9 + $0xa0] sm:$0xff]  ;;  %v6351_v24 = vld [vmem:[#allocation9 + $0x128] sm:$0xff]  ;;  %v14621_v29 = vld [vmem:[#allocation156_spill] sm:$0xff] }
 0x6b5   :  { %4523 = vst [vmem:[#allocation2 + $0x21] sm:$0xff] %v14030_v44  ;;  %6677 = vmatpush.msrb.mxu2 %v6335_v20  ;;  %v14035_v53 = vmax.f32 %v11751_v51, 0.0  ;;  %v14036_v20 = vmax.f32 %v11760_v9, 0.0  ;;  %v14636_v51 = vld [vmem:[#allocation172_spill] sm:$0xff] }
 0x6b6   :  { %14612 = vst [vmem:[#allocation162_spill] sm:$0xff] %v11760_v9  ;;  %6885 = vmatpush.msrb.mxu3 %v6352_v62  ;;  %v14038_v62 = vmax.f32 %v11768_v21, 0.0  ;;  %v14632_v9 = vld [vmem:[#allocation107_spill] sm:$0xff] }
 0x6b7   :  { %4524 = vst [vmem:[#allocation2 + $0x31] sm:$0xff] %v14028_v55  ;;  %6678 = vmatpush.msrb.mxu2 %v6334_v32  ;;  %v4345_v55 = vmul.f32 %v11532_v63, %v14621_v29  ;;  %v14625_v29 = vld [vmem:[#allocation104_spill] sm:$0xff] }
 0x6b8   :  { %14614 = vst [vmem:[#allocation169_spill] sm:$0xff] %v11768_v21  ;;  %6886 = vmatpush.msrb.mxu3 %v6351_v24  ;;  %v4347_v22 = vmul.f32 %v11532_v63, %v14625_v29  ;;  %v14628_v29 = vld [vmem:[#allocation161_spill] sm:$0xff]  ;;  %v14634_v21 = vld [vmem:[#allocation159_spill] sm:$0xff] }
 0x6b9   :  { %4525 = vst [vmem:[#allocation2 + $0x39] sm:$0xff] %v14026_v33  ;;  %v4344_v33 = vmul.f32 %v11532_v63, %v14619_v35  ;;  %v14623_v35 = vld [vmem:[#allocation115_spill] sm:$0xff]  ;;  %v4349_v24 = vmul.f32 %v11532_v63, %v14628_v29  ;;  %v14631_v29 = vmax.f32 %v11776_v57, 0.0 }
 0x6ba   :  { %14616 = vst [vmem:[#allocation127_spill] sm:$0xff] %v11776_v57  ;;  %v4346_v44 = vmul.f32 %v11532_v63, %v14623_v35  ;;  %v14626_v35 = vld [vmem:[#allocation158_spill] sm:$0xff]  ;;  %v6331_v57 = vld [vmem:[#allocation9 + $0x88] sm:$0xff] }
 0x6bb   :  { %4526 = vst [vmem:[#allocation2 + $0x49] sm:$0xff] %v14027_v28  ;;  %v11792_v28 = vadd.f32 %v11530_v14, %v4340_v18  ;;  %v6377_v18 = vld [vmem:[#allocation9 + $0x1f8] sm:$0xff]  ;;  %v4348_v32 = vmul.f32 %v11532_v63, %v14626_v35  ;;  %v14629_v35 = vld [vmem:[#allocation118_spill] sm:$0xff] }
 0x6bc   :  { %14618 = vst [vmem:[#allocation116_spill] sm:$0xff] %v11784_v40  ;;  %7085 = vmatpush.msrb.mxu0 %v6377_v18  ;;  %v4350_v18 = vmul.f32 %v11532_v63, %v14629_v35  ;;  %v14633_v35 = vmax.f32 %v11784_v40, 0.0  ;;  %v14638_v40 = vld [vmem:[#allocation163_spill] sm:$0xff] }
 0x6bd   :  { %4527 = vst [vmem:[#allocation2 + $0x51] sm:$0xff] %v14029_v58  ;;  %v11800_v58 = vadd.f32 %v11530_v14, %v4341_v0  ;;  %v6333_v0 = vld [vmem:[#allocation9 + $0x98] sm:$0xff] }
 0x6be   :  { %14620 = vst [vmem:[#allocation171_spill] sm:$0xff] %v11792_v28  ;;  %6679 = vmatpush.msrb.mxu2 %v6333_v0  ;;  %v4351_v0 = vmul.f32 %v11532_v63, %v14632_v9  ;;  %v14635_v9 = vmax.f32 %v11792_v28, 0.0  ;;  %v6330_v28 = vld [vmem:[#allocation9 + $0x80] sm:$0xff]  ;;  %v11872_v31 = vadd.f32 %v11530_v14, %v4350_v18 }
 0x6bf   :  { %4528 = vst [vmem:[#allocation2 + $0x61] sm:$0xff] %v14031_v39  ;;  %v11808_v39 = vadd.f32 %v11530_v14, %v4342_v27  ;;  %v6350_v27 = vld [vmem:[#allocation9 + $0x120] sm:$0xff] }
 0x6c0   :  { %14622 = vst [vmem:[#allocation90_spill] sm:$0xff] %v11800_v58  ;;  %6887 = vmatpush.msrb.mxu3 %v6350_v27  ;;  %v4352_v27 = vmul.f32 %v11532_v63, %v14634_v21  ;;  %v6316_v21 = vld [vmem:[#allocation9 + $0x10] sm:$0xff]  ;;  %v11880_v23 = vadd.f32 %v11530_v14, %v4351_v0 }
 0x6c1   :  { %4529 = vst [vmem:[#allocation2 + $0x69] sm:$0xff] %v14033_v12  ;;  %v11816_v12 = vadd.f32 %v11530_v14, %v4343_v11  ;;  %v6376_v11 = vld [vmem:[#allocation9 + $0x1f0] sm:$0xff] }
 0x6c2   :  { %14624 = vst [vmem:[#allocation175_spill] sm:$0xff] %v11808_v39  ;;  %7086 = vmatpush.msrb.mxu0 %v6376_v11  ;;  %v6348_v11 = vld [vmem:[#allocation9 + $0x110] sm:$0xff] }
 0x6c3   :  { %4530 = vst [vmem:[#allocation2 + $0x79] sm:$0xff] %v14034_v48  ;;  %v11824_v48 = vadd.f32 %v11530_v14, %v4344_v33  ;;  %v6332_v33 = vld [vmem:[#allocation9 + $0x90] sm:$0xff]  ;;  %v14641_v18 = vmax.f32 %v11816_v12, 0.0 }
 0x6c4   :  { %4531 = vst [vmem:[#allocation2 + $0x81] sm:$0xff] %v14035_v53  ;;  %v11832_v53 = vadd.f32 %v11530_v14, %v4345_v55  ;;  %6680 = vmatpush.msrb.mxu2 %v6332_v33  ;;  %v6349_v55 = vld [vmem:[#allocation9 + $0x118] sm:$0xff]  ;;  %v6374_v33 = vld [vmem:[#allocation9 + $0x1e0] sm:$0xff] }
 0x6c5   :  { %14627 = vst [vmem:[#allocation129_spill] sm:$0xff] %v11824_v48  ;;  %6888 = vmatpush.msrb.mxu3 %v6349_v55  ;;  %v11864_v55 = vadd.f32 %v11530_v14, %v4349_v24  ;;  %v14639_v24 = vmax.f32 %v11808_v39, 0.0  ;;  %v14642_v39 = vld [vmem:[#allocation110_spill] sm:$0xff]  ;;  %v14643_v0 = vmax.f32 %v11824_v48, 0.0  ;;  %v14646_v48 = vld [vmem:[#allocation165_spill] sm:$0xff] }
 0x6c6   :  { %4532 = vst [vmem:[#allocation2 + $0x91] sm:$0xff] %v14036_v20  ;;  %v11840_v20 = vadd.f32 %v11530_v14, %v4346_v44  ;;  %v6375_v44 = vld [vmem:[#allocation9 + $0x1e8] sm:$0xff]  ;;  %6681 = vmatpush.msrb.mxu2 %v6331_v57  ;;  %v14640_v57 = vld [vmem:[#allocation121_spill] sm:$0xff] }
 0x6c7   :  { %4533 = vst [vmem:[#allocation2 + $0x99] sm:$0xff] %v14038_v62  ;;  %v11848_v62 = vadd.f32 %v11530_v14, %v4347_v22  ;;  %v6317_v22 = vld [vmem:[#allocation9 + $0x18] sm:$0xff]  ;;  %7087 = vmatpush.msrb.mxu0 %v6375_v44  ;;  %v4354_v44 = vmul.f32 %v11532_v63, %v14638_v40  ;;  %6889 = vmatpush.msrb.mxu3 %v6348_v11  ;;  %v4842_v40 = vld [vmem:[#allocation2 + $0x2] sm:$0xff] }
 0x6c8   :  { %14630 = vst [vmem:[#allocation119_spill] sm:$0xff] %v11840_v20  ;;  %6470 = vmatpush.msra.mxu1 %v6317_v22  ;;  %v4714_v22 = vld [vmem:[#allocation2 + $0x1] sm:$0xff]  ;;  %6682 = vmatpush.msrb.mxu2 %v6330_v28  ;;  %v4356_v11 = vmul.f32 %v11532_v63, %v14642_v39  ;;  %v14648_v39 = vld [vmem:[#allocation160_spill] sm:$0xff] }
 0x6c9   :  { %4534 = vst [vmem:[#allocation2 + $0xa9] sm:$0xff] %v14631_v29  ;;  %v11856_v29 = vadd.f32 %v11530_v14, %v4348_v32  ;;  %v14637_v32 = vmax.f32 %v11800_v58, 0.0  ;;  %7088 = vmatpush.msrb.mxu0 %v6374_v33  ;;  %v4355_v58 = vmul.f32 %v11532_v63, %v14640_v57  ;;  %v11888_v33 = vadd.f32 %v11530_v14, %v4352_v27  ;;  %v6371_v57 = vld [vmem:[#allocation9 + $0x1c8] sm:$0xff] }
 0x6ca   :  { %4535 = vst [vmem:[#allocation2 + $0xb1] sm:$0xff] %v14633_v35  ;;  %v4353_v35 = vmul.f32 %v11532_v63, %v14636_v51  ;;  %6471 = vmatpush.msra.mxu1 %v6316_v21  ;;  %v6346_v51 = vld [vmem:[#allocation9 + $0x100] sm:$0xff]  ;;  %v14645_v27 = vmax.f32 %v11832_v53, 0.0  ;;  %6683 = vmatmul.f32.vlgmr.msrb.gmra.mxu2 %v4714_v22 }
 0x6cb   :  { %4536 = vst [vmem:[#allocation2 + $0xc1] sm:$0xff] %v14635_v9  ;;  %v6347_v9 = vld [vmem:[#allocation9 + $0x108] sm:$0xff] }
 0x6cc   :  { %4537 = vst [vmem:[#allocation2 + $0xc9] sm:$0xff] %v14637_v32  ;;  %v6373_v32 = vld [vmem:[#allocation9 + $0x1d8] sm:$0xff]  ;;  %6890 = vmatpush.msrb.mxu3 %v6347_v9  ;;  %v11896_v21 = vadd.f32 %v11530_v14, %v4353_v35  ;;  %6472 = vmatpush.msra.mxu1 %v6315_v10  ;;  %v11904_v9 = vadd.f32 %v11530_v14, %v4354_v44  ;;  %v6314_v35 = vld [vmem:[#allocation9] sm:$0xff] }
 0x6cd   :  { %4538 = vst [vmem:[#allocation2 + $0xd9] sm:$0xff] %v14639_v24  ;;  %v6372_v24 = vld [vmem:[#allocation9 + $0x1d0] sm:$0xff]  ;;  %7089 = vmatpush.msrb.mxu0 %v6373_v32  ;;  %v11912_v10 = vadd.f32 %v11530_v14, %v4355_v58  ;;  %v6370_v44 = vld [vmem:[#allocation9 + $0x1c0] sm:$0xff] }
 0x6ce   :  { %4539 = vst [vmem:[#allocation2 + $0xe1] sm:$0xff] %v14641_v18  ;;  %v14644_v18 = vld [vmem:[#allocation164_spill] sm:$0xff]  ;;  %6891 = vmatpush.msrb.mxu3 %v6346_v51  ;;  %6473 = vmatpush.msra.mxu1 %v6314_v35  ;;  %v4586_v32 = vld [vmem:[#allocation2] sm:$0xff]  ;;  %v4424_v51 = vadd.f32 %v11530_v14, %v4356_v11  ;;  %v6369_v35 = vld [vmem:[#allocation9 + $0x1b8] sm:$0xff] }
 0x6cf   :  { %4540 = vst [vmem:[#allocation2 + $0xf1] sm:$0xff] %v14643_v0  ;;  %v4357_v28 = vmul.f32 %v11532_v63, %v14644_v18  ;;  %v4358_v0 = vmul.f32 %v11532_v63, %v14646_v48  ;;  %v14647_v18 = vmax.f32 %v11840_v20, 0.0  ;;  %7090 = vmatpush.msrb.mxu0 %v6372_v24  ;;  %v14649_v48 = vmax.f32 %v11848_v62, 0.0  ;;  %6892 = vmatmul.f32.vlgmr.msrb.gmra.mxu3 %v4842_v40  ;;  %v14650_v20 = vld [vmem:[#allocation176_spill] sm:$0xff] }
 0x6d0   :  { %4541 = vst [vmem:[#allocation2 + $0xf9] sm:$0xff] %v14645_v27  ;;  %v4359_v27 = vmul.f32 %v11532_v63, %v14648_v39  ;;  %v4484_v24 = vmax.f32 %v11888_v33, 0.0  ;;  %v14651_v39 = vmax.f32 %v11856_v29, 0.0  ;;  %6474 = vmatmul.f32.vlgmr.msra.gmra.mxu1 %v4586_v32  ;;  %v14652_v40 = vmax.f32 %v11864_v55, 0.0  ;;  %v4715_v11 = vld [vmem:[#allocation2 + $0x9] sm:$0xff] }
 0x6d1   :  { %4542 = vst [vmem:[#allocation2 + $0x109] sm:$0xff] %v14647_v18  ;;  %v4360_v18 = vmul.f32 %v11532_v63, %v14650_v20  ;;  %7091 = vmatpush.msrb.mxu0 %v6371_v57  ;;  %v4425_v58 = vadd.f32 %v11530_v14, %v4357_v28  ;;  %v4426_v22 = vadd.f32 %v11530_v14, %v4358_v0  ;;  %v14653_v20 = vmax.f32 %v11872_v31, 0.0  ;;  %v4843_v0 = vld [vmem:[#allocation2 + $0xa] sm:$0xff] }
 0x6d2   :  { %4543 = vst [vmem:[#allocation2 + $0x111] sm:$0xff] %v14649_v48  ;;  %v4427_v57 = vadd.f32 %v11530_v14, %v4359_v27  ;;  %v14654_v28 = vmax.f32 %v11880_v23, 0.0  ;;  %v4488_v48 = vmax.f32 %v4424_v51, 0.0  ;;  %6686 = vmatmul.f32.gmra.mxu2 %v4715_v11  ;;  %v6367_v27 = vld [vmem:[#allocation9 + $0x1a8] sm:$0xff]  ;;  %v14656_v32 = vmax.f32 %v11904_v9, 0.0  ;;  %v6365_v11 = vld [vmem:[#allocation9 + $0x198] sm:$0xff] }
 0x6d3   :  { %4544 = vst [vmem:[#allocation2 + $0x121] sm:$0xff] %v14651_v39  ;;  %7092 = vmatpush.msrb.mxu0 %v6370_v44  ;;  %v6368_v39 = vld [vmem:[#allocation9 + $0x1b0] sm:$0xff]  ;;  %v4489_v63 = vmax.f32 %v4425_v58, 0.0  ;;  %v14655_v44 = vmax.f32 %v11896_v21, 0.0  ;;  %v11944_v58 = vld [vmem:[#allocation2 + $0x8] sm:$0xff] }
 0x6d4   :  { %4545 = vst [vmem:[#allocation2 + $0x129] sm:$0xff] %v14652_v40  ;;  %v4428_v40 = vadd.f32 %v11530_v14, %v4360_v18  ;;  %v14657_v14 = vmax.f32 %v11912_v10, 0.0  ;;  %v6366_v18 = vld [vmem:[#allocation9 + $0x1a0] sm:$0xff] }
 0x6d5   :  { %4546 = vst [vmem:[#allocation2 + $0x139] sm:$0xff] %v14653_v20  ;;  %7093 = vmatpush.msrb.mxu0 %v6369_v35  ;;  %v4490_v20 = vmax.f32 %v4426_v22, 0.0  ;;  %v6393_v35 = vld [vmem:[#allocation9 + $0x278] sm:$0xff]  ;;  %v4493_v22 = vmax.f32 %v11645_v61, 0.0  ;;  %v4497_v61 = vmax.f32 %v11657_v16, 0.0  ;;  %v4501_v16 = vmax.f32 %v11669_v59, 0.0 }
 0x6d6   :  { %4547 = vst [vmem:[#allocation2 + $0x141] sm:$0xff] %v14654_v28  ;;  %v4491_v28 = vmax.f32 %v4427_v57, 0.0  ;;  %v4492_v51 = vmax.f32 %v4428_v40, 0.0  ;;  %7294 = vmatpush.msrb.mxu1 %v6393_v35  ;;  %v4494_v57 = vmax.f32 %v11648_v50, 0.0  ;;  %v4496_v40 = vmax.f32 %v11654_v1, 0.0  ;;  %v6362_v1 = vld [vmem:[#allocation9 + $0x180] sm:$0xff] }
 0x6d7   :  { %4548 = vst [vmem:[#allocation2 + $0x151] sm:$0xff] %v4484_v24  ;;  %7094 = vmatpush.msrb.mxu0 %v6368_v39  ;;  %6895 = vmatmul.f32.gmra.mxu3 %v4843_v0  ;;  %v6364_v39 = vld [vmem:[#allocation9 + $0x190] sm:$0xff]  ;;  %v4844_v0 = vld [vmem:[#allocation2 + $0x1a] sm:$0xff]  ;;  %v14658_v50 = vmax.f32 %v11624_v52, 0.0  ;;  %v4502_v52 = vmax.f32 %v11672_v37, 0.0  ;;  %v4506_v59 = vmax.f32 %v11684_v56, 0.0 }
 0x6d8   :  { %4549 = vst [vmem:[#allocation2 + $0x159] sm:$0xff] %v14655_v44  ;;  %6477 = vmatmul.f32.gmra.mxu1 %v11944_v58  ;;  %v4588_v44 = vld [vmem:[#allocation2 + $0x18] sm:$0xff]  ;;  %v4507_v37 = vmax.f32 %v11687_v26, 0.0  ;;  %v4512_v56 = vmax.f32 %v11702_v49, 0.0  ;;  %v4513_v26 = vmax.f32 %v11705_v36, 0.0  ;;  %v4590_v35 = vld [vmem:[#allocation2 + $0x30] sm:$0xff] }
 0x6d9   :  { %4550 = vst [vmem:[#allocation2 + $0x169] sm:$0xff] %v14656_v32  ;;  %7095 = vmatpush.msrb.mxu0 %v6367_v27  ;;  %v4495_v32 = vmax.f32 %v11651_v13, 0.0  ;;  %v4498_v27 = vmax.f32 %v11660_v47, 0.0  ;;  %v4499_v13 = vmax.f32 %v11663_v34, 0.0  ;;  %v4503_v47 = vmax.f32 %v11675_v3, 0.0 }
 0x6da   :  { %4551 = vst [vmem:[#allocation2 + $0x171] sm:$0xff] %v14657_v14  ;;  %6689 = vmatmul.f32.gmra.mxu2 %v14658_v50  ;;  %v4504_v34 = vmax.f32 %v11678_v8, 0.0  ;;  %v4845_v14 = vld [vmem:[#allocation2 + $0x22] sm:$0xff]  ;;  %v4508_v3 = vmax.f32 %v11690_v42, 0.0  ;;  %v4509_v8 = vmax.f32 %v11693_v7, 0.0  ;;  %v14660_v42 = vmax.f32 %v11630_v54, 0.0 }
 0x6db   :  { %4552 = vst [vmem:[#allocation2 + $0x181] sm:$0xff] %v4488_v48  ;;  %7096 = vmatpush.msrb.mxu0 %v6366_v18  ;;  %v6392_v48 = vld [vmem:[#allocation9 + $0x270] sm:$0xff]  ;;  %v4589_v18 = vld [vmem:[#allocation2 + $0x20] sm:$0xff]  ;;  %v4517_v49 = vmax.f32 %v11717_v2, 0.0  ;;  %v4518_v36 = vmax.f32 %v11720_v41, 0.0  ;;  %v4519_v54 = vmax.f32 %v11723_v4, 0.0 }
 0x6dc   :  { %4553 = vst [vmem:[#allocation2 + $0x189] sm:$0xff] %v4489_v63  ;;  %7295 = vmatpush.msrb.mxu1 %v6392_v48  ;;  %v6363_v63 = vld [vmem:[#allocation9 + $0x188] sm:$0xff]  ;;  %v4846_v7 = vld [vmem:[#allocation2 + $0x32] sm:$0xff]  ;;  %v14662_v41 = vmax.f32 %v11636_v43, 0.0  ;;  %v6390_v43 = vld [vmem:[#allocation9 + $0x260] sm:$0xff] }
 0x6dd   :  { %4554 = vst [vmem:[#allocation2 + $0x1c9] sm:$0xff] %v4490_v20  ;;  %7097 = vmatpush.msrb.mxu0 %v6365_v11  ;;  %v4500_v20 = vmax.f32 %v11666_v46, 0.0  ;;  %v14659_v46 = vmax.f32 %v11627_v25, 0.0  ;;  %v4511_v25 = vmax.f32 %v11699_v17, 0.0  ;;  %v4516_v17 = vmax.f32 %v11714_v45, 0.0  ;;  %v4591_v2 = vld [vmem:[#allocation2 + $0x38] sm:$0xff] }
 0x6de   :  { %4555 = vst [vmem:[#allocation2 + $0x1d1] sm:$0xff] %v4491_v28  ;;  %v4505_v28 = vmax.f32 %v11681_v19, 0.0  ;;  %v4510_v19 = vmax.f32 %v11696_v30, 0.0  ;;  %v4515_v30 = vmax.f32 %v11711_v15, 0.0  ;;  %v4520_v15 = vmax.f32 %v11726_v6, 0.0  ;;  %v4848_v4 = vld [vmem:[#allocation2 + $0x4a] sm:$0xff] }
 0x6df   :  { %4556 = vst [vmem:[#allocation2 + $0x1e1] sm:$0xff] %v4492_v51  ;;  %7098 = vmatpush.msrb.mxu0 %v6364_v39  ;;  %6898 = vmatmul.f32.gmra.mxu3 %v4844_v0  ;;  %v4514_v51 = vmax.f32 %v11708_v60, 0.0  ;;  %v6391_v60 = vld [vmem:[#allocation9 + $0x268] sm:$0xff]  ;;  %v14661_v45 = vmax.f32 %v11633_v5, 0.0  ;;  %v14663_v6 = vmax.f32 %v11639_v38, 0.0  ;;  %v4849_v5 = vld [vmem:[#allocation2 + $0x52] sm:$0xff] }
 0x6e0   :  { %4557 = vst [vmem:[#allocation2 + $0x1e9] sm:$0xff] %v4493_v22  ;;  %6480 = vmatmul.f32.gmra.mxu1 %v4588_v44  ;;  %v4847_v22 = vld [vmem:[#allocation2 + $0x3a] sm:$0xff]  ;;  %v4592_v11 = vld [vmem:[#allocation2 + $0x48] sm:$0xff]  ;;  %v14666_v0 = vld [vmem:[#allocation124_spill] sm:$0xff] }
 0x6e1   :  { %4558 = vst [vmem:[#allocation2 + $0x1f9] sm:$0xff] %v4494_v57  ;;  %7099 = vmatpush.msrb.mxu0 %v6363_v63  ;;  %7296 = vmatpush.msrb.mxu1 %v6391_v60  ;;  %v4593_v57 = vld [vmem:[#allocation2 + $0x50] sm:$0xff]  ;;  %v4850_v48 = vld [vmem:[#allocation2 + $0x62] sm:$0xff]  ;;  %v4871_v33 = vld [vmem:[#allocation2 + $0x15a] sm:$0xff] }
 0x6e2   :  { %4559 = vst [vmem:[#allocation2 + $0x201] sm:$0xff] %v4495_v32  ;;  %6692 = vmatmul.f32.gmra.mxu2 %v14659_v46  ;;  %v14664_v32 = vld [vmem:[#allocation166_spill] sm:$0xff]  ;;  %v4851_v38 = vld [vmem:[#allocation2 + $0x6a] sm:$0xff] }
 0x6e3   :  { %4560 = vst [vmem:[#allocation2 + $0x211] sm:$0xff] %v4496_v40  ;;  %7100 = vmatpush.msrb.mxu0 %v6362_v1  ;;  %v14665_v39 = vmax.f32 %v14664_v32, 0.0  ;;  %v4594_v40 = vld [vmem:[#allocation2 + $0x60] sm:$0xff]  ;;  %7297 = vmatpush.msrb.mxu1 %v6390_v43  ;;  %v4595_v63 = vld [vmem:[#allocation2 + $0x68] sm:$0xff]  ;;  %v14670_v1 = vld [vmem:[#allocation168_spill] sm:$0xff] }
 0x6e4   :  { %4561 = vst [vmem:[#allocation2 + $0x219] sm:$0xff] %v4497_v61  ;;  %7101 = vmatmul.f32.vlgmr.msrb.gmra.mxu0 %v4588_v44  ;;  %v14667_v61 = vmax.f32 %v14666_v0, 0.0  ;;  %v14668_v44 = vld [vmem:[#allocation113_spill] sm:$0xff]  ;;  %v4598_v46 = vld [vmem:[#allocation2 + $0x90] sm:$0xff] }
 0x6e5   :  { %4562 = vst [vmem:[#allocation2 + $0x229] sm:$0xff] %v4498_v27  ;;  %v14669_v50 = vmax.f32 %v14668_v44, 0.0  ;;  %v4852_v27 = vld [vmem:[#allocation2 + $0x7a] sm:$0xff] }
 0x6e6   :  { %4563 = vst [vmem:[#allocation2 + $0x231] sm:$0xff] %v4499_v13  ;;  %v4596_v13 = vld [vmem:[#allocation2 + $0x78] sm:$0xff] }
 0x6e7   :  { %4564 = vst [vmem:[#allocation2 + $0x241] sm:$0xff] %v4500_v20  ;;  %6901 = vmatmul.f32.gmra.mxu3 %v4845_v14  ;;  %v14671_v20 = vmax.f32 %v14670_v1, 0.0  ;;  %v14674_v14 = vld [vmem:[#allocation169_spill] sm:$0xff]  ;;  %v14686_v1 = vmax.f32 %v11816_v12, 0.0 }
 0x6e8   :  { %4565 = vst [vmem:[#allocation2 + $0x249] sm:$0xff] %v4501_v16  ;;  %6483 = vmatmul.f32.gmra.mxu1 %v4589_v18  ;;  %v4853_v16 = vld [vmem:[#allocation2 + $0x82] sm:$0xff]  ;;  %v4860_v0 = vld [vmem:[#allocation2 + $0xda] sm:$0xff] }
 0x6e9   :  { %4566 = vst [vmem:[#allocation2 + $0x259] sm:$0xff] %v4502_v52  ;;  %v4597_v52 = vld [vmem:[#allocation2 + $0x80] sm:$0xff] }
 0x6ea   :  { %4567 = vst [vmem:[#allocation2 + $0x261] sm:$0xff] %v4503_v47  ;;  %6695 = vmatmul.f32.gmra.mxu2 %v14660_v42  ;;  %v14672_v47 = vld [vmem:[#allocation162_spill] sm:$0xff] }
 0x6eb   :  { %4568 = vst [vmem:[#allocation2 + $0x271] sm:$0xff] %v4504_v34  ;;  %v14673_v34 = vmax.f32 %v14672_v47, 0.0 }
 0x6ec   :  { %4569 = vst [vmem:[#allocation2 + $0x279] sm:$0xff] %v4505_v28  ;;  %7104 = vmatmul.f32.gmra.mxu0 %v4589_v18  ;;  %v4854_v28 = vld [vmem:[#allocation2 + $0x92] sm:$0xff]  ;;  %v4855_v18 = vld [vmem:[#allocation2 + $0x9a] sm:$0xff] }
 0x6ed   :  { %4570 = vst [vmem:[#allocation2 + $0x289] sm:$0xff] %v4506_v59  ;;  %v6389_v59 = vld [vmem:[#allocation9 + $0x258] sm:$0xff] }
 0x6ee   :  { %4571 = vst [vmem:[#allocation2 + $0x291] sm:$0xff] %v4507_v37  ;;  %7298 = vmatpush.msrb.mxu1 %v6389_v59  ;;  %v14675_v37 = vmax.f32 %v14674_v14, 0.0  ;;  %v14687_v14 = vld [vmem:[#allocation129_spill] sm:$0xff] }
 0x6ef   :  { %4572 = vst [vmem:[#allocation2 + $0x2a1] sm:$0xff] %v4508_v3  ;;  %6904 = vmatmul.f32.gmra.mxu3 %v4846_v7  ;;  %v4599_v3 = vld [vmem:[#allocation2 + $0x98] sm:$0xff]  ;;  %v4601_v7 = vld [vmem:[#allocation2 + $0xb0] sm:$0xff] }
 0x6f0   :  { %4573 = vst [vmem:[#allocation2 + $0x2a9] sm:$0xff] %v4509_v8  ;;  %6486 = vmatmul.f32.gmra.mxu1 %v4590_v35  ;;  %v14676_v8 = vld [vmem:[#allocation127_spill] sm:$0xff] }
 0x6f1   :  { %4574 = vst [vmem:[#allocation2 + $0x2b9] sm:$0xff] %v4510_v19  ;;  %v14677_v19 = vmax.f32 %v14676_v8, 0.0 }
 0x6f2   :  { %4575 = vst [vmem:[#allocation2 + $0x2c1] sm:$0xff] %v4511_v25  ;;  %6698 = vmatmul.f32.gmra.mxu2 %v14661_v45  ;;  %v4856_v25 = vld [vmem:[#allocation2 + $0xaa] sm:$0xff] }
 0x6f3   :  { %4576 = vst [vmem:[#allocation2 + $0x2d1] sm:$0xff] %v4512_v56  ;;  %v4600_v56 = vld [vmem:[#allocation2 + $0xa8] sm:$0xff] }
 0x6f4   :  { %4577 = vst [vmem:[#allocation2 + $0x2d9] sm:$0xff] %v4513_v26  ;;  %7107 = vmatmul.f32.gmra.mxu0 %v4590_v35  ;;  %v14678_v26 = vld [vmem:[#allocation116_spill] sm:$0xff]  ;;  %v14680_v35 = vld [vmem:[#allocation171_spill] sm:$0xff] }
 0x6f5   :  { %4578 = vst [vmem:[#allocation2 + $0x2e9] sm:$0xff] %v4514_v51  ;;  %v14679_v42 = vmax.f32 %v14678_v26, 0.0  ;;  %v4857_v51 = vld [vmem:[#allocation2 + $0xb2] sm:$0xff]  ;;  %v6387_v26 = vld [vmem:[#allocation9 + $0x248] sm:$0xff] }
 0x6f6   :  { %4579 = vst [vmem:[#allocation2 + $0x2f1] sm:$0xff] %v4515_v30 }
 0x6f7   :  { %4580 = vst [vmem:[#allocation2 + $0x301] sm:$0xff] %v4516_v17  ;;  %6907 = vmatmul.f32.gmra.mxu3 %v4847_v22  ;;  %v14681_v17 = vmax.f32 %v14680_v35, 0.0  ;;  %v6388_v22 = vld [vmem:[#allocation9 + $0x250] sm:$0xff] }
 0x6f8   :  { %4581 = vst [vmem:[#allocation2 + $0x309] sm:$0xff] %v4517_v49  ;;  %6489 = vmatmul.f32.gmra.mxu1 %v4591_v2  ;;  %v4858_v49 = vld [vmem:[#allocation2 + $0xc2] sm:$0xff] }
 0x6f9   :  { %4582 = vst [vmem:[#allocation2 + $0x319] sm:$0xff] %v4518_v36  ;;  %v4602_v36 = vld [vmem:[#allocation2 + $0xc0] sm:$0xff]  ;;  %7299 = vmatpush.msrb.mxu1 %v6388_v22 }
 0x6fa   :  { %4583 = vst [vmem:[#allocation2 + $0x321] sm:$0xff] %v4519_v54  ;;  %6701 = vmatmul.f32.gmra.mxu2 %v14662_v41  ;;  %v14682_v41 = vld [vmem:[#allocation90_spill] sm:$0xff] }
 0x6fb   :  { %4584 = vst [vmem:[#allocation2 + $0x331] sm:$0xff] %v4520_v15  ;;  %7300 = vmatpush.msrb.mxu1 %v6387_v26 }
 0x6fc   :  { %7110 = vmatmul.f32.gmra.mxu0 %v4591_v2 }
 0x6ff   :  { %6910 = vmatmul.f32.gmra.mxu3 %v4848_v4  ;;  %v14683_v4 = vmax.f32 %v14682_v41, 0.0  ;;  %v4608_v41 = vld [vmem:[#allocation2 + $0x108] sm:$0xff] }
 0x700   :  { %6492 = vmatmul.f32.gmra.mxu1 %v4592_v11 }
 0x702   :  { %6704 = vmatmul.f32.gmra.mxu2 %v14663_v6  ;;  %v4603_v6 = vld [vmem:[#allocation2 + $0xc8] sm:$0xff] }
 0x704   :  { %7113 = vmatmul.f32.gmra.mxu0 %v4592_v11  ;;  %v4859_v11 = vld [vmem:[#allocation2 + $0xca] sm:$0xff] }
 0x707   :  { %6913 = vmatmul.f32.gmra.mxu3 %v4849_v5 }
 0x708   :  { %6495 = vmatmul.f32.gmra.mxu1 %v4593_v57 }
 0x70a   :  { %6707 = vmatmul.f32.gmra.mxu2 %v14665_v39 }
 0x70c   :  { %7116 = vmatmul.f32.gmra.mxu0 %v4593_v57 }
 0x70f   :  { %6916 = vmatmul.f32.gmra.mxu3 %v4850_v48 }
 0x710   :  { %6498 = vmatmul.f32.gmra.mxu1 %v4594_v40 }
 0x712   :  { %6710 = vmatmul.f32.gmra.mxu2 %v14667_v61  ;;  %v4604_v61 = vld [vmem:[#allocation2 + $0xd8] sm:$0xff] }
 0x714   :  { %7119 = vmatmul.f32.gmra.mxu0 %v4594_v40  ;;  %v14684_v40 = vld [vmem:[#allocation175_spill] sm:$0xff] }
 0x715   :  { %v14685_v43 = vmax.f32 %v14684_v40, 0.0  ;;  %v4609_v40 = vld [vmem:[#allocation2 + $0x110] sm:$0xff] }
 0x717   :  { %6919 = vmatmul.f32.gmra.mxu3 %v4851_v38 }
 0x718   :  { %6501 = vmatmul.f32.gmra.mxu1 %v4595_v63 }
 0x71a   :  { %6713 = vmatmul.f32.gmra.mxu2 %v14669_v50 }
 0x71c   :  { %7122 = vmatmul.f32.gmra.mxu0 %v4595_v63 }
 0x71f   :  { %6922 = vmatmul.f32.gmra.mxu3 %v4852_v27 }
 0x720   :  { %6504 = vmatmul.f32.gmra.mxu1 %v4596_v13 }
 0x722   :  { %6716 = vmatmul.f32.gmra.mxu2 %v14671_v20  ;;  %v4861_v20 = vld [vmem:[#allocation2 + $0xe2] sm:$0xff] }
 0x724   :  { %7125 = vmatmul.f32.gmra.mxu0 %v4596_v13 }
 0x727   :  { %6925 = vmatmul.f32.gmra.mxu3 %v4853_v16  ;;  %v4605_v16 = vld [vmem:[#allocation2 + $0xe0] sm:$0xff] }
 0x728   :  { %6507 = vmatmul.f32.gmra.mxu1 %v4597_v52 }
 0x72a   :  { %6719 = vmatmul.f32.gmra.mxu2 %v14673_v34 }
 0x72c   :  { %7128 = vmatmul.f32.gmra.mxu0 %v4597_v52 }
 0x72f   :  { %6928 = vmatmul.f32.gmra.mxu3 %v4854_v28 }
 0x730   :  { %6510 = vmatmul.f32.gmra.mxu1 %v4598_v46 }
 0x732   :  { %6722 = vmatmul.f32.gmra.mxu2 %v14675_v37  ;;  %v14688_v37 = vmax.f32 %v14687_v14, 0.0 }
 0x734   :  { %7131 = vmatmul.f32.gmra.mxu0 %v4598_v46 }
 0x737   :  { %6931 = vmatmul.f32.gmra.mxu3 %v4855_v18  ;;  %v4862_v18 = vld [vmem:[#allocation2 + $0xf2] sm:$0xff] }
 0x738   :  { %6513 = vmatmul.f32.gmra.mxu1 %v4599_v3 }
 0x73a   :  { %6725 = vmatmul.f32.gmra.mxu2 %v14677_v19 }
 0x73c   :  { %7134 = vmatmul.f32.gmra.mxu0 %v4599_v3  ;;  %v4606_v3 = vld [vmem:[#allocation2 + $0xf0] sm:$0xff] }
 0x73f   :  { %6934 = vmatmul.f32.gmra.mxu3 %v4856_v25 }
 0x740   :  { %6516 = vmatmul.f32.gmra.mxu1 %v4600_v56 }
 0x742   :  { %6728 = vmatmul.f32.gmra.mxu2 %v14679_v42 }
 0x744   :  { %7137 = vmatmul.f32.gmra.mxu0 %v4600_v56 }
 0x747   :  { %6937 = vmatmul.f32.gmra.mxu3 %v4857_v51  ;;  %v14689_v51 = vmax.f32 %v11832_v53, 0.0 }
 0x748   :  { %6519 = vmatmul.f32.gmra.mxu1 %v4601_v7 }
 0x74a   :  { %6731 = vmatmul.f32.gmra.mxu2 %v14681_v17 }
 0x74c   :  { %7140 = vmatmul.f32.gmra.mxu0 %v4601_v7  ;;  %v4863_v7 = vld [vmem:[#allocation2 + $0xfa] sm:$0xff] }
 0x74d   :  { %v6475_v30 = vpop.f32.mrf.mxu1  ;;  %v6684_v54 = vpop.f32.mrf.mxu2 }
 0x74e   :  { %v6685_v60 = vadd.f32 %v6684_v54, %v6475_v30  ;;  %v4607_v30 = vld [vmem:[#allocation2 + $0xf8] sm:$0xff] }
 0x74f   :  { %6940 = vmatmul.f32.gmra.mxu3 %v4858_v49 }
 0x750   :  { %6522 = vmatmul.f32.gmra.mxu1 %v4602_v36 }
 0x752   :  { %v6893_v15 = vpop.f32.mrf.mxu3  ;;  %6734 = vmatmul.f32.gmra.mxu2 %v14683_v4 }
 0x753   :  { %v12005_v45 = vadd.f32 %v6893_v15, %v6685_v60  ;;  %v14690_v15 = vld [vmem:[#allocation119_spill] sm:$0xff] }
 0x754   :  { %7143 = vmatmul.f32.gmra.mxu0 %v4602_v36  ;;  %v14691_v22 = vmax.f32 %v14690_v15, 0.0 }
 0x755   :  { %v6478_v2 = vpop.f32.mrf.mxu1  ;;  %v6687_v5 = vpop.f32.mrf.mxu2 }
 0x756   :  { %v6688_v57 = vadd.f32 %v6687_v5, %v6478_v2  ;;  %v4864_v2 = vld [vmem:[#allocation2 + $0x10a] sm:$0xff] }
 0x757   :  { %6943 = vmatmul.f32.gmra.mxu3 %v4859_v11 }
 0x758   :  { %6525 = vmatmul.f32.gmra.mxu1 %v4603_v6 }
 0x75a   :  { %v6896_v32 = vpop.f32.mrf.mxu3  ;;  %6737 = vmatmul.f32.gmra.mxu2 %v14685_v43 }
 0x75b   :  { %v12009_v39 = vadd.f32 %v6896_v32, %v6688_v57  ;;  %v14692_v32 = vmax.f32 %v11848_v62, 0.0 }
 0x75c   :  { %7146 = vmatmul.f32.gmra.mxu0 %v4603_v6 }
 0x75d   :  { %v6481_v48 = vpop.f32.mrf.mxu1  ;;  %v6690_v63 = vpop.f32.mrf.mxu2 }
 0x75e   :  { %v6691_v44 = vadd.f32 %v6690_v63, %v6481_v48  ;;  %v4865_v48 = vld [vmem:[#allocation2 + $0x112] sm:$0xff] }
 0x75f   :  { %6946 = vmatmul.f32.gmra.mxu3 %v4860_v0 }
 0x760   :  { %6528 = vmatmul.f32.gmra.mxu1 %v4604_v61 }
 0x761   :  { %v12013_v38 = vpop.f32.mrf.mxu0 }
 0x762   :  { %v6899_v50 = vpop.f32.mrf.mxu3  ;;  %6740 = vmatmul.f32.gmra.mxu2 %v14686_v1  ;;  %v4866_v1 = vld [vmem:[#allocation2 + $0x122] sm:$0xff] }
 0x763   :  { %v12015_v27 = vadd.f32 %v6899_v50, %v6691_v44 }
 0x764   :  { %7149 = vmatmul.f32.gmra.mxu0 %v4604_v61 }
 0x765   :  { %v6484_v13 = vpop.f32.mrf.mxu1  ;;  %v6693_v47 = vpop.f32.mrf.mxu2 }
 0x766   :  { %v6694_v34 = vadd.f32 %v6693_v47, %v6484_v13  ;;  %v14693_v13 = vmax.f32 %v11856_v29, 0.0  ;;  %v4867_v29 = vld [vmem:[#allocation2 + $0x12a] sm:$0xff] }
 0x767   :  { %6949 = vmatmul.f32.gmra.mxu3 %v4861_v20  ;;  %v4610_v20 = vld [vmem:[#allocation2 + $0x120] sm:$0xff] }
 0x768   :  { %6531 = vmatmul.f32.gmra.mxu1 %v4605_v16 }
 0x769   :  { %v12019_v52 = vpop.f32.mrf.mxu0 }
 0x76a   :  { %v6902_v28 = vpop.f32.mrf.mxu3  ;;  %6743 = vmatmul.f32.gmra.mxu2 %v14688_v37  ;;  %v14694_v37 = vmax.f32 %v11864_v55, 0.0 }
 0x76b   :  { %v12021_v46 = vadd.f32 %v6902_v28, %v6694_v34 }
 0x76c   :  { %7152 = vmatmul.f32.gmra.mxu0 %v4605_v16 }
 0x76d   :  { %v6487_v59 = vpop.f32.mrf.mxu1  ;;  %v6696_v8 = vpop.f32.mrf.mxu2 }
 0x76e   :  { %v6697_v19 = vadd.f32 %v6696_v8, %v6487_v59  ;;  %v6386_v59 = vld [vmem:[#allocation9 + $0x240] sm:$0xff] }
 0x76f   :  { %6952 = vmatmul.f32.gmra.mxu3 %v4862_v18  ;;  %7301 = vmatpush.msrb.mxu1 %v6386_v59  ;;  %v4611_v18 = vld [vmem:[#allocation2 + $0x128] sm:$0xff] }
 0x770   :  { %6534 = vmatmul.f32.gmra.mxu1 %v4606_v3 }
 0x771   :  { %v12025_v12 = vpop.f32.mrf.mxu0 }
 0x772   :  { %v6905_v25 = vpop.f32.mrf.mxu3  ;;  %6746 = vmatmul.f32.gmra.mxu2 %v14689_v51  ;;  %v14695_v51 = vmax.f32 %v11872_v31, 0.0 }
 0x773   :  { %v12027_v56 = vadd.f32 %v6905_v25, %v6697_v19 }
 0x774   :  { %7155 = vmatmul.f32.gmra.mxu0 %v4606_v3 }
 0x775   :  { %v6490_v42 = vpop.f32.mrf.mxu1  ;;  %v6699_v17 = vpop.f32.mrf.mxu2 }
 0x776   :  { %v6700_v49 = vadd.f32 %v6699_v17, %v6490_v42 }
 0x777   :  { %6955 = vmatmul.f32.gmra.mxu3 %v4863_v7  ;;  %v4868_v7 = vld [vmem:[#allocation2 + $0x13a] sm:$0xff] }
 0x778   :  { %6537 = vmatmul.f32.gmra.mxu1 %v4607_v30 }
 0x779   :  { %v12031_v35 = vpop.f32.mrf.mxu0 }
 0x77a   :  { %v6908_v36 = vpop.f32.mrf.mxu3  ;;  %6749 = vmatmul.f32.gmra.mxu2 %v14691_v22  ;;  %v14696_v22 = vmax.f32 %v11880_v23, 0.0 }
 0x77b   :  { %v12033_v54 = vadd.f32 %v6908_v36, %v6700_v49 }
 0x77c   :  { %7158 = vmatmul.f32.gmra.mxu0 %v4607_v30  ;;  %v4612_v30 = vld [vmem:[#allocation2 + $0x138] sm:$0xff] }
 0x77d   :  { %v6493_v60 = vpop.f32.mrf.mxu1  ;;  %v6702_v4 = vpop.f32.mrf.mxu2 }
 0x77e   :  { %v6703_v11 = vadd.f32 %v6702_v4, %v6493_v60 }
 0x77f   :  { %6958 = vmatmul.f32.gmra.mxu3 %v4864_v2  ;;  %v4869_v2 = vld [vmem:[#allocation2 + $0x142] sm:$0xff] }
 0x780   :  { %6540 = vmatmul.f32.gmra.mxu1 %v4608_v41 }
 0x781   :  { %v12037_v53 = vpop.f32.mrf.mxu0 }
 0x782   :  { %v6911_v6 = vpop.f32.mrf.mxu3  ;;  %6752 = vmatmul.f32.gmra.mxu2 %v14692_v32 }
 0x783   :  { %v12039_v5 = vadd.f32 %v6911_v6, %v6703_v11 }
 0x784   :  { %7161 = vmatmul.f32.gmra.mxu0 %v4608_v41  ;;  %v4613_v41 = vld [vmem:[#allocation2 + $0x140] sm:$0xff] }
 0x785   :  { %v6496_v57 = vpop.f32.mrf.mxu1  ;;  %v6705_v0 = vpop.f32.mrf.mxu2 }
 0x786   :  { %v6706_v61 = vadd.f32 %v6705_v0, %v6496_v57 }
 0x787   :  { %6961 = vmatmul.f32.gmra.mxu3 %v4865_v48  ;;  %v4870_v48 = vld [vmem:[#allocation2 + $0x152] sm:$0xff] }
 0x788   :  { %6543 = vmatmul.f32.gmra.mxu1 %v4609_v40 }
 0x789   :  { %v12043_v43 = vpop.f32.mrf.mxu0 }
 0x78a   :  { %v6914_v63 = vpop.f32.mrf.mxu3  ;;  %6755 = vmatmul.f32.gmra.mxu2 %v14693_v13  ;;  %v6385_v13 = vld [vmem:[#allocation9 + $0x238] sm:$0xff] }
 0x78b   :  { %v12045_v44 = vadd.f32 %v6914_v63, %v6706_v61  ;;  %7302 = vmatpush.msrb.mxu1 %v6385_v13  ;;  %v6384_v13 = vld [vmem:[#allocation9 + $0x230] sm:$0xff] }
 0x78c   :  { %7164 = vmatmul.f32.gmra.mxu0 %v4609_v40  ;;  %v4614_v40 = vld [vmem:[#allocation2 + $0x150] sm:$0xff] }
 0x78d   :  { %v6499_v50 = vpop.f32.mrf.mxu1  ;;  %v6708_v16 = vpop.f32.mrf.mxu2  ;;  %7303 = vmatpush.msrb.mxu1 %v6384_v13 }
 0x78e   :  { %v6709_v47 = vadd.f32 %v6708_v16, %v6499_v50 }
 0x78f   :  { %6964 = vmatmul.f32.gmra.mxu3 %v4866_v1 }
 0x790   :  { %6546 = vmatmul.f32.gmra.mxu1 %v4610_v20 }
 0x791   :  { %v12049_v62 = vpop.f32.mrf.mxu0 }
 0x792   :  { %v6917_v34 = vpop.f32.mrf.mxu3  ;;  %6758 = vmatmul.f32.gmra.mxu2 %v14694_v37 }
 0x793   :  { %v12051_v28 = vadd.f32 %v6917_v34, %v6709_v47 }
 0x794   :  { %7167 = vmatmul.f32.gmra.mxu0 %v4610_v20  ;;  %v14697_v20 = vmax.f32 %v11896_v21, 0.0 }
 0x795   :  { %v6502_v14 = vpop.f32.mrf.mxu1  ;;  %v6711_v8 = vpop.f32.mrf.mxu2 }
 0x796   :  { %v6712_v19 = vadd.f32 %v6711_v8, %v6502_v14  ;;  %v4616_v8 = vld [vmem:[#allocation2 + $0x168] sm:$0xff] }
 0x797   :  { %6967 = vmatmul.f32.gmra.mxu3 %v4867_v29  ;;  %v14698_v29 = vmax.f32 %v11904_v9, 0.0 }
 0x798   :  { %6549 = vmatmul.f32.gmra.mxu1 %v4611_v18 }
 0x799   :  { %v12055_v3 = vpop.f32.mrf.mxu0 }
 0x79a   :  { %v6920_v25 = vpop.f32.mrf.mxu3  ;;  %6761 = vmatmul.f32.gmra.mxu2 %v14695_v51 }
 0x79b   :  { %v12057_v26 = vadd.f32 %v6920_v25, %v6712_v19 }
 0x79c   :  { %7170 = vmatmul.f32.gmra.mxu0 %v4611_v18  ;;  %v4872_v18 = vld [vmem:[#allocation2 + $0x16a] sm:$0xff] }
 0x79d   :  { %v6505_v42 = vpop.f32.mrf.mxu1  ;;  %v6714_v17 = vpop.f32.mrf.mxu2 }
 0x79e   :  { %v6715_v49 = vadd.f32 %v6714_v17, %v6505_v42  ;;  %v4873_v17 = vld [vmem:[#allocation2 + $0x172] sm:$0xff] }
 0x79f   :  { %6970 = vmatmul.f32.gmra.mxu3 %v4868_v7 }
 0x7a0   :  { %6552 = vmatmul.f32.gmra.mxu1 %v4612_v30 }
 0x7a1   :  { %v12061_v55 = vpop.f32.mrf.mxu0 }
 0x7a2   :  { %v6923_v36 = vpop.f32.mrf.mxu3  ;;  %6764 = vmatmul.f32.gmra.mxu2 %v14696_v22 }
 0x7a3   :  { %v12063_v60 = vadd.f32 %v6923_v36, %v6715_v49  ;;  %v4617_v49 = vld [vmem:[#allocation2 + $0x170] sm:$0xff] }
 0x7a4   :  { %7173 = vmatmul.f32.gmra.mxu0 %v4612_v30  ;;  %v14699_v30 = vmax.f32 %v11912_v10, 0.0 }
 0x7a5   :  { %v6508_v15 = vpop.f32.mrf.mxu1  ;;  %v6717_v4 = vpop.f32.mrf.mxu2 }
 0x7a6   :  { %v6718_v11 = vadd.f32 %v6717_v4, %v6508_v15  ;;  %v4874_v4 = vld [vmem:[#allocation2 + $0x1b2] sm:$0xff] }
 0x7a7   :  { %6973 = vmatmul.f32.gmra.mxu3 %v4869_v2  ;;  %v4746_v2 = vld [vmem:[#allocation2 + $0x1b1] sm:$0xff] }
 0x7a8   :  { %6555 = vmatmul.f32.gmra.mxu1 %v4613_v41 }
 0x7a9   :  { %v12067_v31 = vpop.f32.mrf.mxu0 }
 0x7aa   :  { %v6926_v6 = vpop.f32.mrf.mxu3  ;;  %6767 = vmatmul.f32.gmra.mxu2 %v4484_v24  ;;  %v4615_v24 = vld [vmem:[#allocation2 + $0x158] sm:$0xff] }
 0x7ab   :  { %v12069_v57 = vadd.f32 %v6926_v6, %v6718_v11  ;;  %v4618_v6 = vld [vmem:[#allocation2 + $0x1b0] sm:$0xff] }
 0x7ac   :  { %7176 = vmatmul.f32.gmra.mxu0 %v4613_v41 }
 0x7ad   :  { %v6511_v32 = vpop.f32.mrf.mxu1  ;;  %v6720_v0 = vpop.f32.mrf.mxu2 }
 0x7ae   :  { %v6721_v61 = vadd.f32 %v6720_v0, %v6511_v32 }
 0x7af   :  { %6976 = vmatmul.f32.gmra.mxu3 %v4870_v48 }
 0x7b0   :  { %6558 = vmatmul.f32.gmra.mxu1 %v4614_v40 }
 0x7b1   :  { %v12073_v23 = vpop.f32.mrf.mxu0 }
 0x7b2   :  { %v6929_v63 = vpop.f32.mrf.mxu3  ;;  %6770 = vmatmul.f32.gmra.mxu2 %v14697_v20 }
 0x7b3   :  { %v12075_v50 = vadd.f32 %v6929_v63, %v6721_v61  ;;  %v4747_v61 = vld [vmem:[#allocation2 + $0x1b9] sm:$0xff] }
 0x7b4   :  { %7179 = vmatmul.f32.gmra.mxu0 %v4614_v40  ;;  %v5000_v40 = vld [vmem:[#allocation2 + $0x180] sm:$0xff] }
 0x7b5   :  { %v6514_v1 = vpop.f32.mrf.mxu1  ;;  %v6723_v47 = vpop.f32.mrf.mxu2 }
 0x7b6   :  { %v6724_v34 = vadd.f32 %v6723_v47, %v6514_v1  ;;  %v4875_v1 = vld [vmem:[#allocation2 + $0x1ba] sm:$0xff] }
 0x7b7   :  { %6979 = vmatmul.f32.gmra.mxu3 %v4871_v33 }
 0x7b8   :  { %6561 = vmatmul.f32.gmra.mxu1 %v4615_v24 }
 0x7b9   :  { %v12079_v16 = vpop.f32.mrf.mxu0 }
 0x7ba   :  { %v6932_v59 = vpop.f32.mrf.mxu3  ;;  %6773 = vmatmul.f32.gmra.mxu2 %v14698_v29  ;;  %v4748_v29 = vld [vmem:[#allocation2 + $0x1c9] sm:$0xff] }
 0x7bb   :  { %v12081_v14 = vadd.f32 %v6932_v59, %v6724_v34  ;;  %v5001_v34 = vld [vmem:[#allocation2 + $0x188] sm:$0xff] }
 0x7bc   :  { %7182 = vmatmul.f32.gmra.mxu0 %v4615_v24 }
 0x7bd   :  { %v6517_v37 = vpop.f32.mrf.mxu1  ;;  %v6726_v19 = vpop.f32.mrf.mxu2 }
 0x7be   :  { %v6727_v25 = vadd.f32 %v6726_v19, %v6517_v37  ;;  %v4620_v19 = vld [vmem:[#allocation2 + $0x1c8] sm:$0xff] }
 0x7bf   :  { %6982 = vmatmul.f32.gmra.mxu3 %v4872_v18 }
 0x7c0   :  { %6564 = vmatmul.f32.gmra.mxu1 %v4616_v8 }
 0x7c1   :  { %v12085_v21 = vpop.f32.mrf.mxu0 }
 0x7c2   :  { %v6935_v42 = vpop.f32.mrf.mxu3  ;;  %6776 = vmatmul.f32.gmra.mxu2 %v14699_v30 }
 0x7c3   :  { %v12087_v51 = vadd.f32 %v6935_v42, %v6727_v25 }
 0x7c4   :  { %7185 = vmatmul.f32.gmra.mxu0 %v4616_v8  ;;  %v4876_v8 = vld [vmem:[#allocation2 + $0x1ca] sm:$0xff] }
 0x7c5   :  { %v6520_v7 = vpop.f32.mrf.mxu1  ;;  %v6729_v36 = vpop.f32.mrf.mxu2 }
 0x7c6   :  { %v6730_v15 = vadd.f32 %v6729_v36, %v6520_v7  ;;  %v4877_v36 = vld [vmem:[#allocation2 + $0x1d2] sm:$0xff] }
 0x7c7   :  { %6985 = vmatmul.f32.gmra.mxu3 %v4873_v17  ;;  %v4749_v17 = vld [vmem:[#allocation2 + $0x1d1] sm:$0xff] }
 0x7c8   :  { %6567 = vmatmul.f32.gmra.mxu1 %v4617_v49 }
 0x7c9   :  { %v12091_v9 = vpop.f32.mrf.mxu0 }
 0x7ca   :  { %v6938_v22 = vpop.f32.mrf.mxu3  ;;  %6779 = vmatmul.f32.gmra.mxu2 %v4746_v2 }
 0x7cb   :  { %v12093_v41 = vadd.f32 %v6938_v22, %v6730_v15  ;;  %v4621_v15 = vld [vmem:[#allocation2 + $0x1d0] sm:$0xff] }
 0x7cc   :  { %7188 = vmatmul.f32.gmra.mxu0 %v4617_v49 }
 0x7cd   :  { %v6523_v11 = vpop.f32.mrf.mxu1  ;;  %v6732_v32 = vpop.f32.mrf.mxu2 }
 0x7ce   :  { %v6733_v48 = vadd.f32 %v6732_v32, %v6523_v11  ;;  %v4750_v32 = vld [vmem:[#allocation2 + $0x1e1] sm:$0xff] }
 0x7cf   :  { %6988 = vmatmul.f32.gmra.mxu3 %v4874_v4 }
 0x7d0   :  { %6570 = vmatmul.f32.gmra.mxu1 %v4618_v6 }
 0x7d1   :  { %v12095_v10 = vpop.f32.mrf.mxu0 }
 0x7d2   :  { %v6941_v0 = vpop.f32.mrf.mxu3  ;;  %6782 = vmatmul.f32.gmra.mxu2 %v4747_v61 }
 0x7d3   :  { %v12097_v63 = vadd.f32 %v6941_v0, %v6733_v48  ;;  %v4622_v0 = vld [vmem:[#allocation2 + $0x1e0] sm:$0xff] }
 0x7d4   :  { %7191 = vmatmul.f32.gmra.mxu0 %v5000_v40  ;;  %v4878_v40 = vld [vmem:[#allocation2 + $0x1e2] sm:$0xff] }
 0x7d5   :  { %v6526_v20 = vpop.f32.mrf.mxu1  ;;  %v6735_v24 = vpop.f32.mrf.mxu2 }
 0x7d6   :  { %v6736_v47 = vadd.f32 %v6735_v24, %v6526_v20 }
 0x7d7   :  { %6991 = vmatmul.f32.gmra.mxu3 %v4875_v1 }
 0x7d8   :  { %6573 = vmatmul.f32.gmra.mxu1 %v11944_v58 }
 0x7d9   :  { %v12099_v33 = vpop.f32.mrf.mxu0 }
 0x7da   :  { %v6944_v59 = vpop.f32.mrf.mxu3  ;;  %6785 = vmatmul.f32.gmra.mxu2 %v4748_v29  ;;  %v4879_v29 = vld [vmem:[#allocation2 + $0x1ea] sm:$0xff] }
 0x7db   :  { %v12102_v37 = vadd.f32 %v6944_v59, %v6736_v47  ;;  %v6383_v47 = vld [vmem:[#allocation9 + $0x228] sm:$0xff] }
 0x7dc   :  { %7194 = vmatmul.f32.gmra.mxu0 %v5001_v34  ;;  %v4751_v34 = vld [vmem:[#allocation2 + $0x1e9] sm:$0xff]  ;;  %7304 = vmatpush.msrb.mxu1 %v6383_v47 }
 0x7dd   :  { %v6529_v18 = vpop.f32.mrf.mxu1  ;;  %v6738_v42 = vpop.f32.mrf.mxu2 }
 0x7de   :  { %v6739_v7 = vadd.f32 %v6738_v42, %v6529_v18  ;;  %v4623_v18 = vld [vmem:[#allocation2 + $0x1e8] sm:$0xff] }
 0x7df   :  { %6994 = vmatmul.f32.gmra.mxu3 %v4876_v8 }
 0x7e0   :  { %6576 = vmatmul.f32.gmra.mxu1 %v4620_v19 }
 0x7e1   :  { %v12104_v25 = vpop.f32.mrf.mxu0 }
 0x7e2   :  { %v6947_v30 = vpop.f32.mrf.mxu3  ;;  %6788 = vmatmul.f32.gmra.mxu2 %v4749_v17  ;;  %v4752_v17 = vld [vmem:[#allocation2 + $0x1f9] sm:$0xff] }
 0x7e3   :  { %v12106_v58 = vadd.f32 %v6947_v30, %v6739_v7 }
 0x7e4   :  { %7197 = vmatmul.f32.gmra.mxu0 %v4620_v19 }
 0x7e5   :  { %v6532_v49 = vpop.f32.mrf.mxu1  ;;  %v6741_v2 = vpop.f32.mrf.mxu2 }
 0x7e6   :  { %v6742_v4 = vadd.f32 %v6741_v2, %v6532_v49 }
 0x7e7   :  { %6997 = vmatmul.f32.gmra.mxu3 %v4877_v36  ;;  %v4880_v36 = vld [vmem:[#allocation2 + $0x1fa] sm:$0xff] }
 0x7e8   :  { %6579 = vmatmul.f32.gmra.mxu1 %v4621_v15 }
 0x7e9   :  { %v12108_v22 = vpop.f32.mrf.mxu0 }
 0x7ea   :  { %v6950_v11 = vpop.f32.mrf.mxu3  ;;  %6791 = vmatmul.f32.gmra.mxu2 %v4750_v32 }
 0x7eb   :  { %v12110_v6 = vadd.f32 %v6950_v11, %v6742_v4 }
 0x7ec   :  { %7200 = vmatmul.f32.gmra.mxu0 %v4621_v15  ;;  %v4624_v15 = vld [vmem:[#allocation2 + $0x1f8] sm:$0xff] }
 0x7ed   :  { %v6535_v48 = vpop.f32.mrf.mxu1  ;;  %v6744_v13 = vpop.f32.mrf.mxu2 }
 0x7ee   :  { %v6745_v1 = vadd.f32 %v6744_v13, %v6535_v48  ;;  %v4881_v13 = vld [vmem:[#allocation2 + $0x202] sm:$0xff] }
 0x7ef   :  { %7000 = vmatmul.f32.gmra.mxu3 %v4878_v40  ;;  %v4753_v40 = vld [vmem:[#allocation2 + $0x201] sm:$0xff] }
 0x7f0   :  { %6582 = vmatmul.f32.gmra.mxu1 %v4622_v0 }
 0x7f1   :  { %v12112_v61 = vpop.f32.mrf.mxu0 }
 0x7f2   :  { %v6953_v20 = vpop.f32.mrf.mxu3  ;;  %6794 = vmatmul.f32.gmra.mxu2 %v4751_v34 }
 0x7f3   :  { %v12114_v24 = vadd.f32 %v6953_v20, %v6745_v1  ;;  %v4625_v1 = vld [vmem:[#allocation2 + $0x200] sm:$0xff] }
 0x7f4   :  { %7203 = vmatmul.f32.gmra.mxu0 %v4622_v0 }
 0x7f5   :  { %v6538_v59 = vpop.f32.mrf.mxu1  ;;  %v6747_v19 = vpop.f32.mrf.mxu2 }
 0x7f6   :  { %v6748_v42 = vadd.f32 %v6747_v19, %v6538_v59 }
 0x7f7   :  { %7003 = vmatmul.f32.gmra.mxu3 %v4879_v29 }
 0x7f8   :  { %6585 = vmatmul.f32.gmra.mxu1 %v4623_v18 }
 0x7f9   :  { %v12116_v8 = vpop.f32.mrf.mxu0 }
 0x7fa   :  { %v6956_v7 = vpop.f32.mrf.mxu3  ;;  %6797 = vmatmul.f32.gmra.mxu2 %v4752_v17 }
 0x7fb   :  { %v12118_v30 = vadd.f32 %v6956_v7, %v6748_v42  ;;  %v4882_v42 = vld [vmem:[#allocation2 + $0x212] sm:$0xff] }
 0x7fc   :  { %7206 = vmatmul.f32.gmra.mxu0 %v4623_v18  ;;  %v4754_v18 = vld [vmem:[#allocation2 + $0x211] sm:$0xff] }
 0x7fd   :  { %v6541_v49 = vpop.f32.mrf.mxu1  ;;  %v6750_v4 = vpop.f32.mrf.mxu2  ;;  %v4626_v7 = vld [vmem:[#allocation2 + $0x210] sm:$0xff] }
 0x7fe   :  { %v6751_v11 = vadd.f32 %v6750_v4, %v6541_v49 }
 0x7ff   :  { %7006 = vmatmul.f32.gmra.mxu3 %v4880_v36 }
 0x800   :  { %6588 = vmatmul.f32.gmra.mxu1 %v4624_v15 }
 0x801   :  { %v12120_v2 = vpop.f32.mrf.mxu0 }
 0x802   :  { %v6959_v32 = vpop.f32.mrf.mxu3  ;;  %6800 = vmatmul.f32.gmra.mxu2 %v4753_v40 }
 0x803   :  { %v12122_v48 = vadd.f32 %v6959_v32, %v6751_v11  ;;  %v6382_v11 = vld [vmem:[#allocation9 + $0x220] sm:$0xff] }
 0x804   :  { %7209 = vmatmul.f32.gmra.mxu0 %v4624_v15  ;;  %v4755_v32 = vld [vmem:[#allocation2 + $0x219] sm:$0xff]  ;;  %7305 = vmatpush.msrb.mxu1 %v6382_v11 }
 0x805   :  { %v6544_v0 = vpop.f32.mrf.mxu1  ;;  %v6753_v47 = vpop.f32.mrf.mxu2 }
 0x806   :  { %v6754_v34 = vadd.f32 %v6753_v47, %v6544_v0  ;;  %v4883_v0 = vld [vmem:[#allocation2 + $0x21a] sm:$0xff] }
 0x807   :  { %7009 = vmatmul.f32.gmra.mxu3 %v4881_v13  ;;  %v4627_v13 = vld [vmem:[#allocation2 + $0x218] sm:$0xff] }
 0x808   :  { %6591 = vmatmul.f32.gmra.mxu1 %v4625_v1 }
 0x809   :  { %v12124_v20 = vpop.f32.mrf.mxu0 }
 0x80a   :  { %v6962_v59 = vpop.f32.mrf.mxu3  ;;  %6803 = vmatmul.f32.gmra.mxu2 %v4754_v18 }
 0x80b   :  { %v12126_v29 = vadd.f32 %v6962_v59, %v6754_v34 }
 0x80c   :  { %7212 = vmatmul.f32.gmra.mxu0 %v4625_v1 }
 0x80d   :  { %14700 = vst [vmem:[#allocation174_spill] sm:$0xff] %v12126_v29  ;;  %v6547_v19 = vpop.f32.mrf.mxu1  ;;  %v6756_v49 = vpop.f32.mrf.mxu2  ;;  %v4775_v29 = vld [vmem:[#allocation2 + $0x309] sm:$0xff] }
 0x80e   :  { %v6757_v36 = vadd.f32 %v6756_v49, %v6547_v19  ;;  %v4756_v19 = vld [vmem:[#allocation2 + $0x229] sm:$0xff] }
 0x80f   :  { %7012 = vmatmul.f32.gmra.mxu3 %v4882_v42  ;;  %v4628_v49 = vld [vmem:[#allocation2 + $0x228] sm:$0xff] }
 0x810   :  { %6594 = vmatmul.f32.gmra.mxu1 %v4626_v7 }
 0x811   :  { %v12128_v17 = vpop.f32.mrf.mxu0 }
 0x812   :  { %v6965_v15 = vpop.f32.mrf.mxu3  ;;  %6806 = vmatmul.f32.gmra.mxu2 %v4755_v32 }
 0x813   :  { %v12130_v4 = vadd.f32 %v6965_v15, %v6757_v36 }
 0x814   :  { %7215 = vmatmul.f32.gmra.mxu0 %v4626_v7  ;;  %v4884_v7 = vld [vmem:[#allocation2 + $0x22a] sm:$0xff] }
 0x815   :  { %14701 = vst [vmem:[#allocation167_spill] sm:$0xff] %v12130_v4  ;;  %v6550_v40 = vpop.f32.mrf.mxu1  ;;  %v6759_v47 = vpop.f32.mrf.mxu2  ;;  %v4772_v4 = vld [vmem:[#allocation2 + $0x2e9] sm:$0xff] }
 0x816   :  { %v6760_v34 = vadd.f32 %v6759_v47, %v6550_v40  ;;  %v4757_v40 = vld [vmem:[#allocation2 + $0x231] sm:$0xff] }
 0x817   :  { %7015 = vmatmul.f32.gmra.mxu3 %v4883_v0 }
 0x818   :  { %6597 = vmatmul.f32.gmra.mxu1 %v4627_v13 }
 0x819   :  { %v12132_v1 = vpop.f32.mrf.mxu0 }
 0x81a   :  { %14702 = vst [vmem:[#allocation179_spill] sm:$0xff] %v12132_v1  ;;  %v6968_v59 = vpop.f32.mrf.mxu3  ;;  %6809 = vmatmul.f32.gmra.mxu2 %v4756_v19 }
 0x81b   :  { %v12134_v18 = vadd.f32 %v6968_v59, %v6760_v34  ;;  %v4629_v34 = vld [vmem:[#allocation2 + $0x230] sm:$0xff] }
 0x81c   :  { %7218 = vmatmul.f32.gmra.mxu0 %v4627_v13  ;;  %v4885_v13 = vld [vmem:[#allocation2 + $0x232] sm:$0xff] }
 0x81d   :  { %14703 = vst [vmem:[#allocation131_spill] sm:$0xff] %v12134_v18  ;;  %v6553_v42 = vpop.f32.mrf.mxu1  ;;  %v6762_v15 = vpop.f32.mrf.mxu2 }
 0x81e   :  { %v6763_v11 = vadd.f32 %v6762_v15, %v6553_v42  ;;  %v4758_v42 = vld [vmem:[#allocation2 + $0x241] sm:$0xff] }
 0x81f   :  { %7018 = vmatmul.f32.gmra.mxu3 %v4884_v7 }
 0x820   :  { %6600 = vmatmul.f32.gmra.mxu1 %v4628_v49 }
 0x821   :  { %v12136_v36 = vpop.f32.mrf.mxu0 }
 0x822   :  { %14704 = vst [vmem:[#allocation122_spill] sm:$0xff] %v12136_v36  ;;  %v6971_v32 = vpop.f32.mrf.mxu3  ;;  %6812 = vmatmul.f32.gmra.mxu2 %v4757_v40 }
 0x823   :  { %v12138_v0 = vadd.f32 %v6971_v32, %v6763_v11  ;;  %v4630_v11 = vld [vmem:[#allocation2 + $0x240] sm:$0xff] }
 0x824   :  { %7221 = vmatmul.f32.gmra.mxu0 %v4628_v49  ;;  %v4886_v49 = vld [vmem:[#allocation2 + $0x242] sm:$0xff] }
 0x825   :  { %14705 = vst [vmem:[#allocation178_spill] sm:$0xff] %v12138_v0  ;;  %v6556_v47 = vpop.f32.mrf.mxu1  ;;  %v6765_v19 = vpop.f32.mrf.mxu2 }
 0x826   :  { %v6766_v7 = vadd.f32 %v6765_v19, %v6556_v47  ;;  %v6381_v47 = vld [vmem:[#allocation9 + $0x218] sm:$0xff]  ;;  %v4759_v19 = vld [vmem:[#allocation2 + $0x249] sm:$0xff] }
 0x827   :  { %7021 = vmatmul.f32.gmra.mxu3 %v4885_v13  ;;  %7306 = vmatpush.msrb.mxu1 %v6381_v47 }
 0x828   :  { %6603 = vmatmul.f32.gmra.mxu1 %v4629_v34 }
 0x829   :  { %v12140_v59 = vpop.f32.mrf.mxu0 }
 0x82a   :  { %14706 = vst [vmem:[#allocation170_spill] sm:$0xff] %v12140_v59  ;;  %v6974_v18 = vpop.f32.mrf.mxu3  ;;  %6815 = vmatmul.f32.gmra.mxu2 %v4758_v42 }
 0x82b   :  { %v12142_v36 = vadd.f32 %v6974_v18, %v6766_v7  ;;  %v4631_v7 = vld [vmem:[#allocation2 + $0x248] sm:$0xff] }
 0x82c   :  { %7224 = vmatmul.f32.gmra.mxu0 %v4629_v34  ;;  %v4887_v34 = vld [vmem:[#allocation2 + $0x24a] sm:$0xff] }
 0x82d   :  { %14707 = vst [vmem:[#allocation133_spill] sm:$0xff] %v12142_v36  ;;  %v6559_v15 = vpop.f32.mrf.mxu1  ;;  %v6768_v40 = vpop.f32.mrf.mxu2 }
 0x82e   :  { %v6769_v13 = vadd.f32 %v6768_v40, %v6559_v15  ;;  %v4888_v40 = vld [vmem:[#allocation2 + $0x25a] sm:$0xff] }
 0x82f   :  { %7024 = vmatmul.f32.gmra.mxu3 %v4886_v49 }
 0x830   :  { %6606 = vmatmul.f32.gmra.mxu1 %v4630_v11 }
 0x831   :  { %v12144_v32 = vpop.f32.mrf.mxu0 }
 0x832   :  { %14708 = vst [vmem:[#allocation125_spill] sm:$0xff] %v12144_v32  ;;  %v6977_v0 = vpop.f32.mrf.mxu3  ;;  %6818 = vmatmul.f32.gmra.mxu2 %v4759_v19 }
 0x833   :  { %v12146_v59 = vadd.f32 %v6977_v0, %v6769_v13  ;;  %v4632_v13 = vld [vmem:[#allocation2 + $0x258] sm:$0xff] }
 0x834   :  { %7227 = vmatmul.f32.gmra.mxu0 %v4630_v11  ;;  %v4760_v11 = vld [vmem:[#allocation2 + $0x259] sm:$0xff] }
 0x835   :  { %14709 = vst [vmem:[#allocation173_spill] sm:$0xff] %v12146_v59  ;;  %v6562_v18 = vpop.f32.mrf.mxu1  ;;  %v6771_v49 = vpop.f32.mrf.mxu2 }
 0x836   :  { %v6772_v36 = vadd.f32 %v6771_v49, %v6562_v18  ;;  %v4761_v18 = vld [vmem:[#allocation2 + $0x261] sm:$0xff] }
 0x837   :  { %7027 = vmatmul.f32.gmra.mxu3 %v4887_v34 }
 0x838   :  { %6609 = vmatmul.f32.gmra.mxu1 %v4631_v7 }
 0x839   :  { %v12148_v42 = vpop.f32.mrf.mxu0 }
 0x83a   :  { %14710 = vst [vmem:[#allocation53_spill] sm:$0xff] %v12148_v42  ;;  %v6980_v32 = vpop.f32.mrf.mxu3  ;;  %6821 = vmatmul.f32.gmra.mxu2 %v4760_v11 }
 0x83b   :  { %v12150_v15 = vadd.f32 %v6980_v32, %v6772_v36  ;;  %v4889_v36 = vld [vmem:[#allocation2 + $0x262] sm:$0xff] }
 0x83c   :  { %7230 = vmatmul.f32.gmra.mxu0 %v4631_v7  ;;  %v4633_v32 = vld [vmem:[#allocation2 + $0x260] sm:$0xff] }
 0x83d   :  { %14711 = vst [vmem:[#allocation44_spill] sm:$0xff] %v12150_v15  ;;  %v6565_v0 = vpop.f32.mrf.mxu1  ;;  %v6774_v19 = vpop.f32.mrf.mxu2 }
 0x83e   :  { %v6775_v34 = vadd.f32 %v6774_v19, %v6565_v0  ;;  %v4762_v0 = vld [vmem:[#allocation2 + $0x271] sm:$0xff] }
 0x83f   :  { %7030 = vmatmul.f32.gmra.mxu3 %v4888_v40 }
 0x840   :  { %6612 = vmatmul.f32.gmra.mxu1 %v4632_v13 }
 0x841   :  { %v12152_v47 = vpop.f32.mrf.mxu0 }
 0x842   :  { %14712 = vst [vmem:[#allocation181_spill] sm:$0xff] %v12152_v47  ;;  %v6983_v59 = vpop.f32.mrf.mxu3  ;;  %6824 = vmatmul.f32.gmra.mxu2 %v4761_v18 }
 0x843   :  { %v12154_v42 = vadd.f32 %v6983_v59, %v6775_v34  ;;  %v4890_v59 = vld [vmem:[#allocation2 + $0x272] sm:$0xff] }
 0x844   :  { %7233 = vmatmul.f32.gmra.mxu0 %v4632_v13  ;;  %v4634_v13 = vld [vmem:[#allocation2 + $0x270] sm:$0xff] }
 0x845   :  { %14713 = vst [vmem:[#allocation177_spill] sm:$0xff] %v12154_v42  ;;  %v6568_v49 = vpop.f32.mrf.mxu1  ;;  %v6777_v11 = vpop.f32.mrf.mxu2 }
 0x846   :  { %v6778_v40 = vadd.f32 %v6777_v11, %v6568_v49  ;;  %v6380_v49 = vld [vmem:[#allocation9 + $0x210] sm:$0xff]  ;;  %v4763_v11 = vld [vmem:[#allocation2 + $0x279] sm:$0xff] }
 0x847   :  { %7033 = vmatmul.f32.gmra.mxu3 %v4889_v36  ;;  %7307 = vmatpush.msrb.mxu1 %v6380_v49 }
 0x848   :  { %6615 = vmatmul.f32.gmra.mxu1 %v4633_v32 }
 0x849   :  { %v12156_v7 = vpop.f32.mrf.mxu0 }
 0x84a   :  { %14714 = vst [vmem:[#allocation57_spill] sm:$0xff] %v12156_v7  ;;  %v6986_v15 = vpop.f32.mrf.mxu3  ;;  %6827 = vmatmul.f32.gmra.mxu2 %v4762_v0 }
 0x84b   :  { %v12158_v47 = vadd.f32 %v6986_v15, %v6778_v40  ;;  %v4635_v40 = vld [vmem:[#allocation2 + $0x278] sm:$0xff] }
 0x84c   :  { %7236 = vmatmul.f32.gmra.mxu0 %v4633_v32  ;;  %v4891_v32 = vld [vmem:[#allocation2 + $0x27a] sm:$0xff] }
 0x84d   :  { %14715 = vst [vmem:[#allocation48_spill] sm:$0xff] %v12158_v47  ;;  %v6571_v19 = vpop.f32.mrf.mxu1  ;;  %v6780_v18 = vpop.f32.mrf.mxu2 }
 0x84e   :  { %v6781_v36 = vadd.f32 %v6780_v18, %v6571_v19  ;;  %v4892_v18 = vld [vmem:[#allocation2 + $0x28a] sm:$0xff] }
 0x84f   :  { %7036 = vmatmul.f32.gmra.mxu3 %v4890_v59 }
 0x850   :  { %6618 = vmatmul.f32.gmra.mxu1 %v4634_v13 }
 0x851   :  { %v12160_v34 = vpop.f32.mrf.mxu0 }
 0x852   :  { %14716 = vst [vmem:[#allocation180_spill] sm:$0xff] %v12160_v34  ;;  %v6989_v42 = vpop.f32.mrf.mxu3  ;;  %6830 = vmatmul.f32.gmra.mxu2 %v4763_v11 }
 0x853   :  { %v12162_v7 = vadd.f32 %v6989_v42, %v6781_v36  ;;  %v4636_v36 = vld [vmem:[#allocation2 + $0x288] sm:$0xff] }
 0x854   :  { %7239 = vmatmul.f32.gmra.mxu0 %v4634_v13  ;;  %v4764_v13 = vld [vmem:[#allocation2 + $0x289] sm:$0xff] }
 0x855   :  { %14717 = vst [vmem:[#allocation61_spill] sm:$0xff] %v12162_v7  ;;  %v6574_v15 = vpop.f32.mrf.mxu1  ;;  %v6783_v59 = vpop.f32.mrf.mxu2 }
 0x856   :  { %v6784_v47 = vadd.f32 %v6783_v59, %v6574_v15  ;;  %v4765_v15 = vld [vmem:[#allocation2 + $0x291] sm:$0xff] }
 0x857   :  { %7039 = vmatmul.f32.gmra.mxu3 %v4891_v32 }
 0x858   :  { %6621 = vmatmul.f32.gmra.mxu1 %v4635_v40 }
 0x859   :  { %v12164_v0 = vpop.f32.mrf.mxu0 }
 0x85a   :  { %14718 = vst [vmem:[#allocation64_spill] sm:$0xff] %v12164_v0  ;;  %v6992_v34 = vpop.f32.mrf.mxu3  ;;  %6833 = vmatmul.f32.gmra.mxu2 %v4764_v13 }
 0x85b   :  { %v12166_v19 = vadd.f32 %v6992_v34, %v6784_v47  ;;  %v4893_v47 = vld [vmem:[#allocation2 + $0x292] sm:$0xff] }
 0x85c   :  { %7242 = vmatmul.f32.gmra.mxu0 %v4635_v40  ;;  %v4637_v34 = vld [vmem:[#allocation2 + $0x290] sm:$0xff] }
 0x85d   :  { %14719 = vst [vmem:[#allocation182_spill] sm:$0xff] %v12166_v19  ;;  %v6577_v42 = vpop.f32.mrf.mxu1  ;;  %v6786_v11 = vpop.f32.mrf.mxu2 }
 0x85e   :  { %v6787_v32 = vadd.f32 %v6786_v11, %v6577_v42  ;;  %v4766_v42 = vld [vmem:[#allocation2 + $0x2a1] sm:$0xff] }
 0x85f   :  { %7042 = vmatmul.f32.gmra.mxu3 %v4892_v18 }
 0x860   :  { %6624 = vmatmul.f32.gmra.mxu1 %v4636_v36 }
 0x861   :  { %v12168_v49 = vpop.f32.mrf.mxu0 }
 0x862   :  { %14720 = vst [vmem:[#allocation67_spill] sm:$0xff] %v12168_v49  ;;  %v6995_v7 = vpop.f32.mrf.mxu3  ;;  %6836 = vmatmul.f32.gmra.mxu2 %v4765_v15 }
 0x863   :  { %v12170_v0 = vadd.f32 %v6995_v7, %v6787_v32  ;;  %v4894_v7 = vld [vmem:[#allocation2 + $0x2a2] sm:$0xff] }
 0x864   :  { %7245 = vmatmul.f32.gmra.mxu0 %v4636_v36  ;;  %v4638_v36 = vld [vmem:[#allocation2 + $0x2a0] sm:$0xff] }
 0x865   :  { %14721 = vst [vmem:[#allocation70_spill] sm:$0xff] %v12170_v0  ;;  %v6580_v59 = vpop.f32.mrf.mxu1  ;;  %v6789_v13 = vpop.f32.mrf.mxu2 }
 0x866   :  { %v6790_v18 = vadd.f32 %v6789_v13, %v6580_v59  ;;  %v6379_v59 = vld [vmem:[#allocation9 + $0x208] sm:$0xff] }
 0x867   :  { %7045 = vmatmul.f32.gmra.mxu3 %v4893_v47  ;;  %v4767_v13 = vld [vmem:[#allocation2 + $0x2a9] sm:$0xff]  ;;  %7308 = vmatpush.msrb.mxu1 %v6379_v59 }
 0x868   :  { %6627 = vmatmul.f32.gmra.mxu1 %v4637_v34 }
 0x869   :  { %v12172_v40 = vpop.f32.mrf.mxu0 }
 0x86a   :  { %14722 = vst [vmem:[#allocation73_spill] sm:$0xff] %v12172_v40  ;;  %v6998_v19 = vpop.f32.mrf.mxu3  ;;  %6839 = vmatmul.f32.gmra.mxu2 %v4766_v42 }
 0x86b   :  { %v12174_v49 = vadd.f32 %v6998_v19, %v6790_v18  ;;  %v4639_v18 = vld [vmem:[#allocation2 + $0x2a8] sm:$0xff] }
 0x86c   :  { %7248 = vmatmul.f32.gmra.mxu0 %v4637_v34  ;;  %v4895_v34 = vld [vmem:[#allocation2 + $0x2aa] sm:$0xff] }
 0x86d   :  { %14723 = vst [vmem:[#allocation76_spill] sm:$0xff] %v12174_v49  ;;  %v6583_v11 = vpop.f32.mrf.mxu1  ;;  %v6792_v15 = vpop.f32.mrf.mxu2 }
 0x86e   :  { %v6793_v47 = vadd.f32 %v6792_v15, %v6583_v11  ;;  %v4896_v15 = vld [vmem:[#allocation2 + $0x2ba] sm:$0xff] }
 0x86f   :  { %7048 = vmatmul.f32.gmra.mxu3 %v4894_v7 }
 0x870   :  { %6630 = vmatmul.f32.gmra.mxu1 %v4638_v36 }
 0x871   :  { %v12176_v32 = vpop.f32.mrf.mxu0 }
 0x872   :  { %14724 = vst [vmem:[#allocation79_spill] sm:$0xff] %v12176_v32  ;;  %v7001_v0 = vpop.f32.mrf.mxu3  ;;  %6842 = vmatmul.f32.gmra.mxu2 %v4767_v13 }
 0x873   :  { %v12178_v40 = vadd.f32 %v7001_v0, %v6793_v47  ;;  %v4640_v47 = vld [vmem:[#allocation2 + $0x2b8] sm:$0xff] }
 0x874   :  { %7251 = vmatmul.f32.gmra.mxu0 %v4638_v36  ;;  %v4768_v36 = vld [vmem:[#allocation2 + $0x2b9] sm:$0xff] }
 0x875   :  { %14725 = vst [vmem:[#allocation82_spill] sm:$0xff] %v12178_v40  ;;  %v6586_v19 = vpop.f32.mrf.mxu1  ;;  %v6795_v7 = vpop.f32.mrf.mxu2 }
 0x876   :  { %v6796_v49 = vadd.f32 %v6795_v7, %v6586_v19  ;;  %v4769_v19 = vld [vmem:[#allocation2 + $0x2c1] sm:$0xff] }
 0x877   :  { %7051 = vmatmul.f32.gmra.mxu3 %v4895_v34 }
 0x878   :  { %6633 = vmatmul.f32.gmra.mxu1 %v4639_v18 }
 0x879   :  { %v12180_v42 = vpop.f32.mrf.mxu0 }
 0x87a   :  { %14726 = vst [vmem:[#allocation85_spill] sm:$0xff] %v12180_v42  ;;  %v7004_v32 = vpop.f32.mrf.mxu3  ;;  %6845 = vmatmul.f32.gmra.mxu2 %v4768_v36 }
 0x87b   :  { %v12182_v11 = vadd.f32 %v7004_v32, %v6796_v49  ;;  %v4897_v49 = vld [vmem:[#allocation2 + $0x2c2] sm:$0xff] }
 0x87c   :  { %7254 = vmatmul.f32.gmra.mxu0 %v4639_v18  ;;  %v4641_v32 = vld [vmem:[#allocation2 + $0x2c0] sm:$0xff] }
 0x87d   :  { %14727 = vst [vmem:[#allocation86_spill] sm:$0xff] %v12182_v11  ;;  %v6589_v0 = vpop.f32.mrf.mxu1  ;;  %v6798_v13 = vpop.f32.mrf.mxu2 }
 0x87e   :  { %v6799_v34 = vadd.f32 %v6798_v13, %v6589_v0  ;;  %v4770_v0 = vld [vmem:[#allocation2 + $0x2d1] sm:$0xff] }
 0x87f   :  { %7054 = vmatmul.f32.gmra.mxu3 %v4896_v15 }
 0x880   :  { %6636 = vmatmul.f32.gmra.mxu1 %v4640_v47 }
 0x881   :  { %v12184_v59 = vpop.f32.mrf.mxu0 }
 0x882   :  { %14728 = vst [vmem:[#allocation87_spill] sm:$0xff] %v12184_v59  ;;  %v7007_v40 = vpop.f32.mrf.mxu3  ;;  %6848 = vmatmul.f32.gmra.mxu2 %v4769_v19 }
 0x883   :  { %v12186_v42 = vadd.f32 %v7007_v40, %v6799_v34  ;;  %v4898_v40 = vld [vmem:[#allocation2 + $0x2d2] sm:$0xff] }
 0x884   :  { %7257 = vmatmul.f32.gmra.mxu0 %v4640_v47  ;;  %v4642_v47 = vld [vmem:[#allocation2 + $0x2d0] sm:$0xff] }
 0x885   :  { %14729 = vst [vmem:[#allocation88_spill] sm:$0xff] %v12186_v42  ;;  %v6592_v7 = vpop.f32.mrf.mxu1  ;;  %v6801_v36 = vpop.f32.mrf.mxu2 }
 0x886   :  { %v6802_v15 = vadd.f32 %v6801_v36, %v6592_v7  ;;  %v6378_v7 = vld [vmem:[#allocation9 + $0x200] sm:$0xff]  ;;  %v6409_v36 = vld [vmem:[#allocation9 + $0x2f8] sm:$0xff] }
 0x887   :  { %7057 = vmatmul.f32.gmra.mxu3 %v4897_v49  ;;  %7309 = vmatpush.msrb.mxu1 %v6378_v7 }
 0x888   :  { %6639 = vmatmul.f32.gmra.mxu1 %v4641_v32  ;;  %7503 = vmatpush.msra.mxu2 %v6409_v36  ;;  %v6422_v36 = vld [vmem:[#allocation9 + $0x360] sm:$0xff] }
 0x889   :  { %v12188_v18 = vpop.f32.mrf.mxu0 }
 0x88a   :  { %14730 = vst [vmem:[#allocation92_spill] sm:$0xff] %v12188_v18  ;;  %v7010_v11 = vpop.f32.mrf.mxu3  ;;  %6851 = vmatmul.f32.gmra.mxu2 %v4770_v0 }
 0x88b   :  { %v12190_v59 = vadd.f32 %v7010_v11, %v6802_v15  ;;  %v4771_v11 = vld [vmem:[#allocation2 + $0x2d9] sm:$0xff]  ;;  %v6408_v15 = vld [vmem:[#allocation9 + $0x2f0] sm:$0xff] }
 0x88c   :  { %7260 = vmatmul.f32.gmra.mxu0 %v4641_v32  ;;  %v6425_v32 = vld [vmem:[#allocation9 + $0x378] sm:$0xff]  ;;  %7504 = vmatpush.msra.mxu2 %v6408_v15 }
 0x88d   :  { %14731 = vst [vmem:[#allocation109_spill] sm:$0xff] %v12190_v59  ;;  %v6595_v13 = vpop.f32.mrf.mxu1  ;;  %v6804_v19 = vpop.f32.mrf.mxu2  ;;  %7712 = vmatpush.msra.mxu3 %v6425_v32  ;;  %v4899_v59 = vld [vmem:[#allocation2 + $0x2da] sm:$0xff] }
 0x88e   :  { %v6805_v49 = vadd.f32 %v6804_v19, %v6595_v13  ;;  %v6407_v19 = vld [vmem:[#allocation9 + $0x2e8] sm:$0xff]  ;;  %v6421_v15 = vld [vmem:[#allocation9 + $0x358] sm:$0xff] }
 0x88f   :  { %7060 = vmatmul.f32.gmra.mxu3 %v4898_v40  ;;  %v6424_v40 = vld [vmem:[#allocation9 + $0x370] sm:$0xff]  ;;  %7505 = vmatpush.msra.mxu2 %v6407_v19 }
 0x890   :  { %6642 = vmatmul.f32.gmra.mxu1 %v4642_v47  ;;  %7713 = vmatpush.msra.mxu3 %v6424_v40  ;;  %v4900_v40 = vld [vmem:[#allocation2 + $0x2ea] sm:$0xff] }
 0x891   :  { %v12192_v34 = vpop.f32.mrf.mxu0 }
 0x892   :  { %14732 = vst [vmem:[#allocation89_spill] sm:$0xff] %v12192_v34  ;;  %v7013_v42 = vpop.f32.mrf.mxu3  ;;  %6854 = vmatmul.f32.gmra.mxu2 %v4771_v11  ;;  %v4643_v34 = vld [vmem:[#allocation2 + $0x2d8] sm:$0xff] }
 0x893   :  { %v12194_v18 = vadd.f32 %v7013_v42, %v6805_v49  ;;  %v6423_v49 = vld [vmem:[#allocation9 + $0x368] sm:$0xff]  ;;  %v6405_v11 = vld [vmem:[#allocation9 + $0x2d8] sm:$0xff] }
 0x894   :  { %7263 = vmatmul.f32.gmra.mxu0 %v4642_v47  ;;  %7714 = vmatpush.msra.mxu3 %v6423_v49  ;;  %v6403_v49 = vld [vmem:[#allocation9 + $0x2c8] sm:$0xff] }
 0x895   :  { %14733 = vst [vmem:[#allocation91_spill] sm:$0xff] %v12194_v18  ;;  %v6598_v0 = vpop.f32.mrf.mxu1  ;;  %v6807_v42 = vpop.f32.mrf.mxu2  ;;  %v6406_v18 = vld [vmem:[#allocation9 + $0x2e0] sm:$0xff] }
 0x896   :  { %v6808_v47 = vadd.f32 %v6807_v42, %v6598_v0  ;;  %7506 = vmatpush.msra.mxu2 %v6406_v18  ;;  %7715 = vmatpush.msra.mxu3 %v6422_v36  ;;  %v6420_v0 = vld [vmem:[#allocation9 + $0x350] sm:$0xff]  ;;  %v4644_v42 = vld [vmem:[#allocation2 + $0x2e8] sm:$0xff]  ;;  %v6402_v18 = vld [vmem:[#allocation9 + $0x2c0] sm:$0xff] }
 0x897   :  { %7063 = vmatmul.f32.gmra.mxu3 %v4899_v59 }
 0x898   :  { %6645 = vmatmul.f32.gmra.mxu1 %v4643_v34  ;;  %7507 = vmatpush.msra.mxu2 %v6405_v11  ;;  %v6401_v11 = vld [vmem:[#allocation9 + $0x2b8] sm:$0xff] }
 0x899   :  { %v12196_v13 = vpop.f32.mrf.mxu0  ;;  %7716 = vmatpush.msra.mxu3 %v6421_v15  ;;  %v6441_v15 = vld [vmem:[#allocation9 + $0x3f8] sm:$0xff] }
 0x89a   :  { %14734 = vst [vmem:[#allocation93_spill] sm:$0xff] %v12196_v13  ;;  %v7016_v7 = vpop.f32.mrf.mxu3  ;;  %6857 = vmatmul.f32.gmra.mxu2 %v4772_v4  ;;  %v6404_v13 = vld [vmem:[#allocation9 + $0x2d0] sm:$0xff]  ;;  %v6418_v4 = vld [vmem:[#allocation9 + $0x340] sm:$0xff]  ;;  %7921 = vmatpush.msra.mxu0 %v6441_v15  ;;  %v6439_v15 = vld [vmem:[#allocation9 + $0x3e8] sm:$0xff] }
 0x89b   :  { %v12198_v32 = vadd.f32 %v7016_v7, %v6808_v47  ;;  %7508 = vmatpush.msra.mxu2 %v6404_v13  ;;  %7717 = vmatpush.msra.mxu3 %v6420_v0  ;;  %v6419_v7 = vld [vmem:[#allocation9 + $0x348] sm:$0xff]  ;;  %v6417_v13 = vld [vmem:[#allocation9 + $0x338] sm:$0xff]  ;;  %v6400_v0 = vld [vmem:[#allocation9 + $0x2b0] sm:$0xff] }
 0x89c   :  { %7266 = vmatmul.f32.gmra.mxu0 %v4643_v34 }
 0x89d   :  { %14735 = vst [vmem:[#allocation95_spill] sm:$0xff] %v12198_v32  ;;  %v6601_v59 = vpop.f32.mrf.mxu1  ;;  %v6810_v34 = vpop.f32.mrf.mxu2  ;;  %7509 = vmatpush.msra.mxu2 %v6403_v49  ;;  %7718 = vmatpush.msra.mxu3 %v6419_v7 }
 0x89e   :  { %v6811_v47 = vadd.f32 %v6810_v34, %v6601_v59  ;;  %v4901_v59 = vld [vmem:[#allocation2 + $0x2f2] sm:$0xff] }
 0x89f   :  { %7066 = vmatmul.f32.gmra.mxu3 %v4900_v40  ;;  %v4773_v40 = vld [vmem:[#allocation2 + $0x2f1] sm:$0xff]  ;;  %7510 = vmatpush.msra.mxu2 %v6402_v18  ;;  %v6399_v18 = vld [vmem:[#allocation9 + $0x2a8] sm:$0xff] }
 0x8a0   :  { %6648 = vmatmul.f32.gmra.mxu1 %v4644_v42  ;;  %7719 = vmatpush.msra.mxu3 %v6418_v4  ;;  %v4645_v34 = vld [vmem:[#allocation2 + $0x2f0] sm:$0xff]  ;;  %v6438_v4 = vld [vmem:[#allocation9 + $0x3e0] sm:$0xff] }
 0x8a1   :  { %v12200_v19 = vpop.f32.mrf.mxu0  ;;  %7511 = vmatpush.msra.mxu2 %v6401_v11 }
 0x8a2   :  { %14736 = vst [vmem:[#allocation97_spill] sm:$0xff] %v12200_v19  ;;  %v7019_v36 = vpop.f32.mrf.mxu3  ;;  %v6440_v19 = vld [vmem:[#allocation9 + $0x3f0] sm:$0xff]  ;;  %6860 = vmatmul.f32.gmra.mxu2 %v4773_v40  ;;  %7720 = vmatpush.msra.mxu3 %v6417_v13 }
 0x8a3   :  { %v12202_v32 = vadd.f32 %v7019_v36, %v6811_v47  ;;  %7922 = vmatpush.msra.mxu0 %v6440_v19  ;;  %7512 = vmatpush.msra.mxu2 %v6400_v0  ;;  %v6415_v36 = vld [vmem:[#allocation9 + $0x328] sm:$0xff]  ;;  %v6398_v19 = vld [vmem:[#allocation9 + $0x2a0] sm:$0xff] }
 0x8a4   :  { %7269 = vmatmul.f32.gmra.mxu0 %v4644_v42  ;;  %v6416_v42 = vld [vmem:[#allocation9 + $0x330] sm:$0xff]  ;;  %v4902_v0 = vld [vmem:[#allocation2 + $0x302] sm:$0xff] }
 0x8a5   :  { %14737 = vst [vmem:[#allocation99_spill] sm:$0xff] %v12202_v32  ;;  %v6604_v1 = vpop.f32.mrf.mxu1  ;;  %v6813_v49 = vpop.f32.mrf.mxu2  ;;  %7721 = vmatpush.msra.mxu3 %v6416_v42  ;;  %7923 = vmatpush.msra.mxu0 %v6439_v15  ;;  %v4774_v32 = vld [vmem:[#allocation2 + $0x301] sm:$0xff]  ;;  %v6436_v42 = vld [vmem:[#allocation9 + $0x3d0] sm:$0xff] }
 0x8a6   :  { %v6814_v7 = vadd.f32 %v6813_v49, %v6604_v1  ;;  %7513 = vmatpush.msra.mxu2 %v6399_v18  ;;  %v6397_v1 = vld [vmem:[#allocation9 + $0x298] sm:$0xff]  ;;  %v4646_v15 = vld [vmem:[#allocation2 + $0x300] sm:$0xff] }
 0x8a7   :  { %7069 = vmatmul.f32.gmra.mxu3 %v4901_v59  ;;  %v6414_v59 = vld [vmem:[#allocation9 + $0x320] sm:$0xff]  ;;  %7924 = vmatpush.msra.mxu0 %v6438_v4  ;;  %v6413_v49 = vld [vmem:[#allocation9 + $0x318] sm:$0xff]  ;;  %v6435_v4 = vld [vmem:[#allocation9 + $0x3c8] sm:$0xff] }
 0x8a8   :  { %6651 = vmatmul.f32.gmra.mxu1 %v4645_v34  ;;  %7722 = vmatpush.msra.mxu3 %v6415_v36  ;;  %v6412_v36 = vld [vmem:[#allocation9 + $0x310] sm:$0xff] }
 0x8a9   :  { %v12204_v47 = vpop.f32.mrf.mxu0  ;;  %7514 = vmatpush.msra.mxu2 %v6398_v19  ;;  %v6411_v19 = vld [vmem:[#allocation9 + $0x308] sm:$0xff] }
 0x8aa   :  { %14738 = vst [vmem:[#allocation102_spill] sm:$0xff] %v12204_v47  ;;  %v7022_v40 = vpop.f32.mrf.mxu3  ;;  %v6437_v47 = vld [vmem:[#allocation9 + $0x3d8] sm:$0xff]  ;;  %6863 = vmatmul.f32.gmra.mxu2 %v4774_v32  ;;  %7723 = vmatpush.msra.mxu3 %v6414_v59  ;;  %v6395_v32 = vld [vmem:[#allocation9 + $0x288] sm:$0xff] }
 0x8ab   :  { %v12206_v11 = vadd.f32 %v7022_v40, %v6814_v7  ;;  %7925 = vmatpush.msra.mxu0 %v6437_v47  ;;  %7515 = vmatpush.msra.mxu2 %v6397_v1  ;;  %v6394_v47 = vld [vmem:[#allocation9 + $0x280] sm:$0xff] }
 0x8ac   :  { %7272 = vmatmul.f32.gmra.mxu0 %v4645_v34  ;;  %v6396_v34 = vld [vmem:[#allocation9 + $0x290] sm:$0xff]  ;;  %7724 = vmatpush.msra.mxu3 %v6413_v49 }
 0x8ad   :  { %14739 = vst [vmem:[#allocation105_spill] sm:$0xff] %v12206_v11  ;;  %v6607_v13 = vpop.f32.mrf.mxu1  ;;  %v6816_v18 = vpop.f32.mrf.mxu2  ;;  %7926 = vmatpush.msra.mxu0 %v6436_v42  ;;  %7516 = vmatpush.msra.mxu2 %v6396_v34  ;;  %v4903_v49 = vld [vmem:[#allocation2 + $0x30a] sm:$0xff]  ;;  %v6433_v42 = vld [vmem:[#allocation9 + $0x3b8] sm:$0xff] }
 0x8ae   :  { %v6817_v40 = vadd.f32 %v6816_v18, %v6607_v13  ;;  %7725 = vmatpush.msra.mxu3 %v6412_v36  ;;  %v6410_v13 = vld [vmem:[#allocation9 + $0x300] sm:$0xff]  ;;  %v4647_v34 = vld [vmem:[#allocation2 + $0x308] sm:$0xff]  ;;  %v6432_v36 = vld [vmem:[#allocation9 + $0x3b0] sm:$0xff] }
 0x8af   :  { %7072 = vmatmul.f32.gmra.mxu3 %v4902_v0  ;;  %v6434_v0 = vld [vmem:[#allocation9 + $0x3c0] sm:$0xff]  ;;  %7517 = vmatpush.msra.mxu2 %v6395_v32  ;;  %v6431_v32 = vld [vmem:[#allocation9 + $0x3a8] sm:$0xff] }
 0x8b0   :  { %6654 = vmatmul.f32.gmra.mxu1 %v4646_v15  ;;  %7927 = vmatpush.msra.mxu0 %v6435_v4  ;;  %v4776_v4 = vld [vmem:[#allocation2 + $0x319] sm:$0xff] }
 0x8b1   :  { %v12208_v7 = vpop.f32.mrf.mxu0  ;;  %7726 = vmatpush.msra.mxu3 %v6411_v19  ;;  %7518 = vmatpush.msra.mxu2 %v6394_v47  ;;  %v6430_v47 = vld [vmem:[#allocation9 + $0x3a0] sm:$0xff] }
 0x8b2   :  { %14740 = vst [vmem:[#allocation184_spill] sm:$0xff] %v12208_v7  ;;  %v7025_v11 = vpop.f32.mrf.mxu3  ;;  %v6457_v7 = vld [vmem:[#allocation9 + $0x478] sm:$0xff]  ;;  %6866 = vmatmul.f32.gmra.mxu2 %v4775_v29  ;;  %7928 = vmatpush.msra.mxu0 %v6434_v0 }
 0x8b3   :  { %v12210_v59 = vadd.f32 %v7025_v11, %v6817_v40  ;;  %8130 = vmatpush.msra.mxu1 %v6457_v7  ;;  %7727 = vmatpush.msra.mxu3 %v6410_v13  ;;  %v4904_v0 = vld [vmem:[#allocation2 + $0x31a] sm:$0xff] }
 0x8b4   :  { %7275 = vmatmul.f32.gmra.mxu0 %v4646_v15  ;;  %v4648_v7 = vld [vmem:[#allocation2 + $0x318] sm:$0xff] }
 0x8b5   :  { %14741 = vst [vmem:[#allocation183_spill] sm:$0xff] %v12210_v59  ;;  %v6610_v1 = vpop.f32.mrf.mxu1  ;;  %v6819_v15 = vpop.f32.mrf.mxu2  ;;  %7929 = vmatpush.msra.mxu0 %v6433_v42  ;;  %v6428_v42 = vld [vmem:[#allocation9 + $0x390] sm:$0xff] }
 0x8b6   :  { %v6820_v18 = vadd.f32 %v6819_v15, %v6610_v1 }
 0x8b7   :  { %7075 = vmatmul.f32.gmra.mxu3 %v4903_v49  ;;  %7930 = vmatpush.msra.mxu0 %v6432_v36  ;;  %v6429_v49 = vld [vmem:[#allocation9 + $0x398] sm:$0xff]  ;;  %v4777_v36 = vld [vmem:[#allocation2 + $0x321] sm:$0xff] }
 0x8b8   :  { %6657 = vmatmul.f32.gmra.mxu1 %v4647_v34 }
 0x8b9   :  { %v12212_v11 = vpop.f32.mrf.mxu0  ;;  %7931 = vmatpush.msra.mxu0 %v6431_v32  ;;  %v6426_v32 = vld [vmem:[#allocation9 + $0x380] sm:$0xff] }
 0x8ba   :  { %v7028_v40 = vpop.f32.mrf.mxu3  ;;  %6869 = vmatmul.f32.gmra.mxu2 %v4776_v4  ;;  %v4905_v4 = vld [vmem:[#allocation2 + $0x322] sm:$0xff] }
 0x8bb   :  { %v12214_v29 = vadd.f32 %v7028_v40, %v6820_v18  ;;  %7932 = vmatpush.msra.mxu0 %v6430_v47  ;;  %v6427_v18 = vld [vmem:[#allocation9 + $0x388] sm:$0xff] }
 0x8bc   :  { %7278 = vmatmul.f32.gmra.mxu0 %v4647_v34 }
 0x8bd   :  { %14742 = vst [vmem:[#allocation185_spill] sm:$0xff] %v12214_v29  ;;  %v6613_v19 = vpop.f32.mrf.mxu1  ;;  %v6822_v1 = vpop.f32.mrf.mxu2  ;;  %7933 = vmatpush.msra.mxu0 %v6429_v49 }
 0x8be   :  { %v6823_v13 = vadd.f32 %v6822_v1, %v6613_v19  ;;  %v5226_v1 = vld [vmem:[#allocation2 + $0x1a] sm:$0xff] }
 0x8bf   :  { %7078 = vmatmul.f32.gmra.mxu3 %v4904_v0  ;;  %7934 = vmatpush.msra.mxu0 %v6428_v42  ;;  %v4649_v0 = vld [vmem:[#allocation2 + $0x320] sm:$0xff]  ;;  %v5354_v42 = vld [vmem:[#allocation2 + $0x30] sm:$0xff] }
 0x8c0   :  { %6660 = vmatmul.f32.gmra.mxu1 %v4648_v7 }
 0x8c1   :  { %v12216_v59 = vpop.f32.mrf.mxu0  ;;  %7935 = vmatpush.msra.mxu0 %v6427_v18 }
 0x8c2   :  { %v7031_v34 = vpop.f32.mrf.mxu3  ;;  %6872 = vmatmul.f32.gmra.mxu2 %v4777_v36 }
 0x8c3   :  { %v12218_v15 = vadd.f32 %v7031_v34, %v6823_v13  ;;  %7936 = vmatpush.msra.mxu0 %v6426_v32  ;;  %v5098_v34 = vld [vmem:[#allocation2 + $0x19] sm:$0xff] }
 0x8c4   :  { %7281 = vmatmul.f32.gmra.mxu0 %v4648_v7 }
 0x8c5   :  { %14743 = vst [vmem:[#allocation186_spill] sm:$0xff] %v12218_v15  ;;  %v6616_v40 = vpop.f32.mrf.mxu1  ;;  %v6825_v19 = vpop.f32.mrf.mxu2  ;;  %v5032_v15 = vld [vmem:[#allocation2 + $0x330] sm:$0xff] }
 0x8c6   :  { %v6826_v47 = vadd.f32 %v6825_v19, %v6616_v40  ;;  %v6456_v40 = vld [vmem:[#allocation9 + $0x470] sm:$0xff] }
 0x8c7   :  { %7081 = vmatmul.f32.gmra.mxu3 %v4905_v4  ;;  %8131 = vmatpush.msra.mxu1 %v6456_v40  ;;  %v5100_v40 = vld [vmem:[#allocation2 + $0x31] sm:$0xff] }
 0x8c8   :  { %6663 = vmatmul.f32.gmra.mxu1 %v4649_v0 }
 0x8c9   :  { %v12220_v29 = vpop.f32.mrf.mxu0 }
 0x8ca   :  { %14744 = vst [vmem:[#allocation187_spill] sm:$0xff] %v12220_v29  ;;  %v7034_v49 = vpop.f32.mrf.mxu3  ;;  %7519 = vmatmul.f32.vlgmr.msra.gmra.mxu2 %v5226_v1 }
 0x8cb   :  { %v12222_v7 = vadd.f32 %v7034_v49, %v6826_v47  ;;  %v5355_v47 = vld [vmem:[#allocation2 + $0x38] sm:$0xff]  ;;  %v5099_v49 = vld [vmem:[#allocation2 + $0x21] sm:$0xff] }
 0x8cc   :  { %7284 = vmatmul.f32.gmra.mxu0 %v4649_v0  ;;  %v5227_v0 = vld [vmem:[#allocation2 + $0x22] sm:$0xff] }
 0x8cd   :  { %14745 = vst [vmem:[#allocation188_spill] sm:$0xff] %v12222_v7  ;;  %v6619_v13 = vpop.f32.mrf.mxu1  ;;  %v6828_v18 = vpop.f32.mrf.mxu2  ;;  %v5033_v7 = vld [vmem:[#allocation2 + $0x338] sm:$0xff] }
 0x8ce   :  { %v6829_v4 = vadd.f32 %v6828_v18, %v6619_v13 }
 0x8cf   :  { %7728 = vmatmul.f32.vlgmr.msra.gmra.mxu3 %v5354_v42 }
 0x8d0   :  { %7310 = vmatmul.f32.vlgmr.msrb.gmra.mxu1 %v5098_v34 }
 0x8d1   :  { %v12224_v36 = vpop.f32.mrf.mxu0 }
 0x8d2   :  { %v7037_v29 = vpop.f32.mrf.mxu3  ;;  %7522 = vmatmul.f32.gmra.mxu2 %v5227_v0 }
 0x8d3   :  { %v12226_v32 = vadd.f32 %v7037_v29, %v6829_v4  ;;  %v5228_v29 = vld [vmem:[#allocation2 + $0x32] sm:$0xff]  ;;  %v5356_v4 = vld [vmem:[#allocation2 + $0x48] sm:$0xff] }
 0x8d4   :  { %7287 = vmatmul.f32.gmra.mxu0 %v5032_v15 }
 0x8d5   :  { %14746 = vst [vmem:[#allocation189_spill] sm:$0xff] %v12226_v32  ;;  %v6622_v19 = vpop.f32.mrf.mxu1  ;;  %v6831_v42 = vpop.f32.mrf.mxu2 }
 0x8d6   :  { %v6832_v34 = vadd.f32 %v6831_v42, %v6622_v19  ;;  %v5229_v19 = vld [vmem:[#allocation2 + $0x3a] sm:$0xff] }
 0x8d7   :  { %7731 = vmatmul.f32.gmra.mxu3 %v5355_v47 }
 0x8d8   :  { %7313 = vmatmul.f32.gmra.mxu1 %v5099_v49 }
 0x8d9   :  { %v12228_v1 = vpop.f32.mrf.mxu0 }
 0x8da   :  { %14747 = vst [vmem:[#allocation108_spill] sm:$0xff] %v12228_v1  ;;  %v7040_v13 = vpop.f32.mrf.mxu3  ;;  %7525 = vmatmul.f32.gmra.mxu2 %v5228_v29 }
 0x8db   :  { %v12230_v18 = vadd.f32 %v7040_v13, %v6832_v34  ;;  %v5101_v34 = vld [vmem:[#allocation2 + $0x39] sm:$0xff] }
 0x8dc   :  { %7290 = vmatmul.f32.gmra.mxu0 %v5033_v7  ;;  %v5357_v7 = vld [vmem:[#allocation2 + $0x50] sm:$0xff] }
 0x8dd   :  { %14748 = vst [vmem:[#allocation111_spill] sm:$0xff] %v12230_v18  ;;  %v6625_v15 = vpop.f32.mrf.mxu1  ;;  %v6834_v47 = vpop.f32.mrf.mxu2 }
 0x8de   :  { %v6835_v32 = vadd.f32 %v6834_v47, %v6625_v15  ;;  %v5230_v15 = vld [vmem:[#allocation2 + $0x4a] sm:$0xff] }
 0x8df   :  { %7734 = vmatmul.f32.gmra.mxu3 %v5356_v4 }
 0x8e0   :  { %7316 = vmatmul.f32.gmra.mxu1 %v5100_v40 }
 0x8e1   :  { %v12232_v0 = vpop.f32.mrf.mxu0 }
 0x8e2   :  { %14749 = vst [vmem:[#allocation114_spill] sm:$0xff] %v12232_v0  ;;  %v7043_v1 = vpop.f32.mrf.mxu3  ;;  %7528 = vmatmul.f32.gmra.mxu2 %v5229_v19 }
 0x8e3   :  { %v12234_v49 = vadd.f32 %v7043_v1, %v6835_v32  ;;  %v5358_v32 = vld [vmem:[#allocation2 + $0x60] sm:$0xff]  ;;  %v5102_v1 = vld [vmem:[#allocation2 + $0x49] sm:$0xff] }
 0x8e4   :  { %7937 = vmatmul.f32.vlgmr.msra.gmra.mxu0 %v5100_v40 }
 0x8e5   :  { %14750 = vst [vmem:[#allocation117_spill] sm:$0xff] %v12234_v49  ;;  %v6628_v42 = vpop.f32.mrf.mxu1  ;;  %v6837_v29 = vpop.f32.mrf.mxu2 }
 0x8e6   :  { %v6838_v4 = vadd.f32 %v6837_v29, %v6628_v42  ;;  %v6455_v42 = vld [vmem:[#allocation9 + $0x468] sm:$0xff]  ;;  %v5231_v29 = vld [vmem:[#allocation2 + $0x52] sm:$0xff] }
 0x8e7   :  { %7737 = vmatmul.f32.gmra.mxu3 %v5357_v7  ;;  %8132 = vmatpush.msra.mxu1 %v6455_v42 }
 0x8e8   :  { %7319 = vmatmul.f32.gmra.mxu1 %v5101_v34 }
 0x8e9   :  { %v12236_v13 = vpop.f32.mrf.mxu0 }
 0x8ea   :  { %14751 = vst [vmem:[#allocation120_spill] sm:$0xff] %v12236_v13  ;;  %v7046_v18 = vpop.f32.mrf.mxu3  ;;  %7531 = vmatmul.f32.gmra.mxu2 %v5230_v15 }
 0x8eb   :  { %v12238_v0 = vadd.f32 %v7046_v18, %v6838_v4  ;;  %v5103_v4 = vld [vmem:[#allocation2 + $0x51] sm:$0xff] }
 0x8ec   :  { %7940 = vmatmul.f32.gmra.mxu0 %v5101_v34  ;;  %v5359_v34 = vld [vmem:[#allocation2 + $0x68] sm:$0xff] }
 0x8ed   :  { %14752 = vst [vmem:[#allocation190_spill] sm:$0xff] %v12238_v0  ;;  %v6631_v47 = vpop.f32.mrf.mxu1  ;;  %v6840_v19 = vpop.f32.mrf.mxu2 }
 0x8ee   :  { %v6841_v7 = vadd.f32 %v6840_v19, %v6631_v47  ;;  %v5360_v19 = vld [vmem:[#allocation2 + $0x78] sm:$0xff] }
 0x8ef   :  { %7740 = vmatmul.f32.gmra.mxu3 %v5358_v32 }
 0x8f0   :  { %7322 = vmatmul.f32.gmra.mxu1 %v5102_v1 }
 0x8f1   :  { %v12240_v40 = vpop.f32.mrf.mxu0 }
 0x8f2   :  { %14753 = vst [vmem:[#allocation123_spill] sm:$0xff] %v12240_v40  ;;  %v7049_v49 = vpop.f32.mrf.mxu3  ;;  %7534 = vmatmul.f32.gmra.mxu2 %v5231_v29 }
 0x8f3   :  { %v12242_v13 = vadd.f32 %v7049_v49, %v6841_v7  ;;  %v5104_v7 = vld [vmem:[#allocation2 + $0x61] sm:$0xff] }
 0x8f4   :  { %7943 = vmatmul.f32.gmra.mxu0 %v5102_v1  ;;  %v5232_v1 = vld [vmem:[#allocation2 + $0x62] sm:$0xff] }
 0x8f5   :  { %14754 = vst [vmem:[#allocation126_spill] sm:$0xff] %v12242_v13  ;;  %v6634_v18 = vpop.f32.mrf.mxu1  ;;  %v6843_v32 = vpop.f32.mrf.mxu2 }
 0x8f6   :  { %v6844_v0 = vadd.f32 %v6843_v32, %v6634_v18  ;;  %v5233_v18 = vld [vmem:[#allocation2 + $0x6a] sm:$0xff] }
 0x8f7   :  { %7743 = vmatmul.f32.gmra.mxu3 %v5359_v34 }
 0x8f8   :  { %7325 = vmatmul.f32.gmra.mxu1 %v5103_v4 }
 0x8f9   :  { %v12244_v15 = vpop.f32.mrf.mxu0 }
 0x8fa   :  { %14755 = vst [vmem:[#allocation128_spill] sm:$0xff] %v12244_v15  ;;  %v7052_v40 = vpop.f32.mrf.mxu3  ;;  %7537 = vmatmul.f32.gmra.mxu2 %v5232_v1 }
 0x8fb   :  { %v12246_v47 = vadd.f32 %v7052_v40, %v6844_v0  ;;  %v5361_v0 = vld [vmem:[#allocation2 + $0x80] sm:$0xff]  ;;  %v5105_v40 = vld [vmem:[#allocation2 + $0x69] sm:$0xff] }
 0x8fc   :  { %7946 = vmatmul.f32.gmra.mxu0 %v5103_v4 }
 0x8fd   :  { %14756 = vst [vmem:[#allocation130_spill] sm:$0xff] %v12246_v47  ;;  %v6637_v49 = vpop.f32.mrf.mxu1  ;;  %v6846_v29 = vpop.f32.mrf.mxu2 }
 0x8fe   :  { %v6847_v34 = vadd.f32 %v6846_v29, %v6637_v49  ;;  %v5234_v49 = vld [vmem:[#allocation2 + $0x7a] sm:$0xff] }
 0x8ff   :  { %7746 = vmatmul.f32.gmra.mxu3 %v5360_v19 }
 0x900   :  { %7328 = vmatmul.f32.gmra.mxu1 %v5104_v7 }
 0x901   :  { %v12248_v42 = vpop.f32.mrf.mxu0 }
 0x902   :  { %14757 = vst [vmem:[#allocation132_spill] sm:$0xff] %v12248_v42  ;;  %v7055_v13 = vpop.f32.mrf.mxu3  ;;  %7540 = vmatmul.f32.gmra.mxu2 %v5233_v18 }
 0x903   :  { %v12250_v15 = vadd.f32 %v7055_v13, %v6847_v34  ;;  %v5362_v13 = vld [vmem:[#allocation2 + $0x90] sm:$0xff] }
 0x904   :  { %7949 = vmatmul.f32.gmra.mxu0 %v5104_v7  ;;  %v5106_v7 = vld [vmem:[#allocation2 + $0x79] sm:$0xff] }
 0x905   :  { %14758 = vst [vmem:[#allocation137_spill] sm:$0xff] %v12250_v15  ;;  %v6640_v32 = vpop.f32.mrf.mxu1  ;;  %v6849_v1 = vpop.f32.mrf.mxu2 }
 0x906   :  { %v6850_v19 = vadd.f32 %v6849_v1, %v6640_v32  ;;  %v6454_v32 = vld [vmem:[#allocation9 + $0x460] sm:$0xff] }
 0x907   :  { %7749 = vmatmul.f32.gmra.mxu3 %v5361_v0  ;;  %v5235_v1 = vld [vmem:[#allocation2 + $0x82] sm:$0xff]  ;;  %8133 = vmatpush.msra.mxu1 %v6454_v32 }
 0x908   :  { %7331 = vmatmul.f32.gmra.mxu1 %v5105_v40 }
 0x909   :  { %v12252_v4 = vpop.f32.mrf.mxu0 }
 0x90a   :  { %14759 = vst [vmem:[#allocation138_spill] sm:$0xff] %v12252_v4  ;;  %v7058_v47 = vpop.f32.mrf.mxu3  ;;  %7543 = vmatmul.f32.gmra.mxu2 %v5234_v49 }
 0x90b   :  { %v12254_v42 = vadd.f32 %v7058_v47, %v6850_v19  ;;  %v5107_v19 = vld [vmem:[#allocation2 + $0x81] sm:$0xff] }
 0x90c   :  { %7952 = vmatmul.f32.gmra.mxu0 %v5105_v40  ;;  %v5363_v40 = vld [vmem:[#allocation2 + $0x98] sm:$0xff] }
 0x90d   :  { %14760 = vst [vmem:[#allocation139_spill] sm:$0xff] %v12254_v42  ;;  %v6643_v29 = vpop.f32.mrf.mxu1  ;;  %v6852_v18 = vpop.f32.mrf.mxu2 }
 0x90e   :  { %v6853_v0 = vadd.f32 %v6852_v18, %v6643_v29  ;;  %v5364_v18 = vld [vmem:[#allocation2 + $0xa8] sm:$0xff] }
 0x90f   :  { %7752 = vmatmul.f32.gmra.mxu3 %v5362_v13 }
 0x910   :  { %7334 = vmatmul.f32.gmra.mxu1 %v5106_v7 }
 0x911   :  { %v12256_v34 = vpop.f32.mrf.mxu0 }
 0x912   :  { %14761 = vst [vmem:[#allocation140_spill] sm:$0xff] %v12256_v34  ;;  %v7061_v15 = vpop.f32.mrf.mxu3  ;;  %7546 = vmatmul.f32.gmra.mxu2 %v5235_v1 }
 0x913   :  { %v12258_v4 = vadd.f32 %v7061_v15, %v6853_v0  ;;  %v5108_v0 = vld [vmem:[#allocation2 + $0x91] sm:$0xff] }
 0x914   :  { %7955 = vmatmul.f32.gmra.mxu0 %v5106_v7  ;;  %v5236_v7 = vld [vmem:[#allocation2 + $0x92] sm:$0xff] }
 0x915   :  { %14762 = vst [vmem:[#allocation141_spill] sm:$0xff] %v12258_v4  ;;  %v6646_v47 = vpop.f32.mrf.mxu1  ;;  %v6855_v13 = vpop.f32.mrf.mxu2 }
 0x916   :  { %v6856_v42 = vadd.f32 %v6855_v13, %v6646_v47  ;;  %v5237_v47 = vld [vmem:[#allocation2 + $0x9a] sm:$0xff] }
 0x917   :  { %7755 = vmatmul.f32.gmra.mxu3 %v5363_v40 }
 0x918   :  { %7337 = vmatmul.f32.gmra.mxu1 %v5107_v19 }
 0x919   :  { %v12260_v49 = vpop.f32.mrf.mxu0 }
 0x91a   :  { %14763 = vst [vmem:[#allocation142_spill] sm:$0xff] %v12260_v49  ;;  %v7064_v34 = vpop.f32.mrf.mxu3  ;;  %7549 = vmatmul.f32.gmra.mxu2 %v5236_v7 }
 0x91b   :  { %v12262_v29 = vadd.f32 %v7064_v34, %v6856_v42  ;;  %v5365_v42 = vld [vmem:[#allocation2 + $0xb0] sm:$0xff]  ;;  %v5109_v34 = vld [vmem:[#allocation2 + $0x99] sm:$0xff] }
 0x91c   :  { %7958 = vmatmul.f32.gmra.mxu0 %v5107_v19 }
 0x91d   :  { %14764 = vst [vmem:[#allocation143_spill] sm:$0xff] %v12262_v29  ;;  %v6649_v15 = vpop.f32.mrf.mxu1  ;;  %v6858_v1 = vpop.f32.mrf.mxu2 }
 0x91e   :  { %v6859_v40 = vadd.f32 %v6858_v1, %v6649_v15  ;;  %v5238_v15 = vld [vmem:[#allocation2 + $0xaa] sm:$0xff] }
 0x91f   :  { %7758 = vmatmul.f32.gmra.mxu3 %v5364_v18 }
 0x920   :  { %7340 = vmatmul.f32.gmra.mxu1 %v5108_v0 }
 0x921   :  { %v12264_v32 = vpop.f32.mrf.mxu0 }
 0x922   :  { %14765 = vst [vmem:[#allocation144_spill] sm:$0xff] %v12264_v32  ;;  %v7067_v4 = vpop.f32.mrf.mxu3  ;;  %7552 = vmatmul.f32.gmra.mxu2 %v5237_v47 }
 0x923   :  { %v12266_v49 = vadd.f32 %v7067_v4, %v6859_v40  ;;  %v5366_v4 = vld [vmem:[#allocation2 + $0xc0] sm:$0xff] }
 0x924   :  { %7961 = vmatmul.f32.gmra.mxu0 %v5108_v0  ;;  %v5110_v0 = vld [vmem:[#allocation2 + $0xa9] sm:$0xff] }
 0x925   :  { %14766 = vst [vmem:[#allocation145_spill] sm:$0xff] %v12266_v49  ;;  %v6652_v13 = vpop.f32.mrf.mxu1  ;;  %v6861_v7 = vpop.f32.mrf.mxu2 }
 0x926   :  { %v6862_v18 = vadd.f32 %v6861_v7, %v6652_v13  ;;  %v6453_v13 = vld [vmem:[#allocation9 + $0x458] sm:$0xff] }
 0x927   :  { %7761 = vmatmul.f32.gmra.mxu3 %v5365_v42  ;;  %v5239_v7 = vld [vmem:[#allocation2 + $0xb2] sm:$0xff]  ;;  %8134 = vmatpush.msra.mxu1 %v6453_v13 }
 0x928   :  { %7343 = vmatmul.f32.gmra.mxu1 %v5109_v34 }
 0x929   :  { %v12268_v19 = vpop.f32.mrf.mxu0 }
 0x92a   :  { %14767 = vst [vmem:[#allocation146_spill] sm:$0xff] %v12268_v19  ;;  %v7070_v29 = vpop.f32.mrf.mxu3  ;;  %7555 = vmatmul.f32.gmra.mxu2 %v5238_v15 }
 0x92b   :  { %v12270_v32 = vadd.f32 %v7070_v29, %v6862_v18  ;;  %v5111_v18 = vld [vmem:[#allocation2 + $0xb1] sm:$0xff] }
 0x92c   :  { %7964 = vmatmul.f32.gmra.mxu0 %v5109_v34  ;;  %v5367_v34 = vld [vmem:[#allocation2 + $0xc8] sm:$0xff] }
 0x92d   :  { %14768 = vst [vmem:[#allocation147_spill] sm:$0xff] %v12270_v32  ;;  %v6655_v1 = vpop.f32.mrf.mxu1  ;;  %v6864_v47 = vpop.f32.mrf.mxu2 }
 0x92e   :  { %v6865_v42 = vadd.f32 %v6864_v47, %v6655_v1  ;;  %v5368_v47 = vld [vmem:[#allocation2 + $0xd8] sm:$0xff] }
 0x92f   :  { %7764 = vmatmul.f32.gmra.mxu3 %v5366_v4 }
 0x930   :  { %7346 = vmatmul.f32.gmra.mxu1 %v5110_v0 }
 0x931   :  { %v12272_v40 = vpop.f32.mrf.mxu0 }
 0x932   :  { %14769 = vst [vmem:[#allocation148_spill] sm:$0xff] %v12272_v40  ;;  %v7073_v49 = vpop.f32.mrf.mxu3  ;;  %7558 = vmatmul.f32.gmra.mxu2 %v5239_v7 }
 0x933   :  { %v12274_v19 = vadd.f32 %v7073_v49, %v6865_v42  ;;  %v5112_v42 = vld [vmem:[#allocation2 + $0xc1] sm:$0xff] }
 0x934   :  { %7967 = vmatmul.f32.gmra.mxu0 %v5110_v0  ;;  %v5240_v0 = vld [vmem:[#allocation2 + $0xc2] sm:$0xff] }
 0x935   :  { %14770 = vst [vmem:[#allocation149_spill] sm:$0xff] %v12274_v19  ;;  %v6658_v29 = vpop.f32.mrf.mxu1  ;;  %v6867_v4 = vpop.f32.mrf.mxu2 }
 0x936   :  { %v6868_v32 = vadd.f32 %v6867_v4, %v6658_v29  ;;  %v5241_v29 = vld [vmem:[#allocation2 + $0xca] sm:$0xff] }
 0x937   :  { %7767 = vmatmul.f32.gmra.mxu3 %v5367_v34 }
 0x938   :  { %7349 = vmatmul.f32.gmra.mxu1 %v5111_v18 }
 0x939   :  { %v12276_v15 = vpop.f32.mrf.mxu0 }
 0x93a   :  { %14771 = vst [vmem:[#allocation150_spill] sm:$0xff] %v12276_v15  ;;  %v7076_v40 = vpop.f32.mrf.mxu3  ;;  %7561 = vmatmul.f32.gmra.mxu2 %v5240_v0 }
 0x93b   :  { %v12278_v1 = vadd.f32 %v7076_v40, %v6868_v32  ;;  %v5369_v32 = vld [vmem:[#allocation2 + $0xe0] sm:$0xff]  ;;  %v5113_v40 = vld [vmem:[#allocation2 + $0xc9] sm:$0xff] }
 0x93c   :  { %7970 = vmatmul.f32.gmra.mxu0 %v5111_v18 }
 0x93d   :  { %14772 = vst [vmem:[#allocation151_spill] sm:$0xff] %v12278_v1  ;;  %v6661_v49 = vpop.f32.mrf.mxu1  ;;  %v6870_v7 = vpop.f32.mrf.mxu2 }
 0x93e   :  { %v6871_v34 = vadd.f32 %v6870_v7, %v6661_v49  ;;  %v7103_v49 = vadd.f32 %v12013_v38, %v12005_v45  ;;  %v7106_v45 = vadd.f32 %v12019_v52, %v12009_v39  ;;  %v5243_v38 = vld [vmem:[#allocation2 + $0xe2] sm:$0xff]  ;;  %v7109_v39 = vadd.f32 %v12025_v12, %v12015_v27  ;;  %v5244_v52 = vld [vmem:[#allocation2 + $0xf2] sm:$0xff]  ;;  %v5245_v27 = vld [vmem:[#allocation2 + $0xfa] sm:$0xff] }
 0x93f   :  { %7770 = vmatmul.f32.gmra.mxu3 %v5368_v47 }
 0x940   :  { %7352 = vmatmul.f32.gmra.mxu1 %v5112_v42 }
 0x941   :  { %v12280_v13 = vpop.f32.mrf.mxu0 }
 0x942   :  { %14773 = vst [vmem:[#allocation152_spill] sm:$0xff] %v12280_v13  ;;  %v7079_v19 = vpop.f32.mrf.mxu3  ;;  %7564 = vmatmul.f32.gmra.mxu2 %v5241_v29  ;;  %v5114_v29 = vld [vmem:[#allocation2 + $0xd9] sm:$0xff] }
 0x943   :  { %v12282_v15 = vadd.f32 %v7079_v19, %v6871_v34  ;;  %v5242_v19 = vld [vmem:[#allocation2 + $0xda] sm:$0xff]  ;;  %v5370_v34 = vld [vmem:[#allocation2 + $0xf0] sm:$0xff] }
 0x944   :  { %7973 = vmatmul.f32.gmra.mxu0 %v5112_v42 }
 0x945   :  { %14774 = vst [vmem:[#allocation153_spill] sm:$0xff] %v12282_v15  ;;  %v6664_v4 = vpop.f32.mrf.mxu1  ;;  %v6873_v0 = vpop.f32.mrf.mxu2 }
 0x946   :  { %v6874_v47 = vadd.f32 %v6873_v0, %v6664_v4 }
 0x947   :  { %7773 = vmatmul.f32.gmra.mxu3 %v5369_v32 }
 0x948   :  { %7355 = vmatmul.f32.gmra.mxu1 %v5113_v40 }
 0x949   :  { %v12284_v18 = vpop.f32.mrf.mxu0 }
 0x94a   :  { %14775 = vst [vmem:[#allocation100_spill] sm:$0xff] %v12284_v18  ;;  %v7082_v1 = vpop.f32.mrf.mxu3  ;;  %7567 = vmatmul.f32.gmra.mxu2 %v5242_v19  ;;  %v5115_v19 = vld [vmem:[#allocation2 + $0xe1] sm:$0xff] }
 0x94b   :  { %v12286_v13 = vadd.f32 %v7082_v1, %v6874_v47  ;;  %v6452_v1 = vld [vmem:[#allocation9 + $0x450] sm:$0xff] }
 0x94c   :  { %7976 = vmatmul.f32.gmra.mxu0 %v5113_v40  ;;  %8135 = vmatpush.msra.mxu1 %v6452_v1  ;;  %v5372_v1 = vld [vmem:[#allocation2 + $0x108] sm:$0xff] }
 0x94d   :  { %14776 = vst [vmem:[#allocation94_spill] sm:$0xff] %v12286_v13  ;;  %v7311_v42 = vpop.f32.mrf.mxu1  ;;  %v7520_v15 = vpop.f32.mrf.mxu2 }
 0x94e   :  { %v7312_v7 = vadd.f32 %v7311_v42, %v7103_v49  ;;  %v5371_v49 = vld [vmem:[#allocation2 + $0xf8] sm:$0xff] }
 0x94f   :  { %7776 = vmatmul.f32.gmra.mxu3 %v5370_v34 }
 0x950   :  { %7358 = vmatmul.f32.gmra.mxu1 %v5114_v29  ;;  %v7521_v18 = vadd.f32 %v7520_v15, %v7312_v7 }
 0x951   :  { %v12290_v32 = vpop.f32.mrf.mxu0 }
 0x952   :  { %14777 = vst [vmem:[#allocation106_spill] sm:$0xff] %v12290_v32  ;;  %v7729_v4 = vpop.f32.mrf.mxu3  ;;  %7570 = vmatmul.f32.gmra.mxu2 %v5243_v38 }
 0x953   :  { %v12292_v40 = vadd.f32 %v7729_v4, %v7521_v18 }
 0x954   :  { %7979 = vmatmul.f32.gmra.mxu0 %v5114_v29 }
 0x955   :  { %v7314_v0 = vpop.f32.mrf.mxu1  ;;  %v7523_v15 = vpop.f32.mrf.mxu2 }
 0x956   :  { %v7315_v47 = vadd.f32 %v7314_v0, %v7106_v45  ;;  %v5116_v45 = vld [vmem:[#allocation2 + $0xf1] sm:$0xff] }
 0x957   :  { %7779 = vmatmul.f32.gmra.mxu3 %v5371_v49 }
 0x958   :  { %7361 = vmatmul.f32.gmra.mxu1 %v5115_v19  ;;  %v7524_v7 = vadd.f32 %v7523_v15, %v7315_v47  ;;  %v7112_v15 = vadd.f32 %v12031_v35, %v12021_v46  ;;  %v5246_v46 = vld [vmem:[#allocation2 + $0x10a] sm:$0xff] }
 0x959   :  { %v12296_v42 = vpop.f32.mrf.mxu0 }
 0x95a   :  { %14778 = vst [vmem:[#allocation155_spill] sm:$0xff] %v12296_v42  ;;  %v7732_v34 = vpop.f32.mrf.mxu3  ;;  %7573 = vmatmul.f32.gmra.mxu2 %v5244_v52 }
 0x95b   :  { %v12298_v18 = vadd.f32 %v7732_v34, %v7524_v7  ;;  %v5373_v34 = vld [vmem:[#allocation2 + $0x110] sm:$0xff] }
 0x95c   :  { %7982 = vmatmul.f32.gmra.mxu0 %v5115_v19 }
 0x95d   :  { %v7317_v29 = vpop.f32.mrf.mxu1  ;;  %v7526_v0 = vpop.f32.mrf.mxu2 }
 0x95e   :  { %v7318_v4 = vadd.f32 %v7317_v29, %v7109_v39  ;;  %v5117_v39 = vld [vmem:[#allocation2 + $0xf9] sm:$0xff] }
 0x95f   :  { %7782 = vmatmul.f32.gmra.mxu3 %v5372_v1 }
 0x960   :  { %7364 = vmatmul.f32.gmra.mxu1 %v5116_v45  ;;  %v7527_v49 = vadd.f32 %v7526_v0, %v7318_v4  ;;  %v7115_v0 = vadd.f32 %v12037_v53, %v12027_v56  ;;  %v7118_v56 = vadd.f32 %v12043_v43, %v12033_v54  ;;  %v5247_v53 = vld [vmem:[#allocation2 + $0x112] sm:$0xff]  ;;  %v7121_v54 = vadd.f32 %v12049_v62, %v12039_v5  ;;  %v5248_v43 = vld [vmem:[#allocation2 + $0x122] sm:$0xff]  ;;  %v5249_v5 = vld [vmem:[#allocation2 + $0x12a] sm:$0xff] }
 0x961   :  { %v12302_v38 = vpop.f32.mrf.mxu0 }
 0x962   :  { %v7735_v47 = vpop.f32.mrf.mxu3  ;;  %7576 = vmatmul.f32.gmra.mxu2 %v5245_v27 }
 0x963   :  { %v12304_v19 = vadd.f32 %v7735_v47, %v7527_v49  ;;  %v5374_v47 = vld [vmem:[#allocation2 + $0x120] sm:$0xff] }
 0x964   :  { %7985 = vmatmul.f32.gmra.mxu0 %v5116_v45 }
 0x965   :  { %v7320_v12 = vpop.f32.mrf.mxu1  ;;  %v7529_v29 = vpop.f32.mrf.mxu2 }
 0x966   :  { %v7321_v7 = vadd.f32 %v7320_v12, %v7112_v15  ;;  %v5118_v15 = vld [vmem:[#allocation2 + $0x109] sm:$0xff] }
 0x967   :  { %7785 = vmatmul.f32.gmra.mxu3 %v5373_v34 }
 0x968   :  { %7367 = vmatmul.f32.gmra.mxu1 %v5117_v39  ;;  %v7530_v1 = vadd.f32 %v7529_v29, %v7321_v7  ;;  %v6451_v29 = vld [vmem:[#allocation9 + $0x448] sm:$0xff] }
 0x969   :  { %v12308_v52 = vpop.f32.mrf.mxu0  ;;  %8136 = vmatpush.msra.mxu1 %v6451_v29  ;;  %v5376_v29 = vld [vmem:[#allocation2 + $0x138] sm:$0xff] }
 0x96a   :  { %v7738_v4 = vpop.f32.mrf.mxu3  ;;  %7579 = vmatmul.f32.gmra.mxu2 %v5246_v46  ;;  %v5119_v46 = vld [vmem:[#allocation2 + $0x111] sm:$0xff] }
 0x96b   :  { %v12310_v45 = vadd.f32 %v7738_v4, %v7530_v1 }
 0x96c   :  { %7988 = vmatmul.f32.gmra.mxu0 %v5117_v39 }
 0x96d   :  { %v7323_v35 = vpop.f32.mrf.mxu1  ;;  %v7532_v12 = vpop.f32.mrf.mxu2 }
 0x96e   :  { %v7324_v49 = vadd.f32 %v7323_v35, %v7115_v0  ;;  %v5375_v0 = vld [vmem:[#allocation2 + $0x128] sm:$0xff] }
 0x96f   :  { %7788 = vmatmul.f32.gmra.mxu3 %v5374_v47 }
 0x970   :  { %7370 = vmatmul.f32.gmra.mxu1 %v5118_v15  ;;  %v7533_v34 = vadd.f32 %v7532_v12, %v7324_v49 }
 0x971   :  { %v12314_v27 = vpop.f32.mrf.mxu0 }
 0x972   :  { %v7741_v7 = vpop.f32.mrf.mxu3  ;;  %7582 = vmatmul.f32.gmra.mxu2 %v5247_v53 }
 0x973   :  { %v12316_v39 = vadd.f32 %v7741_v7, %v7533_v34 }
 0x974   :  { %7991 = vmatmul.f32.gmra.mxu0 %v5118_v15 }
 0x975   :  { %v7326_v1 = vpop.f32.mrf.mxu1  ;;  %v7535_v49 = vpop.f32.mrf.mxu2 }
 0x976   :  { %v7327_v4 = vadd.f32 %v7326_v1, %v7118_v56  ;;  %v5120_v56 = vld [vmem:[#allocation2 + $0x121] sm:$0xff] }
 0x977   :  { %7791 = vmatmul.f32.gmra.mxu3 %v5375_v0 }
 0x978   :  { %7373 = vmatmul.f32.gmra.mxu1 %v5119_v46  ;;  %v7536_v47 = vadd.f32 %v7535_v49, %v7327_v4  ;;  %v7124_v49 = vadd.f32 %v12055_v3, %v12045_v44  ;;  %v5250_v44 = vld [vmem:[#allocation2 + $0x13a] sm:$0xff] }
 0x979   :  { %v12320_v35 = vpop.f32.mrf.mxu0 }
 0x97a   :  { %v7744_v15 = vpop.f32.mrf.mxu3  ;;  %7585 = vmatmul.f32.gmra.mxu2 %v5248_v43 }
 0x97b   :  { %v12322_v12 = vadd.f32 %v7744_v15, %v7536_v47  ;;  %v5377_v15 = vld [vmem:[#allocation2 + $0x140] sm:$0xff] }
 0x97c   :  { %7994 = vmatmul.f32.gmra.mxu0 %v5119_v46 }
 0x97d   :  { %v7329_v34 = vpop.f32.mrf.mxu1  ;;  %v7538_v1 = vpop.f32.mrf.mxu2 }
 0x97e   :  { %v7330_v7 = vadd.f32 %v7329_v34, %v7121_v54  ;;  %v5121_v54 = vld [vmem:[#allocation2 + $0x129] sm:$0xff] }
 0x97f   :  { %7794 = vmatmul.f32.gmra.mxu3 %v5376_v29 }
 0x980   :  { %7376 = vmatmul.f32.gmra.mxu1 %v5120_v56  ;;  %v7539_v0 = vadd.f32 %v7538_v1, %v7330_v7  ;;  %v7127_v1 = vadd.f32 %v12061_v55, %v12051_v28  ;;  %v7130_v28 = vadd.f32 %v12067_v31, %v12057_v26  ;;  %v5251_v55 = vld [vmem:[#allocation2 + $0x142] sm:$0xff]  ;;  %v7133_v26 = vadd.f32 %v12073_v23, %v12063_v60  ;;  %v5252_v31 = vld [vmem:[#allocation2 + $0x152] sm:$0xff]  ;;  %v5253_v60 = vld [vmem:[#allocation2 + $0x15a] sm:$0xff] }
 0x981   :  { %v12326_v53 = vpop.f32.mrf.mxu0 }
 0x982   :  { %v7747_v4 = vpop.f32.mrf.mxu3  ;;  %7588 = vmatmul.f32.gmra.mxu2 %v5249_v5 }
 0x983   :  { %v12328_v46 = vadd.f32 %v7747_v4, %v7539_v0  ;;  %v5378_v4 = vld [vmem:[#allocation2 + $0x150] sm:$0xff] }
 0x984   :  { %7997 = vmatmul.f32.gmra.mxu0 %v5120_v56 }
 0x985   :  { %v7332_v62 = vpop.f32.mrf.mxu1  ;;  %v7541_v34 = vpop.f32.mrf.mxu2 }
 0x986   :  { %v7333_v47 = vadd.f32 %v7332_v62, %v7124_v49  ;;  %v5122_v49 = vld [vmem:[#allocation2 + $0x139] sm:$0xff] }
 0x987   :  { %7797 = vmatmul.f32.gmra.mxu3 %v5377_v15 }
 0x988   :  { %7379 = vmatmul.f32.gmra.mxu1 %v5121_v54  ;;  %v7542_v29 = vadd.f32 %v7541_v34, %v7333_v47  ;;  %v6450_v34 = vld [vmem:[#allocation9 + $0x440] sm:$0xff] }
 0x989   :  { %v12332_v43 = vpop.f32.mrf.mxu0  ;;  %8137 = vmatpush.msra.mxu1 %v6450_v34  ;;  %v5380_v34 = vld [vmem:[#allocation2 + $0x168] sm:$0xff] }
 0x98a   :  { %v7750_v7 = vpop.f32.mrf.mxu3  ;;  %7591 = vmatmul.f32.gmra.mxu2 %v5250_v44  ;;  %v5123_v44 = vld [vmem:[#allocation2 + $0x141] sm:$0xff] }
 0x98b   :  { %v12334_v56 = vadd.f32 %v7750_v7, %v7542_v29 }
 0x98c   :  { %8000 = vmatmul.f32.gmra.mxu0 %v5121_v54 }
 0x98d   :  { %v7335_v3 = vpop.f32.mrf.mxu1  ;;  %v7544_v62 = vpop.f32.mrf.mxu2 }
 0x98e   :  { %v7336_v0 = vadd.f32 %v7335_v3, %v7127_v1  ;;  %v5379_v1 = vld [vmem:[#allocation2 + $0x158] sm:$0xff] }
 0x98f   :  { %7800 = vmatmul.f32.gmra.mxu3 %v5378_v4 }
 0x990   :  { %7382 = vmatmul.f32.gmra.mxu1 %v5122_v49  ;;  %v7545_v15 = vadd.f32 %v7544_v62, %v7336_v0 }
 0x991   :  { %v12338_v5 = vpop.f32.mrf.mxu0 }
 0x992   :  { %v7753_v47 = vpop.f32.mrf.mxu3  ;;  %7594 = vmatmul.f32.gmra.mxu2 %v5251_v55 }
 0x993   :  { %v12340_v54 = vadd.f32 %v7753_v47, %v7545_v15 }
 0x994   :  { %8003 = vmatmul.f32.gmra.mxu0 %v5122_v49 }
 0x995   :  { %v7338_v29 = vpop.f32.mrf.mxu1  ;;  %v7547_v0 = vpop.f32.mrf.mxu2 }
 0x996   :  { %v7339_v7 = vadd.f32 %v7338_v29, %v7130_v28  ;;  %v5124_v28 = vld [vmem:[#allocation2 + $0x151] sm:$0xff] }
 0x997   :  { %7803 = vmatmul.f32.gmra.mxu3 %v5379_v1 }
 0x998   :  { %7385 = vmatmul.f32.gmra.mxu1 %v5123_v44  ;;  %v7548_v4 = vadd.f32 %v7547_v0, %v7339_v7  ;;  %v7136_v0 = vadd.f32 %v12079_v16, %v12069_v57  ;;  %v5254_v57 = vld [vmem:[#allocation2 + $0x16a] sm:$0xff] }
 0x999   :  { %v12344_v3 = vpop.f32.mrf.mxu0 }
 0x99a   :  { %v7756_v49 = vpop.f32.mrf.mxu3  ;;  %7597 = vmatmul.f32.gmra.mxu2 %v5252_v31 }
 0x99b   :  { %v12346_v62 = vadd.f32 %v7756_v49, %v7548_v4  ;;  %v5381_v49 = vld [vmem:[#allocation2 + $0x170] sm:$0xff] }
 0x99c   :  { %8006 = vmatmul.f32.gmra.mxu0 %v5123_v44 }
 0x99d   :  { %v7341_v15 = vpop.f32.mrf.mxu1  ;;  %v7550_v29 = vpop.f32.mrf.mxu2 }
 0x99e   :  { %v7342_v47 = vadd.f32 %v7341_v15, %v7133_v26  ;;  %v5125_v26 = vld [vmem:[#allocation2 + $0x159] sm:$0xff] }
 0x99f   :  { %7806 = vmatmul.f32.gmra.mxu3 %v5380_v34 }
 0x9a0   :  { %7388 = vmatmul.f32.gmra.mxu1 %v5124_v28  ;;  %v7551_v1 = vadd.f32 %v7550_v29, %v7342_v47  ;;  %v7139_v29 = vadd.f32 %v12085_v21, %v12075_v50  ;;  %v7142_v50 = vadd.f32 %v12091_v9, %v12081_v14  ;;  %v5255_v21 = vld [vmem:[#allocation2 + $0x172] sm:$0xff]  ;;  %v7145_v14 = vadd.f32 %v12095_v10, %v12087_v51  ;;  %v5256_v9 = vld [vmem:[#allocation2 + $0x182] sm:$0xff]  ;;  %v5257_v51 = vld [vmem:[#allocation2 + $0x18a] sm:$0xff] }
 0x9a1   :  { %v12350_v55 = vpop.f32.mrf.mxu0 }
 0x9a2   :  { %v7759_v7 = vpop.f32.mrf.mxu3  ;;  %7600 = vmatmul.f32.gmra.mxu2 %v5253_v60 }
 0x9a3   :  { %v12352_v44 = vadd.f32 %v7759_v7, %v7551_v1  ;;  %v5382_v7 = vld [vmem:[#allocation2 + $0x180] sm:$0xff] }
 0x9a4   :  { %8009 = vmatmul.f32.gmra.mxu0 %v5124_v28 }
 0x9a5   :  { %v7344_v23 = vpop.f32.mrf.mxu1  ;;  %v7553_v15 = vpop.f32.mrf.mxu2 }
 0x9a6   :  { %v7345_v4 = vadd.f32 %v7344_v23, %v7136_v0  ;;  %v5126_v0 = vld [vmem:[#allocation2 + $0x169] sm:$0xff] }
 0x9a7   :  { %7809 = vmatmul.f32.gmra.mxu3 %v5381_v49 }
 0x9a8   :  { %7391 = vmatmul.f32.gmra.mxu1 %v5125_v26  ;;  %v7554_v34 = vadd.f32 %v7553_v15, %v7345_v4  ;;  %v6449_v15 = vld [vmem:[#allocation9 + $0x438] sm:$0xff] }
 0x9a9   :  { %v12356_v31 = vpop.f32.mrf.mxu0  ;;  %8138 = vmatpush.msra.mxu1 %v6449_v15 }
 0x9aa   :  { %v7762_v47 = vpop.f32.mrf.mxu3  ;;  %7603 = vmatmul.f32.gmra.mxu2 %v5254_v57  ;;  %v5127_v57 = vld [vmem:[#allocation2 + $0x171] sm:$0xff] }
 0x9ab   :  { %v12358_v28 = vadd.f32 %v7762_v47, %v7554_v34 }
 0x9ac   :  { %8012 = vmatmul.f32.gmra.mxu0 %v5125_v26 }
 0x9ad   :  { %v7347_v16 = vpop.f32.mrf.mxu1  ;;  %v7556_v23 = vpop.f32.mrf.mxu2 }
 0x9ae   :  { %v7348_v1 = vadd.f32 %v7347_v16, %v7139_v29  ;;  %v5383_v29 = vld [vmem:[#allocation2 + $0x188] sm:$0xff] }
 0x9af   :  { %7812 = vmatmul.f32.gmra.mxu3 %v5382_v7 }
 0x9b0   :  { %7394 = vmatmul.f32.gmra.mxu1 %v5126_v0  ;;  %v7557_v49 = vadd.f32 %v7556_v23, %v7348_v1 }
 0x9b1   :  { %v12362_v60 = vpop.f32.mrf.mxu0 }
 0x9b2   :  { %v7765_v4 = vpop.f32.mrf.mxu3  ;;  %7606 = vmatmul.f32.gmra.mxu2 %v5255_v21 }
 0x9b3   :  { %v12364_v26 = vadd.f32 %v7765_v4, %v7557_v49  ;;  %v5384_v49 = vld [vmem:[#allocation2 + $0x198] sm:$0xff] }
 0x9b4   :  { %8015 = vmatmul.f32.gmra.mxu0 %v5126_v0 }
 0x9b5   :  { %14779 = vst [vmem:[#allocation154_spill] sm:$0xff] %v12364_v26  ;;  %v7350_v34 = vpop.f32.mrf.mxu1  ;;  %v7559_v1 = vpop.f32.mrf.mxu2  ;;  %v14892_v26 = vld [vmem:[#allocation126_spill] sm:$0xff] }
 0x9b6   :  { %v7351_v47 = vadd.f32 %v7350_v34, %v7142_v50  ;;  %v5128_v50 = vld [vmem:[#allocation2 + $0x181] sm:$0xff] }
 0x9b7   :  { %7815 = vmatmul.f32.gmra.mxu3 %v5383_v29 }
 0x9b8   :  { %7397 = vmatmul.f32.gmra.mxu1 %v5127_v57  ;;  %v7560_v7 = vadd.f32 %v7559_v1, %v7351_v47  ;;  %v7148_v1 = vadd.f32 %v12099_v33, %v12093_v41  ;;  %v7151_v41 = vadd.f32 %v12104_v25, %v12097_v63  ;;  %v5258_v33 = vld [vmem:[#allocation2 + $0x1ca] sm:$0xff]  ;;  %v7154_v63 = vadd.f32 %v12108_v22, %v12102_v37  ;;  %v5259_v25 = vld [vmem:[#allocation2 + $0x1d2] sm:$0xff]  ;;  %v5260_v22 = vld [vmem:[#allocation2 + $0x1e2] sm:$0xff] }
 0x9b9   :  { %v12368_v16 = vpop.f32.mrf.mxu0  ;;  %v7157_v37 = vadd.f32 %v12112_v61, %v12106_v58  ;;  %v5261_v58 = vld [vmem:[#allocation2 + $0x1ea] sm:$0xff] }
 0x9ba   :  { %v7768_v0 = vpop.f32.mrf.mxu3  ;;  %7609 = vmatmul.f32.gmra.mxu2 %v5256_v9 }
 0x9bb   :  { %v12370_v23 = vadd.f32 %v7768_v0, %v7560_v7  ;;  %v5129_v0 = vld [vmem:[#allocation2 + $0x189] sm:$0xff] }
 0x9bc   :  { %8018 = vmatmul.f32.gmra.mxu0 %v5127_v57 }
 0x9bd   :  { %14780 = vst [vmem:[#allocation98_spill] sm:$0xff] %v12370_v23  ;;  %v7353_v4 = vpop.f32.mrf.mxu1  ;;  %v7562_v34 = vpop.f32.mrf.mxu2 }
 0x9be   :  { %v7354_v15 = vadd.f32 %v7353_v4, %v7145_v14  ;;  %v12380_v14 = vld [vmem:[#allocation2 + $0x8] sm:$0xff] }
 0x9bf   :  { %7818 = vmatmul.f32.gmra.mxu3 %v5384_v49 }
 0x9c0   :  { %7400 = vmatmul.f32.gmra.mxu1 %v5128_v50  ;;  %v7563_v29 = vadd.f32 %v7562_v34, %v7354_v15 }
 0x9c1   :  { %v12374_v21 = vpop.f32.mrf.mxu0 }
 0x9c2   :  { %14781 = vst [vmem:[#allocation157_spill] sm:$0xff] %v12374_v21  ;;  %v7771_v47 = vpop.f32.mrf.mxu3  ;;  %7612 = vmatmul.f32.gmra.mxu2 %v5257_v51 }
 0x9c3   :  { %v12376_v57 = vadd.f32 %v7771_v47, %v7563_v29  ;;  %v5386_v47 = vld [vmem:[#allocation2 + $0x1e0] sm:$0xff] }
 0x9c4   :  { %8021 = vmatmul.f32.gmra.mxu0 %v5128_v50 }
 0x9c5   :  { %14782 = vst [vmem:[#allocation112_spill] sm:$0xff] %v12376_v57  ;;  %v7356_v10 = vpop.f32.mrf.mxu1  ;;  %v7565_v49 = vpop.f32.mrf.mxu2 }
 0x9c6   :  { %v7357_v7 = vadd.f32 %v7356_v10, %v7148_v1  ;;  %v5130_v1 = vld [vmem:[#allocation2 + $0x1c9] sm:$0xff]  ;;  %v5512_v10 = vld [vmem:[#allocation2 + $0x199] sm:$0xff] }
 0x9c7   :  { %7821 = vmatmul.f32.gmra.mxu3 %v12380_v14 }
 0x9c8   :  { %7403 = vmatmul.f32.gmra.mxu1 %v5129_v0  ;;  %v7566_v4 = vadd.f32 %v7565_v49, %v7357_v7 }
 0x9c9   :  { %v12383_v9 = vpop.f32.mrf.mxu0 }
 0x9ca   :  { %14783 = vst [vmem:[#allocation101_spill] sm:$0xff] %v12383_v9  ;;  %v7774_v15 = vpop.f32.mrf.mxu3  ;;  %7615 = vmatmul.f32.gmra.mxu2 %v5258_v33  ;;  %v5387_v33 = vld [vmem:[#allocation2 + $0x1e8] sm:$0xff] }
 0x9cb   :  { %v12385_v50 = vadd.f32 %v7774_v15, %v7566_v4  ;;  %v6448_v4 = vld [vmem:[#allocation9 + $0x430] sm:$0xff] }
 0x9cc   :  { %8024 = vmatmul.f32.gmra.mxu0 %v5129_v0  ;;  %8139 = vmatpush.msra.mxu1 %v6448_v4 }
 0x9cd   :  { %14784 = vst [vmem:[#allocation156_spill] sm:$0xff] %v12385_v50  ;;  %v7359_v34 = vpop.f32.mrf.mxu1  ;;  %v7568_v42 = vpop.f32.mrf.mxu2  ;;  %v5610_v50 = vld [vmem:[#allocation2 + $0x32] sm:$0xff] }
 0x9ce   :  { %v7360_v29 = vadd.f32 %v7359_v34, %v7151_v41  ;;  %v5131_v34 = vld [vmem:[#allocation2 + $0x1d1] sm:$0xff] }
 0x9cf   :  { %7824 = vmatmul.f32.gmra.mxu3 %v5386_v47 }
 0x9d0   :  { %7406 = vmatmul.f32.gmra.mxu1 %v5130_v1  ;;  %v7569_v7 = vadd.f32 %v7568_v42, %v7360_v29  ;;  %v5513_v42 = vld [vmem:[#allocation2 + $0x1a1] sm:$0xff] }
 0x9d1   :  { %v12389_v51 = vpop.f32.mrf.mxu0 }
 0x9d2   :  { %14785 = vst [vmem:[#allocation115_spill] sm:$0xff] %v12389_v51  ;;  %v7777_v49 = vpop.f32.mrf.mxu3  ;;  %7618 = vmatmul.f32.gmra.mxu2 %v5259_v25  ;;  %v5132_v25 = vld [vmem:[#allocation2 + $0x1e1] sm:$0xff] }
 0x9d3   :  { %v12391_v0 = vadd.f32 %v7777_v49, %v7569_v7 }
 0x9d4   :  { %8027 = vmatmul.f32.gmra.mxu0 %v5512_v10 }
 0x9d5   :  { %14786 = vst [vmem:[#allocation104_spill] sm:$0xff] %v12391_v0  ;;  %v7362_v15 = vpop.f32.mrf.mxu1  ;;  %v7571_v29 = vpop.f32.mrf.mxu2 }
 0x9d6   :  { %v7363_v41 = vadd.f32 %v7362_v15, %v7154_v63  ;;  %v5388_v63 = vld [vmem:[#allocation2 + $0x1f8] sm:$0xff] }
 0x9d7   :  { %7827 = vmatmul.f32.gmra.mxu3 %v5387_v33 }
 0x9d8   :  { %7409 = vmatmul.f32.gmra.mxu1 %v5131_v34  ;;  %v7572_v1 = vadd.f32 %v7571_v29, %v7363_v41  ;;  %v7160_v29 = vadd.f32 %v12116_v8, %v12110_v6  ;;  %v5262_v6 = vld [vmem:[#allocation2 + $0x1fa] sm:$0xff] }
 0x9d9   :  { %v12395_v47 = vpop.f32.mrf.mxu0 }
 0x9da   :  { %14787 = vst [vmem:[#allocation158_spill] sm:$0xff] %v12395_v47  ;;  %v7780_v10 = vpop.f32.mrf.mxu3  ;;  %7621 = vmatmul.f32.gmra.mxu2 %v5260_v22 }
 0x9db   :  { %v12397_v7 = vadd.f32 %v7780_v10, %v7572_v1  ;;  %v5389_v10 = vld [vmem:[#allocation2 + $0x200] sm:$0xff] }
 0x9dc   :  { %8030 = vmatmul.f32.gmra.mxu0 %v5513_v42 }
 0x9dd   :  { %14788 = vst [vmem:[#allocation161_spill] sm:$0xff] %v12397_v7  ;;  %v7365_v49 = vpop.f32.mrf.mxu1  ;;  %v7574_v33 = vpop.f32.mrf.mxu2 }
 0x9de   :  { %v7366_v4 = vadd.f32 %v7365_v49, %v7157_v37  ;;  %v5133_v37 = vld [vmem:[#allocation2 + $0x1e9] sm:$0xff] }
 0x9df   :  { %7830 = vmatmul.f32.gmra.mxu3 %v5388_v63 }
 0x9e0   :  { %7412 = vmatmul.f32.gmra.mxu1 %v5132_v25  ;;  %v7575_v34 = vadd.f32 %v7574_v33, %v7366_v4  ;;  %v7163_v33 = vadd.f32 %v12120_v2, %v12114_v24  ;;  %v7166_v24 = vadd.f32 %v12124_v20, %v12118_v30  ;;  %v5263_v2 = vld [vmem:[#allocation2 + $0x202] sm:$0xff]  ;;  %v7169_v30 = vadd.f32 %v12128_v17, %v12122_v48  ;;  %v5264_v20 = vld [vmem:[#allocation2 + $0x212] sm:$0xff]  ;;  %v5265_v48 = vld [vmem:[#allocation2 + $0x21a] sm:$0xff] }
 0x9e1   :  { %v12401_v15 = vpop.f32.mrf.mxu0 }
 0x9e2   :  { %14789 = vst [vmem:[#allocation118_spill] sm:$0xff] %v12401_v15  ;;  %v7783_v41 = vpop.f32.mrf.mxu3  ;;  %7624 = vmatmul.f32.gmra.mxu2 %v5261_v58 }
 0x9e3   :  { %v12403_v42 = vadd.f32 %v7783_v41, %v7575_v34  ;;  %v5390_v41 = vld [vmem:[#allocation2 + $0x210] sm:$0xff] }
 0x9e4   :  { %8033 = vmatmul.f32.gmra.mxu0 %v5132_v25 }
 0x9e5   :  { %14790 = vst [vmem:[#allocation107_spill] sm:$0xff] %v12403_v42  ;;  %v7368_v61 = vpop.f32.mrf.mxu1  ;;  %v7577_v49 = vpop.f32.mrf.mxu2 }
 0x9e6   :  { %v7369_v1 = vadd.f32 %v7368_v61, %v7160_v29  ;;  %v5134_v29 = vld [vmem:[#allocation2 + $0x1f9] sm:$0xff] }
 0x9e7   :  { %7833 = vmatmul.f32.gmra.mxu3 %v5389_v10 }
 0x9e8   :  { %7415 = vmatmul.f32.gmra.mxu1 %v5133_v37  ;;  %v7578_v63 = vadd.f32 %v7577_v49, %v7369_v1  ;;  %v6447_v49 = vld [vmem:[#allocation9 + $0x428] sm:$0xff] }
 0x9e9   :  { %v12407_v22 = vpop.f32.mrf.mxu0  ;;  %8140 = vmatpush.msra.mxu1 %v6447_v49  ;;  %v5392_v49 = vld [vmem:[#allocation2 + $0x228] sm:$0xff] }
 0x9ea   :  { %14791 = vst [vmem:[#allocation159_spill] sm:$0xff] %v12407_v22  ;;  %v7786_v4 = vpop.f32.mrf.mxu3  ;;  %7627 = vmatmul.f32.gmra.mxu2 %v5262_v6  ;;  %v5135_v6 = vld [vmem:[#allocation2 + $0x201] sm:$0xff] }
 0x9eb   :  { %v12409_v25 = vadd.f32 %v7786_v4, %v7578_v63 }
 0x9ec   :  { %8036 = vmatmul.f32.gmra.mxu0 %v5133_v37 }
 0x9ed   :  { %14792 = vst [vmem:[#allocation172_spill] sm:$0xff] %v12409_v25  ;;  %v7371_v8 = vpop.f32.mrf.mxu1  ;;  %v7580_v61 = vpop.f32.mrf.mxu2 }
 0x9ee   :  { %v7372_v34 = vadd.f32 %v7371_v8, %v7163_v33  ;;  %v5391_v33 = vld [vmem:[#allocation2 + $0x218] sm:$0xff] }
 0x9ef   :  { %7836 = vmatmul.f32.gmra.mxu3 %v5390_v41 }
 0x9f0   :  { %7418 = vmatmul.f32.gmra.mxu1 %v5134_v29  ;;  %v7581_v10 = vadd.f32 %v7580_v61, %v7372_v34 }
 0x9f1   :  { %v12413_v58 = vpop.f32.mrf.mxu0 }
 0x9f2   :  { %14793 = vst [vmem:[#allocation163_spill] sm:$0xff] %v12413_v58  ;;  %v7789_v1 = vpop.f32.mrf.mxu3  ;;  %7630 = vmatmul.f32.gmra.mxu2 %v5263_v2 }
 0x9f3   :  { %v12415_v37 = vadd.f32 %v7789_v1, %v7581_v10 }
 0x9f4   :  { %8039 = vmatmul.f32.gmra.mxu0 %v5134_v29 }
 0x9f5   :  { %14794 = vst [vmem:[#allocation121_spill] sm:$0xff] %v12415_v37  ;;  %v7374_v63 = vpop.f32.mrf.mxu1  ;;  %v7583_v34 = vpop.f32.mrf.mxu2  ;;  %v12553_v37 = vld [vmem:[#allocation2 + $0x302] sm:$0xff] }
 0x9f6   :  { %v7375_v4 = vadd.f32 %v7374_v63, %v7166_v24  ;;  %v5136_v24 = vld [vmem:[#allocation2 + $0x211] sm:$0xff] }
 0x9f7   :  { %7839 = vmatmul.f32.gmra.mxu3 %v5391_v33 }
 0x9f8   :  { %7421 = vmatmul.f32.gmra.mxu1 %v5135_v6  ;;  %v7584_v41 = vadd.f32 %v7583_v34, %v7375_v4  ;;  %v14799_v34 = vld [vmem:[#allocation174_spill] sm:$0xff] }
 0x9f9   :  { %v12419_v8 = vpop.f32.mrf.mxu0 }
 0x9fa   :  { %14795 = vst [vmem:[#allocation110_spill] sm:$0xff] %v12419_v8  ;;  %v7792_v29 = vpop.f32.mrf.mxu3  ;;  %7633 = vmatmul.f32.gmra.mxu2 %v5264_v20  ;;  %v5156_v8 = vld [vmem:[#allocation2 + $0x301] sm:$0xff] }
 0x9fb   :  { %v12421_v61 = vadd.f32 %v7792_v29, %v7584_v41  ;;  %v14800_v41 = vld [vmem:[#allocation179_spill] sm:$0xff] }
 0x9fc   :  { %8042 = vmatmul.f32.gmra.mxu0 %v5135_v6  ;;  %v7172_v29 = vadd.f32 %v14800_v41, %v14799_v34  ;;  %v5266_v34 = vld [vmem:[#allocation2 + $0x22a] sm:$0xff] }
 0x9fd   :  { %14796 = vst [vmem:[#allocation164_spill] sm:$0xff] %v12421_v61  ;;  %v7377_v10 = vpop.f32.mrf.mxu1  ;;  %v7586_v63 = vpop.f32.mrf.mxu2  ;;  %v12546_v61 = vld [vmem:[#allocation2 + $0x2f2] sm:$0xff] }
 0x9fe   :  { %v7378_v1 = vadd.f32 %v7377_v10, %v7169_v30  ;;  %v5393_v30 = vld [vmem:[#allocation2 + $0x230] sm:$0xff]  ;;  %v5137_v10 = vld [vmem:[#allocation2 + $0x219] sm:$0xff] }
 0x9ff   :  { %7842 = vmatmul.f32.gmra.mxu3 %v5392_v49 }
 0xa00   :  { %7424 = vmatmul.f32.gmra.mxu1 %v5136_v24  ;;  %v7587_v33 = vadd.f32 %v7586_v63, %v7378_v1  ;;  %v14803_v63 = vld [vmem:[#allocation167_spill] sm:$0xff] }
 0xa01   :  { %v12425_v2 = vpop.f32.mrf.mxu0 }
 0xa02   :  { %14797 = vst [vmem:[#allocation165_spill] sm:$0xff] %v12425_v2  ;;  %v7795_v4 = vpop.f32.mrf.mxu3  ;;  %7636 = vmatmul.f32.gmra.mxu2 %v5265_v48 }
 0xa03   :  { %v12427_v6 = vadd.f32 %v7795_v4, %v7587_v33  ;;  %v14804_v33 = vld [vmem:[#allocation122_spill] sm:$0xff] }
 0xa04   :  { %8045 = vmatmul.f32.gmra.mxu0 %v5136_v24  ;;  %v7175_v4 = vadd.f32 %v14804_v33, %v14803_v63  ;;  %v5267_v33 = vld [vmem:[#allocation2 + $0x232] sm:$0xff] }
 0xa05   :  { %14798 = vst [vmem:[#allocation160_spill] sm:$0xff] %v12427_v6  ;;  %v7380_v17 = vpop.f32.mrf.mxu1  ;;  %v7589_v13 = vpop.f32.mrf.mxu2 }
 0xa06   :  { %v7381_v20 = vadd.f32 %v7380_v17, %v7172_v29  ;;  %v5394_v29 = vld [vmem:[#allocation2 + $0x240] sm:$0xff]  ;;  %v5138_v17 = vld [vmem:[#allocation2 + $0x229] sm:$0xff] }
 0xa07   :  { %7845 = vmatmul.f32.gmra.mxu3 %v5393_v30 }
 0xa08   :  { %7427 = vmatmul.f32.gmra.mxu1 %v5137_v10  ;;  %v7590_v32 = vadd.f32 %v7589_v13, %v7381_v20 }
 0xa09   :  { %v12431_v49 = vpop.f32.mrf.mxu0 }
 0xa0a   :  { %14801 = vst [vmem:[#allocation176_spill] sm:$0xff] %v12431_v49  ;;  %v7798_v1 = vpop.f32.mrf.mxu3  ;;  %7639 = vmatmul.f32.gmra.mxu2 %v5266_v34 }
 0xa0b   :  { %v12433_v24 = vadd.f32 %v7798_v1, %v7590_v32  ;;  %v6446_v32 = vld [vmem:[#allocation9 + $0x420] sm:$0xff] }
 0xa0c   :  { %8048 = vmatmul.f32.gmra.mxu0 %v5137_v10  ;;  %v14807_v10 = vld [vmem:[#allocation131_spill] sm:$0xff]  ;;  %v14808_v1 = vld [vmem:[#allocation170_spill] sm:$0xff]  ;;  %8141 = vmatpush.msra.mxu1 %v6446_v32 }
 0xa0d   :  { %14802 = vst [vmem:[#allocation166_spill] sm:$0xff] %v12433_v24  ;;  %v7383_v41 = vpop.f32.mrf.mxu1  ;;  %v7592_v6 = vpop.f32.mrf.mxu2  ;;  %v7178_v63 = vadd.f32 %v14808_v1, %v14807_v10  ;;  %v5268_v1 = vld [vmem:[#allocation2 + $0x242] sm:$0xff] }
 0xa0e   :  { %v7384_v48 = vadd.f32 %v7383_v41, %v7175_v4  ;;  %v5395_v41 = vld [vmem:[#allocation2 + $0x248] sm:$0xff] }
 0xa0f   :  { %7848 = vmatmul.f32.gmra.mxu3 %v5394_v29  ;;  %v5139_v29 = vld [vmem:[#allocation2 + $0x231] sm:$0xff] }
 0xa10   :  { %7430 = vmatmul.f32.gmra.mxu1 %v5138_v17  ;;  %v7593_v49 = vadd.f32 %v7592_v6, %v7384_v48 }
 0xa11   :  { %v12437_v30 = vpop.f32.mrf.mxu0 }
 0xa12   :  { %14805 = vst [vmem:[#allocation124_spill] sm:$0xff] %v12437_v30  ;;  %v7801_v13 = vpop.f32.mrf.mxu3  ;;  %7642 = vmatmul.f32.gmra.mxu2 %v5267_v33 }
 0xa13   :  { %v12439_v20 = vadd.f32 %v7801_v13, %v7593_v49  ;;  %v14811_v13 = vld [vmem:[#allocation178_spill] sm:$0xff] }
 0xa14   :  { %8051 = vmatmul.f32.gmra.mxu0 %v5138_v17 }
 0xa15   :  { %14806 = vst [vmem:[#allocation113_spill] sm:$0xff] %v12439_v20  ;;  %v7386_v34 = vpop.f32.mrf.mxu1  ;;  %v7595_v6 = vpop.f32.mrf.mxu2  ;;  %v14812_v20 = vld [vmem:[#allocation125_spill] sm:$0xff] }
 0xa16   :  { %v7387_v4 = vadd.f32 %v7386_v34, %v7178_v63  ;;  %v7181_v10 = vadd.f32 %v14812_v20, %v14811_v13  ;;  %v5396_v63 = vld [vmem:[#allocation2 + $0x258] sm:$0xff]  ;;  %v5140_v34 = vld [vmem:[#allocation2 + $0x241] sm:$0xff]  ;;  %v5269_v20 = vld [vmem:[#allocation2 + $0x24a] sm:$0xff] }
 0xa17   :  { %7851 = vmatmul.f32.gmra.mxu3 %v5395_v41 }
 0xa18   :  { %7433 = vmatmul.f32.gmra.mxu1 %v5139_v29  ;;  %v7596_v48 = vadd.f32 %v7595_v6, %v7387_v4  ;;  %v14815_v6 = vld [vmem:[#allocation133_spill] sm:$0xff] }
 0xa19   :  { %v12443_v24 = vpop.f32.mrf.mxu0 }
 0xa1a   :  { %14809 = vst [vmem:[#allocation168_spill] sm:$0xff] %v12443_v24  ;;  %v7804_v17 = vpop.f32.mrf.mxu3  ;;  %7645 = vmatmul.f32.gmra.mxu2 %v5268_v1 }
 0xa1b   :  { %v12445_v49 = vadd.f32 %v7804_v17, %v7596_v48  ;;  %v14816_v48 = vld [vmem:[#allocation53_spill] sm:$0xff] }
 0xa1c   :  { %8054 = vmatmul.f32.gmra.mxu0 %v5139_v29  ;;  %v7184_v17 = vadd.f32 %v14816_v48, %v14815_v6  ;;  %v5270_v6 = vld [vmem:[#allocation2 + $0x25a] sm:$0xff] }
 0xa1d   :  { %14810 = vst [vmem:[#allocation162_spill] sm:$0xff] %v12445_v49  ;;  %v7389_v32 = vpop.f32.mrf.mxu1  ;;  %v7598_v24 = vpop.f32.mrf.mxu2 }
 0xa1e   :  { %v7390_v33 = vadd.f32 %v7389_v32, %v7181_v10  ;;  %v5397_v10 = vld [vmem:[#allocation2 + $0x260] sm:$0xff]  ;;  %v5141_v32 = vld [vmem:[#allocation2 + $0x249] sm:$0xff] }
 0xa1f   :  { %7854 = vmatmul.f32.gmra.mxu3 %v5396_v63 }
 0xa20   :  { %7436 = vmatmul.f32.gmra.mxu1 %v5140_v34  ;;  %v7599_v30 = vadd.f32 %v7598_v24, %v7390_v33 }
 0xa21   :  { %v12449_v41 = vpop.f32.mrf.mxu0 }
 0xa22   :  { %14813 = vst [vmem:[#allocation169_spill] sm:$0xff] %v12449_v41  ;;  %v7807_v4 = vpop.f32.mrf.mxu3  ;;  %7648 = vmatmul.f32.gmra.mxu2 %v5269_v20 }
 0xa23   :  { %v12451_v29 = vadd.f32 %v7807_v4, %v7599_v30  ;;  %v14819_v30 = vld [vmem:[#allocation173_spill] sm:$0xff] }
 0xa24   :  { %8057 = vmatmul.f32.gmra.mxu0 %v5140_v34  ;;  %v14820_v34 = vld [vmem:[#allocation181_spill] sm:$0xff] }
 0xa25   :  { %14814 = vst [vmem:[#allocation127_spill] sm:$0xff] %v12451_v29  ;;  %v7392_v13 = vpop.f32.mrf.mxu1  ;;  %v7601_v49 = vpop.f32.mrf.mxu2  ;;  %v7187_v4 = vadd.f32 %v14820_v34, %v14819_v30  ;;  %v5271_v34 = vld [vmem:[#allocation2 + $0x262] sm:$0xff] }
 0xa26   :  { %v7393_v1 = vadd.f32 %v7392_v13, %v7184_v17  ;;  %v5398_v17 = vld [vmem:[#allocation2 + $0x270] sm:$0xff]  ;;  %v5142_v13 = vld [vmem:[#allocation2 + $0x259] sm:$0xff] }
 0xa27   :  { %7857 = vmatmul.f32.gmra.mxu3 %v5397_v10 }
 0xa28   :  { %7439 = vmatmul.f32.gmra.mxu1 %v5141_v32  ;;  %v7602_v41 = vadd.f32 %v7601_v49, %v7393_v1 }
 0xa29   :  { %v12455_v63 = vpop.f32.mrf.mxu0 }
 0xa2a   :  { %14817 = vst [vmem:[#allocation116_spill] sm:$0xff] %v12455_v63  ;;  %v7810_v24 = vpop.f32.mrf.mxu3  ;;  %7651 = vmatmul.f32.gmra.mxu2 %v5270_v6 }
 0xa2b   :  { %v12457_v33 = vadd.f32 %v7810_v24, %v7602_v41  ;;  %v6445_v41 = vld [vmem:[#allocation9 + $0x418] sm:$0xff] }
 0xa2c   :  { %8060 = vmatmul.f32.gmra.mxu0 %v5141_v32  ;;  %v14823_v32 = vld [vmem:[#allocation44_spill] sm:$0xff]  ;;  %v14824_v24 = vld [vmem:[#allocation57_spill] sm:$0xff]  ;;  %8142 = vmatpush.msra.mxu1 %v6445_v41 }
 0xa2d   :  { %14818 = vst [vmem:[#allocation171_spill] sm:$0xff] %v12457_v33  ;;  %v7395_v48 = vpop.f32.mrf.mxu1  ;;  %v7604_v29 = vpop.f32.mrf.mxu2  ;;  %v7190_v30 = vadd.f32 %v14824_v24, %v14823_v32  ;;  %v5272_v24 = vld [vmem:[#allocation2 + $0x272] sm:$0xff] }
 0xa2e   :  { %v7396_v20 = vadd.f32 %v7395_v48, %v7187_v4  ;;  %v5399_v48 = vld [vmem:[#allocation2 + $0x278] sm:$0xff] }
 0xa2f   :  { %7860 = vmatmul.f32.gmra.mxu3 %v5398_v17  ;;  %v5143_v17 = vld [vmem:[#allocation2 + $0x261] sm:$0xff] }
 0xa30   :  { %7442 = vmatmul.f32.gmra.mxu1 %v5142_v13  ;;  %v7605_v63 = vadd.f32 %v7604_v29, %v7396_v20 }
 0xa31   :  { %v12461_v10 = vpop.f32.mrf.mxu0 }
 0xa32   :  { %14821 = vst [vmem:[#allocation90_spill] sm:$0xff] %v12461_v10  ;;  %v7813_v49 = vpop.f32.mrf.mxu3  ;;  %7654 = vmatmul.f32.gmra.mxu2 %v5271_v34 }
 0xa33   :  { %v12463_v1 = vadd.f32 %v7813_v49, %v7605_v63  ;;  %v14827_v49 = vld [vmem:[#allocation177_spill] sm:$0xff] }
 0xa34   :  { %8063 = vmatmul.f32.gmra.mxu0 %v5142_v13 }
 0xa35   :  { %14822 = vst [vmem:[#allocation175_spill] sm:$0xff] %v12463_v1  ;;  %v7398_v6 = vpop.f32.mrf.mxu1  ;;  %v7607_v29 = vpop.f32.mrf.mxu2  ;;  %v14828_v1 = vld [vmem:[#allocation180_spill] sm:$0xff] }
 0xa36   :  { %v7399_v4 = vadd.f32 %v7398_v6, %v7190_v30  ;;  %v7193_v32 = vadd.f32 %v14828_v1, %v14827_v49  ;;  %v5400_v30 = vld [vmem:[#allocation2 + $0x288] sm:$0xff]  ;;  %v5144_v6 = vld [vmem:[#allocation2 + $0x271] sm:$0xff]  ;;  %v5273_v1 = vld [vmem:[#allocation2 + $0x27a] sm:$0xff] }
 0xa37   :  { %7863 = vmatmul.f32.gmra.mxu3 %v5399_v48 }
 0xa38   :  { %7445 = vmatmul.f32.gmra.mxu1 %v5143_v17  ;;  %v7608_v20 = vadd.f32 %v7607_v29, %v7399_v4  ;;  %v14831_v29 = vld [vmem:[#allocation48_spill] sm:$0xff] }
 0xa39   :  { %v12467_v33 = vpop.f32.mrf.mxu0 }
 0xa3a   :  { %14825 = vst [vmem:[#allocation129_spill] sm:$0xff] %v12467_v33  ;;  %v7816_v13 = vpop.f32.mrf.mxu3  ;;  %7657 = vmatmul.f32.gmra.mxu2 %v5272_v24 }
 0xa3b   :  { %v12469_v63 = vadd.f32 %v7816_v13, %v7608_v20  ;;  %v14832_v20 = vld [vmem:[#allocation64_spill] sm:$0xff] }
 0xa3c   :  { %8066 = vmatmul.f32.gmra.mxu0 %v5143_v17  ;;  %v7196_v13 = vadd.f32 %v14832_v20, %v14831_v29  ;;  %v5274_v29 = vld [vmem:[#allocation2 + $0x28a] sm:$0xff] }
 0xa3d   :  { %14826 = vst [vmem:[#allocation119_spill] sm:$0xff] %v12469_v63  ;;  %v7401_v41 = vpop.f32.mrf.mxu1  ;;  %v7610_v33 = vpop.f32.mrf.mxu2 }
 0xa3e   :  { %v7402_v34 = vadd.f32 %v7401_v41, %v7193_v32  ;;  %v5401_v32 = vld [vmem:[#allocation2 + $0x290] sm:$0xff]  ;;  %v5145_v41 = vld [vmem:[#allocation2 + $0x279] sm:$0xff] }
 0xa3f   :  { %7866 = vmatmul.f32.gmra.mxu3 %v5400_v30 }
 0xa40   :  { %7448 = vmatmul.f32.gmra.mxu1 %v5144_v6  ;;  %v7611_v10 = vadd.f32 %v7610_v33, %v7402_v34 }
 0xa41   :  { %v12473_v48 = vpop.f32.mrf.mxu0 }
 0xa42   :  { %14829 = vst [vmem:[#allocation174_spill] sm:$0xff] %v12473_v48  ;;  %v7819_v4 = vpop.f32.mrf.mxu3  ;;  %7660 = vmatmul.f32.gmra.mxu2 %v5273_v1 }
 0xa43   :  { %v12475_v17 = vadd.f32 %v7819_v4, %v7611_v10  ;;  %v14835_v10 = vld [vmem:[#allocation61_spill] sm:$0xff] }
 0xa44   :  { %8069 = vmatmul.f32.gmra.mxu0 %v5144_v6  ;;  %v14836_v6 = vld [vmem:[#allocation67_spill] sm:$0xff] }
 0xa45   :  { %14830 = vst [vmem:[#allocation179_spill] sm:$0xff] %v12475_v17  ;;  %v7404_v49 = vpop.f32.mrf.mxu1  ;;  %v7613_v63 = vpop.f32.mrf.mxu2  ;;  %v7199_v4 = vadd.f32 %v14836_v6, %v14835_v10  ;;  %v5275_v6 = vld [vmem:[#allocation2 + $0x292] sm:$0xff] }
 0xa46   :  { %v7405_v24 = vadd.f32 %v7404_v49, %v7196_v13  ;;  %v5402_v13 = vld [vmem:[#allocation2 + $0x2a0] sm:$0xff]  ;;  %v5146_v49 = vld [vmem:[#allocation2 + $0x289] sm:$0xff] }
 0xa47   :  { %7869 = vmatmul.f32.gmra.mxu3 %v5401_v32 }
 0xa48   :  { %7451 = vmatmul.f32.gmra.mxu1 %v5145_v41  ;;  %v7614_v48 = vadd.f32 %v7613_v63, %v7405_v24 }
 0xa49   :  { %v12479_v30 = vpop.f32.mrf.mxu0 }
 0xa4a   :  { %14833 = vst [vmem:[#allocation167_spill] sm:$0xff] %v12479_v30  ;;  %v7822_v33 = vpop.f32.mrf.mxu3  ;;  %7663 = vmatmul.f32.gmra.mxu2 %v5274_v29 }
 0xa4b   :  { %v12481_v34 = vadd.f32 %v7822_v33, %v7614_v48  ;;  %v6444_v48 = vld [vmem:[#allocation9 + $0x410] sm:$0xff]  ;;  %v14840_v33 = vld [vmem:[#allocation73_spill] sm:$0xff] }
 0xa4c   :  { %8072 = vmatmul.f32.gmra.mxu0 %v5145_v41  ;;  %v14839_v41 = vld [vmem:[#allocation182_spill] sm:$0xff]  ;;  %8143 = vmatpush.msra.mxu1 %v6444_v48 }
 0xa4d   :  { %14834 = vst [vmem:[#allocation122_spill] sm:$0xff] %v12481_v34  ;;  %v7407_v20 = vpop.f32.mrf.mxu1  ;;  %v7616_v17 = vpop.f32.mrf.mxu2  ;;  %v7202_v10 = vadd.f32 %v14840_v33, %v14839_v41  ;;  %v5276_v33 = vld [vmem:[#allocation2 + $0x2a2] sm:$0xff] }
 0xa4e   :  { %v7408_v1 = vadd.f32 %v7407_v20, %v7199_v4  ;;  %v5403_v20 = vld [vmem:[#allocation2 + $0x2a8] sm:$0xff] }
 0xa4f   :  { %7872 = vmatmul.f32.gmra.mxu3 %v5402_v13  ;;  %v5147_v13 = vld [vmem:[#allocation2 + $0x291] sm:$0xff] }
 0xa50   :  { %7454 = vmatmul.f32.gmra.mxu1 %v5146_v49  ;;  %v7617_v30 = vadd.f32 %v7616_v17, %v7408_v1 }
 0xa51   :  { %v12485_v32 = vpop.f32.mrf.mxu0 }
 0xa52   :  { %14837 = vst [vmem:[#allocation131_spill] sm:$0xff] %v12485_v32  ;;  %v7825_v63 = vpop.f32.mrf.mxu3  ;;  %7666 = vmatmul.f32.gmra.mxu2 %v5275_v6 }
 0xa53   :  { %v12487_v24 = vadd.f32 %v7825_v63, %v7617_v30  ;;  %v14843_v63 = vld [vmem:[#allocation70_spill] sm:$0xff] }
 0xa54   :  { %8075 = vmatmul.f32.gmra.mxu0 %v5146_v49 }
 0xa55   :  { %14838 = vst [vmem:[#allocation170_spill] sm:$0xff] %v12487_v24  ;;  %v7410_v29 = vpop.f32.mrf.mxu1  ;;  %v7619_v17 = vpop.f32.mrf.mxu2  ;;  %v14844_v24 = vld [vmem:[#allocation79_spill] sm:$0xff] }
 0xa56   :  { %v7411_v4 = vadd.f32 %v7410_v29, %v7202_v10  ;;  %v7205_v41 = vadd.f32 %v14844_v24, %v14843_v63  ;;  %v5404_v10 = vld [vmem:[#allocation2 + $0x2b8] sm:$0xff]  ;;  %v5148_v29 = vld [vmem:[#allocation2 + $0x2a1] sm:$0xff]  ;;  %v5277_v24 = vld [vmem:[#allocation2 + $0x2aa] sm:$0xff] }
 0xa57   :  { %7875 = vmatmul.f32.gmra.mxu3 %v5403_v20 }
 0xa58   :  { %7457 = vmatmul.f32.gmra.mxu1 %v5147_v13  ;;  %v7620_v1 = vadd.f32 %v7619_v17, %v7411_v4  ;;  %v14847_v17 = vld [vmem:[#allocation76_spill] sm:$0xff] }
 0xa59   :  { %v12491_v34 = vpop.f32.mrf.mxu0 }
 0xa5a   :  { %14841 = vst [vmem:[#allocation178_spill] sm:$0xff] %v12491_v34  ;;  %v7828_v49 = vpop.f32.mrf.mxu3  ;;  %7669 = vmatmul.f32.gmra.mxu2 %v5276_v33 }
 0xa5b   :  { %v12493_v30 = vadd.f32 %v7828_v49, %v7620_v1  ;;  %v14848_v1 = vld [vmem:[#allocation85_spill] sm:$0xff] }
 0xa5c   :  { %8078 = vmatmul.f32.gmra.mxu0 %v5147_v13  ;;  %v7208_v49 = vadd.f32 %v14848_v1, %v14847_v17  ;;  %v5278_v17 = vld [vmem:[#allocation2 + $0x2ba] sm:$0xff] }
 0xa5d   :  { %14842 = vst [vmem:[#allocation125_spill] sm:$0xff] %v12493_v30  ;;  %v7413_v48 = vpop.f32.mrf.mxu1  ;;  %v7622_v34 = vpop.f32.mrf.mxu2 }
 0xa5e   :  { %v7414_v6 = vadd.f32 %v7413_v48, %v7205_v41  ;;  %v5405_v41 = vld [vmem:[#allocation2 + $0x2c0] sm:$0xff]  ;;  %v5149_v48 = vld [vmem:[#allocation2 + $0x2a9] sm:$0xff] }
 0xa5f   :  { %7878 = vmatmul.f32.gmra.mxu3 %v5404_v10 }
 0xa60   :  { %7460 = vmatmul.f32.gmra.mxu1 %v5148_v29  ;;  %v7623_v32 = vadd.f32 %v7622_v34, %v7414_v6 }
 0xa61   :  { %v12497_v20 = vpop.f32.mrf.mxu0 }
 0xa62   :  { %14845 = vst [vmem:[#allocation133_spill] sm:$0xff] %v12497_v20  ;;  %v7831_v4 = vpop.f32.mrf.mxu3  ;;  %7672 = vmatmul.f32.gmra.mxu2 %v5277_v24 }
 0xa63   :  { %v12499_v13 = vadd.f32 %v7831_v4, %v7623_v32  ;;  %v14851_v32 = vld [vmem:[#allocation82_spill] sm:$0xff] }
 0xa64   :  { %8081 = vmatmul.f32.gmra.mxu0 %v5148_v29  ;;  %v14852_v29 = vld [vmem:[#allocation87_spill] sm:$0xff] }
 0xa65   :  { %14846 = vst [vmem:[#allocation53_spill] sm:$0xff] %v12499_v13  ;;  %v7416_v63 = vpop.f32.mrf.mxu1  ;;  %v7625_v30 = vpop.f32.mrf.mxu2  ;;  %v7211_v4 = vadd.f32 %v14852_v29, %v14851_v32  ;;  %v5279_v29 = vld [vmem:[#allocation2 + $0x2c2] sm:$0xff] }
 0xa66   :  { %v7417_v33 = vadd.f32 %v7416_v63, %v7208_v49  ;;  %v5406_v49 = vld [vmem:[#allocation2 + $0x2d0] sm:$0xff]  ;;  %v5150_v63 = vld [vmem:[#allocation2 + $0x2b9] sm:$0xff] }
 0xa67   :  { %7881 = vmatmul.f32.gmra.mxu3 %v5405_v41 }
 0xa68   :  { %7463 = vmatmul.f32.gmra.mxu1 %v5149_v48  ;;  %v7626_v20 = vadd.f32 %v7625_v30, %v7417_v33 }
 0xa69   :  { %v12503_v10 = vpop.f32.mrf.mxu0 }
 0xa6a   :  { %14849 = vst [vmem:[#allocation173_spill] sm:$0xff] %v12503_v10  ;;  %v7834_v34 = vpop.f32.mrf.mxu3  ;;  %7675 = vmatmul.f32.gmra.mxu2 %v5278_v17 }
 0xa6b   :  { %v12505_v6 = vadd.f32 %v7834_v34, %v7626_v20  ;;  %v6443_v20 = vld [vmem:[#allocation9 + $0x408] sm:$0xff]  ;;  %v14856_v34 = vld [vmem:[#allocation92_spill] sm:$0xff] }
 0xa6c   :  { %8084 = vmatmul.f32.gmra.mxu0 %v5149_v48  ;;  %v14855_v48 = vld [vmem:[#allocation86_spill] sm:$0xff]  ;;  %8144 = vmatpush.msra.mxu1 %v6443_v20 }
 0xa6d   :  { %14850 = vst [vmem:[#allocation181_spill] sm:$0xff] %v12505_v6  ;;  %v7419_v1 = vpop.f32.mrf.mxu1  ;;  %v7628_v13 = vpop.f32.mrf.mxu2  ;;  %v7214_v32 = vadd.f32 %v14856_v34, %v14855_v48  ;;  %v12521_v34 = vld [vmem:[#allocation2 + $0x2d2] sm:$0xff] }
 0xa6e   :  { %v7420_v24 = vadd.f32 %v7419_v1, %v7211_v4  ;;  %v5407_v1 = vld [vmem:[#allocation2 + $0x2d8] sm:$0xff] }
 0xa6f   :  { %7884 = vmatmul.f32.gmra.mxu3 %v5406_v49  ;;  %v5151_v49 = vld [vmem:[#allocation2 + $0x2c1] sm:$0xff] }
 0xa70   :  { %7466 = vmatmul.f32.gmra.mxu1 %v5150_v63  ;;  %v7629_v10 = vadd.f32 %v7628_v13, %v7420_v24 }
 0xa71   :  { %v12509_v41 = vpop.f32.mrf.mxu0 }
 0xa72   :  { %14853 = vst [vmem:[#allocation44_spill] sm:$0xff] %v12509_v41  ;;  %v7837_v30 = vpop.f32.mrf.mxu3  ;;  %7678 = vmatmul.f32.gmra.mxu2 %v5279_v29  ;;  %v5408_v29 = vld [vmem:[#allocation2 + $0x2e8] sm:$0xff] }
 0xa73   :  { %v12511_v33 = vadd.f32 %v7837_v30, %v7629_v10  ;;  %v14859_v30 = vld [vmem:[#allocation88_spill] sm:$0xff] }
 0xa74   :  { %8087 = vmatmul.f32.gmra.mxu0 %v5150_v63 }
 0xa75   :  { %14854 = vst [vmem:[#allocation57_spill] sm:$0xff] %v12511_v33  ;;  %v7422_v17 = vpop.f32.mrf.mxu1  ;;  %v7631_v13 = vpop.f32.mrf.mxu2  ;;  %v14860_v33 = vld [vmem:[#allocation89_spill] sm:$0xff] }
 0xa76   :  { %v7423_v4 = vadd.f32 %v7422_v17, %v7214_v32  ;;  %v7217_v48 = vadd.f32 %v14860_v33, %v14859_v30  ;;  %v5152_v17 = vld [vmem:[#allocation2 + $0x2d1] sm:$0xff] }
 0xa77   :  { %7887 = vmatmul.f32.gmra.mxu3 %v5407_v1  ;;  %v14864_v33 = vld [vmem:[#allocation93_spill] sm:$0xff] }
 0xa78   :  { %7469 = vmatmul.f32.gmra.mxu1 %v5151_v49  ;;  %v7632_v24 = vadd.f32 %v7631_v13, %v7423_v4 }
 0xa79   :  { %v12515_v6 = vpop.f32.mrf.mxu0 }
 0xa7a   :  { %14857 = vst [vmem:[#allocation177_spill] sm:$0xff] %v12515_v6  ;;  %v7840_v63 = vpop.f32.mrf.mxu3  ;;  %7681 = vmatmul.f32.gmra.mxu2 %v12521_v34 }
 0xa7b   :  { %v12517_v10 = vadd.f32 %v7840_v63, %v7632_v24  ;;  %v14863_v63 = vld [vmem:[#allocation109_spill] sm:$0xff] }
 0xa7c   :  { %8090 = vmatmul.f32.gmra.mxu0 %v5151_v49  ;;  %v7220_v30 = vadd.f32 %v14864_v33, %v14863_v63  ;;  %v14868_v63 = vld [vmem:[#allocation97_spill] sm:$0xff] }
 0xa7d   :  { %14858 = vst [vmem:[#allocation180_spill] sm:$0xff] %v12517_v10  ;;  %v7425_v20 = vpop.f32.mrf.mxu1  ;;  %v7634_v4 = vpop.f32.mrf.mxu2  ;;  %v12530_v10 = vld [vmem:[#allocation2 + $0x2da] sm:$0xff] }
 0xa7e   :  { %v7426_v32 = vadd.f32 %v7425_v20, %v7217_v48  ;;  %v5409_v20 = vld [vmem:[#allocation2 + $0x2f0] sm:$0xff] }
 0xa7f   :  { %7890 = vmatmul.f32.gmra.mxu3 %v5408_v29  ;;  %v5153_v29 = vld [vmem:[#allocation2 + $0x2d9] sm:$0xff] }
 0xa80   :  { %7472 = vmatmul.f32.gmra.mxu1 %v5152_v17  ;;  %v7635_v13 = vadd.f32 %v7634_v4, %v7426_v32 }
 0xa81   :  { %v12524_v1 = vpop.f32.mrf.mxu0 }
 0xa82   :  { %14861 = vst [vmem:[#allocation48_spill] sm:$0xff] %v12524_v1  ;;  %v7843_v49 = vpop.f32.mrf.mxu3  ;;  %7684 = vmatmul.f32.gmra.mxu2 %v12530_v10 }
 0xa83   :  { %v12526_v24 = vadd.f32 %v7843_v49, %v7635_v13  ;;  %v14867_v49 = vld [vmem:[#allocation91_spill] sm:$0xff] }
 0xa84   :  { %8093 = vmatmul.f32.gmra.mxu0 %v5152_v17  ;;  %v7223_v33 = vadd.f32 %v14868_v63, %v14867_v49  ;;  %v14871_v49 = vld [vmem:[#allocation102_spill] sm:$0xff] }
 0xa85   :  { %14862 = vst [vmem:[#allocation64_spill] sm:$0xff] %v12526_v24  ;;  %v7428_v6 = vpop.f32.mrf.mxu1  ;;  %v7637_v32 = vpop.f32.mrf.mxu2  ;;  %v12539_v24 = vld [vmem:[#allocation2 + $0x2ea] sm:$0xff] }
 0xa86   :  { %v7429_v48 = vadd.f32 %v7428_v6, %v7220_v30  ;;  %v5410_v30 = vld [vmem:[#allocation2 + $0x300] sm:$0xff] }
 0xa87   :  { %7893 = vmatmul.f32.gmra.mxu3 %v5409_v20  ;;  %v5154_v20 = vld [vmem:[#allocation2 + $0x2e9] sm:$0xff] }
 0xa88   :  { %7475 = vmatmul.f32.gmra.mxu1 %v5153_v29  ;;  %v7638_v4 = vadd.f32 %v7637_v32, %v7429_v48 }
 0xa89   :  { %v12533_v1 = vpop.f32.mrf.mxu0 }
 0xa8a   :  { %14865 = vst [vmem:[#allocation61_spill] sm:$0xff] %v12533_v1  ;;  %v7846_v17 = vpop.f32.mrf.mxu3  ;;  %7687 = vmatmul.f32.gmra.mxu2 %v12539_v24 }
 0xa8b   :  { %v12535_v13 = vadd.f32 %v7846_v17, %v7638_v4  ;;  %v6442_v17 = vld [vmem:[#allocation9 + $0x400] sm:$0xff] }
 0xa8c   :  { %8096 = vmatmul.f32.gmra.mxu0 %v5153_v29  ;;  %8145 = vmatpush.msra.mxu1 %v6442_v17 }
 0xa8d   :  { %14866 = vst [vmem:[#allocation67_spill] sm:$0xff] %v12535_v13  ;;  %v7431_v41 = vpop.f32.mrf.mxu1  ;;  %v7640_v48 = vpop.f32.mrf.mxu2  ;;  %v14870_v13 = vld [vmem:[#allocation95_spill] sm:$0xff] }
 0xa8e   :  { %v7432_v6 = vadd.f32 %v7431_v41, %v7223_v33  ;;  %v7226_v63 = vadd.f32 %v14871_v49, %v14870_v13  ;;  %v5411_v33 = vld [vmem:[#allocation2 + $0x308] sm:$0xff]  ;;  %v14874_v13 = vld [vmem:[#allocation184_spill] sm:$0xff] }
 0xa8f   :  { %7896 = vmatmul.f32.gmra.mxu3 %v5410_v30  ;;  %v5155_v30 = vld [vmem:[#allocation2 + $0x2f1] sm:$0xff] }
 0xa90   :  { %7478 = vmatmul.f32.gmra.mxu1 %v5154_v20  ;;  %v7641_v32 = vadd.f32 %v7640_v48, %v7432_v6 }
 0xa91   :  { %v12542_v1 = vpop.f32.mrf.mxu0 }
 0xa92   :  { %14869 = vst [vmem:[#allocation182_spill] sm:$0xff] %v12542_v1  ;;  %v7849_v29 = vpop.f32.mrf.mxu3  ;;  %7690 = vmatmul.f32.gmra.mxu2 %v12546_v61 }
 0xa93   :  { %v7850_v4 = vadd.f32 %v7849_v29, %v7641_v32  ;;  %v14873_v29 = vld [vmem:[#allocation99_spill] sm:$0xff] }
 0xa94   :  { %8099 = vmatmul.f32.gmra.mxu0 %v5154_v20  ;;  %v7229_v49 = vadd.f32 %v14874_v13, %v14873_v29  ;;  %v12560_v29 = vld [vmem:[#allocation2 + $0x30a] sm:$0xff] }
 0xa95   :  { %v7434_v2 = vpop.f32.mrf.mxu1  ;;  %v7643_v6 = vpop.f32.mrf.mxu2 }
 0xa96   :  { %v7435_v41 = vadd.f32 %v7434_v2, %v7226_v63  ;;  %v5412_v63 = vld [vmem:[#allocation2 + $0x318] sm:$0xff] }
 0xa97   :  { %7899 = vmatmul.f32.gmra.mxu3 %v5411_v33 }
 0xa98   :  { %7481 = vmatmul.f32.gmra.mxu1 %v5155_v30  ;;  %v7644_v20 = vadd.f32 %v7643_v6, %v7435_v41 }
 0xa99   :  { %v12549_v1 = vpop.f32.mrf.mxu0 }
 0xa9a   :  { %14872 = vst [vmem:[#allocation73_spill] sm:$0xff] %v12549_v1  ;;  %v7852_v48 = vpop.f32.mrf.mxu3  ;;  %7693 = vmatmul.f32.gmra.mxu2 %v12553_v37 }
 0xa9b   :  { %v7853_v32 = vadd.f32 %v7852_v48, %v7644_v20  ;;  %v14875_v20 = vld [vmem:[#allocation105_spill] sm:$0xff] }
 0xa9c   :  { %8102 = vmatmul.f32.gmra.mxu0 %v5155_v30  ;;  %v7232_v48 = vadd.f32 %v12212_v11, %v14875_v20 }
 0xa9d   :  { %v7437_v17 = vpop.f32.mrf.mxu1  ;;  %v7646_v1 = vpop.f32.mrf.mxu2 }
 0xa9e   :  { %v7438_v2 = vadd.f32 %v7437_v17, %v7229_v49  ;;  %v5413_v17 = vld [vmem:[#allocation2 + $0x320] sm:$0xff] }
 0xa9f   :  { %7902 = vmatmul.f32.gmra.mxu3 %v5412_v63  ;;  %v5157_v63 = vld [vmem:[#allocation2 + $0x309] sm:$0xff] }
 0xaa0   :  { %7484 = vmatmul.f32.gmra.mxu1 %v5156_v8  ;;  %v7647_v41 = vadd.f32 %v7646_v1, %v7438_v2 }
 0xaa1   :  { %v8058_v33 = vpop.f32.mrf.mxu0 }
 0xaa2   :  { %v12556_v25 = vadd.f32 %v8058_v33, %v7850_v4  ;;  %v7855_v30 = vpop.f32.mrf.mxu3  ;;  %7696 = vmatmul.f32.gmra.mxu2 %v12560_v29 }
 0xaa3   :  { %v7856_v6 = vadd.f32 %v7855_v30, %v7647_v41  ;;  %v14876_v41 = vld [vmem:[#allocation183_spill] sm:$0xff]  ;;  %v12567_v30 = vld [vmem:[#allocation2 + $0x31a] sm:$0xff] }
 0xaa4   :  { %8105 = vmatmul.f32.gmra.mxu0 %v5156_v8  ;;  %v7235_v11 = vadd.f32 %v12216_v59, %v14876_v41  ;;  %v14878_v59 = vld [vmem:[#allocation187_spill] sm:$0xff] }
 0xaa5   :  { %v7440_v13 = vpop.f32.mrf.mxu1  ;;  %v7649_v4 = vpop.f32.mrf.mxu2  ;;  %v12574_v41 = vld [vmem:[#allocation2 + $0x322] sm:$0xff] }
 0xaa6   :  { %v7441_v49 = vadd.f32 %v7440_v13, %v7232_v48  ;;  %v5414_v13 = vld [vmem:[#allocation2 + $0x330] sm:$0xff] }
 0xaa7   :  { %7905 = vmatmul.f32.gmra.mxu3 %v5413_v17  ;;  %v5158_v17 = vld [vmem:[#allocation2 + $0x319] sm:$0xff] }
 0xaa8   :  { %7487 = vmatmul.f32.gmra.mxu1 %v5157_v63  ;;  %v7650_v1 = vadd.f32 %v7649_v4, %v7441_v49 }
 0xaa9   :  { %v8061_v58 = vpop.f32.mrf.mxu0 }
 0xaaa   :  { %v12563_v33 = vadd.f32 %v8061_v58, %v7853_v32  ;;  %v7858_v8 = vpop.f32.mrf.mxu3  ;;  %7699 = vmatmul.f32.gmra.mxu2 %v12567_v30 }
 0xaab   :  { %v7859_v2 = vadd.f32 %v7858_v8, %v7650_v1  ;;  %v14877_v1 = vld [vmem:[#allocation185_spill] sm:$0xff] }
 0xaac   :  { %8108 = vmatmul.f32.gmra.mxu0 %v5157_v63  ;;  %v7238_v8 = vadd.f32 %v14878_v59, %v14877_v1  ;;  %v12581_v1 = vld [vmem:[#allocation2 + $0x332] sm:$0xff]  ;;  %v5416_v59 = vld [vmem:[#allocation2 + $0x348] sm:$0xff] }
 0xaad   :  { %v7443_v20 = vpop.f32.mrf.mxu1  ;;  %v7652_v58 = vpop.f32.mrf.mxu2 }
 0xaae   :  { %v7444_v48 = vadd.f32 %v7443_v20, %v7235_v11  ;;  %v5415_v20 = vld [vmem:[#allocation2 + $0x338] sm:$0xff] }
 0xaaf   :  { %7908 = vmatmul.f32.gmra.mxu3 %v5414_v13  ;;  %v5159_v13 = vld [vmem:[#allocation2 + $0x321] sm:$0xff] }
 0xab0   :  { %7490 = vmatmul.f32.gmra.mxu1 %v5158_v17  ;;  %v7653_v49 = vadd.f32 %v7652_v58, %v7444_v48 }
 0xab1   :  { %v8064_v42 = vpop.f32.mrf.mxu0 }
 0xab2   :  { %v12570_v32 = vadd.f32 %v8064_v42, %v7856_v6  ;;  %v7861_v63 = vpop.f32.mrf.mxu3  ;;  %7702 = vmatmul.f32.gmra.mxu2 %v12574_v41 }
 0xab3   :  { %v7862_v4 = vadd.f32 %v7861_v63, %v7653_v49  ;;  %v14879_v49 = vld [vmem:[#allocation186_spill] sm:$0xff] }
 0xab4   :  { %8111 = vmatmul.f32.gmra.mxu0 %v5158_v17  ;;  %v7241_v63 = vadd.f32 %v12224_v36, %v14879_v49  ;;  %v14881_v36 = vld [vmem:[#allocation108_spill] sm:$0xff]  ;;  %v12588_v49 = vld [vmem:[#allocation2 + $0x33a] sm:$0xff] }
 0xab5   :  { %v7446_v22 = vpop.f32.mrf.mxu1  ;;  %v7655_v42 = vpop.f32.mrf.mxu2 }
 0xab6   :  { %v7447_v11 = vadd.f32 %v7446_v22, %v7238_v8  ;;  %v5160_v8 = vld [vmem:[#allocation2 + $0x331] sm:$0xff] }
 0xab7   :  { %7911 = vmatmul.f32.gmra.mxu3 %v5415_v20 }
 0xab8   :  { %7493 = vmatmul.f32.gmra.mxu1 %v5159_v13  ;;  %v7656_v48 = vadd.f32 %v7655_v42, %v7447_v11 }
 0xab9   :  { %v8067_v7 = vpop.f32.mrf.mxu0 }
 0xaba   :  { %v12577_v6 = vadd.f32 %v8067_v7, %v7859_v2  ;;  %v7864_v17 = vpop.f32.mrf.mxu3  ;;  %7705 = vmatmul.f32.gmra.mxu2 %v12581_v1 }
 0xabb   :  { %v7865_v58 = vadd.f32 %v7864_v17, %v7656_v48  ;;  %v14880_v48 = vld [vmem:[#allocation188_spill] sm:$0xff] }
 0xabc   :  { %8114 = vmatmul.f32.gmra.mxu0 %v5159_v13  ;;  %v7244_v17 = vadd.f32 %v14881_v36, %v14880_v48 }
 0xabd   :  { %v7449_v15 = vpop.f32.mrf.mxu1  ;;  %v7658_v7 = vpop.f32.mrf.mxu2 }
 0xabe   :  { %v7450_v22 = vadd.f32 %v7449_v15, %v7241_v63  ;;  %v5161_v63 = vld [vmem:[#allocation2 + $0x339] sm:$0xff] }
 0xabf   :  { %7914 = vmatmul.f32.gmra.mxu3 %v5416_v59 }
 0xac0   :  { %7496 = vmatmul.f32.gmra.mxu1 %v5160_v8  ;;  %v7659_v11 = vadd.f32 %v7658_v7, %v7450_v22 }
 0xac1   :  { %v8070_v20 = vpop.f32.mrf.mxu0 }
 0xac2   :  { %v12584_v2 = vadd.f32 %v8070_v20, %v7862_v4  ;;  %v7867_v13 = vpop.f32.mrf.mxu3  ;;  %7708 = vmatmul.f32.gmra.mxu2 %v12588_v49 }
 0xac3   :  { %v7868_v42 = vadd.f32 %v7867_v13, %v7659_v11  ;;  %v14882_v11 = vld [vmem:[#allocation189_spill] sm:$0xff]  ;;  %v14883_v13 = vld [vmem:[#allocation114_spill] sm:$0xff] }
 0xac4   :  { %8117 = vmatmul.f32.gmra.mxu0 %v5160_v8  ;;  %v7247_v48 = vadd.f32 %v14883_v13, %v14882_v11  ;;  %v5545_v13 = vld [vmem:[#allocation2 + $0x351] sm:$0xff] }
 0xac5   :  { %v7452_v0 = vpop.f32.mrf.mxu1  ;;  %v7661_v4 = vpop.f32.mrf.mxu2 }
 0xac6   :  { %v7453_v15 = vadd.f32 %v7452_v0, %v7244_v17  ;;  %v5544_v0 = vld [vmem:[#allocation2 + $0x349] sm:$0xff] }
 0xac7   :  { %7917 = vmatmul.f32.gmra.mxu3 %v12380_v14 }
 0xac8   :  { %7499 = vmatmul.f32.gmra.mxu1 %v5161_v63  ;;  %v7662_v22 = vadd.f32 %v7661_v4, %v7453_v15  ;;  %v14884_v15 = vld [vmem:[#allocation111_spill] sm:$0xff] }
 0xac9   :  { %v8073_v59 = vpop.f32.mrf.mxu0 }
 0xaca   :  { %v12592_v20 = vadd.f32 %v8073_v59, %v7865_v58  ;;  %v7870_v8 = vpop.f32.mrf.mxu3  ;;  %v14885_v59 = vld [vmem:[#allocation120_spill] sm:$0xff] }
 0xacb   :  { %v7871_v7 = vadd.f32 %v7870_v8, %v7662_v22  ;;  %v5611_v8 = vld [vmem:[#allocation2 + $0x3a] sm:$0xff] }
 0xacc   :  { %8120 = vmatmul.f32.gmra.mxu0 %v5161_v63  ;;  %v7250_v63 = vadd.f32 %v14885_v59, %v14884_v15 }
 0xacd   :  { %v7455_v36 = vpop.f32.mrf.mxu1  ;;  %v7664_v17 = vpop.f32.mrf.mxu2 }
 0xace   :  { %v7456_v47 = vadd.f32 %v7455_v36, %v7247_v48 }
 0xad0   :  { %8146 = vmatmul.f32.vlgmr.msra.gmra.mxu1 %v5610_v50  ;;  %v7665_v57 = vadd.f32 %v7664_v17, %v7456_v47  ;;  %v14886_v47 = vld [vmem:[#allocation117_spill] sm:$0xff]  ;;  %v5612_v17 = vld [vmem:[#allocation2 + $0x4a] sm:$0xff] }
 0xad1   :  { %v8076_v51 = vpop.f32.mrf.mxu0 }
 0xad2   :  { %v12596_v14 = vadd.f32 %v8076_v51, %v7868_v42  ;;  %v7873_v9 = vpop.f32.mrf.mxu3  ;;  %v14887_v42 = vld [vmem:[#allocation123_spill] sm:$0xff] }
 0xad3   :  { %v7874_v58 = vadd.f32 %v7873_v9, %v7665_v57 }
 0xad4   :  { %8123 = vmatmul.f32.gmra.mxu0 %v5544_v0  ;;  %v7253_v0 = vadd.f32 %v14887_v42, %v14886_v47 }
 0xad5   :  { %v7458_v4 = vpop.f32.mrf.mxu1  ;;  %v7667_v48 = vpop.f32.mrf.mxu2 }
 0xad6   :  { %v7459_v22 = vadd.f32 %v7458_v4, %v7250_v63 }
 0xad8   :  { %8149 = vmatmul.f32.gmra.mxu1 %v5611_v8  ;;  %v7668_v50 = vadd.f32 %v7667_v48, %v7459_v22 }
 0xad9   :  { %v8079_v11 = vpop.f32.mrf.mxu0 }
 0xada   :  { %v12600_v36 = vadd.f32 %v8079_v11, %v7871_v7  ;;  %v7876_v23 = vpop.f32.mrf.mxu3  ;;  %v14889_v7 = vld [vmem:[#allocation190_spill] sm:$0xff]  ;;  %v14890_v11 = vld [vmem:[#allocation128_spill] sm:$0xff] }
 0xadb   :  { %v7877_v51 = vadd.f32 %v7876_v23, %v7668_v50  ;;  %v7256_v22 = vadd.f32 %v14890_v11, %v14889_v7  ;;  %v5613_v23 = vld [vmem:[#allocation2 + $0x52] sm:$0xff] }
 0xadc   :  { %8126 = vmatmul.f32.gmra.mxu0 %v5545_v13 }
 0xadd   :  { %v7461_v57 = vpop.f32.mrf.mxu1  ;;  %v7670_v59 = vpop.f32.mrf.mxu2 }
 0xade   :  { %v7462_v9 = vadd.f32 %v7461_v57, %v7253_v0 }
 0xae0   :  { %8152 = vmatmul.f32.gmra.mxu1 %v5612_v17  ;;  %v7671_v4 = vadd.f32 %v7670_v59, %v7462_v9 }
 0xae1   :  { %v8082_v15 = vpop.f32.mrf.mxu0 }
 0xae2   :  { %v12604_v63 = vadd.f32 %v8082_v15, %v7874_v58  ;;  %v7879_v8 = vpop.f32.mrf.mxu3  ;;  %v14893_v58 = vld [vmem:[#allocation132_spill] sm:$0xff] }
 0xae3   :  { %v7880_v21 = vadd.f32 %v7879_v8, %v7671_v4  ;;  %v7259_v15 = vadd.f32 %v14893_v58, %v14892_v26  ;;  %v5614_v4 = vld [vmem:[#allocation2 + $0x62] sm:$0xff]  ;;  %v5616_v26 = vld [vmem:[#allocation2 + $0x7a] sm:$0xff] }
 0xae4   :  { %14888 = vst [vmem:[#allocation70_spill] sm:$0xff] %v12604_v63 }
 0xae5   :  { %v7464_v48 = vpop.f32.mrf.mxu1  ;;  %v7673_v47 = vpop.f32.mrf.mxu2 }
 0xae6   :  { %v7465_v13 = vadd.f32 %v7464_v48, %v7256_v22 }
 0xae8   :  { %8155 = vmatmul.f32.gmra.mxu1 %v5613_v23  ;;  %v7674_v0 = vadd.f32 %v7673_v47, %v7465_v13 }
 0xae9   :  { %v8085_v50 = vpop.f32.mrf.mxu0 }
 0xaea   :  { %v12608_v42 = vadd.f32 %v8085_v50, %v7877_v51  ;;  %v7882_v57 = vpop.f32.mrf.mxu3  ;;  %v5615_v51 = vld [vmem:[#allocation2 + $0x6a] sm:$0xff] }
 0xaeb   :  { %v7883_v17 = vadd.f32 %v7882_v57, %v7674_v0 }
 0xaec   :  { %14891 = vst [vmem:[#allocation79_spill] sm:$0xff] %v12608_v42  ;;  %v5641_v42 = vld [vmem:[#allocation2 + $0x1a2] sm:$0xff] }
 0xaed   :  { %v7467_v9 = vpop.f32.mrf.mxu1  ;;  %v7676_v7 = vpop.f32.mrf.mxu2 }
 0xaee   :  { %v7468_v59 = vadd.f32 %v7467_v9, %v7259_v15  ;;  %v5618_v9 = vld [vmem:[#allocation2 + $0x92] sm:$0xff] }
 0xaf0   :  { %8158 = vmatmul.f32.gmra.mxu1 %v5614_v4  ;;  %v7677_v22 = vadd.f32 %v7676_v7, %v7468_v59  ;;  %v5619_v4 = vld [vmem:[#allocation2 + $0x9a] sm:$0xff] }
 0xaf1   :  { %v8088_v8 = vpop.f32.mrf.mxu0 }
 0xaf2   :  { %v12612_v11 = vadd.f32 %v8088_v8, %v7880_v21  ;;  %v7885_v48 = vpop.f32.mrf.mxu3  ;;  %v5617_v21 = vld [vmem:[#allocation2 + $0x82] sm:$0xff]  ;;  %v5620_v8 = vld [vmem:[#allocation2 + $0xaa] sm:$0xff] }
 0xaf3   :  { %v7886_v23 = vadd.f32 %v7885_v48, %v7677_v22  ;;  %v5621_v22 = vld [vmem:[#allocation2 + $0xb2] sm:$0xff] }
 0xaf4   :  { %14894 = vst [vmem:[#allocation76_spill] sm:$0xff] %v12612_v11  ;;  %v5640_v11 = vld [vmem:[#allocation2 + $0x19a] sm:$0xff] }
 0xaf5   :  { %v12614_v63 = vpop.f32.mrf.mxu1 }
 0xaf6   :  { %14895 = vst [vmem:[#allocation85_spill] sm:$0xff] %v12614_v63  ;;  %v5637_v63 = vld [vmem:[#allocation2 + $0x172] sm:$0xff] }
 0xaf8   :  { %8161 = vmatmul.f32.gmra.mxu1 %v5615_v51 }
 0xaf9   :  { %v8091_v13 = vpop.f32.mrf.mxu0 }
 0xafa   :  { %v12616_v50 = vadd.f32 %v8091_v13, %v7883_v17  ;;  %v5623_v13 = vld [vmem:[#allocation2 + $0xca] sm:$0xff] }
 0xafc   :  { %14896 = vst [vmem:[#allocation82_spill] sm:$0xff] %v12616_v50  ;;  %v5639_v50 = vld [vmem:[#allocation2 + $0x18a] sm:$0xff] }
 0xafd   :  { %v12618_v47 = vpop.f32.mrf.mxu1 }
 0xafe   :  { %14897 = vst [vmem:[#allocation87_spill] sm:$0xff] %v12618_v47  ;;  %v5636_v47 = vld [vmem:[#allocation2 + $0x16a] sm:$0xff] }
 0xb00   :  { %8164 = vmatmul.f32.gmra.mxu1 %v5616_v26 }
 0xb01   :  { %v8094_v0 = vpop.f32.mrf.mxu0 }
 0xb02   :  { %v12620_v57 = vadd.f32 %v8094_v0, %v7886_v23  ;;  %v5622_v23 = vld [vmem:[#allocation2 + $0xc2] sm:$0xff]  ;;  %v5624_v0 = vld [vmem:[#allocation2 + $0xda] sm:$0xff] }
 0xb04   :  { %14898 = vst [vmem:[#allocation86_spill] sm:$0xff] %v12620_v57  ;;  %v5638_v57 = vld [vmem:[#allocation2 + $0x182] sm:$0xff] }
 0xb05   :  { %v12622_v58 = vpop.f32.mrf.mxu1 }
 0xb06   :  { %14899 = vst [vmem:[#allocation92_spill] sm:$0xff] %v12622_v58  ;;  %v5635_v58 = vld [vmem:[#allocation2 + $0x15a] sm:$0xff] }
 0xb08   :  { %8167 = vmatmul.f32.gmra.mxu1 %v5617_v21 }
 0xb0d   :  { %v12624_v15 = vpop.f32.mrf.mxu1 }
 0xb0e   :  { %14900 = vst [vmem:[#allocation88_spill] sm:$0xff] %v12624_v15  ;;  %v5634_v15 = vld [vmem:[#allocation2 + $0x152] sm:$0xff] }
 0xb10   :  { %8170 = vmatmul.f32.gmra.mxu1 %v5618_v9  ;;  %v5625_v9 = vld [vmem:[#allocation2 + $0xe2] sm:$0xff] }
 0xb15   :  { %v12626_v59 = vpop.f32.mrf.mxu1 }
 0xb16   :  { %14901 = vst [vmem:[#allocation89_spill] sm:$0xff] %v12626_v59  ;;  %v5633_v59 = vld [vmem:[#allocation2 + $0x142] sm:$0xff] }
 0xb18   :  { %8173 = vmatmul.f32.gmra.mxu1 %v5619_v4 }
 0xb1d   :  { %v12628_v17 = vpop.f32.mrf.mxu1 }
 0xb1e   :  { %14902 = vst [vmem:[#allocation109_spill] sm:$0xff] %v12628_v17  ;;  %v5632_v17 = vld [vmem:[#allocation2 + $0x13a] sm:$0xff] }
 0xb20   :  { %8176 = vmatmul.f32.gmra.mxu1 %v5620_v8  ;;  %v5626_v8 = vld [vmem:[#allocation2 + $0xf2] sm:$0xff] }
 0xb25   :  { %v12630_v7 = vpop.f32.mrf.mxu1 }
 0xb26   :  { %14903 = vst [vmem:[#allocation93_spill] sm:$0xff] %v12630_v7  ;;  %v5631_v7 = vld [vmem:[#allocation2 + $0x12a] sm:$0xff] }
 0xb28   :  { %8179 = vmatmul.f32.gmra.mxu1 %v5621_v22 }
 0xb2d   :  { %v12632_v48 = vpop.f32.mrf.mxu1 }
 0xb2e   :  { %14904 = vst [vmem:[#allocation91_spill] sm:$0xff] %v12632_v48  ;;  %v5627_v48 = vld [vmem:[#allocation2 + $0xfa] sm:$0xff] }
 0xb30   :  { %8182 = vmatmul.f32.gmra.mxu1 %v5622_v23 }
 0xb35   :  { %v12634_v51 = vpop.f32.mrf.mxu1 }
 0xb36   :  { %14905 = vst [vmem:[#allocation97_spill] sm:$0xff] %v12634_v51  ;;  %v5628_v51 = vld [vmem:[#allocation2 + $0x10a] sm:$0xff] }
 0xb38   :  { %8185 = vmatmul.f32.gmra.mxu1 %v5623_v13 }
 0xb3d   :  { %v12636_v26 = vpop.f32.mrf.mxu1 }
 0xb3e   :  { %14906 = vst [vmem:[#allocation95_spill] sm:$0xff] %v12636_v26  ;;  %v5629_v26 = vld [vmem:[#allocation2 + $0x112] sm:$0xff] }
 0xb40   :  { %8188 = vmatmul.f32.gmra.mxu1 %v5624_v0 }
 0xb45   :  { %v12638_v21 = vpop.f32.mrf.mxu1 }
 0xb46   :  { %14907 = vst [vmem:[#allocation102_spill] sm:$0xff] %v12638_v21  ;;  %v5630_v21 = vld [vmem:[#allocation2 + $0x122] sm:$0xff] }
 0xb48   :  { %8191 = vmatmul.f32.gmra.mxu1 %v5625_v9 }
 0xb4d   :  { %v12640_v4 = vpop.f32.mrf.mxu1 }
 0xb50   :  { %8194 = vmatmul.f32.gmra.mxu1 %v5626_v8 }
 0xb55   :  { %v12642_v22 = vpop.f32.mrf.mxu1 }
 0xb58   :  { %8197 = vmatmul.f32.gmra.mxu1 %v5627_v48 }
 0xb5d   :  { %v12644_v23 = vpop.f32.mrf.mxu1 }
 0xb60   :  { %8200 = vmatmul.f32.gmra.mxu1 %v5628_v51 }
 0xb65   :  { %v12646_v13 = vpop.f32.mrf.mxu1 }
 0xb68   :  { %8203 = vmatmul.f32.gmra.mxu1 %v5629_v26 }
 0xb6d   :  { %v12648_v0 = vpop.f32.mrf.mxu1 }
 0xb70   :  { %8206 = vmatmul.f32.gmra.mxu1 %v5630_v21 }
 0xb75   :  { %v12650_v9 = vpop.f32.mrf.mxu1 }
 0xb78   :  { %8209 = vmatmul.f32.gmra.mxu1 %v5631_v7 }
 0xb7d   :  { %v12652_v8 = vpop.f32.mrf.mxu1 }
 0xb80   :  { %8212 = vmatmul.f32.gmra.mxu1 %v5632_v17 }
 0xb85   :  { %v12654_v48 = vpop.f32.mrf.mxu1 }
 0xb88   :  { %8215 = vmatmul.f32.gmra.mxu1 %v5633_v59 }
 0xb8d   :  { %v12656_v51 = vpop.f32.mrf.mxu1 }
 0xb90   :  { %8218 = vmatmul.f32.gmra.mxu1 %v5634_v15 }
 0xb95   :  { %v12658_v26 = vpop.f32.mrf.mxu1 }
 0xb98   :  { %8221 = vmatmul.f32.gmra.mxu1 %v5635_v58 }
 0xb9d   :  { %v12660_v21 = vpop.f32.mrf.mxu1 }
 0xba0   :  { %8224 = vmatmul.f32.gmra.mxu1 %v5636_v47 }
 0xba5   :  { %v12662_v7 = vpop.f32.mrf.mxu1 }
 0xba6   :  { %14908 = vst [vmem:[#allocation99_spill] sm:$0xff] %v12662_v7  ;;  %v5642_v7 = vld [vmem:[#allocation2 + $0x1e2] sm:$0xff] }
 0xba8   :  { %8227 = vmatmul.f32.gmra.mxu1 %v5637_v63 }
 0xbad   :  { %v12664_v17 = vpop.f32.mrf.mxu1 }
 0xbae   :  { %14909 = vst [vmem:[#allocation184_spill] sm:$0xff] %v12664_v17  ;;  %v5643_v17 = vld [vmem:[#allocation2 + $0x1ea] sm:$0xff] }
 0xbb0   :  { %8230 = vmatmul.f32.gmra.mxu1 %v5638_v57 }
 0xbb5   :  { %v12666_v59 = vpop.f32.mrf.mxu1 }
 0xbb6   :  { %14910 = vst [vmem:[#allocation105_spill] sm:$0xff] %v12666_v59  ;;  %v5644_v59 = vld [vmem:[#allocation2 + $0x1fa] sm:$0xff] }
 0xbb8   :  { %8233 = vmatmul.f32.gmra.mxu1 %v5639_v50 }
 0xbbd   :  { %v12668_v15 = vpop.f32.mrf.mxu1 }
 0xbbe   :  { %14911 = vst [vmem:[#allocation183_spill] sm:$0xff] %v12668_v15  ;;  %v5645_v15 = vld [vmem:[#allocation2 + $0x202] sm:$0xff] }
 0xbc0   :  { %8236 = vmatmul.f32.gmra.mxu1 %v5640_v11 }
 0xbc5   :  { %v12670_v58 = vpop.f32.mrf.mxu1 }
 0xbc6   :  { %14912 = vst [vmem:[#allocation185_spill] sm:$0xff] %v12670_v58  ;;  %v5646_v58 = vld [vmem:[#allocation2 + $0x212] sm:$0xff] }
 0xbc8   :  { %8239 = vmatmul.f32.gmra.mxu1 %v5641_v42 }
 0xbcd   :  { %v12672_v47 = vpop.f32.mrf.mxu1 }
 0xbce   :  { %14913 = vst [vmem:[#allocation187_spill] sm:$0xff] %v12672_v47  ;;  %v5647_v47 = vld [vmem:[#allocation2 + $0x21a] sm:$0xff] }
 0xbd0   :  { %8242 = vmatmul.f32.gmra.mxu1 %v5642_v7 }
 0xbd5   :  { %v12674_v63 = vpop.f32.mrf.mxu1 }
 0xbd6   :  { %14914 = vst [vmem:[#allocation186_spill] sm:$0xff] %v12674_v63  ;;  %v5648_v63 = vld [vmem:[#allocation2 + $0x22a] sm:$0xff] }
 0xbd8   :  { %8245 = vmatmul.f32.gmra.mxu1 %v5643_v17 }
 0xbdd   :  { %v12676_v57 = vpop.f32.mrf.mxu1 }
 0xbde   :  { %14915 = vst [vmem:[#allocation188_spill] sm:$0xff] %v12676_v57  ;;  %v5649_v57 = vld [vmem:[#allocation2 + $0x232] sm:$0xff] }
 0xbe0   :  { %8248 = vmatmul.f32.gmra.mxu1 %v5644_v59 }
 0xbe5   :  { %v12678_v50 = vpop.f32.mrf.mxu1 }
 0xbe6   :  { %14916 = vst [vmem:[#allocation108_spill] sm:$0xff] %v12678_v50  ;;  %v5650_v50 = vld [vmem:[#allocation2 + $0x242] sm:$0xff] }
 0xbe8   :  { %8251 = vmatmul.f32.gmra.mxu1 %v5645_v15 }
 0xbed   :  { %v12680_v11 = vpop.f32.mrf.mxu1 }
 0xbee   :  { %14917 = vst [vmem:[#allocation189_spill] sm:$0xff] %v12680_v11  ;;  %v5651_v11 = vld [vmem:[#allocation2 + $0x24a] sm:$0xff] }
 0xbf0   :  { %8254 = vmatmul.f32.gmra.mxu1 %v5646_v58 }
 0xbf5   :  { %v12682_v42 = vpop.f32.mrf.mxu1 }
 0xbf6   :  { %14918 = vst [vmem:[#allocation114_spill] sm:$0xff] %v12682_v42  ;;  %v5652_v42 = vld [vmem:[#allocation2 + $0x25a] sm:$0xff] }
 0xbf8   :  { %8257 = vmatmul.f32.gmra.mxu1 %v5647_v47 }
 0xbfd   :  { %v12684_v7 = vpop.f32.mrf.mxu1 }
 0xbfe   :  { %14919 = vst [vmem:[#allocation111_spill] sm:$0xff] %v12684_v7  ;;  %v5653_v7 = vld [vmem:[#allocation2 + $0x262] sm:$0xff] }
 0xc00   :  { %8260 = vmatmul.f32.gmra.mxu1 %v5648_v63 }
 0xc05   :  { %v12686_v17 = vpop.f32.mrf.mxu1 }
 0xc06   :  { %14920 = vst [vmem:[#allocation120_spill] sm:$0xff] %v12686_v17  ;;  %v5654_v17 = vld [vmem:[#allocation2 + $0x272] sm:$0xff] }
 0xc08   :  { %8263 = vmatmul.f32.gmra.mxu1 %v5649_v57 }
 0xc0d   :  { %v12688_v59 = vpop.f32.mrf.mxu1 }
 0xc0e   :  { %14921 = vst [vmem:[#allocation117_spill] sm:$0xff] %v12688_v59  ;;  %v5655_v59 = vld [vmem:[#allocation2 + $0x27a] sm:$0xff] }
 0xc10   :  { %8266 = vmatmul.f32.gmra.mxu1 %v5650_v50 }
 0xc15   :  { %v12690_v15 = vpop.f32.mrf.mxu1 }
 0xc16   :  { %14922 = vst [vmem:[#allocation123_spill] sm:$0xff] %v12690_v15  ;;  %v5656_v15 = vld [vmem:[#allocation2 + $0x28a] sm:$0xff] }
 0xc18   :  { %8269 = vmatmul.f32.gmra.mxu1 %v5651_v11 }
 0xc1d   :  { %v12692_v58 = vpop.f32.mrf.mxu1 }
 0xc1e   :  { %14923 = vst [vmem:[#allocation190_spill] sm:$0xff] %v12692_v58  ;;  %v5657_v58 = vld [vmem:[#allocation2 + $0x292] sm:$0xff] }
 0xc20   :  { %8272 = vmatmul.f32.gmra.mxu1 %v5652_v42 }
 0xc25   :  { %v12694_v47 = vpop.f32.mrf.mxu1 }
 0xc26   :  { %14924 = vst [vmem:[#allocation128_spill] sm:$0xff] %v12694_v47  ;;  %v5658_v47 = vld [vmem:[#allocation2 + $0x2a2] sm:$0xff] }
 0xc28   :  { %8275 = vmatmul.f32.gmra.mxu1 %v5653_v7 }
 0xc2d   :  { %v12696_v63 = vpop.f32.mrf.mxu1 }
 0xc2e   :  { %14925 = vst [vmem:[#allocation126_spill] sm:$0xff] %v12696_v63  ;;  %v5659_v63 = vld [vmem:[#allocation2 + $0x2aa] sm:$0xff] }
 0xc30   :  { %8278 = vmatmul.f32.gmra.mxu1 %v5654_v17 }
 0xc35   :  { %v12698_v57 = vpop.f32.mrf.mxu1 }
 0xc36   :  { %14926 = vst [vmem:[#allocation132_spill] sm:$0xff] %v12698_v57  ;;  %v5660_v57 = vld [vmem:[#allocation2 + $0x2ba] sm:$0xff] }
 0xc38   :  { %8281 = vmatmul.f32.gmra.mxu1 %v5655_v59 }
 0xc3d   :  { %v12700_v50 = vpop.f32.mrf.mxu1 }
 0xc3e   :  { %14927 = vst [vmem:[#allocation191_spill] sm:$0xff] %v12700_v50  ;;  %v5661_v50 = vld [vmem:[#allocation2 + $0x2c2] sm:$0xff] }
 0xc40   :  { %8284 = vmatmul.f32.gmra.mxu1 %v5656_v15 }
 0xc45   :  { %v12702_v11 = vpop.f32.mrf.mxu1 }
 0xc48   :  { %8287 = vmatmul.f32.gmra.mxu1 %v5657_v58 }
 0xc4d   :  { %v12704_v42 = vpop.f32.mrf.mxu1 }
 0xc50   :  { %8290 = vmatmul.f32.gmra.mxu1 %v5658_v47 }
 0xc55   :  { %v12706_v7 = vpop.f32.mrf.mxu1 }
 0xc58   :  { %8293 = vmatmul.f32.gmra.mxu1 %v5659_v63 }
 0xc5d   :  { %v12708_v17 = vpop.f32.mrf.mxu1 }
 0xc60   :  { %8296 = vmatmul.f32.gmra.mxu1 %v5660_v57 }
 0xc65   :  { %v12710_v59 = vpop.f32.mrf.mxu1 }
 0xc66   :  { %14928 = vst [vmem:[#allocation192_spill] sm:$0xff] %v12710_v59 }
 0xc68   :  { %8299 = vmatmul.f32.gmra.mxu1 %v5661_v50 }
 0xc6d   :  { %v12712_v15 = vpop.f32.mrf.mxu1 }
 0xc70   :  { %8302 = vmatmul.f32.gmra.mxu1 %v12521_v34 }
 0xc75   :  { %v12715_v58 = vpop.f32.mrf.mxu1 }
 0xc78   :  { %8305 = vmatmul.f32.gmra.mxu1 %v12530_v10 }
 0xc7d   :  { %v12718_v47 = vpop.f32.mrf.mxu1 }
 0xc7e   :  { %14929 = vst [vmem:[#allocation193_spill] sm:$0xff] %v12718_v47 }
 0xc80   :  { %8308 = vmatmul.f32.gmra.mxu1 %v12539_v24 }
 0xc85   :  { %v12721_v63 = vpop.f32.mrf.mxu1 }
 0xc88   :  { %8311 = vmatmul.f32.gmra.mxu1 %v12546_v61 }
 0xc8d   :  { %v8267_v57 = vpop.f32.mrf.mxu1 }
 0xc8e   :  { %v12725_v59 = vadd.f32 %v8267_v57, %v12556_v25  ;;  %v14939_v57 = vld [vmem:[#allocation157_spill] sm:$0xff] }
 0xc90   :  { %14930 = vst [vmem:[#allocation194_spill] sm:$0xff] %v12725_v59  ;;  %8314 = vmatmul.f32.gmra.mxu1 %v12553_v37 }
 0xc95   :  { %v8270_v50 = vpop.f32.mrf.mxu1 }
 0xc96   :  { %v12729_v34 = vadd.f32 %v8270_v50, %v12563_v33  ;;  %v14940_v50 = vld [vmem:[#allocation99_spill] sm:$0xff] }
 0xc98   :  { %14931 = vst [vmem:[#allocation195_spill] sm:$0xff] %v12729_v34  ;;  %8317 = vmatmul.f32.gmra.mxu1 %v12560_v29  ;;  %v7942_v29 = vadd.f32 %v12308_v52, %v12298_v18  ;;  %v7954_v52 = vadd.f32 %v12332_v43, %v12322_v12  ;;  %v7960_v12 = vadd.f32 %v12344_v3, %v12334_v56 }
 0xc9d   :  { %v8273_v10 = vpop.f32.mrf.mxu1 }
 0xc9e   :  { %v12733_v47 = vadd.f32 %v8273_v10, %v12570_v32  ;;  %v7939_v32 = vadd.f32 %v12302_v38, %v12292_v40  ;;  %v7951_v40 = vadd.f32 %v12326_v53, %v12316_v39  ;;  %v12782_v53 = vadd.f32 %v12650_v9, %v7954_v52  ;;  %v14941_v10 = vld [vmem:[#allocation98_spill] sm:$0xff] }
 0xc9f   :  { %v7969_v9 = vadd.f32 %v12362_v60, %v12352_v44 }
 0xca0   :  { %14932 = vst [vmem:[#allocation196_spill] sm:$0xff] %v12733_v47  ;;  %8320 = vmatmul.f32.gmra.mxu1 %v12567_v30  ;;  %v7945_v30 = vadd.f32 %v12314_v27, %v12304_v19  ;;  %v12776_v27 = vadd.f32 %v12648_v0, %v7951_v40  ;;  %v5673_v0 = vld [vmem:[#allocation2 + $0x352] sm:$0xff] }
 0xca2   :  { %v12762_v18 = vadd.f32 %v12644_v23, %v7945_v30  ;;  %v12797_v23 = vadd.f32 %v12654_v48, %v7960_v12  ;;  %v12818_v48 = vadd.f32 %v12660_v21, %v7969_v9  ;;  %v14944_v21 = vld [vmem:[#allocation112_spill] sm:$0xff]  ;;  %v14958_v9 = vld [vmem:[#allocation159_spill] sm:$0xff] }
 0xca5   :  { %v8276_v24 = vpop.f32.mrf.mxu1 }
 0xca6   :  { %v12737_v61 = vadd.f32 %v8276_v24, %v12577_v6  ;;  %v12751_v6 = vadd.f32 %v12642_v22, %v7942_v29 }
 0xca8   :  { %14933 = vst [vmem:[#allocation197_spill] sm:$0xff] %v12737_v61  ;;  %8323 = vmatmul.f32.gmra.mxu1 %v12574_v41 }
 0xcad   :  { %v8279_v25 = vpop.f32.mrf.mxu1 }
 0xcae   :  { %v12741_v37 = vadd.f32 %v8279_v25, %v12584_v2  ;;  %v7948_v2 = vadd.f32 %v12320_v35, %v12310_v45 }
 0xcb0   :  { %14934 = vst [vmem:[#allocation198_spill] sm:$0xff] %v12741_v37  ;;  %8326 = vmatmul.f32.gmra.mxu1 %v12581_v1  ;;  %v12759_v1 = vadd.f32 %v12640_v4, %v7939_v32  ;;  %v12770_v19 = vadd.f32 %v12646_v13, %v7948_v2  ;;  %v14946_v2 = vld [vmem:[#allocation105_spill] sm:$0xff] }
 0xcb2   :  { %v8339_v38 = vadd.f32 %v12751_v6, %v12759_v1 }
 0xcb4   :  { %v8340_v45 = vadd.f32 %v8339_v38, %v12762_v18  ;;  %v14948_v38 = vld [vmem:[#allocation70_spill] sm:$0xff] }
 0xcb5   :  { %v8282_v33 = vpop.f32.mrf.mxu1 }
 0xcb6   :  { %v12754_v41 = vadd.f32 %v8282_v33, %v12592_v20  ;;  %v5672_v20 = vld [vmem:[#allocation2 + $0x34a] sm:$0xff]  ;;  %v8341_v39 = vadd.f32 %v8340_v45, %v12770_v19 }
 0xcb7   :  { %v14945_v33 = vld [vmem:[#allocation115_spill] sm:$0xff]  ;;  %v14949_v45 = vld [vmem:[#allocation156_spill] sm:$0xff] }
 0xcb8   :  { %14935 = vst [vmem:[#allocation199_spill] sm:$0xff] %v12754_v41  ;;  %8329 = vmatmul.f32.gmra.mxu1 %v12588_v49  ;;  %v7957_v49 = vadd.f32 %v12338_v5, %v12328_v46  ;;  %v8342_v43 = vadd.f32 %v8341_v39, %v12776_v27  ;;  %v7963_v46 = vadd.f32 %v12350_v55, %v12340_v54  ;;  %v14951_v39 = vld [vmem:[#allocation183_spill] sm:$0xff] }
 0xcb9   :  { %v7981_v32 = vadd.f32 %v14945_v33, %v14944_v21  ;;  %v14967_v21 = vld [vmem:[#allocation110_spill] sm:$0xff] }
 0xcba   :  { %v12791_v22 = vadd.f32 %v12652_v8, %v7957_v49  ;;  %v8343_v5 = vadd.f32 %v8342_v43, %v12782_v53  ;;  %v12803_v56 = vadd.f32 %v12656_v51, %v7963_v46  ;;  %v14938_v51 = vld [vmem:[#allocation154_spill] sm:$0xff]  ;;  %v14953_v43 = vld [vmem:[#allocation104_spill] sm:$0xff] }
 0xcbb   :  { %v7975_v44 = vadd.f32 %v14939_v57, %v14938_v51  ;;  %v12845_v12 = vadd.f32 %v14951_v39, %v7981_v32  ;;  %v14954_v46 = vld [vmem:[#allocation118_spill] sm:$0xff]  ;;  %v14972_v39 = vld [vmem:[#allocation108_spill] sm:$0xff] }
 0xcbc   :  { %v8344_v13 = vadd.f32 %v8343_v5, %v12791_v22  ;;  %v7987_v5 = vadd.f32 %v14954_v46, %v14953_v43  ;;  %v12882_v46 = vpop.f32.mrf.mxu3 }
 0xcbd   :  { %v8285_v35 = vpop.f32.mrf.mxu1  ;;  %14952 = vst [vmem:[#allocation157_spill] sm:$0xff] %v12845_v12 }
 0xcbe   :  { %v12785_v4 = vadd.f32 %v8285_v35, %v12596_v14  ;;  %v7966_v14 = vadd.f32 %v12356_v31, %v12346_v62  ;;  %v8345_v54 = vadd.f32 %v8344_v13, %v12797_v23  ;;  %v7972_v62 = vadd.f32 %v12368_v16, %v12358_v28  ;;  %v14943_v28 = vld [vmem:[#allocation184_spill] sm:$0xff]  ;;  %v14950_v35 = vld [vmem:[#allocation158_spill] sm:$0xff]  ;;  %v14955_v13 = vld [vmem:[#allocation185_spill] sm:$0xff] }
 0xcbf   :  { %v12830_v16 = vadd.f32 %v14943_v28, %v7975_v44  ;;  %v14961_v44 = vld [vmem:[#allocation107_spill] sm:$0xff] }
 0xcc0   :  { %14936 = vst [vmem:[#allocation200_spill] sm:$0xff] %v12785_v4  ;;  %8332 = vmatmul.f32.gmra.mxu1 %v5672_v20  ;;  %v12809_v55 = vadd.f32 %v12658_v26, %v7966_v14  ;;  %v8346_v31 = vadd.f32 %v8345_v54, %v12803_v56  ;;  %v12824_v26 = vadd.f32 %v14940_v50, %v7972_v62 }
 0xcc1   :  { %v7984_v20 = vadd.f32 %v14950_v35, %v14949_v45  ;;  %v14971_v45 = vld [vmem:[#allocation165_spill] sm:$0xff] }
 0xcc2   :  { %v8347_v60 = vadd.f32 %v8346_v31, %v12809_v55  ;;  %v14959_v31 = vld [vmem:[#allocation187_spill] sm:$0xff] }
 0xcc3   :  { %v12857_v51 = vadd.f32 %v14959_v31, %v7987_v5  ;;  %v14974_v5 = vld [vmem:[#allocation164_spill] sm:$0xff] }
 0xcc4   :  { %v8348_v25 = vadd.f32 %v8347_v60, %v12818_v48  ;;  %v14962_v60 = vld [vmem:[#allocation163_spill] sm:$0xff] }
 0xcc5   :  { %v8288_v3 = vpop.f32.mrf.mxu1  ;;  %14960 = vst [vmem:[#allocation98_spill] sm:$0xff] %v12857_v51  ;;  %v7993_v50 = vadd.f32 %v14962_v60, %v14961_v44  ;;  %v14979_v44 = vld [vmem:[#allocation124_spill] sm:$0xff] }
 0xcc6   :  { %v12812_v8 = vadd.f32 %v8288_v3, %v12600_v36  ;;  %v14942_v36 = vld [vmem:[#allocation101_spill] sm:$0xff]  ;;  %v8349_v30 = vadd.f32 %v8348_v25, %v12824_v26  ;;  %v12851_v3 = vadd.f32 %v14955_v13, %v7984_v20  ;;  %v14965_v25 = vld [vmem:[#allocation79_spill] sm:$0xff]  ;;  %v12876_v20 = vpop.f32.mrf.mxu2 }
 0xcc7   :  { %v7978_v24 = vadd.f32 %v14942_v36, %v14941_v10  ;;  %v14963_v36 = vld [vmem:[#allocation186_spill] sm:$0xff] }
 0xcc8   :  { %14937 = vst [vmem:[#allocation201_spill] sm:$0xff] %v12812_v8  ;;  %8335 = vmatmul.f32.gmra.mxu1 %v5673_v0  ;;  %v8350_v49 = vadd.f32 %v8349_v30, %v12830_v16  ;;  %v14957_v0 = vld [vmem:[#allocation161_spill] sm:$0xff]  ;;  %v14968_v30 = vld [vmem:[#allocation188_spill] sm:$0xff] }
 0xcc9   :  { %v12836_v40 = vadd.f32 %v14946_v2, %v7978_v24  ;;  %14956 = vst [vmem:[#allocation99_spill] sm:$0xff] %v12851_v3  ;;  %v7990_v54 = vadd.f32 %v14958_v9, %v14957_v0  ;;  %v12872_v2 = vadd.f32 %v14968_v30, %v7993_v50  ;;  %v14976_v9 = vld [vmem:[#allocation189_spill] sm:$0xff] }
 0xccb   :  { %14947 = vst [vmem:[#allocation154_spill] sm:$0xff] %v12836_v40  ;;  %v8351_v14 = vadd.f32 %v8350_v49, %v12836_v40  ;;  %v12863_v24 = vadd.f32 %v14963_v36, %v7990_v54  ;;  %v15061_v40 = vld [vmem:[#allocation88_spill] sm:$0xff] }
 0xccc   :  { %14969 = vst [vmem:[#allocation184_spill] sm:$0xff] %v12872_v2 }
 0xccd   :  { %v8291_v29 = vpop.f32.mrf.mxu1  ;;  %v8352_v62 = vadd.f32 %v8351_v14, %v12845_v12  ;;  %14964 = vst [vmem:[#allocation101_spill] sm:$0xff] %v12863_v24  ;;  %v14975_v14 = vld [vmem:[#allocation176_spill] sm:$0xff] }
 0xcce   :  { %v12839_v52 = vadd.f32 %v8291_v29, %v14948_v38  ;;  %v14966_v29 = vld [vmem:[#allocation172_spill] sm:$0xff]  ;;  %v14970_v38 = vld [vmem:[#allocation121_spill] sm:$0xff]  ;;  %v8002_v13 = vadd.f32 %v14975_v14, %v14974_v5 }
 0xccf   :  { %v8353_v10 = vadd.f32 %v8352_v62, %v12851_v3  ;;  %v7996_v33 = vadd.f32 %v14967_v21, %v14966_v29  ;;  %v7999_v35 = vadd.f32 %v14971_v45, %v14970_v38  ;;  %v12890_v62 = vpop.f32.mrf.mxu0  ;;  %v14983_v21 = vld [vmem:[#allocation166_spill] sm:$0xff]  ;;  %v14985_v38 = vld [vmem:[#allocation111_spill] sm:$0xff]  ;;  %v14989_v14 = vld [vmem:[#allocation120_spill] sm:$0xff] }
 0xcd1   :  { %v8354_v32 = vadd.f32 %v8353_v10, %v12857_v51  ;;  %v12880_v43 = vadd.f32 %v14972_v39, %v7996_v33  ;;  %v12888_v54 = vadd.f32 %v14976_v9, %v7999_v35  ;;  %v14980_v10 = vld [vmem:[#allocation114_spill] sm:$0xff]  ;;  %v14984_v33 = vld [vmem:[#allocation168_spill] sm:$0xff]  ;;  %v14987_v35 = vld [vmem:[#allocation113_spill] sm:$0xff] }
 0xcd2   :  { %v12896_v36 = vadd.f32 %v14980_v10, %v8002_v13  ;;  %v14991_v13 = vld [vmem:[#allocation162_spill] sm:$0xff]  ;;  %v14992_v9 = vld [vmem:[#allocation116_spill] sm:$0xff]  ;;  %v14993_v10 = vld [vmem:[#allocation117_spill] sm:$0xff] }
 0xcd3   :  { %v8355_v49 = vadd.f32 %v8354_v32, %v12863_v24  ;;  %14973 = vst [vmem:[#allocation112_spill] sm:$0xff] %v12880_v43  ;;  %v8008_v32 = vadd.f32 %v14984_v33, %v14983_v21  ;;  %v14995_v21 = vld [vmem:[#allocation127_spill] sm:$0xff]  ;;  %v14996_v33 = vld [vmem:[#allocation90_spill] sm:$0xff] }
 0xcd4   :  { %14977 = vst [vmem:[#allocation115_spill] sm:$0xff] %v12888_v54  ;;  %v15054_v51 = vld [vmem:[#allocation142_spill] sm:$0xff] }
 0xcd5   :  { %v8294_v57 = vpop.f32.mrf.mxu1  ;;  %v8356_v0 = vadd.f32 %v8355_v49, %v12872_v2  ;;  %14981 = vst [vmem:[#allocation105_spill] sm:$0xff] %v12896_v36  ;;  %v14988_v49 = vld [vmem:[#allocation169_spill] sm:$0xff]  ;;  %v15010_v2 = vld [vmem:[#allocation126_spill] sm:$0xff] }
 0xcd6   :  { %v12866_v28 = vadd.f32 %v8294_v57, %v14965_v25  ;;  %v14978_v57 = vld [vmem:[#allocation160_spill] sm:$0xff]  ;;  %v8011_v39 = vadd.f32 %v14988_v49, %v14987_v35  ;;  %v14999_v49 = vld [vmem:[#allocation82_spill] sm:$0xff] }
 0xcd7   :  { %v8005_v60 = vadd.f32 %v14979_v44, %v14978_v57  ;;  %v8357_v50 = vadd.f32 %v8356_v0, %v12880_v43  ;;  %v14982_v25 = vld [vmem:[#allocation76_spill] sm:$0xff]  ;;  %v12911_v0 = vadd.f32 %v14989_v14, %v8008_v32  ;;  %v12915_v57 = vpop.f32.mrf.mxu2  ;;  %v14997_v32 = vld [vmem:[#allocation123_spill] sm:$0xff] }
 0xcd9   :  { %v8358_v30 = vadd.f32 %v8357_v50, %v12888_v54  ;;  %v12905_v45 = vadd.f32 %v14985_v38, %v8005_v60  ;;  %14990 = vst [vmem:[#allocation156_spill] sm:$0xff] %v12911_v0  ;;  %v12919_v50 = vadd.f32 %v14993_v10, %v8011_v39  ;;  %v12921_v60 = vpop.f32.mrf.mxu3  ;;  %v8017_v38 = vadd.f32 %v14996_v33, %v14995_v21  ;;  %v15004_v54 = vld [vmem:[#allocation175_spill] sm:$0xff]  ;;  %v15005_v21 = vld [vmem:[#allocation174_spill] sm:$0xff] }
 0xcda   :  { %v8023_v33 = vadd.f32 %v15005_v21, %v15004_v54 }
 0xcdb   :  { %14986 = vst [vmem:[#allocation70_spill] sm:$0xff] %v12905_v45  ;;  %v8359_v5 = vadd.f32 %v8358_v30, %v12896_v36 }
 0xcdc   :  { %14994 = vst [vmem:[#allocation158_spill] sm:$0xff] %v12919_v50 }
 0xcdd   :  { %v8297_v31 = vpop.f32.mrf.mxu1  ;;  %v8360_v44 = vadd.f32 %v8359_v5, %v12905_v45  ;;  %v15000_v5 = vld [vmem:[#allocation171_spill] sm:$0xff]  ;;  %v15002_v45 = vld [vmem:[#allocation190_spill] sm:$0xff] }
 0xcde   :  { %v12899_v29 = vadd.f32 %v8297_v31, %v14982_v25  ;;  %v8014_v31 = vadd.f32 %v14992_v9, %v14991_v13  ;;  %v12932_v13 = vpop.f32.mrf.mxu0  ;;  %v15001_v9 = vld [vmem:[#allocation129_spill] sm:$0xff]  ;;  %v12938_v36 = vadd.f32 %v15002_v45, %v8017_v38  ;;  %v15013_v45 = vld [vmem:[#allocation131_spill] sm:$0xff] }
 0xcdf   :  { %v8361_v30 = vadd.f32 %v8360_v44, %v12911_v0  ;;  %v8020_v39 = vadd.f32 %v15001_v9, %v15000_v5  ;;  %v12950_v5 = vadd.f32 %v15010_v2, %v8023_v33  ;;  %v15012_v9 = vld [vmem:[#allocation179_spill] sm:$0xff] }
 0xce0   :  { %v12927_v35 = vadd.f32 %v14997_v32, %v8014_v31  ;;  %15003 = vst [vmem:[#allocation104_spill] sm:$0xff] %v12938_v36  ;;  %v15006_v31 = vld [vmem:[#allocation128_spill] sm:$0xff]  ;;  %v8029_v38 = vadd.f32 %v15013_v45, %v15012_v9  ;;  %v15021_v45 = vld [vmem:[#allocation170_spill] sm:$0xff] }
 0xce1   :  { %v8362_v10 = vadd.f32 %v8361_v30, %v12919_v50  ;;  %v12944_v32 = vadd.f32 %v15006_v31, %v8020_v39  ;;  %15011 = vst [vmem:[#allocation185_spill] sm:$0xff] %v12950_v5  ;;  %v12954_v50 = vpop.f32.mrf.mxu2  ;;  %v15016_v39 = vld [vmem:[#allocation86_spill] sm:$0xff] }
 0xce2   :  { %14998 = vst [vmem:[#allocation183_spill] sm:$0xff] %v12927_v35 }
 0xce3   :  { %v8363_v44 = vadd.f32 %v8362_v10, %v12927_v35  ;;  %15007 = vst [vmem:[#allocation118_spill] sm:$0xff] %v12944_v32  ;;  %v15014_v10 = vld [vmem:[#allocation132_spill] sm:$0xff] }
 0xce5   :  { %v8300_v25 = vpop.f32.mrf.mxu1  ;;  %v8364_v43 = vadd.f32 %v8363_v44, %v12938_v36  ;;  %v15017_v44 = vld [vmem:[#allocation122_spill] sm:$0xff]  ;;  %v15019_v36 = vld [vmem:[#allocation191_spill] sm:$0xff] }
 0xce6   :  { %v12930_v14 = vadd.f32 %v8300_v25, %v14999_v49  ;;  %v15008_v25 = vld [vmem:[#allocation119_spill] sm:$0xff]  ;;  %v12969_v35 = vadd.f32 %v15019_v36, %v8029_v38  ;;  %v12971_v9 = vpop.f32.mrf.mxu0  ;;  %v15027_v38 = vld [vmem:[#allocation53_spill] sm:$0xff] }
 0xce7   :  { %v15009_v49 = vld [vmem:[#allocation167_spill] sm:$0xff]  ;;  %v8365_v54 = vadd.f32 %v8364_v43, %v12944_v32  ;;  %v15022_v43 = vld [vmem:[#allocation133_spill] sm:$0xff] }
 0xce8   :  { %v8026_v0 = vadd.f32 %v15009_v49, %v15008_v25  ;;  %v12963_v25 = vpop.f32.mrf.mxu3  ;;  %v15018_v49 = vld [vmem:[#allocation178_spill] sm:$0xff]  ;;  %15020 = vst [vmem:[#allocation159_spill] sm:$0xff] %v12969_v35  ;;  %v8035_v32 = vadd.f32 %v15022_v43, %v15021_v45 }
 0xce9   :  { %v8032_v2 = vadd.f32 %v15018_v49, %v15017_v44  ;;  %v8366_v33 = vadd.f32 %v8365_v54, %v12950_v5  ;;  %v15028_v49 = vld [vmem:[#allocation44_spill] sm:$0xff] }
 0xcea   :  { %v12958_v21 = vadd.f32 %v15014_v10, %v8026_v0  ;;  %v15024_v10 = vld [vmem:[#allocation125_spill] sm:$0xff]  ;;  %v12983_v54 = vadd.f32 %v12704_v42, %v8035_v32  ;;  %v8041_v5 = vadd.f32 %v15028_v49, %v15027_v38  ;;  %v15035_v49 = vld [vmem:[#allocation192_spill] sm:$0xff] }
 0xcec   :  { %15015 = vst [vmem:[#allocation161_spill] sm:$0xff] %v12958_v21  ;;  %v8367_v0 = vadd.f32 %v8366_v33, %v12958_v21  ;;  %v12995_v21 = vpop.f32.mrf.mxu2  ;;  %v12999_v42 = vadd.f32 %v12708_v17, %v8041_v5 }
 0xced   :  { %v8303_v30 = vpop.f32.mrf.mxu1  ;;  %15026 = vst [vmem:[#allocation107_spill] sm:$0xff] %v12983_v54 }
 0xcee   :  { %v12961_v31 = vadd.f32 %v8303_v30, %v15016_v39  ;;  %v12977_v30 = vadd.f32 %v12702_v11, %v8032_v2  ;;  %v15025_v39 = vld [vmem:[#allocation173_spill] sm:$0xff]  ;;  %v8368_v44 = vadd.f32 %v8367_v0, %v12969_v35  ;;  %15032 = vst [vmem:[#allocation186_spill] sm:$0xff] %v12999_v42  ;;  %v15041_v35 = vld [vmem:[#allocation182_spill] sm:$0xff] }
 0xcef   :  { %v8038_v24 = vadd.f32 %v15025_v39, %v15024_v10  ;;  %v15030_v11 = vld [vmem:[#allocation181_spill] sm:$0xff]  ;;  %v15034_v39 = vld [vmem:[#allocation48_spill] sm:$0xff] }
 0xcf0   :  { %15023 = vst [vmem:[#allocation187_spill] sm:$0xff] %v12977_v30  ;;  %v8369_v45 = vadd.f32 %v8368_v44, %v12977_v30  ;;  %v15031_v2 = vld [vmem:[#allocation177_spill] sm:$0xff]  ;;  %v13001_v32 = vpop.f32.mrf.mxu3 }
 0xcf1   :  { %v12991_v33 = vadd.f32 %v12706_v7, %v8038_v24  ;;  %v8044_v43 = vadd.f32 %v15031_v2, %v15030_v11  ;;  %v15033_v10 = vld [vmem:[#allocation57_spill] sm:$0xff]  ;;  %v13009_v24 = vpop.f32.mrf.mxu0  ;;  %v15037_v11 = vld [vmem:[#allocation180_spill] sm:$0xff] }
 0xcf2   :  { %v8370_v0 = vadd.f32 %v8369_v45, %v12983_v54  ;;  %v8047_v38 = vadd.f32 %v15034_v39, %v15033_v10  ;;  %v15038_v2 = vld [vmem:[#allocation61_spill] sm:$0xff]  ;;  %v15040_v54 = vld [vmem:[#allocation64_spill] sm:$0xff]  ;;  %v15043_v39 = vld [vmem:[#allocation67_spill] sm:$0xff] }
 0xcf3   :  { %15029 = vst [vmem:[#allocation163_spill] sm:$0xff] %v12991_v33  ;;  %v13007_v7 = vadd.f32 %v15035_v49, %v8044_v43  ;;  %v8050_v30 = vadd.f32 %v15038_v2, %v15037_v11  ;;  %v8053_v10 = vadd.f32 %v15041_v35, %v15040_v54  ;;  %v15044_v49 = vld [vmem:[#allocation73_spill] sm:$0xff] }
 0xcf4   :  { %v8371_v44 = vadd.f32 %v8370_v0, %v12991_v33  ;;  %v13015_v17 = vadd.f32 %v12712_v15, %v8047_v38  ;;  %v8056_v33 = vadd.f32 %v15044_v49, %v15043_v39  ;;  %v15045_v2 = vld [vmem:[#allocation193_spill] sm:$0xff]  ;;  %v7691_v15 = vpop.f32.mrf.mxu2 }
 0xcf5   :  { %v12985_v36 = vpop.f32.mrf.mxu1  ;;  %15036 = vst [vmem:[#allocation79_spill] sm:$0xff] %v13007_v7  ;;  %v13023_v43 = vadd.f32 %v12715_v58, %v8050_v30 }
 0xcf6   :  { %v8372_v45 = vadd.f32 %v8371_v44, %v12999_v42  ;;  %15039 = vst [vmem:[#allocation172_spill] sm:$0xff] %v13015_v17  ;;  %v13029_v44 = vadd.f32 %v15045_v2, %v8053_v10  ;;  %v13033_v42 = vadd.f32 %v12721_v63, %v8056_v33 }
 0xcf7   :  { %15042 = vst [vmem:[#allocation110_spill] sm:$0xff] %v13023_v43 }
 0xcf8   :  { %v8373_v0 = vadd.f32 %v8372_v45, %v13007_v7  ;;  %15046 = vst [vmem:[#allocation188_spill] sm:$0xff] %v13029_v44  ;;  %v7900_v35 = vpop.f32.mrf.mxu3 }
 0xcf9   :  { %15047 = vst [vmem:[#allocation121_spill] sm:$0xff] %v13033_v42  ;;  %v8109_v45 = vpop.f32.mrf.mxu0 }
 0xcfa   :  { %v8374_v11 = vadd.f32 %v8373_v0, %v13015_v17 }
 0xcfc   :  { %v8375_v38 = vadd.f32 %v8374_v11, %v13023_v43  ;;  %v7694_v49 = vpop.f32.mrf.mxu2  ;;  %v15048_v43 = vld [vmem:[#allocation130_spill] sm:$0xff] }
 0xcfd   :  { %v13017_v5 = vpop.f32.mrf.mxu1 }
 0xcfe   :  { %v8376_v54 = vadd.f32 %v8375_v38, %v13029_v44  ;;  %v15049_v38 = vld [vmem:[#allocation138_spill] sm:$0xff] }
 0xcff   :  { %v7262_v44 = vadd.f32 %v15049_v38, %v15048_v43  ;;  %v15057_v43 = vld [vmem:[#allocation144_spill] sm:$0xff] }
 0xd00   :  { %v8377_v30 = vadd.f32 %v8376_v54, %v13033_v42  ;;  %v7903_v2 = vpop.f32.mrf.mxu3  ;;  %v15050_v54 = vld [vmem:[#allocation137_spill] sm:$0xff]  ;;  %v15051_v42 = vld [vmem:[#allocation140_spill] sm:$0xff] }
 0xd01   :  { %v8112_v63 = vpop.f32.mrf.mxu0 }
 0xd02   :  { %v8378_v39 = vadd.f32 %v8377_v30, %v12725_v59  ;;  %v7265_v30 = vadd.f32 %v15051_v42, %v15050_v54  ;;  %v15052_v59 = vld [vmem:[#allocation85_spill] sm:$0xff]  ;;  %v15058_v42 = vld [vmem:[#allocation92_spill] sm:$0xff] }
 0xd04   :  { %v8379_v0 = vadd.f32 %v8378_v39, %v12729_v34  ;;  %v7471_v39 = vadd.f32 %v15052_v59, %v7262_v44  ;;  %v7697_v12 = vpop.f32.mrf.mxu2  ;;  %v15060_v44 = vld [vmem:[#allocation146_spill] sm:$0xff] }
 0xd05   :  { %v8312_v58 = vpop.f32.mrf.mxu1 }
 0xd06   :  { %v8380_v10 = vadd.f32 %v8379_v0, %v12733_v47  ;;  %v15053_v47 = vld [vmem:[#allocation139_spill] sm:$0xff] }
 0xd07   :  { %v7268_v3 = vadd.f32 %v15054_v51, %v15053_v47 }
 0xd08   :  { %v8381_v11 = vadd.f32 %v8380_v10, %v12737_v61  ;;  %v15055_v10 = vld [vmem:[#allocation87_spill] sm:$0xff] }
 0xd09   :  { %v7474_v61 = vadd.f32 %v15055_v10, %v7265_v30  ;;  %v7477_v54 = vadd.f32 %v15058_v42, %v7268_v3  ;;  %v8115_v51 = vpop.f32.mrf.mxu0 }
 0xd0a   :  { %v8382_v33 = vadd.f32 %v8381_v11, %v12741_v37  ;;  %v15056_v37 = vld [vmem:[#allocation141_spill] sm:$0xff] }
 0xd0b   :  { %v7271_v38 = vadd.f32 %v15057_v43, %v15056_v37  ;;  %v15062_v37 = vld [vmem:[#allocation145_spill] sm:$0xff]  ;;  %v15063_v43 = vld [vmem:[#allocation148_spill] sm:$0xff]  ;;  %v7686_v42 = vadd.f32 %v12954_v50, %v7477_v54 }
 0xd0c   :  { %v8383_v7 = vadd.f32 %v8382_v33, %v12754_v41  ;;  %v7906_v33 = vpop.f32.mrf.mxu3  ;;  %v7680_v41 = vadd.f32 %v12876_v20, %v7471_v39  ;;  %v15064_v20 = vld [vmem:[#allocation89_spill] sm:$0xff] }
 0xd0d   :  { %v8315_v17 = vpop.f32.mrf.mxu1  ;;  %v7480_v47 = vadd.f32 %v15061_v40, %v7271_v38  ;;  %v15065_v38 = vld [vmem:[#allocation147_spill] sm:$0xff] }
 0xd0e   :  { %v8384_v34 = vadd.f32 %v8383_v7, %v12785_v4  ;;  %v15059_v7 = vld [vmem:[#allocation143_spill] sm:$0xff]  ;;  %v7889_v30 = vadd.f32 %v12882_v46, %v7680_v41  ;;  %v15067_v46 = vld [vmem:[#allocation109_spill] sm:$0xff] }
 0xd0f   :  { %v7274_v4 = vadd.f32 %v15060_v44, %v15059_v7  ;;  %v15066_v7 = vld [vmem:[#allocation150_spill] sm:$0xff]  ;;  %v7895_v44 = vadd.f32 %v12963_v25, %v7686_v42 }
 0xd10   :  { %v8385_v11 = vadd.f32 %v8384_v34, %v12812_v8  ;;  %v7683_v34 = vadd.f32 %v12915_v57, %v7474_v61  ;;  %v7277_v8 = vadd.f32 %v15063_v43, %v15062_v37  ;;  %v7280_v41 = vadd.f32 %v15066_v7, %v15065_v38  ;;  %v15069_v43 = vld [vmem:[#allocation149_spill] sm:$0xff] }
 0xd11   :  { %v7483_v39 = vadd.f32 %v15064_v20, %v7274_v4  ;;  %v7689_v61 = vadd.f32 %v12995_v21, %v7480_v47  ;;  %v7700_v21 = vpop.f32.mrf.mxu2  ;;  %v15070_v20 = vld [vmem:[#allocation152_spill] sm:$0xff] }
 0xd12   :  { %v8386_v59 = vadd.f32 %v8385_v11, %v12839_v52  ;;  %v7892_v3 = vadd.f32 %v12921_v60, %v7683_v34  ;;  %v8098_v11 = vadd.f32 %v12890_v62, %v7889_v30  ;;  %v7486_v57 = vadd.f32 %v15067_v46, %v7277_v8  ;;  %v15068_v34 = vld [vmem:[#allocation93_spill] sm:$0xff] }
 0xd13   :  { %v7898_v50 = vadd.f32 %v13001_v32, %v7689_v61  ;;  %v7692_v54 = vadd.f32 %v7691_v15, %v7483_v39  ;;  %v8104_v30 = vadd.f32 %v12971_v9, %v7895_v44 }
 0xd14   :  { %v8387_v10 = vadd.f32 %v8386_v59, %v12866_v28  ;;  %v8101_v4 = vadd.f32 %v12932_v13, %v7892_v3  ;;  %v13079_v62 = vadd.f32 %v12985_v36, %v8098_v11  ;;  %v7695_v13 = vadd.f32 %v7694_v49, %v7486_v57  ;;  %v7909_v37 = vpop.f32.mrf.mxu3  ;;  %v8118_v11 = vpop.f32.mrf.mxu0  ;;  %v15073_v57 = vld [vmem:[#allocation100_spill] sm:$0xff] }
 0xd15   :  { %v8318_v0 = vpop.f32.mrf.mxu1  ;;  %v7901_v25 = vadd.f32 %v7900_v35, %v7692_v54  ;;  %v7283_v36 = vadd.f32 %v15070_v20, %v15069_v43  ;;  %v8107_v3 = vadd.f32 %v13009_v24, %v7898_v50  ;;  %v13092_v15 = vadd.f32 %v8312_v58, %v8104_v30  ;;  %v15077_v20 = vld [vmem:[#allocation95_spill] sm:$0xff] }
 0xd16   :  { %v8388_v40 = vadd.f32 %v8387_v10, %v12899_v29  ;;  %v7489_v10 = vadd.f32 %v15068_v34, %v7280_v41  ;;  %v13086_v47 = vadd.f32 %v13017_v5, %v8101_v4  ;;  %v7904_v9 = vadd.f32 %v7903_v2, %v7695_v13  ;;  %v15076_v13 = vld [vmem:[#allocation106_spill] sm:$0xff] }
 0xd17   :  { %v8110_v39 = vadd.f32 %v8109_v45, %v7901_v25  ;;  %v13096_v35 = vadd.f32 %v8315_v17, %v8107_v3  ;;  %v15075_v25 = vld [vmem:[#allocation153_spill] sm:$0xff] }
 0xd18   :  { %v8389_v60 = vadd.f32 %v8388_v40, %v12930_v14  ;;  %v7698_v42 = vadd.f32 %v7697_v12, %v7489_v10  ;;  %v15071_v40 = vld [vmem:[#allocation91_spill] sm:$0xff]  ;;  %v8113_v41 = vadd.f32 %v8112_v63, %v7904_v9  ;;  %v15074_v63 = vld [vmem:[#allocation97_spill] sm:$0xff]  ;;  %v7289_v43 = vadd.f32 %v15076_v13, %v15075_v25 }
 0xd19   :  { %v7492_v38 = vadd.f32 %v15071_v40, %v7283_v36  ;;  %v13099_v24 = vadd.f32 %v8318_v0, %v8110_v39  ;;  %v15072_v12 = vld [vmem:[#allocation151_spill] sm:$0xff] }
 0xd1a   :  { %v8390_v8 = vadd.f32 %v8389_v60, %v12961_v31  ;;  %v7907_v7 = vadd.f32 %v7906_v33, %v7698_v42  ;;  %v7286_v44 = vadd.f32 %v15073_v57, %v15072_v12  ;;  %v7703_v60 = vpop.f32.mrf.mxu2  ;;  %v7498_v36 = vadd.f32 %v15077_v20, %v7289_v43 }
 0xd1b   :  { %v7701_v46 = vadd.f32 %v7700_v21, %v7492_v38 }
 0xd1c   :  { %v8391_v32 = vadd.f32 %v8390_v8, %v13079_v62  ;;  %v8116_v58 = vadd.f32 %v8115_v51, %v7907_v7  ;;  %v7912_v33 = vpop.f32.mrf.mxu3  ;;  %v7495_v54 = vadd.f32 %v15074_v63, %v7286_v44  ;;  %v8121_v34 = vpop.f32.mrf.mxu0 }
 0xd1d   :  { %v8321_v59 = vpop.f32.mrf.mxu1  ;;  %v7910_v4 = vadd.f32 %v7909_v37, %v7701_v46 }
 0xd1e   :  { %v8392_v5 = vadd.f32 %v8391_v32, %v13086_v47  ;;  %v13102_v45 = vadd.f32 %v8321_v59, %v8113_v41  ;;  %v7704_v59 = vadd.f32 %v7703_v60, %v7495_v54 }
 0xd1f   :  { %v8119_v30 = vadd.f32 %v8118_v11, %v7910_v4 }
 0xd20   :  { %v8393_v61 = vadd.f32 %v8392_v5, %v13092_v15  ;;  %v7913_v37 = vadd.f32 %v7912_v33, %v7704_v59  ;;  %v15078_v5 = vld [vmem:[#allocation94_spill] sm:$0xff] }
 0xd22   :  { %v8394_v2 = vadd.f32 %v8393_v61, %v13096_v35  ;;  %v7706_v3 = vpop.f32.mrf.mxu2  ;;  %v8122_v32 = vadd.f32 %v8121_v34, %v7913_v37  ;;  %v15080_v61 = vld [vmem:[#allocation102_spill] sm:$0xff] }
 0xd23   :  { %v7707_v40 = vadd.f32 %v7706_v3, %v7498_v36 }
 0xd24   :  { %v8395_v17 = vadd.f32 %v8394_v2, %v13099_v24  ;;  %v7915_v9 = vpop.f32.mrf.mxu3  ;;  %v8124_v11 = vpop.f32.mrf.mxu0 }
 0xd25   :  { %v8324_v49 = vpop.f32.mrf.mxu1  ;;  %v7916_v41 = vadd.f32 %v7915_v9, %v7707_v40 }
 0xd26   :  { %v8325_v50 = vadd.f32 %v8324_v49, %v8116_v58  ;;  %v8396_v0 = vadd.f32 %v8395_v17, %v13102_v45  ;;  %v15079_v49 = vld [vmem:[#allocation155_spill] sm:$0xff] }
 0xd27   :  { %v7292_v7 = vadd.f32 %v15079_v49, %v15078_v5  ;;  %v8125_v58 = vadd.f32 %v8124_v11, %v7916_v41 }
 0xd28   :  { %v8397_v10 = vadd.f32 %v8396_v0, %v8325_v50 }
 0xd29   :  { %v7501_v46 = vadd.f32 %v15080_v61, %v7292_v7 }
 0xd2a   :  { %v7709_v57 = vpop.f32.mrf.mxu2 }
 0xd2b   :  { %v7710_v4 = vadd.f32 %v7709_v57, %v7501_v46 }
 0xd2c   :  { %v7918_v44 = vpop.f32.mrf.mxu3  ;;  %v8127_v17 = vpop.f32.mrf.mxu0 }
 0xd2d   :  { %v8327_v51 = vpop.f32.mrf.mxu1  ;;  %v7919_v33 = vadd.f32 %v7918_v44, %v7710_v4 }
 0xd2e   :  { %v8328_v21 = vadd.f32 %v8327_v51, %v8119_v30 }
 0xd2f   :  { %v8128_v63 = vadd.f32 %v8127_v17, %v7919_v33  ;;  %v15093_v17 = vld [vmem:[#allocation154_spill] sm:$0xff] }
 0xd30   :  { %v8398_v8 = vadd.f32 %v8397_v10, %v8328_v21 }
 0xd35   :  { %v8330_v39 = vpop.f32.mrf.mxu1 }
 0xd36   :  { %v8331_v42 = vadd.f32 %v8330_v39, %v8122_v32 }
 0xd38   :  { %v8399_v38 = vadd.f32 %v8398_v8, %v8331_v42 }
 0xd3d   :  { %v8333_v2 = vpop.f32.mrf.mxu1 }
 0xd3e   :  { %v8334_v12 = vadd.f32 %v8333_v2, %v8125_v58 }
 0xd40   :  { %v8400_v60 = vadd.f32 %v8399_v38, %v8334_v12 }
 0xd45   :  { %v8336_v54 = vpop.f32.mrf.mxu1 }
 0xd46   :  { %v8337_v30 = vadd.f32 %v8336_v54, %v8128_v63  ;;  %v15095_v54 = vld [vmem:[#allocation157_spill] sm:$0xff] }
 0xd48   :  { %v8401_v0 = vadd.f32 %v8400_v60, %v8337_v30 }
 0xd4a   :  { %v8402_v34 = vrot.slane %v8401_v0, 4 }
 0xd4c   :  { %v8403_v51 = vadd.f32 %v8402_v34, %v8401_v0  ;;  %v15097_v34 = vld [vmem:[#allocation99_spill] sm:$0xff] }
 0xd4e   :  { %v8404_v10 = vrot.slane %v8403_v51, 2 }
 0xd50   :  { %v8405_v59 = vadd.f32 %v8404_v10, %v8403_v51 }
 0xd52   :  { %v8406_v8 = vrot.slane %v8405_v59, 1 }
 0xd54   :  { %v8407_v25 = vadd.f32 %v8406_v8, %v8405_v59  ;;  %v15099_v8 = vld [vmem:[#allocation98_spill] sm:$0xff] }
 0xd56   :  { %v13115_v13 = vmul.f32 0.001953125, %v8407_v25 }
 0xd58   :  { %v13118_v43 = vsub.f32 %v8325_v50, %v13115_v13  ;;  %v13121_v37 = vsub.f32 %v8328_v21, %v13115_v13  ;;  %v13124_v20 = vsub.f32 %v8331_v42, %v13115_v13  ;;  %v13127_v36 = vsub.f32 %v8334_v12, %v13115_v13 }
 0xd59   :  { %v13130_v3 = vsub.f32 %v8337_v30, %v13115_v13  ;;  %v13134_v32 = vsub.f32 %v12759_v1, %v13115_v13  ;;  %v13138_v50 = vsub.f32 %v12751_v6, %v13115_v13  ;;  %v13142_v21 = vsub.f32 %v12762_v18, %v13115_v13 }
 0xd5a   :  { %v13150_v42 = vsub.f32 %v12770_v19, %v13115_v13  ;;  %v13154_v1 = vsub.f32 %v12776_v27, %v13115_v13  ;;  %v13160_v18 = vsub.f32 %v12782_v53, %v13115_v13  ;;  %v13166_v19 = vsub.f32 %v12791_v22, %v13115_v13 }
 0xd5b   :  { %15081 = vst [vmem:[#allocation165_spill] sm:$0xff] %v13138_v50  ;;  %v8473_v9 = vmul.f32 %v13134_v32, %v13134_v32  ;;  %v8474_v39 = vmul.f32 %v13138_v50, %v13138_v50  ;;  %v8475_v6 = vmul.f32 %v13142_v21, %v13142_v21  ;;  %v13172_v49 = vsub.f32 %v12797_v23, %v13115_v13 }
 0xd5c   :  { %15082 = vst [vmem:[#allocation108_spill] sm:$0xff] %v13142_v21  ;;  %v8476_v40 = vmul.f32 %v13150_v42, %v13150_v42  ;;  %v8477_v27 = vmul.f32 %v13154_v1, %v13154_v1  ;;  %v8478_v53 = vmul.f32 %v13160_v18, %v13160_v18  ;;  %v13178_v41 = vsub.f32 %v12803_v56, %v13115_v13 }
 0xd5d   :  { %15083 = vst [vmem:[#allocation164_spill] sm:$0xff] %v13150_v42  ;;  %v8537_v11 = vadd.f32 %v8474_v39, %v8473_v9  ;;  %v8479_v22 = vmul.f32 %v13166_v19, %v13166_v19  ;;  %v13184_v46 = vsub.f32 %v12809_v55, %v13115_v13  ;;  %v8480_v23 = vmul.f32 %v13172_v49, %v13172_v49 }
 0xd5e   :  { %15084 = vst [vmem:[#allocation176_spill] sm:$0xff] %v13154_v1  ;;  %v13190_v2 = vsub.f32 %v12818_v48, %v13115_v13  ;;  %v8481_v56 = vmul.f32 %v13178_v41, %v13178_v41  ;;  %v13196_v57 = vsub.f32 %v12824_v26, %v13115_v13  ;;  %v13202_v4 = vsub.f32 %v12830_v16, %v13115_v13 }
 0xd5f   :  { %15085 = vst [vmem:[#allocation189_spill] sm:$0xff] %v13160_v18  ;;  %v8538_v38 = vadd.f32 %v8537_v11, %v8475_v6  ;;  %v8482_v55 = vmul.f32 %v13184_v46, %v13184_v46  ;;  %v13208_v33 = vsub.f32 %v15093_v17, %v13115_v13  ;;  %v13214_v30 = vsub.f32 %v15095_v54, %v13115_v13  ;;  %v15101_v6 = vld [vmem:[#allocation101_spill] sm:$0xff] }
 0xd60   :  { %15086 = vst [vmem:[#allocation160_spill] sm:$0xff] %v13166_v19  ;;  %v8483_v48 = vmul.f32 %v13190_v2, %v13190_v2  ;;  %v8484_v26 = vmul.f32 %v13196_v57, %v13196_v57  ;;  %v8485_v16 = vmul.f32 %v13202_v4, %v13202_v4  ;;  %v13220_v51 = vsub.f32 %v15097_v34, %v13115_v13  ;;  %v15111_v34 = vld [vmem:[#allocation156_spill] sm:$0xff] }
 0xd61   :  { %v8539_v5 = vadd.f32 %v8538_v38, %v8476_v40  ;;  %15087 = vst [vmem:[#allocation124_spill] sm:$0xff] %v13172_v49  ;;  %v8486_v10 = vmul.f32 %v13208_v33, %v13208_v33  ;;  %v13226_v25 = vsub.f32 %v15099_v8, %v13115_v13  ;;  %v8487_v9 = vmul.f32 %v13214_v30, %v13214_v30 }
 0xd62   :  { %15088 = vst [vmem:[#allocation114_spill] sm:$0xff] %v13178_v41  ;;  %v13232_v11 = vsub.f32 %v15101_v6, %v13115_v13  ;;  %v8488_v40 = vmul.f32 %v13220_v51, %v13220_v51  ;;  %v8532_v41 = vmul.f32 %v13118_v43, %v13118_v43 }
 0xd63   :  { %v8540_v7 = vadd.f32 %v8539_v5, %v8477_v27  ;;  %15089 = vst [vmem:[#allocation76_spill] sm:$0xff] %v13184_v46  ;;  %v15103_v27 = vld [vmem:[#allocation184_spill] sm:$0xff] }
 0xd64   :  { %15090 = vst [vmem:[#allocation166_spill] sm:$0xff] %v13190_v2  ;;  %v13238_v5 = vsub.f32 %v15103_v27, %v13115_v13 }
 0xd65   :  { %v8541_v61 = vadd.f32 %v8540_v7, %v8478_v53  ;;  %15091 = vst [vmem:[#allocation168_spill] sm:$0xff] %v13196_v57  ;;  %v8489_v53 = vmul.f32 %v13226_v25, %v13226_v25 }
 0xd66   :  { %15092 = vst [vmem:[#allocation111_spill] sm:$0xff] %v13202_v4 }
 0xd67   :  { %v8542_v58 = vadd.f32 %v8541_v61, %v8479_v22  ;;  %15094 = vst [vmem:[#allocation113_spill] sm:$0xff] %v13208_v33  ;;  %v15105_v22 = vld [vmem:[#allocation112_spill] sm:$0xff] }
 0xd68   :  { %15096 = vst [vmem:[#allocation169_spill] sm:$0xff] %v13214_v30  ;;  %v13244_v61 = vsub.f32 %v15105_v22, %v13115_v13  ;;  %v15114_v22 = vld [vmem:[#allocation104_spill] sm:$0xff] }
 0xd69   :  { %v8543_v12 = vadd.f32 %v8542_v58, %v8480_v23  ;;  %15098 = vst [vmem:[#allocation120_spill] sm:$0xff] %v13220_v51  ;;  %v8490_v23 = vmul.f32 %v13232_v11, %v13232_v11 }
 0xd6a   :  { %15100 = vst [vmem:[#allocation162_spill] sm:$0xff] %v13226_v25  ;;  %v8492_v17 = vmul.f32 %v13244_v61, %v13244_v61 }
 0xd6b   :  { %v8544_v44 = vadd.f32 %v8543_v12, %v8481_v56  ;;  %15102 = vst [vmem:[#allocation116_spill] sm:$0xff] %v13232_v11  ;;  %v15107_v56 = vld [vmem:[#allocation115_spill] sm:$0xff] }
 0xd6c   :  { %15104 = vst [vmem:[#allocation117_spill] sm:$0xff] %v13238_v5  ;;  %v13250_v12 = vsub.f32 %v15107_v56, %v13115_v13 }
 0xd6d   :  { %v8545_v60 = vadd.f32 %v8544_v44, %v8482_v55  ;;  %15106 = vst [vmem:[#allocation127_spill] sm:$0xff] %v13244_v61  ;;  %v8491_v55 = vmul.f32 %v13238_v5, %v13238_v5 }
 0xd6e   :  { %15108 = vst [vmem:[#allocation90_spill] sm:$0xff] %v13250_v12 }
 0xd6f   :  { %v8546_v63 = vadd.f32 %v8545_v60, %v8483_v48  ;;  %v15109_v48 = vld [vmem:[#allocation105_spill] sm:$0xff] }
 0xd70   :  { %v13256_v60 = vsub.f32 %v15109_v48, %v13115_v13 }
 0xd71   :  { %v8547_v0 = vadd.f32 %v8546_v63, %v8484_v26  ;;  %v15110_v63 = vld [vmem:[#allocation70_spill] sm:$0xff] }
 0xd72   :  { %v13262_v54 = vsub.f32 %v15110_v63, %v13115_v13 }
 0xd73   :  { %v8548_v59 = vadd.f32 %v8547_v0, %v8485_v16  ;;  %v8493_v16 = vmul.f32 %v13250_v12, %v13250_v12 }
 0xd74   :  { %v8495_v6 = vmul.f32 %v13262_v54, %v13262_v54 }
 0xd75   :  { %v8549_v39 = vadd.f32 %v8548_v59, %v8486_v10  ;;  %v13268_v10 = vsub.f32 %v15111_v34, %v13115_v13  ;;  %v8494_v59 = vmul.f32 %v13256_v60, %v13256_v60  ;;  %v15117_v34 = vld [vmem:[#allocation161_spill] sm:$0xff] }
 0xd77   :  { %v8550_v38 = vadd.f32 %v8549_v39, %v8487_v9  ;;  %v15112_v9 = vld [vmem:[#allocation158_spill] sm:$0xff] }
 0xd78   :  { %v13274_v39 = vsub.f32 %v15112_v9, %v13115_v13 }
 0xd79   :  { %v8551_v7 = vadd.f32 %v8550_v38, %v8488_v40  ;;  %v15113_v38 = vld [vmem:[#allocation183_spill] sm:$0xff] }
 0xd7a   :  { %v13280_v27 = vsub.f32 %v15113_v38, %v13115_v13 }
 0xd7b   :  { %v8552_v58 = vadd.f32 %v8551_v7, %v8489_v53  ;;  %v8496_v53 = vmul.f32 %v13268_v10, %v13268_v10 }
 0xd7c   :  { %v8498_v48 = vmul.f32 %v13280_v27, %v13280_v27 }
 0xd7d   :  { %v8553_v44 = vadd.f32 %v8552_v58, %v8490_v23  ;;  %v13286_v23 = vsub.f32 %v15114_v22, %v13115_v13  ;;  %v8497_v58 = vmul.f32 %v13274_v39, %v13274_v39 }
 0xd7f   :  { %v8554_v26 = vadd.f32 %v8553_v44, %v8491_v55  ;;  %v15115_v55 = vld [vmem:[#allocation118_spill] sm:$0xff] }
 0xd80   :  { %v13292_v44 = vsub.f32 %v15115_v55, %v13115_v13  ;;  %v15120_v55 = vld [vmem:[#allocation107_spill] sm:$0xff] }
 0xd81   :  { %v8555_v0 = vadd.f32 %v8554_v26, %v8492_v17  ;;  %v15116_v26 = vld [vmem:[#allocation185_spill] sm:$0xff] }
 0xd82   :  { %v13298_v63 = vsub.f32 %v15116_v26, %v13115_v13 }
 0xd83   :  { %v8556_v8 = vadd.f32 %v8555_v0, %v8493_v16  ;;  %v8499_v16 = vmul.f32 %v13286_v23, %v13286_v23 }
 0xd84   :  { %v8501_v38 = vmul.f32 %v13298_v63, %v13298_v63 }
 0xd85   :  { %v8557_v40 = vadd.f32 %v8556_v8, %v8494_v59  ;;  %v13304_v59 = vsub.f32 %v15117_v34, %v13115_v13  ;;  %v8500_v8 = vmul.f32 %v13292_v44, %v13292_v44 }
 0xd87   :  { %v8558_v7 = vadd.f32 %v8557_v40, %v8495_v6  ;;  %v15118_v6 = vld [vmem:[#allocation159_spill] sm:$0xff] }
 0xd88   :  { %v13310_v40 = vsub.f32 %v15118_v6, %v13115_v13 }
 0xd89   :  { %v8559_v56 = vadd.f32 %v8558_v7, %v8496_v53  ;;  %v15119_v7 = vld [vmem:[#allocation187_spill] sm:$0xff] }
 0xd8a   :  { %v13316_v22 = vsub.f32 %v15119_v7, %v13115_v13  ;;  %v15123_v7 = vld [vmem:[#allocation79_spill] sm:$0xff] }
 0xd8b   :  { %v8560_v17 = vadd.f32 %v8559_v56, %v8497_v58  ;;  %v8502_v58 = vmul.f32 %v13304_v59, %v13304_v59 }
 0xd8c   :  { %v8504_v34 = vmul.f32 %v13316_v22, %v13316_v22 }
 0xd8d   :  { %v8561_v0 = vadd.f32 %v8560_v17, %v8498_v48  ;;  %v13322_v48 = vsub.f32 %v15120_v55, %v13115_v13  ;;  %v8503_v17 = vmul.f32 %v13310_v40, %v13310_v40  ;;  %v13340_v55 = vsub.f32 %v15123_v7, %v13115_v13  ;;  %v15126_v7 = vld [vmem:[#allocation188_spill] sm:$0xff] }
 0xd8e   :  { %v13358_v5 = vsub.f32 %v15126_v7, %v13115_v13  ;;  %v15129_v7 = vld [vmem:[#allocation195_spill] sm:$0xff] }
 0xd8f   :  { %v8562_v9 = vadd.f32 %v8561_v0, %v8499_v16  ;;  %v15121_v16 = vld [vmem:[#allocation163_spill] sm:$0xff]  ;;  %v13376_v51 = vsub.f32 %v15129_v7, %v13115_v13  ;;  %v15132_v7 = vld [vmem:[#allocation198_spill] sm:$0xff] }
 0xd90   :  { %v13328_v0 = vsub.f32 %v15121_v16, %v13115_v13  ;;  %v15124_v16 = vld [vmem:[#allocation172_spill] sm:$0xff]  ;;  %v13394_v4 = vsub.f32 %v15132_v7, %v13115_v13  ;;  %v15135_v7 = vld [vmem:[#allocation201_spill] sm:$0xff] }
 0xd91   :  { %v8563_v53 = vadd.f32 %v8562_v9, %v8500_v8  ;;  %v15122_v9 = vld [vmem:[#allocation186_spill] sm:$0xff]  ;;  %v13346_v12 = vsub.f32 %v15124_v16, %v13115_v13  ;;  %v15127_v16 = vld [vmem:[#allocation121_spill] sm:$0xff]  ;;  %v13412_v46 = vsub.f32 %v15135_v7, %v13115_v13  ;;  %v13430_v7 = vsub.f32 %v12899_v29, %v13115_v13 }
 0xd92   :  { %v13334_v6 = vsub.f32 %v15122_v9, %v13115_v13  ;;  %v15125_v9 = vld [vmem:[#allocation110_spill] sm:$0xff]  ;;  %v13364_v11 = vsub.f32 %v15127_v16, %v13115_v13  ;;  %v15130_v16 = vld [vmem:[#allocation196_spill] sm:$0xff] }
 0xd93   :  { %v8564_v56 = vadd.f32 %v8563_v53, %v8501_v38  ;;  %v8505_v38 = vmul.f32 %v13322_v48, %v13322_v48  ;;  %v13352_v61 = vsub.f32 %v15125_v9, %v13115_v13  ;;  %v15128_v9 = vld [vmem:[#allocation194_spill] sm:$0xff]  ;;  %v13382_v30 = vsub.f32 %v15130_v16, %v13115_v13  ;;  %v15133_v16 = vld [vmem:[#allocation199_spill] sm:$0xff] }
 0xd94   :  { %v13370_v25 = vsub.f32 %v15128_v9, %v13115_v13  ;;  %v15131_v9 = vld [vmem:[#allocation197_spill] sm:$0xff]  ;;  %v13400_v57 = vsub.f32 %v15133_v16, %v13115_v13  ;;  %v13418_v16 = vsub.f32 %v12839_v52, %v13115_v13  ;;  %v8523_v29 = vmul.f32 %v13430_v7, %v13430_v7 }
 0xd95   :  { %v8565_v26 = vadd.f32 %v8564_v56, %v8502_v58  ;;  %v8506_v58 = vmul.f32 %v13328_v0, %v13328_v0  ;;  %v13388_v33 = vsub.f32 %v15131_v9, %v13115_v13  ;;  %v15134_v9 = vld [vmem:[#allocation200_spill] sm:$0xff] }
 0xd96   :  { %v13406_v2 = vsub.f32 %v15134_v9, %v13115_v13  ;;  %v13424_v9 = vsub.f32 %v12866_v28, %v13115_v13  ;;  %v8521_v52 = vmul.f32 %v13418_v16, %v13418_v16 }
 0xd97   :  { %v8566_v8 = vadd.f32 %v8565_v26, %v8503_v17  ;;  %v8507_v17 = vmul.f32 %v13334_v6, %v13334_v6 }
 0xd98   :  { %v8522_v28 = vmul.f32 %v13424_v9, %v13424_v9 }
 0xd99   :  { %v8567_v53 = vadd.f32 %v8566_v8, %v8504_v34  ;;  %v8508_v34 = vmul.f32 %v13340_v55, %v13340_v55 }
 0xd9b   :  { %v8568_v56 = vadd.f32 %v8567_v53, %v8505_v38  ;;  %v8509_v38 = vmul.f32 %v13346_v12, %v13346_v12 }
 0xd9d   :  { %v8569_v26 = vadd.f32 %v8568_v56, %v8506_v58  ;;  %v8510_v58 = vmul.f32 %v13352_v61, %v13352_v61 }
 0xd9f   :  { %v8570_v8 = vadd.f32 %v8569_v26, %v8507_v17  ;;  %v8511_v17 = vmul.f32 %v13358_v5, %v13358_v5 }
 0xda1   :  { %v8571_v53 = vadd.f32 %v8570_v8, %v8508_v34  ;;  %v8512_v34 = vmul.f32 %v13364_v11, %v13364_v11 }
 0xda3   :  { %v8572_v56 = vadd.f32 %v8571_v53, %v8509_v38  ;;  %v8513_v38 = vmul.f32 %v13370_v25, %v13370_v25 }
 0xda5   :  { %v8573_v26 = vadd.f32 %v8572_v56, %v8510_v58  ;;  %v8514_v58 = vmul.f32 %v13376_v51, %v13376_v51 }
 0xda7   :  { %v8574_v8 = vadd.f32 %v8573_v26, %v8511_v17  ;;  %v8515_v17 = vmul.f32 %v13382_v30, %v13382_v30 }
 0xda9   :  { %v8575_v53 = vadd.f32 %v8574_v8, %v8512_v34  ;;  %v8516_v34 = vmul.f32 %v13388_v33, %v13388_v33 }
 0xdab   :  { %v8576_v56 = vadd.f32 %v8575_v53, %v8513_v38  ;;  %v8517_v38 = vmul.f32 %v13394_v4, %v13394_v4 }
 0xdad   :  { %v8577_v26 = vadd.f32 %v8576_v56, %v8514_v58  ;;  %v8518_v58 = vmul.f32 %v13400_v57, %v13400_v57 }
 0xdaf   :  { %v8578_v8 = vadd.f32 %v8577_v26, %v8515_v17  ;;  %v8519_v17 = vmul.f32 %v13406_v2, %v13406_v2 }
 0xdb1   :  { %v8579_v53 = vadd.f32 %v8578_v8, %v8516_v34  ;;  %v8520_v34 = vmul.f32 %v13412_v46, %v13412_v46 }
 0xdb3   :  { %v8580_v56 = vadd.f32 %v8579_v53, %v8517_v38  ;;  %v13436_v53 = vsub.f32 %v12930_v14, %v13115_v13 }
 0xdb5   :  { %v8581_v26 = vadd.f32 %v8580_v56, %v8518_v58  ;;  %v13442_v56 = vsub.f32 %v12961_v31, %v13115_v13  ;;  %v8524_v14 = vmul.f32 %v13436_v53, %v13436_v53 }
 0xdb7   :  { %v8582_v8 = vadd.f32 %v8581_v26, %v8519_v17  ;;  %v13448_v26 = vsub.f32 %v13079_v62, %v13115_v13  ;;  %v8525_v31 = vmul.f32 %v13442_v56, %v13442_v56 }
 0xdb9   :  { %v8583_v38 = vadd.f32 %v8582_v8, %v8520_v34  ;;  %v13454_v8 = vsub.f32 %v13086_v47, %v13115_v13  ;;  %v8526_v62 = vmul.f32 %v13448_v26, %v13448_v26 }
 0xdbb   :  { %v8584_v58 = vadd.f32 %v8583_v38, %v8521_v52  ;;  %v13460_v38 = vsub.f32 %v13092_v15, %v13115_v13  ;;  %v8527_v47 = vmul.f32 %v13454_v8, %v13454_v8 }
 0xdbd   :  { %v8585_v17 = vadd.f32 %v8584_v58, %v8522_v28  ;;  %v13466_v58 = vsub.f32 %v13096_v35, %v13115_v13  ;;  %v8528_v15 = vmul.f32 %v13460_v38, %v13460_v38 }
 0xdbf   :  { %v8586_v34 = vadd.f32 %v8585_v17, %v8523_v29  ;;  %v13472_v17 = vsub.f32 %v13099_v24, %v13115_v13  ;;  %v8529_v35 = vmul.f32 %v13466_v58, %v13466_v58 }
 0xdc1   :  { %v8587_v52 = vadd.f32 %v8586_v34, %v8524_v14  ;;  %v13478_v34 = vsub.f32 %v13102_v45, %v13115_v13  ;;  %v8533_v45 = vmul.f32 %v13121_v37, %v13121_v37 }
 0xdc3   :  { %v8588_v28 = vadd.f32 %v8587_v52, %v8525_v31  ;;  %v8530_v52 = vmul.f32 %v13472_v17, %v13472_v17  ;;  %v8531_v24 = vmul.f32 %v13478_v34, %v13478_v34 }
 0xdc5   :  { %v8589_v29 = vadd.f32 %v8588_v28, %v8526_v62 }
 0xdc7   :  { %v8590_v14 = vadd.f32 %v8589_v29, %v8527_v47  ;;  %v8534_v29 = vmul.f32 %v13124_v20, %v13124_v20 }
 0xdc9   :  { %v8591_v31 = vadd.f32 %v8590_v14, %v8528_v15  ;;  %v8535_v14 = vmul.f32 %v13127_v36, %v13127_v36 }
 0xdcb   :  { %v8592_v62 = vadd.f32 %v8591_v31, %v8529_v35  ;;  %v8536_v31 = vmul.f32 %v13130_v3, %v13130_v3 }
 0xdcd   :  { %v8593_v28 = vadd.f32 %v8592_v62, %v8530_v52 }
 0xdcf   :  { %v8594_v47 = vadd.f32 %v8593_v28, %v8531_v24 }
 0xdd1   :  { %v8595_v13 = vadd.f32 %v8594_v47, %v8532_v41 }
 0xdd3   :  { %v8596_v15 = vadd.f32 %v8595_v13, %v8533_v45 }
 0xdd5   :  { %v8597_v35 = vadd.f32 %v8596_v15, %v8534_v29  ;;  %v8607_v29 = vld [vmem:[%s13899_s5] sm:$0x1]  ;;  %s9124_s5 = smov [#allocation10]  }
 0xdd7   :  { %v8598_v52 = vadd.f32 %v8597_v35, %v8535_v14  ;;  %v15136_v35 = vld [vmem:[#allocation96_spill] sm:$0xff] }
 0xdd9   :  { %v8599_v62 = vadd.f32 %v8598_v52, %v8536_v31 }
 0xddb   :  { %v8600_v49 = vrot.slane %v8599_v62, 4 }
 0xddd   :  { %v8601_v19 = vadd.f32 %v8600_v49, %v8599_v62 }
 0xddf   :  { %v8602_v24 = vrot.slane %v8601_v19, 2 }
 0xde1   :  { %v8603_v28 = vadd.f32 %v8602_v24, %v8601_v19 }
 0xde3   :  { %v8604_v18 = vrot.slane %v8603_v28, 1 }
 0xde5   :  { %v8605_v1 = vadd.f32 %v8604_v18, %v8603_v28 }
 0xde7   :  { %v8606_v41 = vmul.f32 0.001953125, %v8605_v1  ;;  %v13502_v1 = vld [vmem:[%s13900_s6] ss:$0 sm:$0xff]  ;;  %s8951_s6 = sshll.u32 %s9124_s5, 4  ;;  %s8952_s6 = int_to_ptr.vmem [resolvable:$true] %s8951_s6 }
 0xde9   :  { %v8608_v47 = vadd.f32 1e-05, %v8606_v41 }
 0xdeb   :  { %9010 = vrsqrt.f32 %v8608_v47  ;;  %vm8615_vm4 = vweird.f32 %v8608_v47 }
 0xdf1   :  { %v9011_v42 = vpop.eup %9010 }
 0xdf2   :  { %v8610_v45 = vmul.f32 %v9011_v42, %v8608_v47  ;;  %vm8616_vm3 = vweird.f32 %v9011_v42 }
 0xdf3   :  { %vm8617_vm5 = vmor %vm8615_vm4, %vm8616_vm3 }
 0xdf4   :  { %v8611_v13 = vmul.f32 %v9011_v42, %v8610_v45 }
 0xdf6   :  { %v8612_v21 = vmul.f32 0.5, %v8611_v13 }
 0xdf8   :  { %v8613_v50 = vsub.f32 1.5, %v8612_v21 }
 0xdfa   :  { %v8614_v15 = vmul.f32 %v9011_v42, %v8613_v50 }
 0xdfc   :  { %v8618_v49 = vsel %vm8617_vm5, %v9011_v42, %v8614_v15 }
 0xdfd   :  { %v8619_v19 = vmul.f32 %v8618_v49, %v8607_v29 }
 0xdff   :  { %v13504_v18 = vperm.slane %v8619_v19, 0 }
 0xe01   :  { %v8686_v21 = vmul.f32 %v13504_v18, %v13130_v3  ;;  %v8644_v50 = vmul.f32 %v13504_v18, %v13256_v60  ;;  %v8645_v42 = vmul.f32 %v13504_v18, %v13262_v54  ;;  %v8646_v62 = vmul.f32 %v13504_v18, %v13268_v10 }
 0xe02   :  { %v8647_v24 = vmul.f32 %v13504_v18, %v13274_v39  ;;  %v8648_v3 = vmul.f32 %v13504_v18, %v13280_v27  ;;  %v8649_v28 = vmul.f32 %v13504_v18, %v13286_v23  ;;  %v8650_v41 = vmul.f32 %v13504_v18, %v13292_v44 }
 0xe03   :  { %v8754_v14 = vadd.f32 %v13502_v1, %v8686_v21  ;;  %v8651_v60 = vmul.f32 %v13504_v18, %v13298_v63  ;;  %v8652_v54 = vmul.f32 %v13504_v18, %v13304_v59  ;;  %v8653_v10 = vmul.f32 %v13504_v18, %v13310_v40 }
 0xe04   :  { %v8654_v39 = vmul.f32 %v13504_v18, %v13316_v22  ;;  %v8655_v27 = vmul.f32 %v13504_v18, %v13322_v48  ;;  %v8656_v23 = vmul.f32 %v13504_v18, %v13328_v0  ;;  %v8657_v44 = vmul.f32 %v13504_v18, %v13334_v6 }
 0xe05   :  { %v8818_v31 = vadd.f32 %v8754_v14, %v15136_v35  ;;  %v8658_v63 = vmul.f32 %v13504_v18, %v13340_v55  ;;  %v8659_v59 = vmul.f32 %v13504_v18, %v13346_v12  ;;  %v8660_v40 = vmul.f32 %v13504_v18, %v13352_v61 }
 0xe06   :  { %v8661_v22 = vmul.f32 %v13504_v18, %v13358_v5  ;;  %v8662_v48 = vmul.f32 %v13504_v18, %v13364_v11  ;;  %v8663_v0 = vmul.f32 %v13504_v18, %v13370_v25  ;;  %v8664_v6 = vmul.f32 %v13504_v18, %v13376_v51 }
 0xe07   :  { %v8882_v52 = vmax.f32 %v8818_v31, 0.0  ;;  %v8665_v55 = vmul.f32 %v13504_v18, %v13382_v30  ;;  %v8666_v12 = vmul.f32 %v13504_v18, %v13388_v33  ;;  %v8667_v61 = vmul.f32 %v13504_v18, %v13394_v4 }
 0xe08   :  { %v8668_v5 = vmul.f32 %v13504_v18, %v13400_v57  ;;  %v8669_v11 = vmul.f32 %v13504_v18, %v13406_v2  ;;  %v8670_v25 = vmul.f32 %v13504_v18, %v13412_v46  ;;  %v8671_v51 = vmul.f32 %v13504_v18, %v13418_v16 }
 0xe09   :  { %8946 = vst [vmem:[#allocation10 + $0x1f8] sm:$0xff] %v8882_v52  ;;  %v8672_v30 = vmul.f32 %v13504_v18, %v13424_v9  ;;  %v8673_v33 = vmul.f32 %v13504_v18, %v13430_v7  ;;  %v8674_v4 = vmul.f32 %v13504_v18, %v13436_v53  ;;  %v8675_v57 = vmul.f32 %v13504_v18, %v13442_v56 }
 0xe0a   :  { %v8676_v2 = vmul.f32 %v13504_v18, %v13448_v26  ;;  %v8677_v46 = vmul.f32 %v13504_v18, %v13454_v8  ;;  %v8678_v16 = vmul.f32 %v13504_v18, %v13460_v38  ;;  %v8679_v9 = vmul.f32 %v13504_v18, %v13466_v58 }
 0xe0b   :  { %v8680_v7 = vmul.f32 %v13504_v18, %v13472_v17  ;;  %v8681_v53 = vmul.f32 %v13504_v18, %v13478_v34  ;;  %v8682_v56 = vmul.f32 %v13504_v18, %v13118_v43  ;;  %v8683_v26 = vmul.f32 %v13504_v18, %v13121_v37 }
 0xe0c   :  { %v8684_v8 = vmul.f32 %v13504_v18, %v13124_v20  ;;  %v8685_v38 = vmul.f32 %v13504_v18, %v13127_v36  ;;  %v13595_v58 = vadd.f32 %v13502_v1, %v8644_v50  ;;  %v13598_v17 = vadd.f32 %v13502_v1, %v8645_v42 }
 0xe0d   :  { %v13601_v34 = vadd.f32 %v13502_v1, %v8646_v62  ;;  %v13604_v43 = vadd.f32 %v13502_v1, %v8647_v24  ;;  %v13607_v37 = vadd.f32 %v13502_v1, %v8648_v3  ;;  %v13610_v20 = vadd.f32 %v13502_v1, %v8649_v28 }
 0xe0e   :  { %v13613_v36 = vadd.f32 %v13502_v1, %v8650_v41  ;;  %v13616_v47 = vadd.f32 %v13502_v1, %v8651_v60  ;;  %v13619_v45 = vadd.f32 %v13502_v1, %v8652_v54  ;;  %v13622_v13 = vadd.f32 %v13502_v1, %v8653_v10 }
 0xe0f   :  { %v13625_v29 = vadd.f32 %v13502_v1, %v8654_v39  ;;  %v13628_v15 = vadd.f32 %v13502_v1, %v8655_v27  ;;  %v13631_v49 = vadd.f32 %v13502_v1, %v8656_v23  ;;  %v13634_v19 = vadd.f32 %v13502_v1, %v8657_v44 }
 0xe10   :  { %v13637_v21 = vadd.f32 %v13502_v1, %v8658_v63  ;;  %v13640_v14 = vadd.f32 %v13502_v1, %v8659_v59  ;;  %v13643_v35 = vadd.f32 %v13502_v1, %v8660_v40  ;;  %v13646_v31 = vadd.f32 %v13502_v1, %v8661_v22 }
 0xe11   :  { %v13649_v52 = vadd.f32 %v13502_v1, %v8662_v48  ;;  %v13652_v50 = vadd.f32 %v13502_v1, %v8663_v0  ;;  %v13655_v42 = vadd.f32 %v13502_v1, %v8664_v6  ;;  %v13658_v62 = vadd.f32 %v13502_v1, %v8665_v55 }
 0xe12   :  { %v13661_v24 = vadd.f32 %v13502_v1, %v8666_v12  ;;  %v13664_v3 = vadd.f32 %v13502_v1, %v8667_v61  ;;  %v13667_v28 = vadd.f32 %v13502_v1, %v8668_v5  ;;  %v13670_v41 = vadd.f32 %v13502_v1, %v8669_v11  ;;  %v15149_v5 = vld [vmem:[#allocation165_spill] sm:$0xff] }
 0xe13   :  { %v13673_v60 = vadd.f32 %v13502_v1, %v8670_v25  ;;  %v13676_v54 = vadd.f32 %v13502_v1, %v8671_v51  ;;  %v13679_v10 = vadd.f32 %v13502_v1, %v8672_v30  ;;  %v13682_v39 = vadd.f32 %v13502_v1, %v8673_v33  ;;  %v15150_v25 = vld [vmem:[#allocation108_spill] sm:$0xff] }
 0xe14   :  { %v13685_v27 = vadd.f32 %v13502_v1, %v8674_v4  ;;  %v13688_v23 = vadd.f32 %v13502_v1, %v8675_v57  ;;  %v13691_v44 = vadd.f32 %v13502_v1, %v8676_v2  ;;  %v13694_v63 = vadd.f32 %v13502_v1, %v8677_v46  ;;  %v15151_v30 = vld [vmem:[#allocation164_spill] sm:$0xff]  ;;  %v15153_v2 = vld [vmem:[#allocation189_spill] sm:$0xff] }
 0xe15   :  { %v13697_v59 = vadd.f32 %v13502_v1, %v8678_v16  ;;  %v13700_v40 = vadd.f32 %v13502_v1, %v8679_v9  ;;  %v13703_v22 = vadd.f32 %v13502_v1, %v8680_v7  ;;  %v13706_v48 = vadd.f32 %v13502_v1, %v8681_v53  ;;  %v15152_v4 = vld [vmem:[#allocation176_spill] sm:$0xff] }
 0xe16   :  { %15137 = vst [vmem:[#allocation123_spill] sm:$0xff] %v13685_v27  ;;  %v13709_v0 = vadd.f32 %v13502_v1, %v8682_v56  ;;  %v13712_v6 = vadd.f32 %v13502_v1, %v8683_v26  ;;  %v13715_v55 = vadd.f32 %v13502_v1, %v8684_v8  ;;  %v13718_v12 = vadd.f32 %v13502_v1, %v8685_v38  ;;  %v15154_v16 = vld [vmem:[#allocation160_spill] sm:$0xff]  ;;  %v15156_v38 = vld [vmem:[#allocation114_spill] sm:$0xff] }
 0xe17   :  { %15138 = vst [vmem:[#allocation82_spill] sm:$0xff] %v13688_v23  ;;  %v8623_v61 = vmul.f32 %v13504_v18, %v13134_v32  ;;  %v8624_v11 = vmul.f32 %v13504_v18, %v15149_v5  ;;  %v8625_v51 = vmul.f32 %v13504_v18, %v15150_v25  ;;  %v8626_v33 = vmul.f32 %v13504_v18, %v15151_v30  ;;  %v15155_v56 = vld [vmem:[#allocation124_spill] sm:$0xff] }
 0xe18   :  { %15139 = vst [vmem:[#allocation171_spill] sm:$0xff] %v13691_v44  ;;  %v8627_v57 = vmul.f32 %v13504_v18, %v15152_v4  ;;  %v8628_v46 = vmul.f32 %v13504_v18, %v15153_v2  ;;  %v8629_v9 = vmul.f32 %v13504_v18, %v15154_v16  ;;  %v8630_v26 = vmul.f32 %v13504_v18, %v15155_v56  ;;  %v15157_v30 = vld [vmem:[#allocation76_spill] sm:$0xff]  ;;  %v15158_v2 = vld [vmem:[#allocation166_spill] sm:$0xff] }
 0xe19   :  { %15140 = vst [vmem:[#allocation129_spill] sm:$0xff] %v13694_v63  ;;  %v8691_v32 = vadd.f32 %v13502_v1, %v8623_v61  ;;  %v8692_v7 = vadd.f32 %v13502_v1, %v8624_v11  ;;  %v8693_v53 = vadd.f32 %v13502_v1, %v8625_v51  ;;  %v8694_v8 = vadd.f32 %v13502_v1, %v8626_v33  ;;  %v15159_v16 = vld [vmem:[#allocation16_spill] sm:$0xff]  ;;  %v15160_v56 = vld [vmem:[#allocation18_spill] sm:$0xff] }
 0xe1a   :  { %15141 = vst [vmem:[#allocation190_spill] sm:$0xff] %v13697_v59  ;;  %v8631_v5 = vmul.f32 %v13504_v18, %v15156_v38  ;;  %v8695_v25 = vadd.f32 %v13502_v1, %v8627_v57  ;;  %v8632_v4 = vmul.f32 %v13504_v18, %v15157_v30  ;;  %v8633_v61 = vmul.f32 %v13504_v18, %v15158_v2  ;;  %v15161_v33 = vld [vmem:[#allocation20_spill] sm:$0xff] }
 0xe1b   :  { %15142 = vst [vmem:[#allocation175_spill] sm:$0xff] %v13700_v40  ;;  %v8696_v11 = vadd.f32 %v13502_v1, %v8628_v46  ;;  %v8697_v51 = vadd.f32 %v13502_v1, %v8629_v9  ;;  %v8698_v57 = vadd.f32 %v13502_v1, %v8630_v26  ;;  %v15165_v40 = vld [vmem:[#allocation113_spill] sm:$0xff]  ;;  %v15168_v26 = vld [vmem:[#allocation26_spill] sm:$0xff]  ;;  %v15170_v44 = vld [vmem:[#allocation120_spill] sm:$0xff] }
 0xe1c   :  { %15143 = vst [vmem:[#allocation174_spill] sm:$0xff] %v13703_v22  ;;  %v15164_v22 = vld [vmem:[#allocation111_spill] sm:$0xff]  ;;  %v8636_v46 = vmul.f32 %v13504_v18, %v15165_v40  ;;  %v8699_v9 = vadd.f32 %v13502_v1, %v8631_v5  ;;  %v8638_v40 = vmul.f32 %v13504_v18, %v15170_v44  ;;  %v15173_v27 = vld [vmem:[#allocation32_spill] sm:$0xff]  ;;  %v15175_v44 = vld [vmem:[#allocation34_spill] sm:$0xff] }
 0xe1d   :  { %15144 = vst [vmem:[#allocation128_spill] sm:$0xff] %v13706_v48  ;;  %v15163_v48 = vld [vmem:[#allocation22_spill] sm:$0xff]  ;;  %v8635_v2 = vmul.f32 %v13504_v18, %v15164_v22 }
 0xe1e   :  { %15145 = vst [vmem:[#allocation119_spill] sm:$0xff] %v13709_v0  ;;  %v15162_v0 = vld [vmem:[#allocation168_spill] sm:$0xff]  ;;  %v8758_v30 = vadd.f32 %v8694_v8, %v15163_v48 }
 0xe1f   :  { %15146 = vst [vmem:[#allocation167_spill] sm:$0xff] %v13712_v6  ;;  %v8757_v6 = vadd.f32 %v8693_v53, %v15161_v33  ;;  %v8634_v38 = vmul.f32 %v13504_v18, %v15162_v0  ;;  %v8701_v0 = vadd.f32 %v13502_v1, %v8633_v61  ;;  %v8760_v33 = vadd.f32 %v8696_v11, %v15168_v26  ;;  %v15169_v48 = vld [vmem:[#allocation28_spill] sm:$0xff] }
 0xe20   :  { %15147 = vst [vmem:[#allocation126_spill] sm:$0xff] %v13715_v55  ;;  %v8756_v55 = vadd.f32 %v8692_v7, %v15160_v56  ;;  %v15167_v7 = vld [vmem:[#allocation169_spill] sm:$0xff]  ;;  %v8700_v56 = vadd.f32 %v13502_v1, %v8632_v4  ;;  %v8761_v8 = vadd.f32 %v8697_v51, %v15169_v48  ;;  %v8822_v23 = vmax.f32 %v8758_v30, 0.0 }
 0xe21   :  { %15148 = vst [vmem:[#allocation179_spill] sm:$0xff] %v13718_v12  ;;  %v8755_v12 = vadd.f32 %v8691_v32, %v15159_v16  ;;  %v15166_v32 = vld [vmem:[#allocation24_spill] sm:$0xff]  ;;  %v8637_v53 = vmul.f32 %v13504_v18, %v15167_v7  ;;  %v8821_v63 = vmax.f32 %v8757_v6, 0.0  ;;  %v8702_v5 = vadd.f32 %v13502_v1, %v8634_v38  ;;  %v15172_v7 = vld [vmem:[#allocation162_spill] sm:$0xff] }
 0xe22   :  { %v8759_v16 = vadd.f32 %v8695_v25, %v15166_v32  ;;  %v8820_v22 = vmax.f32 %v8756_v55, 0.0  ;;  %v15171_v25 = vld [vmem:[#allocation30_spill] sm:$0xff]  ;;  %v8639_v4 = vmul.f32 %v13504_v18, %v15172_v7  ;;  %v8703_v61 = vadd.f32 %v13502_v1, %v8635_v2  ;;  %8886 = vst [vmem:[#allocation10 + $0x18] sm:$0xff] %v8822_v23 }
 0xe23   :  { %v8819_v59 = vmax.f32 %v8755_v12, 0.0  ;;  %v8762_v32 = vadd.f32 %v8698_v57, %v15171_v25  ;;  %v8763_v11 = vadd.f32 %v8699_v9, %v15173_v27  ;;  %v15174_v12 = vld [vmem:[#allocation116_spill] sm:$0xff]  ;;  %v8704_v55 = vadd.f32 %v13502_v1, %v8636_v46  ;;  %v15176_v57 = vld [vmem:[#allocation117_spill] sm:$0xff]  ;;  %8885 = vst [vmem:[#allocation10 + $0x10] sm:$0xff] %v8821_v63  ;;  %v15178_v27 = vld [vmem:[#allocation127_spill] sm:$0xff] }
 0xe24   :  { %v8823_v26 = vmax.f32 %v8759_v16, 0.0  ;;  %v8640_v6 = vmul.f32 %v13504_v18, %v15174_v12  ;;  %v8764_v51 = vadd.f32 %v8700_v56, %v15175_v44  ;;  %v8824_v38 = vmax.f32 %v8760_v33, 0.0  ;;  %8884 = vst [vmem:[#allocation10 + $0x8] sm:$0xff] %v8820_v22  ;;  %v15177_v25 = vld [vmem:[#allocation36_spill] sm:$0xff]  ;;  %v15179_v16 = vld [vmem:[#allocation38_spill] sm:$0xff] }
 0xe25   :  { %8883 = vst [vmem:[#allocation10] sm:$0xff] %v8819_v59  ;;  %v8641_v30 = vmul.f32 %v13504_v18, %v15176_v57  ;;  %v8705_v48 = vadd.f32 %v13502_v1, %v8637_v53  ;;  %v8765_v2 = vadd.f32 %v8701_v0, %v15177_v25  ;;  %v8825_v7 = vmax.f32 %v8761_v8, 0.0  ;;  %v15180_v56 = vld [vmem:[#allocation90_spill] sm:$0xff]  ;;  %v15181_v44 = vld [vmem:[#allocation40_spill] sm:$0xff] }
 0xe26   :  { %v8642_v59 = vmul.f32 %v13504_v18, %v15178_v27  ;;  %v8706_v9 = vadd.f32 %v13502_v1, %v8638_v40  ;;  %v8766_v46 = vadd.f32 %v8702_v5, %v15179_v16  ;;  %v8826_v12 = vmax.f32 %v8762_v32, 0.0  ;;  %8887 = vst [vmem:[#allocation10 + $0x20] sm:$0xff] %v8823_v26  ;;  %v15182_v0 = vld [vmem:[#allocation42_spill] sm:$0xff]  ;;  %v15183_v5 = vld [vmem:[#allocation45_spill] sm:$0xff]  ;;  %v15184_v27 = vld [vmem:[#allocation47_spill] sm:$0xff] }
 0xe27   :  { %v8643_v33 = vmul.f32 %v13504_v18, %v15180_v56  ;;  %v8707_v22 = vadd.f32 %v13502_v1, %v8639_v4  ;;  %v8767_v53 = vadd.f32 %v8703_v61, %v15181_v44  ;;  %v8827_v57 = vmax.f32 %v8763_v11, 0.0  ;;  %8888 = vst [vmem:[#allocation10 + $0x28] sm:$0xff] %v8824_v38  ;;  %v15185_v11 = vld [vmem:[#allocation50_spill] sm:$0xff] }
 0xe28   :  { %v8708_v63 = vadd.f32 %v13502_v1, %v8640_v6  ;;  %v8768_v8 = vadd.f32 %v8704_v55, %v15182_v0  ;;  %v8828_v25 = vmax.f32 %v8764_v51, 0.0  ;;  %v8709_v40 = vadd.f32 %v13502_v1, %v8641_v30  ;;  %8889 = vst [vmem:[#allocation10 + $0x30] sm:$0xff] %v8825_v7  ;;  %v15186_v55 = vld [vmem:[#allocation52_spill] sm:$0xff]  ;;  %v15187_v30 = vld [vmem:[#allocation55_spill] sm:$0xff]  ;;  %v15188_v7 = vld [vmem:[#allocation58_spill] sm:$0xff] }
 0xe29   :  { %v8769_v32 = vadd.f32 %v8705_v48, %v15183_v5  ;;  %v8829_v23 = vmax.f32 %v8765_v2, 0.0  ;;  %v8710_v18 = vadd.f32 %v13502_v1, %v8642_v59  ;;  %v8770_v4 = vadd.f32 %v8706_v9, %v15184_v27  ;;  %8890 = vst [vmem:[#allocation10 + $0x38] sm:$0xff] %v8826_v12  ;;  %v15189_v9 = vld [vmem:[#allocation60_spill] sm:$0xff]  ;;  %v15191_v44 = vld [vmem:[#allocation66_spill] sm:$0xff] }
 0xe2a   :  { %v8830_v16 = vmax.f32 %v8766_v46, 0.0  ;;  %v8711_v61 = vadd.f32 %v13502_v1, %v8643_v33  ;;  %v8771_v26 = vadd.f32 %v8707_v22, %v15185_v11  ;;  %v8831_v6 = vmax.f32 %v8767_v53, 0.0  ;;  %8891 = vst [vmem:[#allocation10 + $0x40] sm:$0xff] %v8827_v57  ;;  %v15190_v1 = vld [vmem:[#allocation63_spill] sm:$0xff] }
 0xe2b   :  { %v8772_v51 = vadd.f32 %v8708_v63, %v15186_v55  ;;  %v8832_v38 = vmax.f32 %v8768_v8, 0.0  ;;  %8892 = vst [vmem:[#allocation10 + $0x48] sm:$0xff] %v8828_v25  ;;  %v8773_v48 = vadd.f32 %v8709_v40, %v15187_v30  ;;  %v8833_v2 = vmax.f32 %v8769_v32, 0.0  ;;  %v15192_v63 = vld [vmem:[#allocation69_spill] sm:$0xff]  ;;  %v15193_v25 = vld [vmem:[#allocation72_spill] sm:$0xff]  ;;  %v15194_v32 = vld [vmem:[#allocation75_spill] sm:$0xff] }
 0xe2c   :  { %8893 = vst [vmem:[#allocation10 + $0x50] sm:$0xff] %v8829_v23  ;;  %v8774_v59 = vadd.f32 %v8710_v18, %v15188_v7  ;;  %v8834_v56 = vmax.f32 %v8770_v4, 0.0  ;;  %v8775_v46 = vadd.f32 %v8711_v61, %v15189_v9  ;;  %v8835_v12 = vmax.f32 %v8771_v26, 0.0  ;;  %v15195_v18 = vld [vmem:[#allocation78_spill] sm:$0xff]  ;;  %v15196_v4 = vld [vmem:[#allocation81_spill] sm:$0xff]  ;;  %v15197_v61 = vld [vmem:[#allocation84_spill] sm:$0xff] }
 0xe2d   :  { %8894 = vst [vmem:[#allocation10 + $0x58] sm:$0xff] %v8830_v16  ;;  %v8776_v33 = vadd.f32 %v13595_v58, %v15190_v1  ;;  %v8836_v22 = vmax.f32 %v8772_v51, 0.0  ;;  %v8777_v53 = vadd.f32 %v13598_v17, %v15191_v44  ;;  %v8837_v57 = vmax.f32 %v8773_v48, 0.0  ;;  %v15198_v26 = vld [vmem:[#allocation136_spill] sm:$0xff]  ;;  %v15199_v55 = vld [vmem:[#allocation134_spill] sm:$0xff]  ;;  %v15202_v7 = vld [vmem:[#allocation15_spill] sm:$0xff] }
 0xe2e   :  { %8895 = vst [vmem:[#allocation10 + $0x60] sm:$0xff] %v8831_v6  ;;  %v8778_v0 = vadd.f32 %v13601_v34, %v15192_v63  ;;  %v8838_v8 = vmax.f32 %v8774_v59, 0.0  ;;  %v8779_v40 = vadd.f32 %v13604_v43, %v15193_v25  ;;  %v8839_v5 = vmax.f32 %v8775_v46, 0.0  ;;  %v15201_v48 = vld [vmem:[#allocation14_spill] sm:$0xff]  ;;  %v15204_v46 = vld [vmem:[#allocation19_spill] sm:$0xff]  ;;  %v15205_v1 = vld [vmem:[#allocation21_spill] sm:$0xff] }
 0xe2f   :  { %8896 = vst [vmem:[#allocation10 + $0x68] sm:$0xff] %v8832_v38  ;;  %v8780_v58 = vadd.f32 %v13607_v37, %v15194_v32  ;;  %v8840_v23 = vmax.f32 %v8776_v33, 0.0  ;;  %v8781_v17 = vadd.f32 %v13610_v20, %v15195_v18  ;;  %v8841_v27 = vmax.f32 %v8777_v53, 0.0  ;;  %v15200_v38 = vld [vmem:[#allocation135_spill] sm:$0xff]  ;;  %v15207_v53 = vld [vmem:[#allocation25_spill] sm:$0xff] }
 0xe30   :  { %8897 = vst [vmem:[#allocation10 + $0x70] sm:$0xff] %v8833_v2  ;;  %v8782_v34 = vadd.f32 %v13613_v36, %v15196_v4  ;;  %v8842_v16 = vmax.f32 %v8778_v0, 0.0  ;;  %v8783_v43 = vadd.f32 %v13616_v47, %v15197_v61  ;;  %v8843_v11 = vmax.f32 %v8779_v40, 0.0  ;;  %v15208_v63 = vld [vmem:[#allocation27_spill] sm:$0xff]  ;;  %v15211_v32 = vld [vmem:[#allocation33_spill] sm:$0xff] }
 0xe31   :  { %8898 = vst [vmem:[#allocation10 + $0x78] sm:$0xff] %v8834_v56  ;;  %v8784_v37 = vadd.f32 %v15198_v26, %v13619_v45  ;;  %v8844_v6 = vmax.f32 %v8780_v58, 0.0  ;;  %v8785_v20 = vadd.f32 %v13622_v13, %v15199_v55  ;;  %v8845_v51 = vmax.f32 %v8781_v17, 0.0  ;;  %v15203_v56 = vld [vmem:[#allocation17_spill] sm:$0xff]  ;;  %v15210_v40 = vld [vmem:[#allocation31_spill] sm:$0xff]  ;;  %v15217_v26 = vld [vmem:[#allocation46_spill] sm:$0xff] }
 0xe32   :  { %8899 = vst [vmem:[#allocation10 + $0x80] sm:$0xff] %v8835_v12  ;;  %v8786_v36 = vadd.f32 %v13625_v29, %v15200_v38  ;;  %v8846_v30 = vmax.f32 %v8782_v34, 0.0  ;;  %v8787_v47 = vadd.f32 %v13628_v15, %v15201_v48  ;;  %v8847_v2 = vmax.f32 %v8783_v43, 0.0  ;;  %v15213_v17 = vld [vmem:[#allocation37_spill] sm:$0xff]  ;;  %v15214_v4 = vld [vmem:[#allocation39_spill] sm:$0xff]  ;;  %v15220_v38 = vld [vmem:[#allocation54_spill] sm:$0xff] }
 0xe33   :  { %8900 = vst [vmem:[#allocation10 + $0x88] sm:$0xff] %v8836_v22  ;;  %v8788_v45 = vadd.f32 %v13631_v49, %v15202_v7  ;;  %v8848_v59 = vmax.f32 %v8784_v37, 0.0  ;;  %v8789_v13 = vadd.f32 %v13634_v19, %v15203_v56  ;;  %v8849_v9 = vmax.f32 %v8785_v20, 0.0  ;;  %v15206_v22 = vld [vmem:[#allocation23_spill] sm:$0xff]  ;;  %v15222_v48 = vld [vmem:[#allocation56_spill] sm:$0xff]  ;;  %v15226_v56 = vld [vmem:[#allocation62_spill] sm:$0xff] }
 0xe34   :  { %8901 = vst [vmem:[#allocation10 + $0x90] sm:$0xff] %v8837_v57  ;;  %v8790_v29 = vadd.f32 %v13637_v21, %v15204_v46  ;;  %v8850_v12 = vmax.f32 %v8786_v36, 0.0  ;;  %v8791_v15 = vadd.f32 %v13640_v14, %v15205_v1  ;;  %v8851_v33 = vmax.f32 %v8787_v47, 0.0  ;;  %v15216_v43 = vld [vmem:[#allocation43_spill] sm:$0xff]  ;;  %v15223_v47 = vld [vmem:[#allocation82_spill] sm:$0xff]  ;;  %v15228_v46 = vld [vmem:[#allocation65_spill] sm:$0xff] }
 0xe35   :  { %8902 = vst [vmem:[#allocation10 + $0x98] sm:$0xff] %v8838_v8  ;;  %v8792_v49 = vadd.f32 %v13643_v35, %v15206_v22  ;;  %v8852_v44 = vmax.f32 %v8788_v45, 0.0  ;;  %v8793_v19 = vadd.f32 %v13646_v31, %v15207_v53  ;;  %v8853_v57 = vmax.f32 %v8789_v13, 0.0  ;;  %v15209_v8 = vld [vmem:[#allocation29_spill] sm:$0xff]  ;;  %v15219_v20 = vld [vmem:[#allocation51_spill] sm:$0xff]  ;;  %v15233_v53 = vld [vmem:[#allocation174_spill] sm:$0xff] }
 0xe36   :  { %8903 = vst [vmem:[#allocation10 + $0xa0] sm:$0xff] %v8839_v5  ;;  %v8794_v21 = vadd.f32 %v13649_v52, %v15208_v63  ;;  %v8854_v0 = vmax.f32 %v8790_v29, 0.0  ;;  %v8795_v14 = vadd.f32 %v13652_v50, %v15209_v8  ;;  %v8855_v25 = vmax.f32 %v8791_v15, 0.0  ;;  %v15221_v36 = vld [vmem:[#allocation123_spill] sm:$0xff]  ;;  %v15227_v13 = vld [vmem:[#allocation129_spill] sm:$0xff]  ;;  %v15229_v29 = vld [vmem:[#allocation190_spill] sm:$0xff] }
 0xe37   :  { %8904 = vst [vmem:[#allocation10 + $0xa8] sm:$0xff] %v8840_v23  ;;  %v8796_v35 = vadd.f32 %v13655_v42, %v15210_v40  ;;  %v8856_v5 = vmax.f32 %v8792_v49, 0.0  ;;  %v8797_v31 = vadd.f32 %v13658_v62, %v15211_v32  ;;  %v8857_v58 = vmax.f32 %v8793_v19, 0.0  ;;  %v15212_v23 = vld [vmem:[#allocation35_spill] sm:$0xff]  ;;  %v15230_v15 = vld [vmem:[#allocation68_spill] sm:$0xff]  ;;  %v15234_v63 = vld [vmem:[#allocation74_spill] sm:$0xff] }
 0xe38   :  { %8905 = vst [vmem:[#allocation10 + $0xb0] sm:$0xff] %v8841_v27  ;;  %v8798_v52 = vadd.f32 %v13661_v24, %v15212_v23  ;;  %v8858_v18 = vmax.f32 %v8794_v21, 0.0  ;;  %v8799_v50 = vadd.f32 %v13664_v3, %v15213_v17  ;;  %v8859_v27 = vmax.f32 %v8795_v14, 0.0  ;;  %v15224_v7 = vld [vmem:[#allocation59_spill] sm:$0xff]  ;;  %v15235_v21 = vld [vmem:[#allocation128_spill] sm:$0xff]  ;;  %v15236_v14 = vld [vmem:[#allocation77_spill] sm:$0xff] }
 0xe39   :  { %8906 = vst [vmem:[#allocation10 + $0xb8] sm:$0xff] %v8842_v16  ;;  %v8800_v42 = vadd.f32 %v13667_v28, %v15214_v4  ;;  %v8860_v34 = vmax.f32 %v8796_v35, 0.0  ;;  %v15215_v16 = vld [vmem:[#allocation41_spill] sm:$0xff]  ;;  %v8861_v61 = vmax.f32 %v8797_v31, 0.0  ;;  %v8802_v24 = vadd.f32 %v13673_v60, %v15216_v43  ;;  %v15225_v45 = vld [vmem:[#allocation171_spill] sm:$0xff] }
 0xe3a   :  { %8907 = vst [vmem:[#allocation10 + $0xc0] sm:$0xff] %v8843_v11  ;;  %v8801_v62 = vadd.f32 %v13670_v41, %v15215_v16  ;;  %v8862_v11 = vmax.f32 %v8798_v52, 0.0  ;;  %v8803_v3 = vadd.f32 %v13676_v54, %v15217_v26  ;;  %v8863_v37 = vmax.f32 %v8799_v50, 0.0  ;;  %v15239_v32 = vld [vmem:[#allocation167_spill] sm:$0xff]  ;;  %v15241_v52 = vld [vmem:[#allocation126_spill] sm:$0xff] }
 0xe3b   :  { %8908 = vst [vmem:[#allocation10 + $0xc8] sm:$0xff] %v8844_v6  ;;  %v15218_v6 = vld [vmem:[#allocation49_spill] sm:$0xff]  ;;  %v8864_v55 = vmax.f32 %v8800_v42, 0.0  ;;  %v8805_v41 = vadd.f32 %v13682_v39, %v15219_v20  ;;  %v8806_v60 = vadd.f32 %v15221_v36, %v15220_v38  ;;  %v8807_v54 = vadd.f32 %v15223_v47, %v15222_v48  ;;  %v15240_v23 = vld [vmem:[#allocation83_spill] sm:$0xff] }
 0xe3c   :  { %8909 = vst [vmem:[#allocation10 + $0xd0] sm:$0xff] %v8845_v51  ;;  %v8804_v28 = vadd.f32 %v13679_v10, %v15218_v6  ;;  %v8865_v51 = vmax.f32 %v8801_v62, 0.0  ;;  %v8808_v10 = vadd.f32 %v15225_v45, %v15224_v7  ;;  %v8809_v39 = vadd.f32 %v15227_v13, %v15226_v56  ;;  %v15242_v50 = vld [vmem:[#allocation103_spill] sm:$0xff] }
 0xe3d   :  { %8910 = vst [vmem:[#allocation10 + $0xd8] sm:$0xff] %v8846_v30  ;;  %v8866_v30 = vmax.f32 %v8802_v24, 0.0  ;;  %v8870_v1 = vmax.f32 %v8806_v60, 0.0  ;;  %v8871_v49 = vmax.f32 %v8807_v54, 0.0 }
 0xe3e   :  { %8911 = vst [vmem:[#allocation10 + $0xe0] sm:$0xff] %v8847_v2  ;;  %v8867_v2 = vmax.f32 %v8803_v3, 0.0  ;;  %v8873_v8 = vmax.f32 %v8809_v39, 0.0 }
 0xe3f   :  { %8912 = vst [vmem:[#allocation10 + $0xe8] sm:$0xff] %v8848_v59  ;;  %v8868_v59 = vmax.f32 %v8804_v28, 0.0 }
 0xe40   :  { %8913 = vst [vmem:[#allocation10 + $0xf0] sm:$0xff] %v8849_v9  ;;  %v8869_v9 = vmax.f32 %v8805_v41, 0.0 }
 0xe41   :  { %8914 = vst [vmem:[#allocation10 + $0xf8] sm:$0xff] %v8850_v12  ;;  %v8810_v12 = vadd.f32 %v15229_v29, %v15228_v46 }
 0xe42   :  { %8915 = vst [vmem:[#allocation10 + $0x100] sm:$0xff] %v8851_v33  ;;  %v15231_v33 = vld [vmem:[#allocation175_spill] sm:$0xff] }
 0xe43   :  { %8916 = vst [vmem:[#allocation10 + $0x108] sm:$0xff] %v8852_v44  ;;  %v8811_v22 = vadd.f32 %v15231_v33, %v15230_v15  ;;  %v15232_v44 = vld [vmem:[#allocation71_spill] sm:$0xff]  ;;  %v8874_v35 = vmax.f32 %v8810_v12, 0.0 }
 0xe44   :  { %8917 = vst [vmem:[#allocation10 + $0x110] sm:$0xff] %v8853_v57  ;;  %v8812_v19 = vadd.f32 %v15233_v53, %v15232_v44  ;;  %v8872_v57 = vmax.f32 %v8808_v10, 0.0 }
 0xe45   :  { %8918 = vst [vmem:[#allocation10 + $0x118] sm:$0xff] %v8854_v0  ;;  %v8813_v0 = vadd.f32 %v15235_v21, %v15234_v63 }
 0xe46   :  { %8919 = vst [vmem:[#allocation10 + $0x120] sm:$0xff] %v8855_v25  ;;  %v15237_v25 = vld [vmem:[#allocation119_spill] sm:$0xff]  ;;  %v8876_v17 = vmax.f32 %v8812_v19, 0.0 }
 0xe47   :  { %8920 = vst [vmem:[#allocation10 + $0x128] sm:$0xff] %v8856_v5  ;;  %v8814_v40 = vadd.f32 %v15237_v25, %v15236_v14  ;;  %v15238_v5 = vld [vmem:[#allocation80_spill] sm:$0xff]  ;;  %v8877_v42 = vmax.f32 %v8813_v0, 0.0 }
 0xe48   :  { %8921 = vst [vmem:[#allocation10 + $0x130] sm:$0xff] %v8857_v58  ;;  %v8815_v31 = vadd.f32 %v15239_v32, %v15238_v5  ;;  %v8875_v58 = vmax.f32 %v8811_v22, 0.0 }
 0xe49   :  { %8922 = vst [vmem:[#allocation10 + $0x138] sm:$0xff] %v8858_v18  ;;  %v8816_v18 = vadd.f32 %v15241_v52, %v15240_v23 }
 0xe4a   :  { %8923 = vst [vmem:[#allocation10 + $0x140] sm:$0xff] %v8859_v27  ;;  %v15243_v27 = vld [vmem:[#allocation179_spill] sm:$0xff]  ;;  %v8879_v16 = vmax.f32 %v8815_v31, 0.0 }
 0xe4b   :  { %8924 = vst [vmem:[#allocation10 + $0x148] sm:$0xff] %v8860_v34  ;;  %v8817_v4 = vadd.f32 %v15243_v27, %v15242_v50  ;;  %v8878_v34 = vmax.f32 %v8814_v40, 0.0  ;;  %v8880_v62 = vmax.f32 %v8816_v18, 0.0 }
 0xe4c   :  { %8925 = vst [vmem:[#allocation10 + $0x150] sm:$0xff] %v8861_v61 }
 0xe4d   :  { %8926 = vst [vmem:[#allocation10 + $0x158] sm:$0xff] %v8862_v11  ;;  %v8881_v61 = vmax.f32 %v8817_v4, 0.0 }
 0xe4e   :  { %8927 = vst [vmem:[#allocation10 + $0x160] sm:$0xff] %v8863_v37 }
 0xe4f   :  { %8928 = vst [vmem:[#allocation10 + $0x168] sm:$0xff] %v8864_v55 }
 0xe50   :  { %8929 = vst [vmem:[#allocation10 + $0x170] sm:$0xff] %v8865_v51 }
 0xe51   :  { %8930 = vst [vmem:[#allocation10 + $0x178] sm:$0xff] %v8866_v30 }
 0xe52   :  { %8931 = vst [vmem:[#allocation10 + $0x180] sm:$0xff] %v8867_v2 }
 0xe53   :  { %8932 = vst [vmem:[#allocation10 + $0x188] sm:$0xff] %v8868_v59 }
 0xe54   :  { %8933 = vst [vmem:[#allocation10 + $0x190] sm:$0xff] %v8869_v9 }
 0xe55   :  { %8934 = vst [vmem:[#allocation10 + $0x198] sm:$0xff] %v8870_v1 }
 0xe56   :  { %8935 = vst [vmem:[#allocation10 + $0x1a0] sm:$0xff] %v8871_v49 }
 0xe57   :  { %8936 = vst [vmem:[#allocation10 + $0x1a8] sm:$0xff] %v8872_v57 }
 0xe58   :  { %8937 = vst [vmem:[#allocation10 + $0x1b0] sm:$0xff] %v8873_v8 }
 0xe59   :  { %8938 = vst [vmem:[#allocation10 + $0x1b8] sm:$0xff] %v8874_v35 }
 0xe5a   :  { %8939 = vst [vmem:[#allocation10 + $0x1c0] sm:$0xff] %v8875_v58 }
 0xe5b   :  { %8940 = vst [vmem:[#allocation10 + $0x1c8] sm:$0xff] %v8876_v17 }
 0xe5c   :  { %8941 = vst [vmem:[#allocation10 + $0x1d0] sm:$0xff] %v8877_v42 }
 0xe5d   :  { %8942 = vst [vmem:[#allocation10 + $0x1d8] sm:$0xff] %v8878_v34 }
 0xe5e   :  { %8943 = vst [vmem:[#allocation10 + $0x1e0] sm:$0xff] %v8879_v16 }
 0xe5f   :  { %8944 = vst [vmem:[#allocation10 + $0x1e8] sm:$0xff] %v8880_v62 }
 0xe60   :  { %8945 = vst [vmem:[#allocation10 + $0x1f0] sm:$0xff] %v8881_v61 }
 0xe61   :  { %8959 = dma.vmem_to_hbm [thread:$0]  %s8952_s6, 8192, %s8954_s23, [#allocation6], %s9119_s9, %s9119_s9, %s9120_s10  }
 0xe62   :  { %9116 = dma.done.wait [#allocation6], 8192  }
 0xe63   :  { %9117 = vsyncadd [#allocation6], 4294959104 }
 0xe64   :  { %8964 = vsyncpa [#allocation5], 1 }
 0xe65   :  { %8965 = vsyncpa [#allocation8], 1 }
 0xe66   :  { %8966 = vsyncpa [#allocation6], 1 }

</bundles_post_ra>
